<compile_context>
chip_gen: v5e
topology: v5e:2x2
jax: 0.10.0
libtpu: 0.0.40
codegen_flags: <defaults>
</compile_context>

<pallas_src>
import functools

import numpy as np
import jax
import jax.numpy as jnp
from jax.experimental import pallas as pl
from jax.experimental.pallas import tpu as pltpu

EPS = 1e-5  # BatchNorm2d default eps

_VMEM = pl.BlockSpec(memory_space=pltpu.MemorySpace.VMEM)


def _pallas(kernel, out_shape, *args):
    return pl.pallas_call(
        kernel,
        out_shape=out_shape,
        in_specs=[_VMEM] * len(args),
        out_specs=_VMEM,
    )(*args)


# ----------------------------- Pallas kernels ------------------------------

def _conv_bn_relu_kernel(x_ref, w_ref, s_ref, st_ref, g_ref, b_ref, o_ref):
    """Fused 3x3 conv (stride 1, pad 1) + training-mode BatchNorm + ReLU.

    x_ref : (N, H+2, (W+2)*Cin)   bf16  spatially padded input, channels in lanes
    w_ref : (3, (W+2)*Cin, W*Cout) bf16  banded weights (kw taps folded in)
    s_ref : (W*Cout, Cout)         f32   0/1 matrix: fold (w, c) lanes -> per-channel
    st_ref: (Cout, W*Cout)         f32   transpose: broadcast per-channel -> lanes
    g_ref, b_ref : (1, Cout)       f32   BN gamma / beta
    o_ref : (N, H, W*Cout)         bf16
    """
    n, h, wc = o_ref.shape
    cout = g_ref.shape[-1]
    m = n * h * (wc // cout)  # elements per channel for the batch statistics

    acc = jnp.zeros((n, h, wc), jnp.float32)
    for kh in range(3):  # shift-and-accumulate over the 3 kernel rows
        win = x_ref[:, kh:kh + h, :]                                  # (N,H,WpCin)
        wk = jnp.broadcast_to(w_ref[kh], (n,) + w_ref.shape[1:])      # (N,WpCin,WC)
        acc = acc + jnp.einsum('bqk,bkd->bqd', win, wk,
                               preferred_element_type=jnp.float32)

    # One-pass BN statistics (sum & sum-of-squares), folded over the w lanes.
    s1 = jnp.sum(acc, axis=0, keepdims=True)
    s1 = jnp.sum(s1, axis=1, keepdims=True)                           # (1,1,WC)
    s2 = jnp.sum(acc * acc, axis=0, keepdims=True)
    s2 = jnp.sum(s2, axis=1, keepdims=True)                           # (1,1,WC)
    sum_c = jnp.dot(s1[0], s_ref[...], preferred_element_type=jnp.float32)  # (1,Cout)
    sq_c = jnp.dot(s2[0], s_ref[...], preferred_element_type=jnp.float32)   # (1,Cout)
    mean = sum_c / m
    var = sq_c / m - mean * mean
    scale_c = g_ref[...] * jax.lax.rsqrt(var + EPS)
    shift_c = b_ref[...] - mean * scale_c
    scale = jnp.dot(scale_c, st_ref[...], preferred_element_type=jnp.float32)  # (1,WC)
    shift = jnp.dot(shift_c, st_ref[...], preferred_element_type=jnp.float32)  # (1,WC)

    y = acc * scale[:, None, :] + shift[:, None, :]
    o_ref[...] = jnp.maximum(y, 0.0).astype(o_ref.dtype)


def _conv_bias_kernel(x_ref, w_ref, bias_ref, o_ref):
    """3x3 conv + bias (used for ConvTranspose2d on the zero-dilated input)."""
    n, h, wc = o_ref.shape
    acc = jnp.zeros((n, h, wc), jnp.float32)
    for kh in range(3):
        win = x_ref[:, kh:kh + h, :]
        wk = jnp.broadcast_to(w_ref[kh], (n,) + w_ref.shape[1:])
        acc = acc + jnp.einsum('bqk,bkd->bqd', win, wk,
                               preferred_element_type=jnp.float32)
    o_ref[...] = (acc + bias_ref[...][:, None, :]).astype(o_ref.dtype)


def _max4_kernel(a_ref, b_ref, c_ref, d_ref, o_ref):
    o_ref[...] = jnp.maximum(jnp.maximum(a_ref[...], b_ref[...]),
                             jnp.maximum(c_ref[...], d_ref[...]))


def _bmm_kernel(a_ref, x_ref, o_ref):
    """No-bias batched matmul: (J,K) resize matrix applied to (B,K,D) -> (B,J,D)."""
    b = x_ref.shape[0]
    a = jnp.broadcast_to(a_ref[...].astype(jnp.float32), (b,) + a_ref.shape)
    x = x_ref[...].astype(jnp.float32)
    o_ref[...] = jnp.einsum('bjk,bkd->bjd', a, x,
                            preferred_element_type=jnp.float32).astype(o_ref.dtype)


def _matmul_bias_kernel(x_ref, w_ref, b_ref, o_ref):
    o_ref[...] = (jnp.dot(x_ref[...], w_ref[...],
                          preferred_element_type=jnp.float32)
                  + b_ref[...]).astype(o_ref.dtype)


# ------------------------------ conv helpers -------------------------------

def _band_delta(width):
    """D[kw, j, wp] = 1 iff wp == j + kw  (static, numpy)."""
    wp = width + 2
    d = np.zeros((3, width, wp), np.float32)
    for kw in range(3):
        d[kw, np.arange(width), np.arange(width) + kw] = 1.0
    return d


def _banded_weight(w_conv, width):
    """(Cout,Cin,3,3) conv weight -> (3, (width+2)*Cin, width*Cout) banded bf16."""
    cout, cin = w_conv.shape[0], w_conv.shape[1]
    d = jnp.asarray(_band_delta(width))
    b = jnp.einsum('kjp,oihk->hpijo', d, w_conv)  # (3, Wp, Cin, W, Cout)
    return b.reshape(3, (width + 2) * cin, width * cout).astype(jnp.bfloat16)


def _fold_matrices(width, cout):
    s = np.tile(np.eye(cout, dtype=np.float32), (width, 1))  # (W*Cout, Cout)
    return jnp.asarray(s), jnp.asarray(s.T)


def conv3x3_bn_relu(x, w_conv, gamma, beta):
    """x: (N,H,W,Cin) bf16; w_conv: (Cout,Cin,3,3).  Conv bias is dropped
    (exactly cancelled by the training-mode BN mean subtraction)."""
    n, h, w, cin = x.shape
    cout = w_conv.shape[0]
    xp = jnp.pad(x, ((0, 0), (1, 1), (1, 1), (0, 0)))
    x3 = xp.reshape(n, h + 2, (w + 2) * cin).astype(jnp.bfloat16)
    wb = _banded_weight(w_conv, w)
    s, st = _fold_matrices(w, cout)
    out = _pallas(
        _conv_bn_relu_kernel,
        jax.ShapeDtypeStruct((n, h, w * cout), jnp.bfloat16),
        x3, wb, s, st,
        gamma.reshape(1, cout).astype(jnp.float32),
        beta.reshape(1, cout).astype(jnp.float32))
    return out.reshape(n, h, w, cout)


def conv_transpose_3x3_s2_p1(x, w_t, bias):
    """ConvTranspose2d(k=3,s=2,p=1). w_t: (Cin,Cout,3,3) PyTorch layout.
    Zero-dilate input, pad k-1-p=1, then ordinary conv with the flipped kernel.
    TODO(synk): a 4-phase output-parity decomposition would skip the structural
    zeros entirely; negligible at these spatial sizes."""
    n, h, w, cin = x.shape
    cout = w_t.shape[1]
    ho, wo = 2 * h - 1, 2 * w - 1
    xd = jnp.zeros((n, ho, wo, cin), x.dtype).at[:, ::2, ::2, :].set(x)
    xp = jnp.pad(xd, ((0, 0), (1, 1), (1, 1), (0, 0)))
    x3 = xp.reshape(n, ho + 2, (wo + 2) * cin).astype(jnp.bfloat16)
    w_conv = jnp.transpose(jnp.flip(w_t, axis=(2, 3)), (1, 0, 2, 3))  # (Cout,Cin,3,3)
    wb = _banded_weight(w_conv, wo)
    bias_wc = jnp.tile(bias.reshape(1, cout).astype(jnp.float32), (1, wo))
    out = _pallas(
        _conv_bias_kernel,
        jax.ShapeDtypeStruct((n, ho, wo * cout), jnp.bfloat16),
        x3, wb, bias_wc)
    return out.reshape(n, ho, wo, cout)


def conv1x1(x, w, b):
    n, h, wd, cin = x.shape
    cout = w.shape[0]
    y = _pallas(
        _matmul_bias_kernel,
        jax.ShapeDtypeStruct((n * h * wd, cout), jnp.bfloat16),
        x.reshape(-1, cin).astype(jnp.bfloat16),
        w.reshape(cout, cin).T.astype(jnp.bfloat16),
        b.reshape(1, cout).astype(jnp.float32))
    return y.reshape(n, h, wd, cout)


def maxpool_2x2(x):
    n, h, w, c = x.shape
    ho, wo = h // 2, w // 2
    a = x[:, 0::2, 0::2, :].reshape(-1, c)
    b = x[:, 0::2, 1::2, :].reshape(-1, c)
    cc = x[:, 1::2, 0::2, :].reshape(-1, c)
    d = x[:, 1::2, 1::2, :].reshape(-1, c)
    out = _pallas(_max4_kernel, jax.ShapeDtypeStruct(a.shape, x.dtype), a, b, cc, d)
    return out.reshape(n, ho, wo, c)


def _resize_matrix(in_size, out_size):
    """Row-stochastic matrix reproducing F.interpolate bilinear, align_corners=False."""
    dst = np.arange(out_size, dtype=np.float64)
    scale = in_size / out_size
    src = np.maximum(scale * (dst + 0.5) - 0.5, 0.0)
    i0 = np.minimum(np.floor(src).astype(np.int64), in_size - 1)
    i1 = np.where(i0 < in_size - 1, i0 + 1, i0)
    l1 = src - i0
    l0 = 1.0 - l1
    a = np.zeros((out_size, in_size), np.float32)
    np.add.at(a, (np.arange(out_size), i0), l0)
    np.add.at(a, (np.arange(out_size), i1), l1)
    return jnp.asarray(a)


def bilinear_resize(x, out_h, out_w, out_dtype):
    """Separable bilinear resize (align_corners=False), channels stay last.
    Only free row-major reshapes between the two batched-matmul kernels."""
    n, h, w, c = x.shape
    ah = _resize_matrix(h, out_h)   # (out_h, H)
    aw = _resize_matrix(w, out_w)   # (out_w, W)
    t = _pallas(_bmm_kernel,
                jax.ShapeDtypeStruct((n, out_h, w * c), jnp.float32),
                ah, x.reshape(n, h, w * c))
    y = _pallas(_bmm_kernel,
                jax.ShapeDtypeStruct((n * out_h, out_w, c), out_dtype),
                aw, t.reshape(n * out_h, w, c))
    return y.reshape(n, out_h, out_w, c)


# ------------------------------ parameter init -----------------------------

def init_params(key, n_channels=4, n_classes=3, depth=3):
    keys = iter(jax.random.split(key, 256))

    def conv_w(cin, cout, k=3):
        return 0.1 * jax.random.normal(next(keys), (cout, cin, k, k), jnp.float32)

    def vec(c, scale=0.05, base=0.0):
        return base + scale * jax.random.normal(next(keys), (c,), jnp.float32)

    def conv_block_params(cin, cout):
        # b1/b2 are kept for structural parity with the PyTorch module but are
        # unused: a per-channel conv bias is cancelled by training-mode BN.
        return dict(
            w1=conv_w(cin, cout), b1=vec(cout), g1=vec(cout, base=1.0), be1=vec(cout),
            w2=conv_w(cout, cout), b2=vec(cout), g2=vec(cout, base=1.0), be2=vec(cout),
        )

    params = {}
    params["encoders"] = [
        conv_block_params(3 if i == 0 else n_channels * 2 ** (i - 1), n_channels * 2 ** i)
        for i in range(depth)
    ]
    params["bottleneck"] = conv_block_params(n_channels * 2 ** (depth - 1),
                                             n_channels * 2 ** depth)
    decs = []
    for i in range(depth - 2, -1, -1):
        cin = n_channels * 2 ** (i + 2)
        cout = n_channels * 2 ** i
        decs.append(dict(
            wt=0.1 * jax.random.normal(next(keys), (cin, cout, 3, 3), jnp.float32),
            bt=vec(cout),
            block=conv_block_params(cout, cout),
        ))
    params["decoders"] = decs
    params["final_w"] = 0.1 * jax.random.normal(next(keys), (n_classes, n_channels, 1, 1),
                                                jnp.float32)
    params["final_b"] = vec(n_classes)
    return params


# --------------------------------- forward ---------------------------------

def conv_block_apply(x, p):
    x = conv3x3_bn_relu(x, p["w1"], p["g1"], p["be1"])
    x = conv3x3_bn_relu(x, p["w2"], p["g2"], p["be2"])
    return x


def unet_forward(x_nchw, params, image_dim):
    x = jnp.transpose(x_nchw, (0, 2, 3, 1)).astype(jnp.bfloat16)  # NCHW -> NHWC
    feats = []
    for p in params["encoders"]:
        x = conv_block_apply(x, p)
        feats.append(x)
        x = maxpool_2x2(x)
    x = conv_block_apply(x, params["bottleneck"])
    for i, p in enumerate(params["decoders"]):
        # Reference also computes crop() for i == 0 but discards it (no concat),
        # so the resize is only materialized when it is consumed.
        if i != 0:
            enc = feats[-(i + 1)]
            enc = bilinear_resize(enc, x.shape[1], x.shape[2], jnp.bfloat16)
            x = jnp.concatenate([enc, x], axis=-1)  # dim=1 in NCHW == channel axis
        x = conv_transpose_3x3_s2_p1(x, p["wt"], p["bt"])
        x = conv_block_apply(x, p["block"])
    x = conv1x1(x, params["final_w"], params["final_b"])
    x = bilinear_resize(x, image_dim[1], image_dim[2], jnp.float32)
    return jnp.transpose(x, (0, 3, 1, 2))  # NHWC -> NCHW


# ----------------------------------- main -----------------------------------

if __name__ == "__main__":
    key = jax.random.PRNGKey(0)
    k_param, k_x = jax.random.split(key)

    # Small config: image_dim=(3,16,16), n_channels=4, n_classes=3, depth=3, batch=2.
    image_dim = (3, 16, 16)
    n_channels, n_classes, depth = 4, 3, 3

    params = init_params(k_param, n_channels=n_channels, n_classes=n_classes, depth=depth)
    x = jax.random.normal(k_x, (2, image_dim[0], image_dim[1], image_dim[2]), jnp.float32)

    fwd = jax.jit(functools.partial(unet_forward, image_dim=image_dim))
    out = jax.block_until_ready(fwd(x, params))

    assert out.shape == (2, n_classes, image_dim[1], image_dim[2]), out.shape
    assert bool(jnp.all(jnp.isfinite(out)))
    print("KERNEL_OK")
</pallas_src>

<mosaic_0001>
module attributes {stable_mosaic.version = 11 : i64} {
  func.func @_conv_bn_relu_kernel(%arg0: memref<2x18x54xbf16, #tpu.memory_space<vmem>>, %arg1: memref<3x54x64xbf16, #tpu.memory_space<vmem>>, %arg2: memref<64x4xf32, #tpu.memory_space<vmem>>, %arg3: memref<4x64xf32, #tpu.memory_space<vmem>>, %arg4: memref<1x4xf32, #tpu.memory_space<vmem>>, %arg5: memref<1x4xf32, #tpu.memory_space<vmem>>, %arg6: memref<2x16x64xbf16, #tpu.memory_space<vmem>>) attributes {dimension_semantics = [], scalar_prefetch = 0 : i64, scratch_operands = 0 : i64, tpu.core_type = #tpu.core_type<tc>} {
    %cst = arith.constant 0.000000e+00 : f32
    %0 = vector.broadcast %cst : f32 to vector<2x16x64xf32>
    %c0 = arith.constant 0 : index
    %c0_0 = arith.constant 0 : index
    %c0_1 = arith.constant 0 : index
    %1 = vector.load %arg0[%c0, %c0_0, %c0_1] : memref<2x18x54xbf16, #tpu.memory_space<vmem>>, vector<2x16x54xbf16>
    %c0_2 = arith.constant 0 : index
    %c0_3 = arith.constant 0 : index
    %c0_4 = arith.constant 0 : index
    %2 = vector.load %arg1[%c0_2, %c0_3, %c0_4] : memref<3x54x64xbf16, #tpu.memory_space<vmem>>, vector<1x54x64xbf16>
    %3 = vector.shape_cast %2 : vector<1x54x64xbf16> to vector<54x64xbf16>
    %4 = vector.shape_cast %3 : vector<54x64xbf16> to vector<1x54x64xbf16>
    %5 = vector.broadcast %4 : vector<1x54x64xbf16> to vector<2x54x64xbf16>
    "tpu.trace_start"() <{level = 10 : i32, message = "bqk,bkd->bqd"}> : () -> ()
    %cst_5 = arith.constant dense<0.000000e+00> : vector<2x16x64xf32>
    %6 = tpu.matmul %1, %5, %cst_5 {dimension_numbers = #tpu.dot_dimension_numbers<[2], [1], [1], [2], [0, 0, 0, 1, 1, 2], [0], [0]>} : vector<2x16x54xbf16>, vector<2x54x64xbf16>, vector<2x16x64xf32> -> vector<2x16x64xf32>
    "tpu.trace_stop"() : () -> ()
    %7 = arith.addf %0, %6 : vector<2x16x64xf32>
    %c0_6 = arith.constant 0 : index
    %c1 = arith.constant 1 : index
    %c0_7 = arith.constant 0 : index
    %8 = vector.load %arg0[%c0_6, %c1, %c0_7] : memref<2x18x54xbf16, #tpu.memory_space<vmem>>, vector<2x16x54xbf16>
    %c1_8 = arith.constant 1 : index
    %c0_9 = arith.constant 0 : index
    %c0_10 = arith.constant 0 : index
    %9 = vector.load %arg1[%c1_8, %c0_9, %c0_10] : memref<3x54x64xbf16, #tpu.memory_space<vmem>>, vector<1x54x64xbf16>
    %10 = vector.shape_cast %9 : vector<1x54x64xbf16> to vector<54x64xbf16>
    %11 = vector.shape_cast %10 : vector<54x64xbf16> to vector<1x54x64xbf16>
    %12 = vector.broadcast %11 : vector<1x54x64xbf16> to vector<2x54x64xbf16>
    "tpu.trace_start"() <{level = 10 : i32, message = "bqk,bkd->bqd"}> : () -> ()
    %cst_11 = arith.constant dense<0.000000e+00> : vector<2x16x64xf32>
    %13 = tpu.matmul %8, %12, %cst_11 {dimension_numbers = #tpu.dot_dimension_numbers<[2], [1], [1], [2], [0, 0, 0, 1, 1, 2], [0], [0]>} : vector<2x16x54xbf16>, vector<2x54x64xbf16>, vector<2x16x64xf32> -> vector<2x16x64xf32>
    "tpu.trace_stop"() : () -> ()
    %14 = arith.addf %7, %13 : vector<2x16x64xf32>
    %c0_12 = arith.constant 0 : index
    %c2 = arith.constant 2 : index
    %c0_13 = arith.constant 0 : index
    %15 = vector.load %arg0[%c0_12, %c2, %c0_13] : memref<2x18x54xbf16, #tpu.memory_space<vmem>>, vector<2x16x54xbf16>
    %c2_14 = arith.constant 2 : index
    %c0_15 = arith.constant 0 : index
    %c0_16 = arith.constant 0 : index
    %16 = vector.load %arg1[%c2_14, %c0_15, %c0_16] : memref<3x54x64xbf16, #tpu.memory_space<vmem>>, vector<1x54x64xbf16>
    %17 = vector.shape_cast %16 : vector<1x54x64xbf16> to vector<54x64xbf16>
    %18 = vector.shape_cast %17 : vector<54x64xbf16> to vector<1x54x64xbf16>
    %19 = vector.broadcast %18 : vector<1x54x64xbf16> to vector<2x54x64xbf16>
    "tpu.trace_start"() <{level = 10 : i32, message = "bqk,bkd->bqd"}> : () -> ()
    %cst_17 = arith.constant dense<0.000000e+00> : vector<2x16x64xf32>
    %20 = tpu.matmul %15, %19, %cst_17 {dimension_numbers = #tpu.dot_dimension_numbers<[2], [1], [1], [2], [0, 0, 0, 1, 1, 2], [0], [0]>} : vector<2x16x54xbf16>, vector<2x54x64xbf16>, vector<2x16x64xf32> -> vector<2x16x64xf32>
    "tpu.trace_stop"() : () -> ()
    %21 = arith.addf %14, %20 : vector<2x16x64xf32>
    %cst_18 = arith.constant dense<0.000000e+00> : vector<16x64xf32>
    %22 = vector.multi_reduction <add>, %21, %cst_18 [0] : vector<2x16x64xf32> to vector<16x64xf32>
    %23 = vector.shape_cast %22 : vector<16x64xf32> to vector<1x16x64xf32>
    %cst_19 = arith.constant dense<0.000000e+00> : vector<1x64xf32>
    %24 = vector.multi_reduction <add>, %23, %cst_19 [1] : vector<1x16x64xf32> to vector<1x64xf32>
    %25 = vector.shape_cast %24 : vector<1x64xf32> to vector<1x1x64xf32>
    %26 = arith.mulf %21, %21 : vector<2x16x64xf32>
    %cst_20 = arith.constant dense<0.000000e+00> : vector<16x64xf32>
    %27 = vector.multi_reduction <add>, %26, %cst_20 [0] : vector<2x16x64xf32> to vector<16x64xf32>
    %28 = vector.shape_cast %27 : vector<16x64xf32> to vector<1x16x64xf32>
    %cst_21 = arith.constant dense<0.000000e+00> : vector<1x64xf32>
    %29 = vector.multi_reduction <add>, %28, %cst_21 [1] : vector<1x16x64xf32> to vector<1x64xf32>
    %30 = vector.shape_cast %29 : vector<1x64xf32> to vector<1x1x64xf32>
    %31 = vector.shape_cast %25 : vector<1x1x64xf32> to vector<1x64xf32>
    %c0_22 = arith.constant 0 : index
    %c0_23 = arith.constant 0 : index
    %32 = vector.load %arg2[%c0_22, %c0_23] : memref<64x4xf32, #tpu.memory_space<vmem>>, vector<64x4xf32>
    %cst_24 = arith.constant dense<0.000000e+00> : vector<1x4xf32>
    %33 = tpu.matmul %31, %32, %cst_24 {dimension_numbers = #tpu.dot_dimension_numbers<[1], [0], [0], [1], [0, 0, 1, 1], [], []>} : vector<1x64xf32>, vector<64x4xf32>, vector<1x4xf32> -> vector<1x4xf32>
    %34 = vector.shape_cast %30 : vector<1x1x64xf32> to vector<1x64xf32>
    %c0_25 = arith.constant 0 : index
    %c0_26 = arith.constant 0 : index
    %35 = vector.load %arg2[%c0_25, %c0_26] : memref<64x4xf32, #tpu.memory_space<vmem>>, vector<64x4xf32>
    %cst_27 = arith.constant dense<0.000000e+00> : vector<1x4xf32>
    %36 = tpu.matmul %34, %35, %cst_27 {dimension_numbers = #tpu.dot_dimension_numbers<[1], [0], [0], [1], [0, 0, 1, 1], [], []>} : vector<1x64xf32>, vector<64x4xf32>, vector<1x4xf32> -> vector<1x4xf32>
    %cst_28 = arith.constant 5.120000e+02 : f32
    %37 = vector.broadcast %cst_28 : f32 to vector<1x4xf32>
    %38 = arith.divf %33, %37 : vector<1x4xf32>
    %cst_29 = arith.constant 5.120000e+02 : f32
    %39 = vector.broadcast %cst_29 : f32 to vector<1x4xf32>
    %40 = arith.divf %36, %39 : vector<1x4xf32>
    %41 = arith.mulf %38, %38 : vector<1x4xf32>
    %42 = arith.subf %40, %41 : vector<1x4xf32>
    %c0_30 = arith.constant 0 : index
    %c0_31 = arith.constant 0 : index
    %43 = vector.load %arg4[%c0_30, %c0_31] : memref<1x4xf32, #tpu.memory_space<vmem>>, vector<1x4xf32>
    %cst_32 = arith.constant 9.99999974E-6 : f32
    %44 = vector.broadcast %cst_32 : f32 to vector<1x4xf32>
    %45 = arith.addf %42, %44 : vector<1x4xf32>
    %46 = math.rsqrt %45 : vector<1x4xf32>
    %47 = arith.mulf %43, %46 : vector<1x4xf32>
    %c0_33 = arith.constant 0 : index
    %c0_34 = arith.constant 0 : index
    %48 = vector.load %arg5[%c0_33, %c0_34] : memref<1x4xf32, #tpu.memory_space<vmem>>, vector<1x4xf32>
    %49 = arith.mulf %38, %47 : vector<1x4xf32>
    %50 = arith.subf %48, %49 : vector<1x4xf32>
    %c0_35 = arith.constant 0 : index
    %c0_36 = arith.constant 0 : index
    %51 = vector.load %arg3[%c0_35, %c0_36] : memref<4x64xf32, #tpu.memory_space<vmem>>, vector<4x64xf32>
    %cst_37 = arith.constant dense<0.000000e+00> : vector<1x64xf32>
    %52 = tpu.matmul %47, %51, %cst_37 {dimension_numbers = #tpu.dot_dimension_numbers<[1], [0], [0], [1], [0, 0, 1, 1], [], []>} : vector<1x4xf32>, vector<4x64xf32>, vector<1x64xf32> -> vector<1x64xf32>
    %c0_38 = arith.constant 0 : index
    %c0_39 = arith.constant 0 : index
    %53 = vector.load %arg3[%c0_38, %c0_39] : memref<4x64xf32, #tpu.memory_space<vmem>>, vector<4x64xf32>
    %cst_40 = arith.constant dense<0.000000e+00> : vector<1x64xf32>
    %54 = tpu.matmul %50, %53, %cst_40 {dimension_numbers = #tpu.dot_dimension_numbers<[1], [0], [0], [1], [0, 0, 1, 1], [], []>} : vector<1x4xf32>, vector<4x64xf32>, vector<1x64xf32> -> vector<1x64xf32>
    %55 = vector.shape_cast %52 : vector<1x64xf32> to vector<1x1x64xf32>
    %56 = vector.broadcast %55 : vector<1x1x64xf32> to vector<2x16x64xf32>
    %57 = arith.mulf %21, %56 : vector<2x16x64xf32>
    %58 = vector.shape_cast %54 : vector<1x64xf32> to vector<1x1x64xf32>
    %59 = vector.broadcast %58 : vector<1x1x64xf32> to vector<2x16x64xf32>
    %60 = arith.addf %57, %59 : vector<2x16x64xf32>
    %cst_41 = arith.constant 0.000000e+00 : f32
    %61 = vector.broadcast %cst_41 : f32 to vector<2x16x64xf32>
    %62 = arith.maximumf %60, %61 : vector<2x16x64xf32>
    %63 = arith.truncf %62 : vector<2x16x64xf32> to vector<2x16x64xbf16>
    %c0_42 = arith.constant 0 : index
    %c0_43 = arith.constant 0 : index
    %c0_44 = arith.constant 0 : index
    %64 = vector.load %arg6[%c0_42, %c0_43, %c0_44] : memref<2x16x64xbf16, #tpu.memory_space<vmem>>, vector<2x16x64xbf16>
    tpu.vector_store %arg6[%c0_42, %c0_43, %c0_44], %63 {strides = array<i32>} : memref<2x16x64xbf16, #tpu.memory_space<vmem>>, vector<2x16x64xbf16>,
    return
  }
}

module attributes {stable_mosaic.version = 11 : i64} {
  func.func @_conv_bn_relu_kernel(%arg0: memref<2x18x72xbf16, #tpu.memory_space<vmem>>, %arg1: memref<3x72x64xbf16, #tpu.memory_space<vmem>>, %arg2: memref<64x4xf32, #tpu.memory_space<vmem>>, %arg3: memref<4x64xf32, #tpu.memory_space<vmem>>, %arg4: memref<1x4xf32, #tpu.memory_space<vmem>>, %arg5: memref<1x4xf32, #tpu.memory_space<vmem>>, %arg6: memref<2x16x64xbf16, #tpu.memory_space<vmem>>) attributes {dimension_semantics = [], scalar_prefetch = 0 : i64, scratch_operands = 0 : i64, tpu.core_type = #tpu.core_type<tc>} {
    %cst = arith.constant 0.000000e+00 : f32
    %0 = vector.broadcast %cst : f32 to vector<2x16x64xf32>
    %c0 = arith.constant 0 : index
    %c0_0 = arith.constant 0 : index
    %c0_1 = arith.constant 0 : index
    %1 = vector.load %arg0[%c0, %c0_0, %c0_1] : memref<2x18x72xbf16, #tpu.memory_space<vmem>>, vector<2x16x72xbf16>
    %c0_2 = arith.constant 0 : index
    %c0_3 = arith.constant 0 : index
    %c0_4 = arith.constant 0 : index
    %2 = vector.load %arg1[%c0_2, %c0_3, %c0_4] : memref<3x72x64xbf16, #tpu.memory_space<vmem>>, vector<1x72x64xbf16>
    %3 = vector.shape_cast %2 : vector<1x72x64xbf16> to vector<72x64xbf16>
    %4 = vector.shape_cast %3 : vector<72x64xbf16> to vector<1x72x64xbf16>
    %5 = vector.broadcast %4 : vector<1x72x64xbf16> to vector<2x72x64xbf16>
    "tpu.trace_start"() <{level = 10 : i32, message = "bqk,bkd->bqd"}> : () -> ()
    %cst_5 = arith.constant dense<0.000000e+00> : vector<2x16x64xf32>
    %6 = tpu.matmul %1, %5, %cst_5 {dimension_numbers = #tpu.dot_dimension_numbers<[2], [1], [1], [2], [0, 0, 0, 1, 1, 2], [0], [0]>} : vector<2x16x72xbf16>, vector<2x72x64xbf16>, vector<2x16x64xf32> -> vector<2x16x64xf32>
    "tpu.trace_stop"() : () -> ()
    %7 = arith.addf %0, %6 : vector<2x16x64xf32>
    %c0_6 = arith.constant 0 : index
    %c1 = arith.constant 1 : index
    %c0_7 = arith.constant 0 : index
    %8 = vector.load %arg0[%c0_6, %c1, %c0_7] : memref<2x18x72xbf16, #tpu.memory_space<vmem>>, vector<2x16x72xbf16>
    %c1_8 = arith.constant 1 : index
    %c0_9 = arith.constant 0 : index
    %c0_10 = arith.constant 0 : index
    %9 = vector.load %arg1[%c1_8, %c0_9, %c0_10] : memref<3x72x64xbf16, #tpu.memory_space<vmem>>, vector<1x72x64xbf16>
    %10 = vector.shape_cast %9 : vector<1x72x64xbf16> to vector<72x64xbf16>
    %11 = vector.shape_cast %10 : vector<72x64xbf16> to vector<1x72x64xbf16>
    %12 = vector.broadcast %11 : vector<1x72x64xbf16> to vector<2x72x64xbf16>
    "tpu.trace_start"() <{level = 10 : i32, message = "bqk,bkd->bqd"}> : () -> ()
    %cst_11 = arith.constant dense<0.000000e+00> : vector<2x16x64xf32>
    %13 = tpu.matmul %8, %12, %cst_11 {dimension_numbers = #tpu.dot_dimension_numbers<[2], [1], [1], [2], [0, 0, 0, 1, 1, 2], [0], [0]>} : vector<2x16x72xbf16>, vector<2x72x64xbf16>, vector<2x16x64xf32> -> vector<2x16x64xf32>
    "tpu.trace_stop"() : () -> ()
    %14 = arith.addf %7, %13 : vector<2x16x64xf32>
    %c0_12 = arith.constant 0 : index
    %c2 = arith.constant 2 : index
    %c0_13 = arith.constant 0 : index
    %15 = vector.load %arg0[%c0_12, %c2, %c0_13] : memref<2x18x72xbf16, #tpu.memory_space<vmem>>, vector<2x16x72xbf16>
    %c2_14 = arith.constant 2 : index
    %c0_15 = arith.constant 0 : index
    %c0_16 = arith.constant 0 : index
    %16 = vector.load %arg1[%c2_14, %c0_15, %c0_16] : memref<3x72x64xbf16, #tpu.memory_space<vmem>>, vector<1x72x64xbf16>
    %17 = vector.shape_cast %16 : vector<1x72x64xbf16> to vector<72x64xbf16>
    %18 = vector.shape_cast %17 : vector<72x64xbf16> to vector<1x72x64xbf16>
    %19 = vector.broadcast %18 : vector<1x72x64xbf16> to vector<2x72x64xbf16>
    "tpu.trace_start"() <{level = 10 : i32, message = "bqk,bkd->bqd"}> : () -> ()
    %cst_17 = arith.constant dense<0.000000e+00> : vector<2x16x64xf32>
    %20 = tpu.matmul %15, %19, %cst_17 {dimension_numbers = #tpu.dot_dimension_numbers<[2], [1], [1], [2], [0, 0, 0, 1, 1, 2], [0], [0]>} : vector<2x16x72xbf16>, vector<2x72x64xbf16>, vector<2x16x64xf32> -> vector<2x16x64xf32>
    "tpu.trace_stop"() : () -> ()
    %21 = arith.addf %14, %20 : vector<2x16x64xf32>
    %cst_18 = arith.constant dense<0.000000e+00> : vector<16x64xf32>
    %22 = vector.multi_reduction <add>, %21, %cst_18 [0] : vector<2x16x64xf32> to vector<16x64xf32>
    %23 = vector.shape_cast %22 : vector<16x64xf32> to vector<1x16x64xf32>
    %cst_19 = arith.constant dense<0.000000e+00> : vector<1x64xf32>
    %24 = vector.multi_reduction <add>, %23, %cst_19 [1] : vector<1x16x64xf32> to vector<1x64xf32>
    %25 = vector.shape_cast %24 : vector<1x64xf32> to vector<1x1x64xf32>
    %26 = arith.mulf %21, %21 : vector<2x16x64xf32>
    %cst_20 = arith.constant dense<0.000000e+00> : vector<16x64xf32>
    %27 = vector.multi_reduction <add>, %26, %cst_20 [0] : vector<2x16x64xf32> to vector<16x64xf32>
    %28 = vector.shape_cast %27 : vector<16x64xf32> to vector<1x16x64xf32>
    %cst_21 = arith.constant dense<0.000000e+00> : vector<1x64xf32>
    %29 = vector.multi_reduction <add>, %28, %cst_21 [1] : vector<1x16x64xf32> to vector<1x64xf32>
    %30 = vector.shape_cast %29 : vector<1x64xf32> to vector<1x1x64xf32>
    %31 = vector.shape_cast %25 : vector<1x1x64xf32> to vector<1x64xf32>
    %c0_22 = arith.constant 0 : index
    %c0_23 = arith.constant 0 : index
    %32 = vector.load %arg2[%c0_22, %c0_23] : memref<64x4xf32, #tpu.memory_space<vmem>>, vector<64x4xf32>
    %cst_24 = arith.constant dense<0.000000e+00> : vector<1x4xf32>
    %33 = tpu.matmul %31, %32, %cst_24 {dimension_numbers = #tpu.dot_dimension_numbers<[1], [0], [0], [1], [0, 0, 1, 1], [], []>} : vector<1x64xf32>, vector<64x4xf32>, vector<1x4xf32> -> vector<1x4xf32>
    %34 = vector.shape_cast %30 : vector<1x1x64xf32> to vector<1x64xf32>
    %c0_25 = arith.constant 0 : index
    %c0_26 = arith.constant 0 : index
    %35 = vector.load %arg2[%c0_25, %c0_26] : memref<64x4xf32, #tpu.memory_space<vmem>>, vector<64x4xf32>
    %cst_27 = arith.constant dense<0.000000e+00> : vector<1x4xf32>
    %36 = tpu.matmul %34, %35, %cst_27 {dimension_numbers = #tpu.dot_dimension_numbers<[1], [0], [0], [1], [0, 0, 1, 1], [], []>} : vector<1x64xf32>, vector<64x4xf32>, vector<1x4xf32> -> vector<1x4xf32>
    %cst_28 = arith.constant 5.120000e+02 : f32
    %37 = vector.broadcast %cst_28 : f32 to vector<1x4xf32>
    %38 = arith.divf %33, %37 : vector<1x4xf32>
    %cst_29 = arith.constant 5.120000e+02 : f32
    %39 = vector.broadcast %cst_29 : f32 to vector<1x4xf32>
    %40 = arith.divf %36, %39 : vector<1x4xf32>
    %41 = arith.mulf %38, %38 : vector<1x4xf32>
    %42 = arith.subf %40, %41 : vector<1x4xf32>
    %c0_30 = arith.constant 0 : index
    %c0_31 = arith.constant 0 : index
    %43 = vector.load %arg4[%c0_30, %c0_31] : memref<1x4xf32, #tpu.memory_space<vmem>>, vector<1x4xf32>
    %cst_32 = arith.constant 9.99999974E-6 : f32
    %44 = vector.broadcast %cst_32 : f32 to vector<1x4xf32>
    %45 = arith.addf %42, %44 : vector<1x4xf32>
    %46 = math.rsqrt %45 : vector<1x4xf32>
    %47 = arith.mulf %43, %46 : vector<1x4xf32>
    %c0_33 = arith.constant 0 : index
    %c0_34 = arith.constant 0 : index
    %48 = vector.load %arg5[%c0_33, %c0_34] : memref<1x4xf32, #tpu.memory_space<vmem>>, vector<1x4xf32>
    %49 = arith.mulf %38, %47 : vector<1x4xf32>
    %50 = arith.subf %48, %49 : vector<1x4xf32>
    %c0_35 = arith.constant 0 : index
    %c0_36 = arith.constant 0 : index
    %51 = vector.load %arg3[%c0_35, %c0_36] : memref<4x64xf32, #tpu.memory_space<vmem>>, vector<4x64xf32>
    %cst_37 = arith.constant dense<0.000000e+00> : vector<1x64xf32>
    %52 = tpu.matmul %47, %51, %cst_37 {dimension_numbers = #tpu.dot_dimension_numbers<[1], [0], [0], [1], [0, 0, 1, 1], [], []>} : vector<1x4xf32>, vector<4x64xf32>, vector<1x64xf32> -> vector<1x64xf32>
    %c0_38 = arith.constant 0 : index
    %c0_39 = arith.constant 0 : index
    %53 = vector.load %arg3[%c0_38, %c0_39] : memref<4x64xf32, #tpu.memory_space<vmem>>, vector<4x64xf32>
    %cst_40 = arith.constant dense<0.000000e+00> : vector<1x64xf32>
    %54 = tpu.matmul %50, %53, %cst_40 {dimension_numbers = #tpu.dot_dimension_numbers<[1], [0], [0], [1], [0, 0, 1, 1], [], []>} : vector<1x4xf32>, vector<4x64xf32>, vector<1x64xf32> -> vector<1x64xf32>
    %55 = vector.shape_cast %52 : vector<1x64xf32> to vector<1x1x64xf32>
    %56 = vector.broadcast %55 : vector<1x1x64xf32> to vector<2x16x64xf32>
    %57 = arith.mulf %21, %56 : vector<2x16x64xf32>
    %58 = vector.shape_cast %54 : vector<1x64xf32> to vector<1x1x64xf32>
    %59 = vector.broadcast %58 : vector<1x1x64xf32> to vector<2x16x64xf32>
    %60 = arith.addf %57, %59 : vector<2x16x64xf32>
    %cst_41 = arith.constant 0.000000e+00 : f32
    %61 = vector.broadcast %cst_41 : f32 to vector<2x16x64xf32>
    %62 = arith.maximumf %60, %61 : vector<2x16x64xf32>
    %63 = arith.truncf %62 : vector<2x16x64xf32> to vector<2x16x64xbf16>
    %c0_42 = arith.constant 0 : index
    %c0_43 = arith.constant 0 : index
    %c0_44 = arith.constant 0 : index
    %64 = vector.load %arg6[%c0_42, %c0_43, %c0_44] : memref<2x16x64xbf16, #tpu.memory_space<vmem>>, vector<2x16x64xbf16>
    tpu.vector_store %arg6[%c0_42, %c0_43, %c0_44], %63 {strides = array<i32>} : memref<2x16x64xbf16, #tpu.memory_space<vmem>>, vector<2x16x64xbf16>,
    return
  }
}

module attributes {stable_mosaic.version = 11 : i64} {
  func.func @_max4_kernel(%arg0: memref<128x4xbf16, #tpu.memory_space<vmem>>, %arg1: memref<128x4xbf16, #tpu.memory_space<vmem>>, %arg2: memref<128x4xbf16, #tpu.memory_space<vmem>>, %arg3: memref<128x4xbf16, #tpu.memory_space<vmem>>, %arg4: memref<128x4xbf16, #tpu.memory_space<vmem>>) attributes {dimension_semantics = [], scalar_prefetch = 0 : i64, scratch_operands = 0 : i64, tpu.core_type = #tpu.core_type<tc>} {
    %c0 = arith.constant 0 : index
    %c0_0 = arith.constant 0 : index
    %0 = vector.load %arg0[%c0, %c0_0] : memref<128x4xbf16, #tpu.memory_space<vmem>>, vector<128x4xbf16>
    %c0_1 = arith.constant 0 : index
    %c0_2 = arith.constant 0 : index
    %1 = vector.load %arg1[%c0_1, %c0_2] : memref<128x4xbf16, #tpu.memory_space<vmem>>, vector<128x4xbf16>
    %2 = arith.maximumf %0, %1 : vector<128x4xbf16>
    %c0_3 = arith.constant 0 : index
    %c0_4 = arith.constant 0 : index
    %3 = vector.load %arg2[%c0_3, %c0_4] : memref<128x4xbf16, #tpu.memory_space<vmem>>, vector<128x4xbf16>
    %c0_5 = arith.constant 0 : index
    %c0_6 = arith.constant 0 : index
    %4 = vector.load %arg3[%c0_5, %c0_6] : memref<128x4xbf16, #tpu.memory_space<vmem>>, vector<128x4xbf16>
    %5 = arith.maximumf %3, %4 : vector<128x4xbf16>
    %6 = arith.maximumf %2, %5 : vector<128x4xbf16>
    %c0_7 = arith.constant 0 : index
    %c0_8 = arith.constant 0 : index
    %7 = vector.load %arg4[%c0_7, %c0_8] : memref<128x4xbf16, #tpu.memory_space<vmem>>, vector<128x4xbf16>
    tpu.vector_store %arg4[%c0_7, %c0_8], %6 {strides = array<i32>} : memref<128x4xbf16, #tpu.memory_space<vmem>>, vector<128x4xbf16>,
    return
  }
}

module attributes {stable_mosaic.version = 11 : i64} {
  func.func @_conv_bn_relu_kernel(%arg0: memref<2x10x40xbf16, #tpu.memory_space<vmem>>, %arg1: memref<3x40x64xbf16, #tpu.memory_space<vmem>>, %arg2: memref<64x8xf32, #tpu.memory_space<vmem>>, %arg3: memref<8x64xf32, #tpu.memory_space<vmem>>, %arg4: memref<1x8xf32, #tpu.memory_space<vmem>>, %arg5: memref<1x8xf32, #tpu.memory_space<vmem>>, %arg6: memref<2x8x64xbf16, #tpu.memory_space<vmem>>) attributes {dimension_semantics = [], scalar_prefetch = 0 : i64, scratch_operands = 0 : i64, tpu.core_type = #tpu.core_type<tc>} {
    %cst = arith.constant 0.000000e+00 : f32
    %0 = vector.broadcast %cst : f32 to vector<2x8x64xf32>
    %c0 = arith.constant 0 : index
    %c0_0 = arith.constant 0 : index
    %c0_1 = arith.constant 0 : index
    %1 = vector.load %arg0[%c0, %c0_0, %c0_1] : memref<2x10x40xbf16, #tpu.memory_space<vmem>>, vector<2x8x40xbf16>
    %c0_2 = arith.constant 0 : index
    %c0_3 = arith.constant 0 : index
    %c0_4 = arith.constant 0 : index
    %2 = vector.load %arg1[%c0_2, %c0_3, %c0_4] : memref<3x40x64xbf16, #tpu.memory_space<vmem>>, vector<1x40x64xbf16>
    %3 = vector.shape_cast %2 : vector<1x40x64xbf16> to vector<40x64xbf16>
    %4 = vector.shape_cast %3 : vector<40x64xbf16> to vector<1x40x64xbf16>
    %5 = vector.broadcast %4 : vector<1x40x64xbf16> to vector<2x40x64xbf16>
    "tpu.trace_start"() <{level = 10 : i32, message = "bqk,bkd->bqd"}> : () -> ()
    %cst_5 = arith.constant dense<0.000000e+00> : vector<2x8x64xf32>
    %6 = tpu.matmul %1, %5, %cst_5 {dimension_numbers = #tpu.dot_dimension_numbers<[2], [1], [1], [2], [0, 0, 0, 1, 1, 2], [0], [0]>} : vector<2x8x40xbf16>, vector<2x40x64xbf16>, vector<2x8x64xf32> -> vector<2x8x64xf32>
    "tpu.trace_stop"() : () -> ()
    %7 = arith.addf %0, %6 : vector<2x8x64xf32>
    %c0_6 = arith.constant 0 : index
    %c1 = arith.constant 1 : index
    %c0_7 = arith.constant 0 : index
    %8 = vector.load %arg0[%c0_6, %c1, %c0_7] : memref<2x10x40xbf16, #tpu.memory_space<vmem>>, vector<2x8x40xbf16>
    %c1_8 = arith.constant 1 : index
    %c0_9 = arith.constant 0 : index
    %c0_10 = arith.constant 0 : index
    %9 = vector.load %arg1[%c1_8, %c0_9, %c0_10] : memref<3x40x64xbf16, #tpu.memory_space<vmem>>, vector<1x40x64xbf16>
    %10 = vector.shape_cast %9 : vector<1x40x64xbf16> to vector<40x64xbf16>
    %11 = vector.shape_cast %10 : vector<40x64xbf16> to vector<1x40x64xbf16>
    %12 = vector.broadcast %11 : vector<1x40x64xbf16> to vector<2x40x64xbf16>
    "tpu.trace_start"() <{level = 10 : i32, message = "bqk,bkd->bqd"}> : () -> ()
    %cst_11 = arith.constant dense<0.000000e+00> : vector<2x8x64xf32>
    %13 = tpu.matmul %8, %12, %cst_11 {dimension_numbers = #tpu.dot_dimension_numbers<[2], [1], [1], [2], [0, 0, 0, 1, 1, 2], [0], [0]>} : vector<2x8x40xbf16>, vector<2x40x64xbf16>, vector<2x8x64xf32> -> vector<2x8x64xf32>
    "tpu.trace_stop"() : () -> ()
    %14 = arith.addf %7, %13 : vector<2x8x64xf32>
    %c0_12 = arith.constant 0 : index
    %c2 = arith.constant 2 : index
    %c0_13 = arith.constant 0 : index
    %15 = vector.load %arg0[%c0_12, %c2, %c0_13] : memref<2x10x40xbf16, #tpu.memory_space<vmem>>, vector<2x8x40xbf16>
    %c2_14 = arith.constant 2 : index
    %c0_15 = arith.constant 0 : index
    %c0_16 = arith.constant 0 : index
    %16 = vector.load %arg1[%c2_14, %c0_15, %c0_16] : memref<3x40x64xbf16, #tpu.memory_space<vmem>>, vector<1x40x64xbf16>
    %17 = vector.shape_cast %16 : vector<1x40x64xbf16> to vector<40x64xbf16>
    %18 = vector.shape_cast %17 : vector<40x64xbf16> to vector<1x40x64xbf16>
    %19 = vector.broadcast %18 : vector<1x40x64xbf16> to vector<2x40x64xbf16>
    "tpu.trace_start"() <{level = 10 : i32, message = "bqk,bkd->bqd"}> : () -> ()
    %cst_17 = arith.constant dense<0.000000e+00> : vector<2x8x64xf32>
    %20 = tpu.matmul %15, %19, %cst_17 {dimension_numbers = #tpu.dot_dimension_numbers<[2], [1], [1], [2], [0, 0, 0, 1, 1, 2], [0], [0]>} : vector<2x8x40xbf16>, vector<2x40x64xbf16>, vector<2x8x64xf32> -> vector<2x8x64xf32>
    "tpu.trace_stop"() : () -> ()
    %21 = arith.addf %14, %20 : vector<2x8x64xf32>
    %cst_18 = arith.constant dense<0.000000e+00> : vector<8x64xf32>
    %22 = vector.multi_reduction <add>, %21, %cst_18 [0] : vector<2x8x64xf32> to vector<8x64xf32>
    %23 = vector.shape_cast %22 : vector<8x64xf32> to vector<1x8x64xf32>
    %cst_19 = arith.constant dense<0.000000e+00> : vector<1x64xf32>
    %24 = vector.multi_reduction <add>, %23, %cst_19 [1] : vector<1x8x64xf32> to vector<1x64xf32>
    %25 = vector.shape_cast %24 : vector<1x64xf32> to vector<1x1x64xf32>
    %26 = arith.mulf %21, %21 : vector<2x8x64xf32>
    %cst_20 = arith.constant dense<0.000000e+00> : vector<8x64xf32>
    %27 = vector.multi_reduction <add>, %26, %cst_20 [0] : vector<2x8x64xf32> to vector<8x64xf32>
    %28 = vector.shape_cast %27 : vector<8x64xf32> to vector<1x8x64xf32>
    %cst_21 = arith.constant dense<0.000000e+00> : vector<1x64xf32>
    %29 = vector.multi_reduction <add>, %28, %cst_21 [1] : vector<1x8x64xf32> to vector<1x64xf32>
    %30 = vector.shape_cast %29 : vector<1x64xf32> to vector<1x1x64xf32>
    %31 = vector.shape_cast %25 : vector<1x1x64xf32> to vector<1x64xf32>
    %c0_22 = arith.constant 0 : index
    %c0_23 = arith.constant 0 : index
    %32 = vector.load %arg2[%c0_22, %c0_23] : memref<64x8xf32, #tpu.memory_space<vmem>>, vector<64x8xf32>
    %cst_24 = arith.constant dense<0.000000e+00> : vector<1x8xf32>
    %33 = tpu.matmul %31, %32, %cst_24 {dimension_numbers = #tpu.dot_dimension_numbers<[1], [0], [0], [1], [0, 0, 1, 1], [], []>} : vector<1x64xf32>, vector<64x8xf32>, vector<1x8xf32> -> vector<1x8xf32>
    %34 = vector.shape_cast %30 : vector<1x1x64xf32> to vector<1x64xf32>
    %c0_25 = arith.constant 0 : index
    %c0_26 = arith.constant 0 : index
    %35 = vector.load %arg2[%c0_25, %c0_26] : memref<64x8xf32, #tpu.memory_space<vmem>>, vector<64x8xf32>
    %cst_27 = arith.constant dense<0.000000e+00> : vector<1x8xf32>
    %36 = tpu.matmul %34, %35, %cst_27 {dimension_numbers = #tpu.dot_dimension_numbers<[1], [0], [0], [1], [0, 0, 1, 1], [], []>} : vector<1x64xf32>, vector<64x8xf32>, vector<1x8xf32> -> vector<1x8xf32>
    %cst_28 = arith.constant 1.280000e+02 : f32
    %37 = vector.broadcast %cst_28 : f32 to vector<1x8xf32>
    %38 = arith.divf %33, %37 : vector<1x8xf32>
    %cst_29 = arith.constant 1.280000e+02 : f32
    %39 = vector.broadcast %cst_29 : f32 to vector<1x8xf32>
    %40 = arith.divf %36, %39 : vector<1x8xf32>
    %41 = arith.mulf %38, %38 : vector<1x8xf32>
    %42 = arith.subf %40, %41 : vector<1x8xf32>
    %c0_30 = arith.constant 0 : index
    %c0_31 = arith.constant 0 : index
    %43 = vector.load %arg4[%c0_30, %c0_31] : memref<1x8xf32, #tpu.memory_space<vmem>>, vector<1x8xf32>
    %cst_32 = arith.constant 9.99999974E-6 : f32
    %44 = vector.broadcast %cst_32 : f32 to vector<1x8xf32>
    %45 = arith.addf %42, %44 : vector<1x8xf32>
    %46 = math.rsqrt %45 : vector<1x8xf32>
    %47 = arith.mulf %43, %46 : vector<1x8xf32>
    %c0_33 = arith.constant 0 : index
    %c0_34 = arith.constant 0 : index
    %48 = vector.load %arg5[%c0_33, %c0_34] : memref<1x8xf32, #tpu.memory_space<vmem>>, vector<1x8xf32>
    %49 = arith.mulf %38, %47 : vector<1x8xf32>
    %50 = arith.subf %48, %49 : vector<1x8xf32>
    %c0_35 = arith.constant 0 : index
    %c0_36 = arith.constant 0 : index
    %51 = vector.load %arg3[%c0_35, %c0_36] : memref<8x64xf32, #tpu.memory_space<vmem>>, vector<8x64xf32>
    %cst_37 = arith.constant dense<0.000000e+00> : vector<1x64xf32>
    %52 = tpu.matmul %47, %51, %cst_37 {dimension_numbers = #tpu.dot_dimension_numbers<[1], [0], [0], [1], [0, 0, 1, 1], [], []>} : vector<1x8xf32>, vector<8x64xf32>, vector<1x64xf32> -> vector<1x64xf32>
    %c0_38 = arith.constant 0 : index
    %c0_39 = arith.constant 0 : index
    %53 = vector.load %arg3[%c0_38, %c0_39] : memref<8x64xf32, #tpu.memory_space<vmem>>, vector<8x64xf32>
    %cst_40 = arith.constant dense<0.000000e+00> : vector<1x64xf32>
    %54 = tpu.matmul %50, %53, %cst_40 {dimension_numbers = #tpu.dot_dimension_numbers<[1], [0], [0], [1], [0, 0, 1, 1], [], []>} : vector<1x8xf32>, vector<8x64xf32>, vector<1x64xf32> -> vector<1x64xf32>
    %55 = vector.shape_cast %52 : vector<1x64xf32> to vector<1x1x64xf32>
    %56 = vector.broadcast %55 : vector<1x1x64xf32> to vector<2x8x64xf32>
    %57 = arith.mulf %21, %56 : vector<2x8x64xf32>
    %58 = vector.shape_cast %54 : vector<1x64xf32> to vector<1x1x64xf32>
    %59 = vector.broadcast %58 : vector<1x1x64xf32> to vector<2x8x64xf32>
    %60 = arith.addf %57, %59 : vector<2x8x64xf32>
    %cst_41 = arith.constant 0.000000e+00 : f32
    %61 = vector.broadcast %cst_41 : f32 to vector<2x8x64xf32>
    %62 = arith.maximumf %60, %61 : vector<2x8x64xf32>
    %63 = arith.truncf %62 : vector<2x8x64xf32> to vector<2x8x64xbf16>
    %c0_42 = arith.constant 0 : index
    %c0_43 = arith.constant 0 : index
    %c0_44 = arith.constant 0 : index
    %64 = vector.load %arg6[%c0_42, %c0_43, %c0_44] : memref<2x8x64xbf16, #tpu.memory_space<vmem>>, vector<2x8x64xbf16>
    tpu.vector_store %arg6[%c0_42, %c0_43, %c0_44], %63 {strides = array<i32>} : memref<2x8x64xbf16, #tpu.memory_space<vmem>>, vector<2x8x64xbf16>,
    return
  }
}

module attributes {stable_mosaic.version = 11 : i64} {
  func.func @_conv_bn_relu_kernel(%arg0: memref<2x10x80xbf16, #tpu.memory_space<vmem>>, %arg1: memref<3x80x64xbf16, #tpu.memory_space<vmem>>, %arg2: memref<64x8xf32, #tpu.memory_space<vmem>>, %arg3: memref<8x64xf32, #tpu.memory_space<vmem>>, %arg4: memref<1x8xf32, #tpu.memory_space<vmem>>, %arg5: memref<1x8xf32, #tpu.memory_space<vmem>>, %arg6: memref<2x8x64xbf16, #tpu.memory_space<vmem>>) attributes {dimension_semantics = [], scalar_prefetch = 0 : i64, scratch_operands = 0 : i64, tpu.core_type = #tpu.core_type<tc>} {
    %cst = arith.constant 0.000000e+00 : f32
    %0 = vector.broadcast %cst : f32 to vector<2x8x64xf32>
    %c0 = arith.constant 0 : index
    %c0_0 = arith.constant 0 : index
    %c0_1 = arith.constant 0 : index
    %1 = vector.load %arg0[%c0, %c0_0, %c0_1] : memref<2x10x80xbf16, #tpu.memory_space<vmem>>, vector<2x8x80xbf16>
    %c0_2 = arith.constant 0 : index
    %c0_3 = arith.constant 0 : index
    %c0_4 = arith.constant 0 : index
    %2 = vector.load %arg1[%c0_2, %c0_3, %c0_4] : memref<3x80x64xbf16, #tpu.memory_space<vmem>>, vector<1x80x64xbf16>
    %3 = vector.shape_cast %2 : vector<1x80x64xbf16> to vector<80x64xbf16>
    %4 = vector.shape_cast %3 : vector<80x64xbf16> to vector<1x80x64xbf16>
    %5 = vector.broadcast %4 : vector<1x80x64xbf16> to vector<2x80x64xbf16>
    "tpu.trace_start"() <{level = 10 : i32, message = "bqk,bkd->bqd"}> : () -> ()
    %cst_5 = arith.constant dense<0.000000e+00> : vector<2x8x64xf32>
    %6 = tpu.matmul %1, %5, %cst_5 {dimension_numbers = #tpu.dot_dimension_numbers<[2], [1], [1], [2], [0, 0, 0, 1, 1, 2], [0], [0]>} : vector<2x8x80xbf16>, vector<2x80x64xbf16>, vector<2x8x64xf32> -> vector<2x8x64xf32>
    "tpu.trace_stop"() : () -> ()
    %7 = arith.addf %0, %6 : vector<2x8x64xf32>
    %c0_6 = arith.constant 0 : index
    %c1 = arith.constant 1 : index
    %c0_7 = arith.constant 0 : index
    %8 = vector.load %arg0[%c0_6, %c1, %c0_7] : memref<2x10x80xbf16, #tpu.memory_space<vmem>>, vector<2x8x80xbf16>
    %c1_8 = arith.constant 1 : index
    %c0_9 = arith.constant 0 : index
    %c0_10 = arith.constant 0 : index
    %9 = vector.load %arg1[%c1_8, %c0_9, %c0_10] : memref<3x80x64xbf16, #tpu.memory_space<vmem>>, vector<1x80x64xbf16>
    %10 = vector.shape_cast %9 : vector<1x80x64xbf16> to vector<80x64xbf16>
    %11 = vector.shape_cast %10 : vector<80x64xbf16> to vector<1x80x64xbf16>
    %12 = vector.broadcast %11 : vector<1x80x64xbf16> to vector<2x80x64xbf16>
    "tpu.trace_start"() <{level = 10 : i32, message = "bqk,bkd->bqd"}> : () -> ()
    %cst_11 = arith.constant dense<0.000000e+00> : vector<2x8x64xf32>
    %13 = tpu.matmul %8, %12, %cst_11 {dimension_numbers = #tpu.dot_dimension_numbers<[2], [1], [1], [2], [0, 0, 0, 1, 1, 2], [0], [0]>} : vector<2x8x80xbf16>, vector<2x80x64xbf16>, vector<2x8x64xf32> -> vector<2x8x64xf32>
    "tpu.trace_stop"() : () -> ()
    %14 = arith.addf %7, %13 : vector<2x8x64xf32>
    %c0_12 = arith.constant 0 : index
    %c2 = arith.constant 2 : index
    %c0_13 = arith.constant 0 : index
    %15 = vector.load %arg0[%c0_12, %c2, %c0_13] : memref<2x10x80xbf16, #tpu.memory_space<vmem>>, vector<2x8x80xbf16>
    %c2_14 = arith.constant 2 : index
    %c0_15 = arith.constant 0 : index
    %c0_16 = arith.constant 0 : index
    %16 = vector.load %arg1[%c2_14, %c0_15, %c0_16] : memref<3x80x64xbf16, #tpu.memory_space<vmem>>, vector<1x80x64xbf16>
    %17 = vector.shape_cast %16 : vector<1x80x64xbf16> to vector<80x64xbf16>
    %18 = vector.shape_cast %17 : vector<80x64xbf16> to vector<1x80x64xbf16>
    %19 = vector.broadcast %18 : vector<1x80x64xbf16> to vector<2x80x64xbf16>
    "tpu.trace_start"() <{level = 10 : i32, message = "bqk,bkd->bqd"}> : () -> ()
    %cst_17 = arith.constant dense<0.000000e+00> : vector<2x8x64xf32>
    %20 = tpu.matmul %15, %19, %cst_17 {dimension_numbers = #tpu.dot_dimension_numbers<[2], [1], [1], [2], [0, 0, 0, 1, 1, 2], [0], [0]>} : vector<2x8x80xbf16>, vector<2x80x64xbf16>, vector<2x8x64xf32> -> vector<2x8x64xf32>
    "tpu.trace_stop"() : () -> ()
    %21 = arith.addf %14, %20 : vector<2x8x64xf32>
    %cst_18 = arith.constant dense<0.000000e+00> : vector<8x64xf32>
    %22 = vector.multi_reduction <add>, %21, %cst_18 [0] : vector<2x8x64xf32> to vector<8x64xf32>
    %23 = vector.shape_cast %22 : vector<8x64xf32> to vector<1x8x64xf32>
    %cst_19 = arith.constant dense<0.000000e+00> : vector<1x64xf32>
    %24 = vector.multi_reduction <add>, %23, %cst_19 [1] : vector<1x8x64xf32> to vector<1x64xf32>
    %25 = vector.shape_cast %24 : vector<1x64xf32> to vector<1x1x64xf32>
    %26 = arith.mulf %21, %21 : vector<2x8x64xf32>
    %cst_20 = arith.constant dense<0.000000e+00> : vector<8x64xf32>
    %27 = vector.multi_reduction <add>, %26, %cst_20 [0] : vector<2x8x64xf32> to vector<8x64xf32>
    %28 = vector.shape_cast %27 : vector<8x64xf32> to vector<1x8x64xf32>
    %cst_21 = arith.constant dense<0.000000e+00> : vector<1x64xf32>
    %29 = vector.multi_reduction <add>, %28, %cst_21 [1] : vector<1x8x64xf32> to vector<1x64xf32>
    %30 = vector.shape_cast %29 : vector<1x64xf32> to vector<1x1x64xf32>
    %31 = vector.shape_cast %25 : vector<1x1x64xf32> to vector<1x64xf32>
    %c0_22 = arith.constant 0 : index
    %c0_23 = arith.constant 0 : index
    %32 = vector.load %arg2[%c0_22, %c0_23] : memref<64x8xf32, #tpu.memory_space<vmem>>, vector<64x8xf32>
    %cst_24 = arith.constant dense<0.000000e+00> : vector<1x8xf32>
    %33 = tpu.matmul %31, %32, %cst_24 {dimension_numbers = #tpu.dot_dimension_numbers<[1], [0], [0], [1], [0, 0, 1, 1], [], []>} : vector<1x64xf32>, vector<64x8xf32>, vector<1x8xf32> -> vector<1x8xf32>
    %34 = vector.shape_cast %30 : vector<1x1x64xf32> to vector<1x64xf32>
    %c0_25 = arith.constant 0 : index
    %c0_26 = arith.constant 0 : index
    %35 = vector.load %arg2[%c0_25, %c0_26] : memref<64x8xf32, #tpu.memory_space<vmem>>, vector<64x8xf32>
    %cst_27 = arith.constant dense<0.000000e+00> : vector<1x8xf32>
    %36 = tpu.matmul %34, %35, %cst_27 {dimension_numbers = #tpu.dot_dimension_numbers<[1], [0], [0], [1], [0, 0, 1, 1], [], []>} : vector<1x64xf32>, vector<64x8xf32>, vector<1x8xf32> -> vector<1x8xf32>
    %cst_28 = arith.constant 1.280000e+02 : f32
    %37 = vector.broadcast %cst_28 : f32 to vector<1x8xf32>
    %38 = arith.divf %33, %37 : vector<1x8xf32>
    %cst_29 = arith.constant 1.280000e+02 : f32
    %39 = vector.broadcast %cst_29 : f32 to vector<1x8xf32>
    %40 = arith.divf %36, %39 : vector<1x8xf32>
    %41 = arith.mulf %38, %38 : vector<1x8xf32>
    %42 = arith.subf %40, %41 : vector<1x8xf32>
    %c0_30 = arith.constant 0 : index
    %c0_31 = arith.constant 0 : index
    %43 = vector.load %arg4[%c0_30, %c0_31] : memref<1x8xf32, #tpu.memory_space<vmem>>, vector<1x8xf32>
    %cst_32 = arith.constant 9.99999974E-6 : f32
    %44 = vector.broadcast %cst_32 : f32 to vector<1x8xf32>
    %45 = arith.addf %42, %44 : vector<1x8xf32>
    %46 = math.rsqrt %45 : vector<1x8xf32>
    %47 = arith.mulf %43, %46 : vector<1x8xf32>
    %c0_33 = arith.constant 0 : index
    %c0_34 = arith.constant 0 : index
    %48 = vector.load %arg5[%c0_33, %c0_34] : memref<1x8xf32, #tpu.memory_space<vmem>>, vector<1x8xf32>
    %49 = arith.mulf %38, %47 : vector<1x8xf32>
    %50 = arith.subf %48, %49 : vector<1x8xf32>
    %c0_35 = arith.constant 0 : index
    %c0_36 = arith.constant 0 : index
    %51 = vector.load %arg3[%c0_35, %c0_36] : memref<8x64xf32, #tpu.memory_space<vmem>>, vector<8x64xf32>
    %cst_37 = arith.constant dense<0.000000e+00> : vector<1x64xf32>
    %52 = tpu.matmul %47, %51, %cst_37 {dimension_numbers = #tpu.dot_dimension_numbers<[1], [0], [0], [1], [0, 0, 1, 1], [], []>} : vector<1x8xf32>, vector<8x64xf32>, vector<1x64xf32> -> vector<1x64xf32>
    %c0_38 = arith.constant 0 : index
    %c0_39 = arith.constant 0 : index
    %53 = vector.load %arg3[%c0_38, %c0_39] : memref<8x64xf32, #tpu.memory_space<vmem>>, vector<8x64xf32>
    %cst_40 = arith.constant dense<0.000000e+00> : vector<1x64xf32>
    %54 = tpu.matmul %50, %53, %cst_40 {dimension_numbers = #tpu.dot_dimension_numbers<[1], [0], [0], [1], [0, 0, 1, 1], [], []>} : vector<1x8xf32>, vector<8x64xf32>, vector<1x64xf32> -> vector<1x64xf32>
    %55 = vector.shape_cast %52 : vector<1x64xf32> to vector<1x1x64xf32>
    %56 = vector.broadcast %55 : vector<1x1x64xf32> to vector<2x8x64xf32>
    %57 = arith.mulf %21, %56 : vector<2x8x64xf32>
    %58 = vector.shape_cast %54 : vector<1x64xf32> to vector<1x1x64xf32>
    %59 = vector.broadcast %58 : vector<1x1x64xf32> to vector<2x8x64xf32>
    %60 = arith.addf %57, %59 : vector<2x8x64xf32>
    %cst_41 = arith.constant 0.000000e+00 : f32
    %61 = vector.broadcast %cst_41 : f32 to vector<2x8x64xf32>
    %62 = arith.maximumf %60, %61 : vector<2x8x64xf32>
    %63 = arith.truncf %62 : vector<2x8x64xf32> to vector<2x8x64xbf16>
    %c0_42 = arith.constant 0 : index
    %c0_43 = arith.constant 0 : index
    %c0_44 = arith.constant 0 : index
    %64 = vector.load %arg6[%c0_42, %c0_43, %c0_44] : memref<2x8x64xbf16, #tpu.memory_space<vmem>>, vector<2x8x64xbf16>
    tpu.vector_store %arg6[%c0_42, %c0_43, %c0_44], %63 {strides = array<i32>} : memref<2x8x64xbf16, #tpu.memory_space<vmem>>, vector<2x8x64xbf16>,
    return
  }
}

module attributes {stable_mosaic.version = 11 : i64} {
  func.func @_max4_kernel(%arg0: memref<32x8xbf16, #tpu.memory_space<vmem>>, %arg1: memref<32x8xbf16, #tpu.memory_space<vmem>>, %arg2: memref<32x8xbf16, #tpu.memory_space<vmem>>, %arg3: memref<32x8xbf16, #tpu.memory_space<vmem>>, %arg4: memref<32x8xbf16, #tpu.memory_space<vmem>>) attributes {dimension_semantics = [], scalar_prefetch = 0 : i64, scratch_operands = 0 : i64, tpu.core_type = #tpu.core_type<tc>} {
    %c0 = arith.constant 0 : index
    %c0_0 = arith.constant 0 : index
    %0 = vector.load %arg0[%c0, %c0_0] : memref<32x8xbf16, #tpu.memory_space<vmem>>, vector<32x8xbf16>
    %c0_1 = arith.constant 0 : index
    %c0_2 = arith.constant 0 : index
    %1 = vector.load %arg1[%c0_1, %c0_2] : memref<32x8xbf16, #tpu.memory_space<vmem>>, vector<32x8xbf16>
    %2 = arith.maximumf %0, %1 : vector<32x8xbf16>
    %c0_3 = arith.constant 0 : index
    %c0_4 = arith.constant 0 : index
    %3 = vector.load %arg2[%c0_3, %c0_4] : memref<32x8xbf16, #tpu.memory_space<vmem>>, vector<32x8xbf16>
    %c0_5 = arith.constant 0 : index
    %c0_6 = arith.constant 0 : index
    %4 = vector.load %arg3[%c0_5, %c0_6] : memref<32x8xbf16, #tpu.memory_space<vmem>>, vector<32x8xbf16>
    %5 = arith.maximumf %3, %4 : vector<32x8xbf16>
    %6 = arith.maximumf %2, %5 : vector<32x8xbf16>
    %c0_7 = arith.constant 0 : index
    %c0_8 = arith.constant 0 : index
    %7 = vector.load %arg4[%c0_7, %c0_8] : memref<32x8xbf16, #tpu.memory_space<vmem>>, vector<32x8xbf16>
    tpu.vector_store %arg4[%c0_7, %c0_8], %6 {strides = array<i32>} : memref<32x8xbf16, #tpu.memory_space<vmem>>, vector<32x8xbf16>,
    return
  }
}

module attributes {stable_mosaic.version = 11 : i64} {
  func.func @_conv_bn_relu_kernel(%arg0: memref<2x6x48xbf16, #tpu.memory_space<vmem>>, %arg1: memref<3x48x64xbf16, #tpu.memory_space<vmem>>, %arg2: memref<64x16xf32, #tpu.memory_space<vmem>>, %arg3: memref<16x64xf32, #tpu.memory_space<vmem>>, %arg4: memref<1x16xf32, #tpu.memory_space<vmem>>, %arg5: memref<1x16xf32, #tpu.memory_space<vmem>>, %arg6: memref<2x4x64xbf16, #tpu.memory_space<vmem>>) attributes {dimension_semantics = [], scalar_prefetch = 0 : i64, scratch_operands = 0 : i64, tpu.core_type = #tpu.core_type<tc>} {
    %cst = arith.constant 0.000000e+00 : f32
    %0 = vector.broadcast %cst : f32 to vector<2x4x64xf32>
    %c0 = arith.constant 0 : index
    %c0_0 = arith.constant 0 : index
    %c0_1 = arith.constant 0 : index
    %1 = vector.load %arg0[%c0, %c0_0, %c0_1] : memref<2x6x48xbf16, #tpu.memory_space<vmem>>, vector<2x4x48xbf16>
    %c0_2 = arith.constant 0 : index
    %c0_3 = arith.constant 0 : index
    %c0_4 = arith.constant 0 : index
    %2 = vector.load %arg1[%c0_2, %c0_3, %c0_4] : memref<3x48x64xbf16, #tpu.memory_space<vmem>>, vector<1x48x64xbf16>
    %3 = vector.shape_cast %2 : vector<1x48x64xbf16> to vector<48x64xbf16>
    %4 = vector.shape_cast %3 : vector<48x64xbf16> to vector<1x48x64xbf16>
    %5 = vector.broadcast %4 : vector<1x48x64xbf16> to vector<2x48x64xbf16>
    "tpu.trace_start"() <{level = 10 : i32, message = "bqk,bkd->bqd"}> : () -> ()
    %cst_5 = arith.constant dense<0.000000e+00> : vector<2x4x64xf32>
    %6 = tpu.matmul %1, %5, %cst_5 {dimension_numbers = #tpu.dot_dimension_numbers<[2], [1], [1], [2], [0, 0, 0, 1, 1, 2], [0], [0]>} : vector<2x4x48xbf16>, vector<2x48x64xbf16>, vector<2x4x64xf32> -> vector<2x4x64xf32>
    "tpu.trace_stop"() : () -> ()
    %7 = arith.addf %0, %6 : vector<2x4x64xf32>
    %c0_6 = arith.constant 0 : index
    %c1 = arith.constant 1 : index
    %c0_7 = arith.constant 0 : index
    %8 = vector.load %arg0[%c0_6, %c1, %c0_7] : memref<2x6x48xbf16, #tpu.memory_space<vmem>>, vector<2x4x48xbf16>
    %c1_8 = arith.constant 1 : index
    %c0_9 = arith.constant 0 : index
    %c0_10 = arith.constant 0 : index
    %9 = vector.load %arg1[%c1_8, %c0_9, %c0_10] : memref<3x48x64xbf16, #tpu.memory_space<vmem>>, vector<1x48x64xbf16>
    %10 = vector.shape_cast %9 : vector<1x48x64xbf16> to vector<48x64xbf16>
    %11 = vector.shape_cast %10 : vector<48x64xbf16> to vector<1x48x64xbf16>
    %12 = vector.broadcast %11 : vector<1x48x64xbf16> to vector<2x48x64xbf16>
    "tpu.trace_start"() <{level = 10 : i32, message = "bqk,bkd->bqd"}> : () -> ()
    %cst_11 = arith.constant dense<0.000000e+00> : vector<2x4x64xf32>
    %13 = tpu.matmul %8, %12, %cst_11 {dimension_numbers = #tpu.dot_dimension_numbers<[2], [1], [1], [2], [0, 0, 0, 1, 1, 2], [0], [0]>} : vector<2x4x48xbf16>, vector<2x48x64xbf16>, vector<2x4x64xf32> -> vector<2x4x64xf32>
    "tpu.trace_stop"() : () -> ()
    %14 = arith.addf %7, %13 : vector<2x4x64xf32>
    %c0_12 = arith.constant 0 : index
    %c2 = arith.constant 2 : index
    %c0_13 = arith.constant 0 : index
    %15 = vector.load %arg0[%c0_12, %c2, %c0_13] : memref<2x6x48xbf16, #tpu.memory_space<vmem>>, vector<2x4x48xbf16>
    %c2_14 = arith.constant 2 : index
    %c0_15 = arith.constant 0 : index
    %c0_16 = arith.constant 0 : index
    %16 = vector.load %arg1[%c2_14, %c0_15, %c0_16] : memref<3x48x64xbf16, #tpu.memory_space<vmem>>, vector<1x48x64xbf16>
    %17 = vector.shape_cast %16 : vector<1x48x64xbf16> to vector<48x64xbf16>
    %18 = vector.shape_cast %17 : vector<48x64xbf16> to vector<1x48x64xbf16>
    %19 = vector.broadcast %18 : vector<1x48x64xbf16> to vector<2x48x64xbf16>
    "tpu.trace_start"() <{level = 10 : i32, message = "bqk,bkd->bqd"}> : () -> ()
    %cst_17 = arith.constant dense<0.000000e+00> : vector<2x4x64xf32>
    %20 = tpu.matmul %15, %19, %cst_17 {dimension_numbers = #tpu.dot_dimension_numbers<[2], [1], [1], [2], [0, 0, 0, 1, 1, 2], [0], [0]>} : vector<2x4x48xbf16>, vector<2x48x64xbf16>, vector<2x4x64xf32> -> vector<2x4x64xf32>
    "tpu.trace_stop"() : () -> ()
    %21 = arith.addf %14, %20 : vector<2x4x64xf32>
    %cst_18 = arith.constant dense<0.000000e+00> : vector<4x64xf32>
    %22 = vector.multi_reduction <add>, %21, %cst_18 [0] : vector<2x4x64xf32> to vector<4x64xf32>
    %23 = vector.shape_cast %22 : vector<4x64xf32> to vector<1x4x64xf32>
    %cst_19 = arith.constant dense<0.000000e+00> : vector<1x64xf32>
    %24 = vector.multi_reduction <add>, %23, %cst_19 [1] : vector<1x4x64xf32> to vector<1x64xf32>
    %25 = vector.shape_cast %24 : vector<1x64xf32> to vector<1x1x64xf32>
    %26 = arith.mulf %21, %21 : vector<2x4x64xf32>
    %cst_20 = arith.constant dense<0.000000e+00> : vector<4x64xf32>
    %27 = vector.multi_reduction <add>, %26, %cst_20 [0] : vector<2x4x64xf32> to vector<4x64xf32>
    %28 = vector.shape_cast %27 : vector<4x64xf32> to vector<1x4x64xf32>
    %cst_21 = arith.constant dense<0.000000e+00> : vector<1x64xf32>
    %29 = vector.multi_reduction <add>, %28, %cst_21 [1] : vector<1x4x64xf32> to vector<1x64xf32>
    %30 = vector.shape_cast %29 : vector<1x64xf32> to vector<1x1x64xf32>
    %31 = vector.shape_cast %25 : vector<1x1x64xf32> to vector<1x64xf32>
    %c0_22 = arith.constant 0 : index
    %c0_23 = arith.constant 0 : index
    %32 = vector.load %arg2[%c0_22, %c0_23] : memref<64x16xf32, #tpu.memory_space<vmem>>, vector<64x16xf32>
    %cst_24 = arith.constant dense<0.000000e+00> : vector<1x16xf32>
    %33 = tpu.matmul %31, %32, %cst_24 {dimension_numbers = #tpu.dot_dimension_numbers<[1], [0], [0], [1], [0, 0, 1, 1], [], []>} : vector<1x64xf32>, vector<64x16xf32>, vector<1x16xf32> -> vector<1x16xf32>
    %34 = vector.shape_cast %30 : vector<1x1x64xf32> to vector<1x64xf32>
    %c0_25 = arith.constant 0 : index
    %c0_26 = arith.constant 0 : index
    %35 = vector.load %arg2[%c0_25, %c0_26] : memref<64x16xf32, #tpu.memory_space<vmem>>, vector<64x16xf32>
    %cst_27 = arith.constant dense<0.000000e+00> : vector<1x16xf32>
    %36 = tpu.matmul %34, %35, %cst_27 {dimension_numbers = #tpu.dot_dimension_numbers<[1], [0], [0], [1], [0, 0, 1, 1], [], []>} : vector<1x64xf32>, vector<64x16xf32>, vector<1x16xf32> -> vector<1x16xf32>
    %cst_28 = arith.constant 3.200000e+01 : f32
    %37 = vector.broadcast %cst_28 : f32 to vector<1x16xf32>
    %38 = arith.divf %33, %37 : vector<1x16xf32>
    %cst_29 = arith.constant 3.200000e+01 : f32
    %39 = vector.broadcast %cst_29 : f32 to vector<1x16xf32>
    %40 = arith.divf %36, %39 : vector<1x16xf32>
    %41 = arith.mulf %38, %38 : vector<1x16xf32>
    %42 = arith.subf %40, %41 : vector<1x16xf32>
    %c0_30 = arith.constant 0 : index
    %c0_31 = arith.constant 0 : index
    %43 = vector.load %arg4[%c0_30, %c0_31] : memref<1x16xf32, #tpu.memory_space<vmem>>, vector<1x16xf32>
    %cst_32 = arith.constant 9.99999974E-6 : f32
    %44 = vector.broadcast %cst_32 : f32 to vector<1x16xf32>
    %45 = arith.addf %42, %44 : vector<1x16xf32>
    %46 = math.rsqrt %45 : vector<1x16xf32>
    %47 = arith.mulf %43, %46 : vector<1x16xf32>
    %c0_33 = arith.constant 0 : index
    %c0_34 = arith.constant 0 : index
    %48 = vector.load %arg5[%c0_33, %c0_34] : memref<1x16xf32, #tpu.memory_space<vmem>>, vector<1x16xf32>
    %49 = arith.mulf %38, %47 : vector<1x16xf32>
    %50 = arith.subf %48, %49 : vector<1x16xf32>
    %c0_35 = arith.constant 0 : index
    %c0_36 = arith.constant 0 : index
    %51 = vector.load %arg3[%c0_35, %c0_36] : memref<16x64xf32, #tpu.memory_space<vmem>>, vector<16x64xf32>
    %cst_37 = arith.constant dense<0.000000e+00> : vector<1x64xf32>
    %52 = tpu.matmul %47, %51, %cst_37 {dimension_numbers = #tpu.dot_dimension_numbers<[1], [0], [0], [1], [0, 0, 1, 1], [], []>} : vector<1x16xf32>, vector<16x64xf32>, vector<1x64xf32> -> vector<1x64xf32>
    %c0_38 = arith.constant 0 : index
    %c0_39 = arith.constant 0 : index
    %53 = vector.load %arg3[%c0_38, %c0_39] : memref<16x64xf32, #tpu.memory_space<vmem>>, vector<16x64xf32>
    %cst_40 = arith.constant dense<0.000000e+00> : vector<1x64xf32>
    %54 = tpu.matmul %50, %53, %cst_40 {dimension_numbers = #tpu.dot_dimension_numbers<[1], [0], [0], [1], [0, 0, 1, 1], [], []>} : vector<1x16xf32>, vector<16x64xf32>, vector<1x64xf32> -> vector<1x64xf32>
    %55 = vector.shape_cast %52 : vector<1x64xf32> to vector<1x1x64xf32>
    %56 = vector.broadcast %55 : vector<1x1x64xf32> to vector<2x4x64xf32>
    %57 = arith.mulf %21, %56 : vector<2x4x64xf32>
    %58 = vector.shape_cast %54 : vector<1x64xf32> to vector<1x1x64xf32>
    %59 = vector.broadcast %58 : vector<1x1x64xf32> to vector<2x4x64xf32>
    %60 = arith.addf %57, %59 : vector<2x4x64xf32>
    %cst_41 = arith.constant 0.000000e+00 : f32
    %61 = vector.broadcast %cst_41 : f32 to vector<2x4x64xf32>
    %62 = arith.maximumf %60, %61 : vector<2x4x64xf32>
    %63 = arith.truncf %62 : vector<2x4x64xf32> to vector<2x4x64xbf16>
    %c0_42 = arith.constant 0 : index
    %c0_43 = arith.constant 0 : index
    %c0_44 = arith.constant 0 : index
    %64 = vector.load %arg6[%c0_42, %c0_43, %c0_44] : memref<2x4x64xbf16, #tpu.memory_space<vmem>>, vector<2x4x64xbf16>
    tpu.vector_store %arg6[%c0_42, %c0_43, %c0_44], %63 {strides = array<i32>} : memref<2x4x64xbf16, #tpu.memory_space<vmem>>, vector<2x4x64xbf16>,
    return
  }
}

module attributes {stable_mosaic.version = 11 : i64} {
  func.func @_conv_bn_relu_kernel(%arg0: memref<2x6x96xbf16, #tpu.memory_space<vmem>>, %arg1: memref<3x96x64xbf16, #tpu.memory_space<vmem>>, %arg2: memref<64x16xf32, #tpu.memory_space<vmem>>, %arg3: memref<16x64xf32, #tpu.memory_space<vmem>>, %arg4: memref<1x16xf32, #tpu.memory_space<vmem>>, %arg5: memref<1x16xf32, #tpu.memory_space<vmem>>, %arg6: memref<2x4x64xbf16, #tpu.memory_space<vmem>>) attributes {dimension_semantics = [], scalar_prefetch = 0 : i64, scratch_operands = 0 : i64, tpu.core_type = #tpu.core_type<tc>} {
    %cst = arith.constant 0.000000e+00 : f32
    %0 = vector.broadcast %cst : f32 to vector<2x4x64xf32>
    %c0 = arith.constant 0 : index
    %c0_0 = arith.constant 0 : index
    %c0_1 = arith.constant 0 : index
    %1 = vector.load %arg0[%c0, %c0_0, %c0_1] : memref<2x6x96xbf16, #tpu.memory_space<vmem>>, vector<2x4x96xbf16>
    %c0_2 = arith.constant 0 : index
    %c0_3 = arith.constant 0 : index
    %c0_4 = arith.constant 0 : index
    %2 = vector.load %arg1[%c0_2, %c0_3, %c0_4] : memref<3x96x64xbf16, #tpu.memory_space<vmem>>, vector<1x96x64xbf16>
    %3 = vector.shape_cast %2 : vector<1x96x64xbf16> to vector<96x64xbf16>
    %4 = vector.shape_cast %3 : vector<96x64xbf16> to vector<1x96x64xbf16>
    %5 = vector.broadcast %4 : vector<1x96x64xbf16> to vector<2x96x64xbf16>
    "tpu.trace_start"() <{level = 10 : i32, message = "bqk,bkd->bqd"}> : () -> ()
    %cst_5 = arith.constant dense<0.000000e+00> : vector<2x4x64xf32>
    %6 = tpu.matmul %1, %5, %cst_5 {dimension_numbers = #tpu.dot_dimension_numbers<[2], [1], [1], [2], [0, 0, 0, 1, 1, 2], [0], [0]>} : vector<2x4x96xbf16>, vector<2x96x64xbf16>, vector<2x4x64xf32> -> vector<2x4x64xf32>
    "tpu.trace_stop"() : () -> ()
    %7 = arith.addf %0, %6 : vector<2x4x64xf32>
    %c0_6 = arith.constant 0 : index
    %c1 = arith.constant 1 : index
    %c0_7 = arith.constant 0 : index
    %8 = vector.load %arg0[%c0_6, %c1, %c0_7] : memref<2x6x96xbf16, #tpu.memory_space<vmem>>, vector<2x4x96xbf16>
    %c1_8 = arith.constant 1 : index
    %c0_9 = arith.constant 0 : index
    %c0_10 = arith.constant 0 : index
    %9 = vector.load %arg1[%c1_8, %c0_9, %c0_10] : memref<3x96x64xbf16, #tpu.memory_space<vmem>>, vector<1x96x64xbf16>
    %10 = vector.shape_cast %9 : vector<1x96x64xbf16> to vector<96x64xbf16>
    %11 = vector.shape_cast %10 : vector<96x64xbf16> to vector<1x96x64xbf16>
    %12 = vector.broadcast %11 : vector<1x96x64xbf16> to vector<2x96x64xbf16>
    "tpu.trace_start"() <{level = 10 : i32, message = "bqk,bkd->bqd"}> : () -> ()
    %cst_11 = arith.constant dense<0.000000e+00> : vector<2x4x64xf32>
    %13 = tpu.matmul %8, %12, %cst_11 {dimension_numbers = #tpu.dot_dimension_numbers<[2], [1], [1], [2], [0, 0, 0, 1, 1, 2], [0], [0]>} : vector<2x4x96xbf16>, vector<2x96x64xbf16>, vector<2x4x64xf32> -> vector<2x4x64xf32>
    "tpu.trace_stop"() : () -> ()
    %14 = arith.addf %7, %13 : vector<2x4x64xf32>
    %c0_12 = arith.constant 0 : index
    %c2 = arith.constant 2 : index
    %c0_13 = arith.constant 0 : index
    %15 = vector.load %arg0[%c0_12, %c2, %c0_13] : memref<2x6x96xbf16, #tpu.memory_space<vmem>>, vector<2x4x96xbf16>
    %c2_14 = arith.constant 2 : index
    %c0_15 = arith.constant 0 : index
    %c0_16 = arith.constant 0 : index
    %16 = vector.load %arg1[%c2_14, %c0_15, %c0_16] : memref<3x96x64xbf16, #tpu.memory_space<vmem>>, vector<1x96x64xbf16>
    %17 = vector.shape_cast %16 : vector<1x96x64xbf16> to vector<96x64xbf16>
    %18 = vector.shape_cast %17 : vector<96x64xbf16> to vector<1x96x64xbf16>
    %19 = vector.broadcast %18 : vector<1x96x64xbf16> to vector<2x96x64xbf16>
    "tpu.trace_start"() <{level = 10 : i32, message = "bqk,bkd->bqd"}> : () -> ()
    %cst_17 = arith.constant dense<0.000000e+00> : vector<2x4x64xf32>
    %20 = tpu.matmul %15, %19, %cst_17 {dimension_numbers = #tpu.dot_dimension_numbers<[2], [1], [1], [2], [0, 0, 0, 1, 1, 2], [0], [0]>} : vector<2x4x96xbf16>, vector<2x96x64xbf16>, vector<2x4x64xf32> -> vector<2x4x64xf32>
    "tpu.trace_stop"() : () -> ()
    %21 = arith.addf %14, %20 : vector<2x4x64xf32>
    %cst_18 = arith.constant dense<0.000000e+00> : vector<4x64xf32>
    %22 = vector.multi_reduction <add>, %21, %cst_18 [0] : vector<2x4x64xf32> to vector<4x64xf32>
    %23 = vector.shape_cast %22 : vector<4x64xf32> to vector<1x4x64xf32>
    %cst_19 = arith.constant dense<0.000000e+00> : vector<1x64xf32>
    %24 = vector.multi_reduction <add>, %23, %cst_19 [1] : vector<1x4x64xf32> to vector<1x64xf32>
    %25 = vector.shape_cast %24 : vector<1x64xf32> to vector<1x1x64xf32>
    %26 = arith.mulf %21, %21 : vector<2x4x64xf32>
    %cst_20 = arith.constant dense<0.000000e+00> : vector<4x64xf32>
    %27 = vector.multi_reduction <add>, %26, %cst_20 [0] : vector<2x4x64xf32> to vector<4x64xf32>
    %28 = vector.shape_cast %27 : vector<4x64xf32> to vector<1x4x64xf32>
    %cst_21 = arith.constant dense<0.000000e+00> : vector<1x64xf32>
    %29 = vector.multi_reduction <add>, %28, %cst_21 [1] : vector<1x4x64xf32> to vector<1x64xf32>
    %30 = vector.shape_cast %29 : vector<1x64xf32> to vector<1x1x64xf32>
    %31 = vector.shape_cast %25 : vector<1x1x64xf32> to vector<1x64xf32>
    %c0_22 = arith.constant 0 : index
    %c0_23 = arith.constant 0 : index
    %32 = vector.load %arg2[%c0_22, %c0_23] : memref<64x16xf32, #tpu.memory_space<vmem>>, vector<64x16xf32>
    %cst_24 = arith.constant dense<0.000000e+00> : vector<1x16xf32>
    %33 = tpu.matmul %31, %32, %cst_24 {dimension_numbers = #tpu.dot_dimension_numbers<[1], [0], [0], [1], [0, 0, 1, 1], [], []>} : vector<1x64xf32>, vector<64x16xf32>, vector<1x16xf32> -> vector<1x16xf32>
    %34 = vector.shape_cast %30 : vector<1x1x64xf32> to vector<1x64xf32>
    %c0_25 = arith.constant 0 : index
    %c0_26 = arith.constant 0 : index
    %35 = vector.load %arg2[%c0_25, %c0_26] : memref<64x16xf32, #tpu.memory_space<vmem>>, vector<64x16xf32>
    %cst_27 = arith.constant dense<0.000000e+00> : vector<1x16xf32>
    %36 = tpu.matmul %34, %35, %cst_27 {dimension_numbers = #tpu.dot_dimension_numbers<[1], [0], [0], [1], [0, 0, 1, 1], [], []>} : vector<1x64xf32>, vector<64x16xf32>, vector<1x16xf32> -> vector<1x16xf32>
    %cst_28 = arith.constant 3.200000e+01 : f32
    %37 = vector.broadcast %cst_28 : f32 to vector<1x16xf32>
    %38 = arith.divf %33, %37 : vector<1x16xf32>
    %cst_29 = arith.constant 3.200000e+01 : f32
    %39 = vector.broadcast %cst_29 : f32 to vector<1x16xf32>
    %40 = arith.divf %36, %39 : vector<1x16xf32>
    %41 = arith.mulf %38, %38 : vector<1x16xf32>
    %42 = arith.subf %40, %41 : vector<1x16xf32>
    %c0_30 = arith.constant 0 : index
    %c0_31 = arith.constant 0 : index
    %43 = vector.load %arg4[%c0_30, %c0_31] : memref<1x16xf32, #tpu.memory_space<vmem>>, vector<1x16xf32>
    %cst_32 = arith.constant 9.99999974E-6 : f32
    %44 = vector.broadcast %cst_32 : f32 to vector<1x16xf32>
    %45 = arith.addf %42, %44 : vector<1x16xf32>
    %46 = math.rsqrt %45 : vector<1x16xf32>
    %47 = arith.mulf %43, %46 : vector<1x16xf32>
    %c0_33 = arith.constant 0 : index
    %c0_34 = arith.constant 0 : index
    %48 = vector.load %arg5[%c0_33, %c0_34] : memref<1x16xf32, #tpu.memory_space<vmem>>, vector<1x16xf32>
    %49 = arith.mulf %38, %47 : vector<1x16xf32>
    %50 = arith.subf %48, %49 : vector<1x16xf32>
    %c0_35 = arith.constant 0 : index
    %c0_36 = arith.constant 0 : index
    %51 = vector.load %arg3[%c0_35, %c0_36] : memref<16x64xf32, #tpu.memory_space<vmem>>, vector<16x64xf32>
    %cst_37 = arith.constant dense<0.000000e+00> : vector<1x64xf32>
    %52 = tpu.matmul %47, %51, %cst_37 {dimension_numbers = #tpu.dot_dimension_numbers<[1], [0], [0], [1], [0, 0, 1, 1], [], []>} : vector<1x16xf32>, vector<16x64xf32>, vector<1x64xf32> -> vector<1x64xf32>
    %c0_38 = arith.constant 0 : index
    %c0_39 = arith.constant 0 : index
    %53 = vector.load %arg3[%c0_38, %c0_39] : memref<16x64xf32, #tpu.memory_space<vmem>>, vector<16x64xf32>
    %cst_40 = arith.constant dense<0.000000e+00> : vector<1x64xf32>
    %54 = tpu.matmul %50, %53, %cst_40 {dimension_numbers = #tpu.dot_dimension_numbers<[1], [0], [0], [1], [0, 0, 1, 1], [], []>} : vector<1x16xf32>, vector<16x64xf32>, vector<1x64xf32> -> vector<1x64xf32>
    %55 = vector.shape_cast %52 : vector<1x64xf32> to vector<1x1x64xf32>
    %56 = vector.broadcast %55 : vector<1x1x64xf32> to vector<2x4x64xf32>
    %57 = arith.mulf %21, %56 : vector<2x4x64xf32>
    %58 = vector.shape_cast %54 : vector<1x64xf32> to vector<1x1x64xf32>
    %59 = vector.broadcast %58 : vector<1x1x64xf32> to vector<2x4x64xf32>
    %60 = arith.addf %57, %59 : vector<2x4x64xf32>
    %cst_41 = arith.constant 0.000000e+00 : f32
    %61 = vector.broadcast %cst_41 : f32 to vector<2x4x64xf32>
    %62 = arith.maximumf %60, %61 : vector<2x4x64xf32>
    %63 = arith.truncf %62 : vector<2x4x64xf32> to vector<2x4x64xbf16>
    %c0_42 = arith.constant 0 : index
    %c0_43 = arith.constant 0 : index
    %c0_44 = arith.constant 0 : index
    %64 = vector.load %arg6[%c0_42, %c0_43, %c0_44] : memref<2x4x64xbf16, #tpu.memory_space<vmem>>, vector<2x4x64xbf16>
    tpu.vector_store %arg6[%c0_42, %c0_43, %c0_44], %63 {strides = array<i32>} : memref<2x4x64xbf16, #tpu.memory_space<vmem>>, vector<2x4x64xbf16>,
    return
  }
}

module attributes {stable_mosaic.version = 11 : i64} {
  func.func @_max4_kernel(%arg0: memref<8x16xbf16, #tpu.memory_space<vmem>>, %arg1: memref<8x16xbf16, #tpu.memory_space<vmem>>, %arg2: memref<8x16xbf16, #tpu.memory_space<vmem>>, %arg3: memref<8x16xbf16, #tpu.memory_space<vmem>>, %arg4: memref<8x16xbf16, #tpu.memory_space<vmem>>) attributes {dimension_semantics = [], scalar_prefetch = 0 : i64, scratch_operands = 0 : i64, tpu.core_type = #tpu.core_type<tc>} {
    %c0 = arith.constant 0 : index
    %c0_0 = arith.constant 0 : index
    %0 = vector.load %arg0[%c0, %c0_0] : memref<8x16xbf16, #tpu.memory_space<vmem>>, vector<8x16xbf16>
    %c0_1 = arith.constant 0 : index
    %c0_2 = arith.constant 0 : index
    %1 = vector.load %arg1[%c0_1, %c0_2] : memref<8x16xbf16, #tpu.memory_space<vmem>>, vector<8x16xbf16>
    %2 = arith.maximumf %0, %1 : vector<8x16xbf16>
    %c0_3 = arith.constant 0 : index
    %c0_4 = arith.constant 0 : index
    %3 = vector.load %arg2[%c0_3, %c0_4] : memref<8x16xbf16, #tpu.memory_space<vmem>>, vector<8x16xbf16>
    %c0_5 = arith.constant 0 : index
    %c0_6 = arith.constant 0 : index
    %4 = vector.load %arg3[%c0_5, %c0_6] : memref<8x16xbf16, #tpu.memory_space<vmem>>, vector<8x16xbf16>
    %5 = arith.maximumf %3, %4 : vector<8x16xbf16>
    %6 = arith.maximumf %2, %5 : vector<8x16xbf16>
    %c0_7 = arith.constant 0 : index
    %c0_8 = arith.constant 0 : index
    %7 = vector.load %arg4[%c0_7, %c0_8] : memref<8x16xbf16, #tpu.memory_space<vmem>>, vector<8x16xbf16>
    tpu.vector_store %arg4[%c0_7, %c0_8], %6 {strides = array<i32>} : memref<8x16xbf16, #tpu.memory_space<vmem>>, vector<8x16xbf16>,
    return
  }
}

module attributes {stable_mosaic.version = 11 : i64} {
  func.func @_conv_bn_relu_kernel(%arg0: memref<2x4x64xbf16, #tpu.memory_space<vmem>>, %arg1: memref<3x64x64xbf16, #tpu.memory_space<vmem>>, %arg2: memref<64x32xf32, #tpu.memory_space<vmem>>, %arg3: memref<32x64xf32, #tpu.memory_space<vmem>>, %arg4: memref<1x32xf32, #tpu.memory_space<vmem>>, %arg5: memref<1x32xf32, #tpu.memory_space<vmem>>, %arg6: memref<2x2x64xbf16, #tpu.memory_space<vmem>>) attributes {dimension_semantics = [], scalar_prefetch = 0 : i64, scratch_operands = 0 : i64, tpu.core_type = #tpu.core_type<tc>} {
    %cst = arith.constant 0.000000e+00 : f32
    %0 = vector.broadcast %cst : f32 to vector<2x2x64xf32>
    %c0 = arith.constant 0 : index
    %c0_0 = arith.constant 0 : index
    %c0_1 = arith.constant 0 : index
    %1 = vector.load %arg0[%c0, %c0_0, %c0_1] : memref<2x4x64xbf16, #tpu.memory_space<vmem>>, vector<2x2x64xbf16>
    %c0_2 = arith.constant 0 : index
    %c0_3 = arith.constant 0 : index
    %c0_4 = arith.constant 0 : index
    %2 = vector.load %arg1[%c0_2, %c0_3, %c0_4] : memref<3x64x64xbf16, #tpu.memory_space<vmem>>, vector<1x64x64xbf16>
    %3 = vector.shape_cast %2 : vector<1x64x64xbf16> to vector<64x64xbf16>
    %4 = vector.shape_cast %3 : vector<64x64xbf16> to vector<1x64x64xbf16>
    %5 = vector.broadcast %4 : vector<1x64x64xbf16> to vector<2x64x64xbf16>
    "tpu.trace_start"() <{level = 10 : i32, message = "bqk,bkd->bqd"}> : () -> ()
    %cst_5 = arith.constant dense<0.000000e+00> : vector<2x2x64xf32>
    %6 = tpu.matmul %1, %5, %cst_5 {dimension_numbers = #tpu.dot_dimension_numbers<[2], [1], [1], [2], [0, 0, 0, 1, 1, 2], [0], [0]>} : vector<2x2x64xbf16>, vector<2x64x64xbf16>, vector<2x2x64xf32> -> vector<2x2x64xf32>
    "tpu.trace_stop"() : () -> ()
    %7 = arith.addf %0, %6 : vector<2x2x64xf32>
    %c0_6 = arith.constant 0 : index
    %c1 = arith.constant 1 : index
    %c0_7 = arith.constant 0 : index
    %8 = vector.load %arg0[%c0_6, %c1, %c0_7] : memref<2x4x64xbf16, #tpu.memory_space<vmem>>, vector<2x2x64xbf16>
    %c1_8 = arith.constant 1 : index
    %c0_9 = arith.constant 0 : index
    %c0_10 = arith.constant 0 : index
    %9 = vector.load %arg1[%c1_8, %c0_9, %c0_10] : memref<3x64x64xbf16, #tpu.memory_space<vmem>>, vector<1x64x64xbf16>
    %10 = vector.shape_cast %9 : vector<1x64x64xbf16> to vector<64x64xbf16>
    %11 = vector.shape_cast %10 : vector<64x64xbf16> to vector<1x64x64xbf16>
    %12 = vector.broadcast %11 : vector<1x64x64xbf16> to vector<2x64x64xbf16>
    "tpu.trace_start"() <{level = 10 : i32, message = "bqk,bkd->bqd"}> : () -> ()
    %cst_11 = arith.constant dense<0.000000e+00> : vector<2x2x64xf32>
    %13 = tpu.matmul %8, %12, %cst_11 {dimension_numbers = #tpu.dot_dimension_numbers<[2], [1], [1], [2], [0, 0, 0, 1, 1, 2], [0], [0]>} : vector<2x2x64xbf16>, vector<2x64x64xbf16>, vector<2x2x64xf32> -> vector<2x2x64xf32>
    "tpu.trace_stop"() : () -> ()
    %14 = arith.addf %7, %13 : vector<2x2x64xf32>
    %c0_12 = arith.constant 0 : index
    %c2 = arith.constant 2 : index
    %c0_13 = arith.constant 0 : index
    %15 = vector.load %arg0[%c0_12, %c2, %c0_13] : memref<2x4x64xbf16, #tpu.memory_space<vmem>>, vector<2x2x64xbf16>
    %c2_14 = arith.constant 2 : index
    %c0_15 = arith.constant 0 : index
    %c0_16 = arith.constant 0 : index
    %16 = vector.load %arg1[%c2_14, %c0_15, %c0_16] : memref<3x64x64xbf16, #tpu.memory_space<vmem>>, vector<1x64x64xbf16>
    %17 = vector.shape_cast %16 : vector<1x64x64xbf16> to vector<64x64xbf16>
    %18 = vector.shape_cast %17 : vector<64x64xbf16> to vector<1x64x64xbf16>
    %19 = vector.broadcast %18 : vector<1x64x64xbf16> to vector<2x64x64xbf16>
    "tpu.trace_start"() <{level = 10 : i32, message = "bqk,bkd->bqd"}> : () -> ()
    %cst_17 = arith.constant dense<0.000000e+00> : vector<2x2x64xf32>
    %20 = tpu.matmul %15, %19, %cst_17 {dimension_numbers = #tpu.dot_dimension_numbers<[2], [1], [1], [2], [0, 0, 0, 1, 1, 2], [0], [0]>} : vector<2x2x64xbf16>, vector<2x64x64xbf16>, vector<2x2x64xf32> -> vector<2x2x64xf32>
    "tpu.trace_stop"() : () -> ()
    %21 = arith.addf %14, %20 : vector<2x2x64xf32>
    %cst_18 = arith.constant dense<0.000000e+00> : vector<2x64xf32>
    %22 = vector.multi_reduction <add>, %21, %cst_18 [0] : vector<2x2x64xf32> to vector<2x64xf32>
    %23 = vector.shape_cast %22 : vector<2x64xf32> to vector<1x2x64xf32>
    %cst_19 = arith.constant dense<0.000000e+00> : vector<1x64xf32>
    %24 = vector.multi_reduction <add>, %23, %cst_19 [1] : vector<1x2x64xf32> to vector<1x64xf32>
    %25 = vector.shape_cast %24 : vector<1x64xf32> to vector<1x1x64xf32>
    %26 = arith.mulf %21, %21 : vector<2x2x64xf32>
    %cst_20 = arith.constant dense<0.000000e+00> : vector<2x64xf32>
    %27 = vector.multi_reduction <add>, %26, %cst_20 [0] : vector<2x2x64xf32> to vector<2x64xf32>
    %28 = vector.shape_cast %27 : vector<2x64xf32> to vector<1x2x64xf32>
    %cst_21 = arith.constant dense<0.000000e+00> : vector<1x64xf32>
    %29 = vector.multi_reduction <add>, %28, %cst_21 [1] : vector<1x2x64xf32> to vector<1x64xf32>
    %30 = vector.shape_cast %29 : vector<1x64xf32> to vector<1x1x64xf32>
    %31 = vector.shape_cast %25 : vector<1x1x64xf32> to vector<1x64xf32>
    %c0_22 = arith.constant 0 : index
    %c0_23 = arith.constant 0 : index
    %32 = vector.load %arg2[%c0_22, %c0_23] : memref<64x32xf32, #tpu.memory_space<vmem>>, vector<64x32xf32>
    %cst_24 = arith.constant dense<0.000000e+00> : vector<1x32xf32>
    %33 = tpu.matmul %31, %32, %cst_24 {dimension_numbers = #tpu.dot_dimension_numbers<[1], [0], [0], [1], [0, 0, 1, 1], [], []>} : vector<1x64xf32>, vector<64x32xf32>, vector<1x32xf32> -> vector<1x32xf32>
    %34 = vector.shape_cast %30 : vector<1x1x64xf32> to vector<1x64xf32>
    %c0_25 = arith.constant 0 : index
    %c0_26 = arith.constant 0 : index
    %35 = vector.load %arg2[%c0_25, %c0_26] : memref<64x32xf32, #tpu.memory_space<vmem>>, vector<64x32xf32>
    %cst_27 = arith.constant dense<0.000000e+00> : vector<1x32xf32>
    %36 = tpu.matmul %34, %35, %cst_27 {dimension_numbers = #tpu.dot_dimension_numbers<[1], [0], [0], [1], [0, 0, 1, 1], [], []>} : vector<1x64xf32>, vector<64x32xf32>, vector<1x32xf32> -> vector<1x32xf32>
    %cst_28 = arith.constant 8.000000e+00 : f32
    %37 = vector.broadcast %cst_28 : f32 to vector<1x32xf32>
    %38 = arith.divf %33, %37 : vector<1x32xf32>
    %cst_29 = arith.constant 8.000000e+00 : f32
    %39 = vector.broadcast %cst_29 : f32 to vector<1x32xf32>
    %40 = arith.divf %36, %39 : vector<1x32xf32>
    %41 = arith.mulf %38, %38 : vector<1x32xf32>
    %42 = arith.subf %40, %41 : vector<1x32xf32>
    %c0_30 = arith.constant 0 : index
    %c0_31 = arith.constant 0 : index
    %43 = vector.load %arg4[%c0_30, %c0_31] : memref<1x32xf32, #tpu.memory_space<vmem>>, vector<1x32xf32>
    %cst_32 = arith.constant 9.99999974E-6 : f32
    %44 = vector.broadcast %cst_32 : f32 to vector<1x32xf32>
    %45 = arith.addf %42, %44 : vector<1x32xf32>
    %46 = math.rsqrt %45 : vector<1x32xf32>
    %47 = arith.mulf %43, %46 : vector<1x32xf32>
    %c0_33 = arith.constant 0 : index
    %c0_34 = arith.constant 0 : index
    %48 = vector.load %arg5[%c0_33, %c0_34] : memref<1x32xf32, #tpu.memory_space<vmem>>, vector<1x32xf32>
    %49 = arith.mulf %38, %47 : vector<1x32xf32>
    %50 = arith.subf %48, %49 : vector<1x32xf32>
    %c0_35 = arith.constant 0 : index
    %c0_36 = arith.constant 0 : index
    %51 = vector.load %arg3[%c0_35, %c0_36] : memref<32x64xf32, #tpu.memory_space<vmem>>, vector<32x64xf32>
    %cst_37 = arith.constant dense<0.000000e+00> : vector<1x64xf32>
    %52 = tpu.matmul %47, %51, %cst_37 {dimension_numbers = #tpu.dot_dimension_numbers<[1], [0], [0], [1], [0, 0, 1, 1], [], []>} : vector<1x32xf32>, vector<32x64xf32>, vector<1x64xf32> -> vector<1x64xf32>
    %c0_38 = arith.constant 0 : index
    %c0_39 = arith.constant 0 : index
    %53 = vector.load %arg3[%c0_38, %c0_39] : memref<32x64xf32, #tpu.memory_space<vmem>>, vector<32x64xf32>
    %cst_40 = arith.constant dense<0.000000e+00> : vector<1x64xf32>
    %54 = tpu.matmul %50, %53, %cst_40 {dimension_numbers = #tpu.dot_dimension_numbers<[1], [0], [0], [1], [0, 0, 1, 1], [], []>} : vector<1x32xf32>, vector<32x64xf32>, vector<1x64xf32> -> vector<1x64xf32>
    %55 = vector.shape_cast %52 : vector<1x64xf32> to vector<1x1x64xf32>
    %56 = vector.broadcast %55 : vector<1x1x64xf32> to vector<2x2x64xf32>
    %57 = arith.mulf %21, %56 : vector<2x2x64xf32>
    %58 = vector.shape_cast %54 : vector<1x64xf32> to vector<1x1x64xf32>
    %59 = vector.broadcast %58 : vector<1x1x64xf32> to vector<2x2x64xf32>
    %60 = arith.addf %57, %59 : vector<2x2x64xf32>
    %cst_41 = arith.constant 0.000000e+00 : f32
    %61 = vector.broadcast %cst_41 : f32 to vector<2x2x64xf32>
    %62 = arith.maximumf %60, %61 : vector<2x2x64xf32>
    %63 = arith.truncf %62 : vector<2x2x64xf32> to vector<2x2x64xbf16>
    %c0_42 = arith.constant 0 : index
    %c0_43 = arith.constant 0 : index
    %c0_44 = arith.constant 0 : index
    %64 = vector.load %arg6[%c0_42, %c0_43, %c0_44] : memref<2x2x64xbf16, #tpu.memory_space<vmem>>, vector<2x2x64xbf16>
    tpu.vector_store %arg6[%c0_42, %c0_43, %c0_44], %63 {strides = array<i32>} : memref<2x2x64xbf16, #tpu.memory_space<vmem>>, vector<2x2x64xbf16>,
    return
  }
}

module attributes {stable_mosaic.version = 11 : i64} {
  func.func @_conv_bn_relu_kernel(%arg0: memref<2x4x128xbf16, #tpu.memory_space<vmem>>, %arg1: memref<3x128x64xbf16, #tpu.memory_space<vmem>>, %arg2: memref<64x32xf32, #tpu.memory_space<vmem>>, %arg3: memref<32x64xf32, #tpu.memory_space<vmem>>, %arg4: memref<1x32xf32, #tpu.memory_space<vmem>>, %arg5: memref<1x32xf32, #tpu.memory_space<vmem>>, %arg6: memref<2x2x64xbf16, #tpu.memory_space<vmem>>) attributes {dimension_semantics = [], scalar_prefetch = 0 : i64, scratch_operands = 0 : i64, tpu.core_type = #tpu.core_type<tc>} {
    %cst = arith.constant 0.000000e+00 : f32
    %0 = vector.broadcast %cst : f32 to vector<2x2x64xf32>
    %c0 = arith.constant 0 : index
    %c0_0 = arith.constant 0 : index
    %c0_1 = arith.constant 0 : index
    %1 = vector.load %arg0[%c0, %c0_0, %c0_1] : memref<2x4x128xbf16, #tpu.memory_space<vmem>>, vector<2x2x128xbf16>
    %c0_2 = arith.constant 0 : index
    %c0_3 = arith.constant 0 : index
    %c0_4 = arith.constant 0 : index
    %2 = vector.load %arg1[%c0_2, %c0_3, %c0_4] : memref<3x128x64xbf16, #tpu.memory_space<vmem>>, vector<1x128x64xbf16>
    %3 = vector.shape_cast %2 : vector<1x128x64xbf16> to vector<128x64xbf16>
    %4 = vector.shape_cast %3 : vector<128x64xbf16> to vector<1x128x64xbf16>
    %5 = vector.broadcast %4 : vector<1x128x64xbf16> to vector<2x128x64xbf16>
    "tpu.trace_start"() <{level = 10 : i32, message = "bqk,bkd->bqd"}> : () -> ()
    %cst_5 = arith.constant dense<0.000000e+00> : vector<2x2x64xf32>
    %6 = tpu.matmul %1, %5, %cst_5 {dimension_numbers = #tpu.dot_dimension_numbers<[2], [1], [1], [2], [0, 0, 0, 1, 1, 2], [0], [0]>} : vector<2x2x128xbf16>, vector<2x128x64xbf16>, vector<2x2x64xf32> -> vector<2x2x64xf32>
    "tpu.trace_stop"() : () -> ()
    %7 = arith.addf %0, %6 : vector<2x2x64xf32>
    %c0_6 = arith.constant 0 : index
    %c1 = arith.constant 1 : index
    %c0_7 = arith.constant 0 : index
    %8 = vector.load %arg0[%c0_6, %c1, %c0_7] : memref<2x4x128xbf16, #tpu.memory_space<vmem>>, vector<2x2x128xbf16>
    %c1_8 = arith.constant 1 : index
    %c0_9 = arith.constant 0 : index
    %c0_10 = arith.constant 0 : index
    %9 = vector.load %arg1[%c1_8, %c0_9, %c0_10] : memref<3x128x64xbf16, #tpu.memory_space<vmem>>, vector<1x128x64xbf16>
    %10 = vector.shape_cast %9 : vector<1x128x64xbf16> to vector<128x64xbf16>
    %11 = vector.shape_cast %10 : vector<128x64xbf16> to vector<1x128x64xbf16>
    %12 = vector.broadcast %11 : vector<1x128x64xbf16> to vector<2x128x64xbf16>
    "tpu.trace_start"() <{level = 10 : i32, message = "bqk,bkd->bqd"}> : () -> ()
    %cst_11 = arith.constant dense<0.000000e+00> : vector<2x2x64xf32>
    %13 = tpu.matmul %8, %12, %cst_11 {dimension_numbers = #tpu.dot_dimension_numbers<[2], [1], [1], [2], [0, 0, 0, 1, 1, 2], [0], [0]>} : vector<2x2x128xbf16>, vector<2x128x64xbf16>, vector<2x2x64xf32> -> vector<2x2x64xf32>
    "tpu.trace_stop"() : () -> ()
    %14 = arith.addf %7, %13 : vector<2x2x64xf32>
    %c0_12 = arith.constant 0 : index
    %c2 = arith.constant 2 : index
    %c0_13 = arith.constant 0 : index
    %15 = vector.load %arg0[%c0_12, %c2, %c0_13] : memref<2x4x128xbf16, #tpu.memory_space<vmem>>, vector<2x2x128xbf16>
    %c2_14 = arith.constant 2 : index
    %c0_15 = arith.constant 0 : index
    %c0_16 = arith.constant 0 : index
    %16 = vector.load %arg1[%c2_14, %c0_15, %c0_16] : memref<3x128x64xbf16, #tpu.memory_space<vmem>>, vector<1x128x64xbf16>
    %17 = vector.shape_cast %16 : vector<1x128x64xbf16> to vector<128x64xbf16>
    %18 = vector.shape_cast %17 : vector<128x64xbf16> to vector<1x128x64xbf16>
    %19 = vector.broadcast %18 : vector<1x128x64xbf16> to vector<2x128x64xbf16>
    "tpu.trace_start"() <{level = 10 : i32, message = "bqk,bkd->bqd"}> : () -> ()
    %cst_17 = arith.constant dense<0.000000e+00> : vector<2x2x64xf32>
    %20 = tpu.matmul %15, %19, %cst_17 {dimension_numbers = #tpu.dot_dimension_numbers<[2], [1], [1], [2], [0, 0, 0, 1, 1, 2], [0], [0]>} : vector<2x2x128xbf16>, vector<2x128x64xbf16>, vector<2x2x64xf32> -> vector<2x2x64xf32>
    "tpu.trace_stop"() : () -> ()
    %21 = arith.addf %14, %20 : vector<2x2x64xf32>
    %cst_18 = arith.constant dense<0.000000e+00> : vector<2x64xf32>
    %22 = vector.multi_reduction <add>, %21, %cst_18 [0] : vector<2x2x64xf32> to vector<2x64xf32>
    %23 = vector.shape_cast %22 : vector<2x64xf32> to vector<1x2x64xf32>
    %cst_19 = arith.constant dense<0.000000e+00> : vector<1x64xf32>
    %24 = vector.multi_reduction <add>, %23, %cst_19 [1] : vector<1x2x64xf32> to vector<1x64xf32>
    %25 = vector.shape_cast %24 : vector<1x64xf32> to vector<1x1x64xf32>
    %26 = arith.mulf %21, %21 : vector<2x2x64xf32>
    %cst_20 = arith.constant dense<0.000000e+00> : vector<2x64xf32>
    %27 = vector.multi_reduction <add>, %26, %cst_20 [0] : vector<2x2x64xf32> to vector<2x64xf32>
    %28 = vector.shape_cast %27 : vector<2x64xf32> to vector<1x2x64xf32>
    %cst_21 = arith.constant dense<0.000000e+00> : vector<1x64xf32>
    %29 = vector.multi_reduction <add>, %28, %cst_21 [1] : vector<1x2x64xf32> to vector<1x64xf32>
    %30 = vector.shape_cast %29 : vector<1x64xf32> to vector<1x1x64xf32>
    %31 = vector.shape_cast %25 : vector<1x1x64xf32> to vector<1x64xf32>
    %c0_22 = arith.constant 0 : index
    %c0_23 = arith.constant 0 : index
    %32 = vector.load %arg2[%c0_22, %c0_23] : memref<64x32xf32, #tpu.memory_space<vmem>>, vector<64x32xf32>
    %cst_24 = arith.constant dense<0.000000e+00> : vector<1x32xf32>
    %33 = tpu.matmul %31, %32, %cst_24 {dimension_numbers = #tpu.dot_dimension_numbers<[1], [0], [0], [1], [0, 0, 1, 1], [], []>} : vector<1x64xf32>, vector<64x32xf32>, vector<1x32xf32> -> vector<1x32xf32>
    %34 = vector.shape_cast %30 : vector<1x1x64xf32> to vector<1x64xf32>
    %c0_25 = arith.constant 0 : index
    %c0_26 = arith.constant 0 : index
    %35 = vector.load %arg2[%c0_25, %c0_26] : memref<64x32xf32, #tpu.memory_space<vmem>>, vector<64x32xf32>
    %cst_27 = arith.constant dense<0.000000e+00> : vector<1x32xf32>
    %36 = tpu.matmul %34, %35, %cst_27 {dimension_numbers = #tpu.dot_dimension_numbers<[1], [0], [0], [1], [0, 0, 1, 1], [], []>} : vector<1x64xf32>, vector<64x32xf32>, vector<1x32xf32> -> vector<1x32xf32>
    %cst_28 = arith.constant 8.000000e+00 : f32
    %37 = vector.broadcast %cst_28 : f32 to vector<1x32xf32>
    %38 = arith.divf %33, %37 : vector<1x32xf32>
    %cst_29 = arith.constant 8.000000e+00 : f32
    %39 = vector.broadcast %cst_29 : f32 to vector<1x32xf32>
    %40 = arith.divf %36, %39 : vector<1x32xf32>
    %41 = arith.mulf %38, %38 : vector<1x32xf32>
    %42 = arith.subf %40, %41 : vector<1x32xf32>
    %c0_30 = arith.constant 0 : index
    %c0_31 = arith.constant 0 : index
    %43 = vector.load %arg4[%c0_30, %c0_31] : memref<1x32xf32, #tpu.memory_space<vmem>>, vector<1x32xf32>
    %cst_32 = arith.constant 9.99999974E-6 : f32
    %44 = vector.broadcast %cst_32 : f32 to vector<1x32xf32>
    %45 = arith.addf %42, %44 : vector<1x32xf32>
    %46 = math.rsqrt %45 : vector<1x32xf32>
    %47 = arith.mulf %43, %46 : vector<1x32xf32>
    %c0_33 = arith.constant 0 : index
    %c0_34 = arith.constant 0 : index
    %48 = vector.load %arg5[%c0_33, %c0_34] : memref<1x32xf32, #tpu.memory_space<vmem>>, vector<1x32xf32>
    %49 = arith.mulf %38, %47 : vector<1x32xf32>
    %50 = arith.subf %48, %49 : vector<1x32xf32>
    %c0_35 = arith.constant 0 : index
    %c0_36 = arith.constant 0 : index
    %51 = vector.load %arg3[%c0_35, %c0_36] : memref<32x64xf32, #tpu.memory_space<vmem>>, vector<32x64xf32>
    %cst_37 = arith.constant dense<0.000000e+00> : vector<1x64xf32>
    %52 = tpu.matmul %47, %51, %cst_37 {dimension_numbers = #tpu.dot_dimension_numbers<[1], [0], [0], [1], [0, 0, 1, 1], [], []>} : vector<1x32xf32>, vector<32x64xf32>, vector<1x64xf32> -> vector<1x64xf32>
    %c0_38 = arith.constant 0 : index
    %c0_39 = arith.constant 0 : index
    %53 = vector.load %arg3[%c0_38, %c0_39] : memref<32x64xf32, #tpu.memory_space<vmem>>, vector<32x64xf32>
    %cst_40 = arith.constant dense<0.000000e+00> : vector<1x64xf32>
    %54 = tpu.matmul %50, %53, %cst_40 {dimension_numbers = #tpu.dot_dimension_numbers<[1], [0], [0], [1], [0, 0, 1, 1], [], []>} : vector<1x32xf32>, vector<32x64xf32>, vector<1x64xf32> -> vector<1x64xf32>
    %55 = vector.shape_cast %52 : vector<1x64xf32> to vector<1x1x64xf32>
    %56 = vector.broadcast %55 : vector<1x1x64xf32> to vector<2x2x64xf32>
    %57 = arith.mulf %21, %56 : vector<2x2x64xf32>
    %58 = vector.shape_cast %54 : vector<1x64xf32> to vector<1x1x64xf32>
    %59 = vector.broadcast %58 : vector<1x1x64xf32> to vector<2x2x64xf32>
    %60 = arith.addf %57, %59 : vector<2x2x64xf32>
    %cst_41 = arith.constant 0.000000e+00 : f32
    %61 = vector.broadcast %cst_41 : f32 to vector<2x2x64xf32>
    %62 = arith.maximumf %60, %61 : vector<2x2x64xf32>
    %63 = arith.truncf %62 : vector<2x2x64xf32> to vector<2x2x64xbf16>
    %c0_42 = arith.constant 0 : index
    %c0_43 = arith.constant 0 : index
    %c0_44 = arith.constant 0 : index
    %64 = vector.load %arg6[%c0_42, %c0_43, %c0_44] : memref<2x2x64xbf16, #tpu.memory_space<vmem>>, vector<2x2x64xbf16>
    tpu.vector_store %arg6[%c0_42, %c0_43, %c0_44], %63 {strides = array<i32>} : memref<2x2x64xbf16, #tpu.memory_space<vmem>>, vector<2x2x64xbf16>,
    return
  }
}

module attributes {stable_mosaic.version = 11 : i64} {
  func.func @_conv_bias_kernel(%arg0: memref<2x5x160xbf16, #tpu.memory_space<vmem>>, %arg1: memref<3x160x24xbf16, #tpu.memory_space<vmem>>, %arg2: memref<1x24xf32, #tpu.memory_space<vmem>>, %arg3: memref<2x3x24xbf16, #tpu.memory_space<vmem>>) attributes {dimension_semantics = [], scalar_prefetch = 0 : i64, scratch_operands = 0 : i64, tpu.core_type = #tpu.core_type<tc>} {
    %cst = arith.constant 0.000000e+00 : f32
    %0 = vector.broadcast %cst : f32 to vector<2x3x24xf32>
    %c0 = arith.constant 0 : index
    %c0_0 = arith.constant 0 : index
    %c0_1 = arith.constant 0 : index
    %1 = vector.load %arg0[%c0, %c0_0, %c0_1] : memref<2x5x160xbf16, #tpu.memory_space<vmem>>, vector<2x3x160xbf16>
    %c0_2 = arith.constant 0 : index
    %c0_3 = arith.constant 0 : index
    %c0_4 = arith.constant 0 : index
    %2 = vector.load %arg1[%c0_2, %c0_3, %c0_4] : memref<3x160x24xbf16, #tpu.memory_space<vmem>>, vector<1x160x24xbf16>
    %3 = vector.shape_cast %2 : vector<1x160x24xbf16> to vector<160x24xbf16>
    %4 = vector.shape_cast %3 : vector<160x24xbf16> to vector<1x160x24xbf16>
    %5 = vector.broadcast %4 : vector<1x160x24xbf16> to vector<2x160x24xbf16>
    "tpu.trace_start"() <{level = 10 : i32, message = "bqk,bkd->bqd"}> : () -> ()
    %cst_5 = arith.constant dense<0.000000e+00> : vector<2x3x24xf32>
    %6 = tpu.matmul %1, %5, %cst_5 {dimension_numbers = #tpu.dot_dimension_numbers<[2], [1], [1], [2], [0, 0, 0, 1, 1, 2], [0], [0]>} : vector<2x3x160xbf16>, vector<2x160x24xbf16>, vector<2x3x24xf32> -> vector<2x3x24xf32>
    "tpu.trace_stop"() : () -> ()
    %7 = arith.addf %0, %6 : vector<2x3x24xf32>
    %c0_6 = arith.constant 0 : index
    %c1 = arith.constant 1 : index
    %c0_7 = arith.constant 0 : index
    %8 = vector.load %arg0[%c0_6, %c1, %c0_7] : memref<2x5x160xbf16, #tpu.memory_space<vmem>>, vector<2x3x160xbf16>
    %c1_8 = arith.constant 1 : index
    %c0_9 = arith.constant 0 : index
    %c0_10 = arith.constant 0 : index
    %9 = vector.load %arg1[%c1_8, %c0_9, %c0_10] : memref<3x160x24xbf16, #tpu.memory_space<vmem>>, vector<1x160x24xbf16>
    %10 = vector.shape_cast %9 : vector<1x160x24xbf16> to vector<160x24xbf16>
    %11 = vector.shape_cast %10 : vector<160x24xbf16> to vector<1x160x24xbf16>
    %12 = vector.broadcast %11 : vector<1x160x24xbf16> to vector<2x160x24xbf16>
    "tpu.trace_start"() <{level = 10 : i32, message = "bqk,bkd->bqd"}> : () -> ()
    %cst_11 = arith.constant dense<0.000000e+00> : vector<2x3x24xf32>
    %13 = tpu.matmul %8, %12, %cst_11 {dimension_numbers = #tpu.dot_dimension_numbers<[2], [1], [1], [2], [0, 0, 0, 1, 1, 2], [0], [0]>} : vector<2x3x160xbf16>, vector<2x160x24xbf16>, vector<2x3x24xf32> -> vector<2x3x24xf32>
    "tpu.trace_stop"() : () -> ()
    %14 = arith.addf %7, %13 : vector<2x3x24xf32>
    %c0_12 = arith.constant 0 : index
    %c2 = arith.constant 2 : index
    %c0_13 = arith.constant 0 : index
    %15 = vector.load %arg0[%c0_12, %c2, %c0_13] : memref<2x5x160xbf16, #tpu.memory_space<vmem>>, vector<2x3x160xbf16>
    %c2_14 = arith.constant 2 : index
    %c0_15 = arith.constant 0 : index
    %c0_16 = arith.constant 0 : index
    %16 = vector.load %arg1[%c2_14, %c0_15, %c0_16] : memref<3x160x24xbf16, #tpu.memory_space<vmem>>, vector<1x160x24xbf16>
    %17 = vector.shape_cast %16 : vector<1x160x24xbf16> to vector<160x24xbf16>
    %18 = vector.shape_cast %17 : vector<160x24xbf16> to vector<1x160x24xbf16>
    %19 = vector.broadcast %18 : vector<1x160x24xbf16> to vector<2x160x24xbf16>
    "tpu.trace_start"() <{level = 10 : i32, message = "bqk,bkd->bqd"}> : () -> ()
    %cst_17 = arith.constant dense<0.000000e+00> : vector<2x3x24xf32>
    %20 = tpu.matmul %15, %19, %cst_17 {dimension_numbers = #tpu.dot_dimension_numbers<[2], [1], [1], [2], [0, 0, 0, 1, 1, 2], [0], [0]>} : vector<2x3x160xbf16>, vector<2x160x24xbf16>, vector<2x3x24xf32> -> vector<2x3x24xf32>
    "tpu.trace_stop"() : () -> ()
    %21 = arith.addf %14, %20 : vector<2x3x24xf32>
    %c0_18 = arith.constant 0 : index
    %c0_19 = arith.constant 0 : index
    %22 = vector.load %arg2[%c0_18, %c0_19] : memref<1x24xf32, #tpu.memory_space<vmem>>, vector<1x24xf32>
    %23 = vector.shape_cast %22 : vector<1x24xf32> to vector<1x1x24xf32>
    %24 = vector.broadcast %23 : vector<1x1x24xf32> to vector<2x3x24xf32>
    %25 = arith.addf %21, %24 : vector<2x3x24xf32>
    %26 = arith.truncf %25 : vector<2x3x24xf32> to vector<2x3x24xbf16>
    %c0_20 = arith.constant 0 : index
    %c0_21 = arith.constant 0 : index
    %c0_22 = arith.constant 0 : index
    %27 = vector.load %arg3[%c0_20, %c0_21, %c0_22] : memref<2x3x24xbf16, #tpu.memory_space<vmem>>, vector<2x3x24xbf16>
    tpu.vector_store %arg3[%c0_20, %c0_21, %c0_22], %26 {strides = array<i32>} : memref<2x3x24xbf16, #tpu.memory_space<vmem>>, vector<2x3x24xbf16>,
    return
  }
}

module attributes {stable_mosaic.version = 11 : i64} {
  func.func @_conv_bn_relu_kernel(%arg0: memref<2x5x40xbf16, #tpu.memory_space<vmem>>, %arg1: memref<3x40x24xbf16, #tpu.memory_space<vmem>>, %arg2: memref<24x8xf32, #tpu.memory_space<vmem>>, %arg3: memref<8x24xf32, #tpu.memory_space<vmem>>, %arg4: memref<1x8xf32, #tpu.memory_space<vmem>>, %arg5: memref<1x8xf32, #tpu.memory_space<vmem>>, %arg6: memref<2x3x24xbf16, #tpu.memory_space<vmem>>) attributes {dimension_semantics = [], scalar_prefetch = 0 : i64, scratch_operands = 0 : i64, tpu.core_type = #tpu.core_type<tc>} {
    %cst = arith.constant 0.000000e+00 : f32
    %0 = vector.broadcast %cst : f32 to vector<2x3x24xf32>
    %c0 = arith.constant 0 : index
    %c0_0 = arith.constant 0 : index
    %c0_1 = arith.constant 0 : index
    %1 = vector.load %arg0[%c0, %c0_0, %c0_1] : memref<2x5x40xbf16, #tpu.memory_space<vmem>>, vector<2x3x40xbf16>
    %c0_2 = arith.constant 0 : index
    %c0_3 = arith.constant 0 : index
    %c0_4 = arith.constant 0 : index
    %2 = vector.load %arg1[%c0_2, %c0_3, %c0_4] : memref<3x40x24xbf16, #tpu.memory_space<vmem>>, vector<1x40x24xbf16>
    %3 = vector.shape_cast %2 : vector<1x40x24xbf16> to vector<40x24xbf16>
    %4 = vector.shape_cast %3 : vector<40x24xbf16> to vector<1x40x24xbf16>
    %5 = vector.broadcast %4 : vector<1x40x24xbf16> to vector<2x40x24xbf16>
    "tpu.trace_start"() <{level = 10 : i32, message = "bqk,bkd->bqd"}> : () -> ()
    %cst_5 = arith.constant dense<0.000000e+00> : vector<2x3x24xf32>
    %6 = tpu.matmul %1, %5, %cst_5 {dimension_numbers = #tpu.dot_dimension_numbers<[2], [1], [1], [2], [0, 0, 0, 1, 1, 2], [0], [0]>} : vector<2x3x40xbf16>, vector<2x40x24xbf16>, vector<2x3x24xf32> -> vector<2x3x24xf32>
    "tpu.trace_stop"() : () -> ()
    %7 = arith.addf %0, %6 : vector<2x3x24xf32>
    %c0_6 = arith.constant 0 : index
    %c1 = arith.constant 1 : index
    %c0_7 = arith.constant 0 : index
    %8 = vector.load %arg0[%c0_6, %c1, %c0_7] : memref<2x5x40xbf16, #tpu.memory_space<vmem>>, vector<2x3x40xbf16>
    %c1_8 = arith.constant 1 : index
    %c0_9 = arith.constant 0 : index
    %c0_10 = arith.constant 0 : index
    %9 = vector.load %arg1[%c1_8, %c0_9, %c0_10] : memref<3x40x24xbf16, #tpu.memory_space<vmem>>, vector<1x40x24xbf16>
    %10 = vector.shape_cast %9 : vector<1x40x24xbf16> to vector<40x24xbf16>
    %11 = vector.shape_cast %10 : vector<40x24xbf16> to vector<1x40x24xbf16>
    %12 = vector.broadcast %11 : vector<1x40x24xbf16> to vector<2x40x24xbf16>
    "tpu.trace_start"() <{level = 10 : i32, message = "bqk,bkd->bqd"}> : () -> ()
    %cst_11 = arith.constant dense<0.000000e+00> : vector<2x3x24xf32>
    %13 = tpu.matmul %8, %12, %cst_11 {dimension_numbers = #tpu.dot_dimension_numbers<[2], [1], [1], [2], [0, 0, 0, 1, 1, 2], [0], [0]>} : vector<2x3x40xbf16>, vector<2x40x24xbf16>, vector<2x3x24xf32> -> vector<2x3x24xf32>
    "tpu.trace_stop"() : () -> ()
    %14 = arith.addf %7, %13 : vector<2x3x24xf32>
    %c0_12 = arith.constant 0 : index
    %c2 = arith.constant 2 : index
    %c0_13 = arith.constant 0 : index
    %15 = vector.load %arg0[%c0_12, %c2, %c0_13] : memref<2x5x40xbf16, #tpu.memory_space<vmem>>, vector<2x3x40xbf16>
    %c2_14 = arith.constant 2 : index
    %c0_15 = arith.constant 0 : index
    %c0_16 = arith.constant 0 : index
    %16 = vector.load %arg1[%c2_14, %c0_15, %c0_16] : memref<3x40x24xbf16, #tpu.memory_space<vmem>>, vector<1x40x24xbf16>
    %17 = vector.shape_cast %16 : vector<1x40x24xbf16> to vector<40x24xbf16>
    %18 = vector.shape_cast %17 : vector<40x24xbf16> to vector<1x40x24xbf16>
    %19 = vector.broadcast %18 : vector<1x40x24xbf16> to vector<2x40x24xbf16>
    "tpu.trace_start"() <{level = 10 : i32, message = "bqk,bkd->bqd"}> : () -> ()
    %cst_17 = arith.constant dense<0.000000e+00> : vector<2x3x24xf32>
    %20 = tpu.matmul %15, %19, %cst_17 {dimension_numbers = #tpu.dot_dimension_numbers<[2], [1], [1], [2], [0, 0, 0, 1, 1, 2], [0], [0]>} : vector<2x3x40xbf16>, vector<2x40x24xbf16>, vector<2x3x24xf32> -> vector<2x3x24xf32>
    "tpu.trace_stop"() : () -> ()
    %21 = arith.addf %14, %20 : vector<2x3x24xf32>
    %cst_18 = arith.constant dense<0.000000e+00> : vector<3x24xf32>
    %22 = vector.multi_reduction <add>, %21, %cst_18 [0] : vector<2x3x24xf32> to vector<3x24xf32>
    %23 = vector.shape_cast %22 : vector<3x24xf32> to vector<1x3x24xf32>
    %cst_19 = arith.constant dense<0.000000e+00> : vector<1x24xf32>
    %24 = vector.multi_reduction <add>, %23, %cst_19 [1] : vector<1x3x24xf32> to vector<1x24xf32>
    %25 = vector.shape_cast %24 : vector<1x24xf32> to vector<1x1x24xf32>
    %26 = arith.mulf %21, %21 : vector<2x3x24xf32>
    %cst_20 = arith.constant dense<0.000000e+00> : vector<3x24xf32>
    %27 = vector.multi_reduction <add>, %26, %cst_20 [0] : vector<2x3x24xf32> to vector<3x24xf32>
    %28 = vector.shape_cast %27 : vector<3x24xf32> to vector<1x3x24xf32>
    %cst_21 = arith.constant dense<0.000000e+00> : vector<1x24xf32>
    %29 = vector.multi_reduction <add>, %28, %cst_21 [1] : vector<1x3x24xf32> to vector<1x24xf32>
    %30 = vector.shape_cast %29 : vector<1x24xf32> to vector<1x1x24xf32>
    %31 = vector.shape_cast %25 : vector<1x1x24xf32> to vector<1x24xf32>
    %c0_22 = arith.constant 0 : index
    %c0_23 = arith.constant 0 : index
    %32 = vector.load %arg2[%c0_22, %c0_23] : memref<24x8xf32, #tpu.memory_space<vmem>>, vector<24x8xf32>
    %cst_24 = arith.constant dense<0.000000e+00> : vector<1x8xf32>
    %33 = tpu.matmul %31, %32, %cst_24 {dimension_numbers = #tpu.dot_dimension_numbers<[1], [0], [0], [1], [0, 0, 1, 1], [], []>} : vector<1x24xf32>, vector<24x8xf32>, vector<1x8xf32> -> vector<1x8xf32>
    %34 = vector.shape_cast %30 : vector<1x1x24xf32> to vector<1x24xf32>
    %c0_25 = arith.constant 0 : index
    %c0_26 = arith.constant 0 : index
    %35 = vector.load %arg2[%c0_25, %c0_26] : memref<24x8xf32, #tpu.memory_space<vmem>>, vector<24x8xf32>
    %cst_27 = arith.constant dense<0.000000e+00> : vector<1x8xf32>
    %36 = tpu.matmul %34, %35, %cst_27 {dimension_numbers = #tpu.dot_dimension_numbers<[1], [0], [0], [1], [0, 0, 1, 1], [], []>} : vector<1x24xf32>, vector<24x8xf32>, vector<1x8xf32> -> vector<1x8xf32>
    %cst_28 = arith.constant 1.800000e+01 : f32
    %37 = vector.broadcast %cst_28 : f32 to vector<1x8xf32>
    %38 = arith.divf %33, %37 : vector<1x8xf32>
    %cst_29 = arith.constant 1.800000e+01 : f32
    %39 = vector.broadcast %cst_29 : f32 to vector<1x8xf32>
    %40 = arith.divf %36, %39 : vector<1x8xf32>
    %41 = arith.mulf %38, %38 : vector<1x8xf32>
    %42 = arith.subf %40, %41 : vector<1x8xf32>
    %c0_30 = arith.constant 0 : index
    %c0_31 = arith.constant 0 : index
    %43 = vector.load %arg4[%c0_30, %c0_31] : memref<1x8xf32, #tpu.memory_space<vmem>>, vector<1x8xf32>
    %cst_32 = arith.constant 9.99999974E-6 : f32
    %44 = vector.broadcast %cst_32 : f32 to vector<1x8xf32>
    %45 = arith.addf %42, %44 : vector<1x8xf32>
    %46 = math.rsqrt %45 : vector<1x8xf32>
    %47 = arith.mulf %43, %46 : vector<1x8xf32>
    %c0_33 = arith.constant 0 : index
    %c0_34 = arith.constant 0 : index
    %48 = vector.load %arg5[%c0_33, %c0_34] : memref<1x8xf32, #tpu.memory_space<vmem>>, vector<1x8xf32>
    %49 = arith.mulf %38, %47 : vector<1x8xf32>
    %50 = arith.subf %48, %49 : vector<1x8xf32>
    %c0_35 = arith.constant 0 : index
    %c0_36 = arith.constant 0 : index
    %51 = vector.load %arg3[%c0_35, %c0_36] : memref<8x24xf32, #tpu.memory_space<vmem>>, vector<8x24xf32>
    %cst_37 = arith.constant dense<0.000000e+00> : vector<1x24xf32>
    %52 = tpu.matmul %47, %51, %cst_37 {dimension_numbers = #tpu.dot_dimension_numbers<[1], [0], [0], [1], [0, 0, 1, 1], [], []>} : vector<1x8xf32>, vector<8x24xf32>, vector<1x24xf32> -> vector<1x24xf32>
    %c0_38 = arith.constant 0 : index
    %c0_39 = arith.constant 0 : index
    %53 = vector.load %arg3[%c0_38, %c0_39] : memref<8x24xf32, #tpu.memory_space<vmem>>, vector<8x24xf32>
    %cst_40 = arith.constant dense<0.000000e+00> : vector<1x24xf32>
    %54 = tpu.matmul %50, %53, %cst_40 {dimension_numbers = #tpu.dot_dimension_numbers<[1], [0], [0], [1], [0, 0, 1, 1], [], []>} : vector<1x8xf32>, vector<8x24xf32>, vector<1x24xf32> -> vector<1x24xf32>
    %55 = vector.shape_cast %52 : vector<1x24xf32> to vector<1x1x24xf32>
    %56 = vector.broadcast %55 : vector<1x1x24xf32> to vector<2x3x24xf32>
    %57 = arith.mulf %21, %56 : vector<2x3x24xf32>
    %58 = vector.shape_cast %54 : vector<1x24xf32> to vector<1x1x24xf32>
    %59 = vector.broadcast %58 : vector<1x1x24xf32> to vector<2x3x24xf32>
    %60 = arith.addf %57, %59 : vector<2x3x24xf32>
    %cst_41 = arith.constant 0.000000e+00 : f32
    %61 = vector.broadcast %cst_41 : f32 to vector<2x3x24xf32>
    %62 = arith.maximumf %60, %61 : vector<2x3x24xf32>
    %63 = arith.truncf %62 : vector<2x3x24xf32> to vector<2x3x24xbf16>
    %c0_42 = arith.constant 0 : index
    %c0_43 = arith.constant 0 : index
    %c0_44 = arith.constant 0 : index
    %64 = vector.load %arg6[%c0_42, %c0_43, %c0_44] : memref<2x3x24xbf16, #tpu.memory_space<vmem>>, vector<2x3x24xbf16>
    tpu.vector_store %arg6[%c0_42, %c0_43, %c0_44], %63 {strides = array<i32>} : memref<2x3x24xbf16, #tpu.memory_space<vmem>>, vector<2x3x24xbf16>,
    return
  }
}

module attributes {stable_mosaic.version = 11 : i64} {
  func.func @_bmm_kernel(%arg0: memref<3x8xf32, #tpu.memory_space<vmem>>, %arg1: memref<2x8x64xbf16, #tpu.memory_space<vmem>>, %arg2: memref<2x3x64xf32, #tpu.memory_space<vmem>>) attributes {dimension_semantics = [], scalar_prefetch = 0 : i64, scratch_operands = 0 : i64, tpu.core_type = #tpu.core_type<tc>} {
    %c0 = arith.constant 0 : index
    %c0_0 = arith.constant 0 : index
    %0 = vector.load %arg0[%c0, %c0_0] : memref<3x8xf32, #tpu.memory_space<vmem>>, vector<3x8xf32>
    %1 = vector.shape_cast %0 : vector<3x8xf32> to vector<1x3x8xf32>
    %2 = vector.broadcast %1 : vector<1x3x8xf32> to vector<2x3x8xf32>
    %c0_1 = arith.constant 0 : index
    %c0_2 = arith.constant 0 : index
    %c0_3 = arith.constant 0 : index
    %3 = vector.load %arg1[%c0_1, %c0_2, %c0_3] : memref<2x8x64xbf16, #tpu.memory_space<vmem>>, vector<2x8x64xbf16>
    %4 = arith.extf %3 : vector<2x8x64xbf16> to vector<2x8x64xf32>
    "tpu.trace_start"() <{level = 10 : i32, message = "bjk,bkd->bjd"}> : () -> ()
    %cst = arith.constant dense<0.000000e+00> : vector<2x3x64xf32>
    %5 = tpu.matmul %2, %4, %cst {dimension_numbers = #tpu.dot_dimension_numbers<[2], [1], [1], [2], [0, 0, 0, 1, 1, 2], [0], [0]>} : vector<2x3x8xf32>, vector<2x8x64xf32>, vector<2x3x64xf32> -> vector<2x3x64xf32>
    "tpu.trace_stop"() : () -> ()
    %c0_4 = arith.constant 0 : index
    %c0_5 = arith.constant 0 : index
    %c0_6 = arith.constant 0 : index
    %6 = vector.load %arg2[%c0_4, %c0_5, %c0_6] : memref<2x3x64xf32, #tpu.memory_space<vmem>>, vector<2x3x64xf32>
    tpu.vector_store %arg2[%c0_4, %c0_5, %c0_6], %5 {strides = array<i32>} : memref<2x3x64xf32, #tpu.memory_space<vmem>>, vector<2x3x64xf32>,
    return
  }
}

module attributes {stable_mosaic.version = 11 : i64} {
  func.func @_bmm_kernel(%arg0: memref<3x8xf32, #tpu.memory_space<vmem>>, %arg1: memref<6x8x8xf32, #tpu.memory_space<vmem>>, %arg2: memref<6x3x8xbf16, #tpu.memory_space<vmem>>) attributes {dimension_semantics = [], scalar_prefetch = 0 : i64, scratch_operands = 0 : i64, tpu.core_type = #tpu.core_type<tc>} {
    %c0 = arith.constant 0 : index
    %c0_0 = arith.constant 0 : index
    %0 = vector.load %arg0[%c0, %c0_0] : memref<3x8xf32, #tpu.memory_space<vmem>>, vector<3x8xf32>
    %1 = vector.shape_cast %0 : vector<3x8xf32> to vector<1x3x8xf32>
    %2 = vector.broadcast %1 : vector<1x3x8xf32> to vector<6x3x8xf32>
    %c0_1 = arith.constant 0 : index
    %c0_2 = arith.constant 0 : index
    %c0_3 = arith.constant 0 : index
    %3 = vector.load %arg1[%c0_1, %c0_2, %c0_3] : memref<6x8x8xf32, #tpu.memory_space<vmem>>, vector<6x8x8xf32>
    "tpu.trace_start"() <{level = 10 : i32, message = "bjk,bkd->bjd"}> : () -> ()
    %cst = arith.constant dense<0.000000e+00> : vector<6x3x8xf32>
    %4 = tpu.matmul %2, %3, %cst {dimension_numbers = #tpu.dot_dimension_numbers<[2], [1], [1], [2], [0, 0, 0, 1, 1, 2], [0], [0]>} : vector<6x3x8xf32>, vector<6x8x8xf32>, vector<6x3x8xf32> -> vector<6x3x8xf32>
    "tpu.trace_stop"() : () -> ()
    %5 = arith.truncf %4 : vector<6x3x8xf32> to vector<6x3x8xbf16>
    %c0_4 = arith.constant 0 : index
    %c0_5 = arith.constant 0 : index
    %c0_6 = arith.constant 0 : index
    %6 = vector.load %arg2[%c0_4, %c0_5, %c0_6] : memref<6x3x8xbf16, #tpu.memory_space<vmem>>, vector<6x3x8xbf16>
    tpu.vector_store %arg2[%c0_4, %c0_5, %c0_6], %5 {strides = array<i32>} : memref<6x3x8xbf16, #tpu.memory_space<vmem>>, vector<6x3x8xbf16>,
    return
  }
}

module attributes {stable_mosaic.version = 11 : i64} {
  func.func @_conv_bias_kernel(%arg0: memref<2x7x112xbf16, #tpu.memory_space<vmem>>, %arg1: memref<3x112x20xbf16, #tpu.memory_space<vmem>>, %arg2: memref<1x20xf32, #tpu.memory_space<vmem>>, %arg3: memref<2x5x20xbf16, #tpu.memory_space<vmem>>) attributes {dimension_semantics = [], scalar_prefetch = 0 : i64, scratch_operands = 0 : i64, tpu.core_type = #tpu.core_type<tc>} {
    %cst = arith.constant 0.000000e+00 : f32
    %0 = vector.broadcast %cst : f32 to vector<2x5x20xf32>
    %c0 = arith.constant 0 : index
    %c0_0 = arith.constant 0 : index
    %c0_1 = arith.constant 0 : index
    %1 = vector.load %arg0[%c0, %c0_0, %c0_1] : memref<2x7x112xbf16, #tpu.memory_space<vmem>>, vector<2x5x112xbf16>
    %c0_2 = arith.constant 0 : index
    %c0_3 = arith.constant 0 : index
    %c0_4 = arith.constant 0 : index
    %2 = vector.load %arg1[%c0_2, %c0_3, %c0_4] : memref<3x112x20xbf16, #tpu.memory_space<vmem>>, vector<1x112x20xbf16>
    %3 = vector.shape_cast %2 : vector<1x112x20xbf16> to vector<112x20xbf16>
    %4 = vector.shape_cast %3 : vector<112x20xbf16> to vector<1x112x20xbf16>
    %5 = vector.broadcast %4 : vector<1x112x20xbf16> to vector<2x112x20xbf16>
    "tpu.trace_start"() <{level = 10 : i32, message = "bqk,bkd->bqd"}> : () -> ()
    %cst_5 = arith.constant dense<0.000000e+00> : vector<2x5x20xf32>
    %6 = tpu.matmul %1, %5, %cst_5 {dimension_numbers = #tpu.dot_dimension_numbers<[2], [1], [1], [2], [0, 0, 0, 1, 1, 2], [0], [0]>} : vector<2x5x112xbf16>, vector<2x112x20xbf16>, vector<2x5x20xf32> -> vector<2x5x20xf32>
    "tpu.trace_stop"() : () -> ()
    %7 = arith.addf %0, %6 : vector<2x5x20xf32>
    %c0_6 = arith.constant 0 : index
    %c1 = arith.constant 1 : index
    %c0_7 = arith.constant 0 : index
    %8 = vector.load %arg0[%c0_6, %c1, %c0_7] : memref<2x7x112xbf16, #tpu.memory_space<vmem>>, vector<2x5x112xbf16>
    %c1_8 = arith.constant 1 : index
    %c0_9 = arith.constant 0 : index
    %c0_10 = arith.constant 0 : index
    %9 = vector.load %arg1[%c1_8, %c0_9, %c0_10] : memref<3x112x20xbf16, #tpu.memory_space<vmem>>, vector<1x112x20xbf16>
    %10 = vector.shape_cast %9 : vector<1x112x20xbf16> to vector<112x20xbf16>
    %11 = vector.shape_cast %10 : vector<112x20xbf16> to vector<1x112x20xbf16>
    %12 = vector.broadcast %11 : vector<1x112x20xbf16> to vector<2x112x20xbf16>
    "tpu.trace_start"() <{level = 10 : i32, message = "bqk,bkd->bqd"}> : () -> ()
    %cst_11 = arith.constant dense<0.000000e+00> : vector<2x5x20xf32>
    %13 = tpu.matmul %8, %12, %cst_11 {dimension_numbers = #tpu.dot_dimension_numbers<[2], [1], [1], [2], [0, 0, 0, 1, 1, 2], [0], [0]>} : vector<2x5x112xbf16>, vector<2x112x20xbf16>, vector<2x5x20xf32> -> vector<2x5x20xf32>
    "tpu.trace_stop"() : () -> ()
    %14 = arith.addf %7, %13 : vector<2x5x20xf32>
    %c0_12 = arith.constant 0 : index
    %c2 = arith.constant 2 : index
    %c0_13 = arith.constant 0 : index
    %15 = vector.load %arg0[%c0_12, %c2, %c0_13] : memref<2x7x112xbf16, #tpu.memory_space<vmem>>, vector<2x5x112xbf16>
    %c2_14 = arith.constant 2 : index
    %c0_15 = arith.constant 0 : index
    %c0_16 = arith.constant 0 : index
    %16 = vector.load %arg1[%c2_14, %c0_15, %c0_16] : memref<3x112x20xbf16, #tpu.memory_space<vmem>>, vector<1x112x20xbf16>
    %17 = vector.shape_cast %16 : vector<1x112x20xbf16> to vector<112x20xbf16>
    %18 = vector.shape_cast %17 : vector<112x20xbf16> to vector<1x112x20xbf16>
    %19 = vector.broadcast %18 : vector<1x112x20xbf16> to vector<2x112x20xbf16>
    "tpu.trace_start"() <{level = 10 : i32, message = "bqk,bkd->bqd"}> : () -> ()
    %cst_17 = arith.constant dense<0.000000e+00> : vector<2x5x20xf32>
    %20 = tpu.matmul %15, %19, %cst_17 {dimension_numbers = #tpu.dot_dimension_numbers<[2], [1], [1], [2], [0, 0, 0, 1, 1, 2], [0], [0]>} : vector<2x5x112xbf16>, vector<2x112x20xbf16>, vector<2x5x20xf32> -> vector<2x5x20xf32>
    "tpu.trace_stop"() : () -> ()
    %21 = arith.addf %14, %20 : vector<2x5x20xf32>
    %c0_18 = arith.constant 0 : index
    %c0_19 = arith.constant 0 : index
    %22 = vector.load %arg2[%c0_18, %c0_19] : memref<1x20xf32, #tpu.memory_space<vmem>>, vector<1x20xf32>
    %23 = vector.shape_cast %22 : vector<1x20xf32> to vector<1x1x20xf32>
    %24 = vector.broadcast %23 : vector<1x1x20xf32> to vector<2x5x20xf32>
    %25 = arith.addf %21, %24 : vector<2x5x20xf32>
    %26 = arith.truncf %25 : vector<2x5x20xf32> to vector<2x5x20xbf16>
    %c0_20 = arith.constant 0 : index
    %c0_21 = arith.constant 0 : index
    %c0_22 = arith.constant 0 : index
    %27 = vector.load %arg3[%c0_20, %c0_21, %c0_22] : memref<2x5x20xbf16, #tpu.memory_space<vmem>>, vector<2x5x20xbf16>
    tpu.vector_store %arg3[%c0_20, %c0_21, %c0_22], %26 {strides = array<i32>} : memref<2x5x20xbf16, #tpu.memory_space<vmem>>, vector<2x5x20xbf16>,
    return
  }
}

module attributes {stable_mosaic.version = 11 : i64} {
  func.func @_conv_bn_relu_kernel(%arg0: memref<2x7x28xbf16, #tpu.memory_space<vmem>>, %arg1: memref<3x28x20xbf16, #tpu.memory_space<vmem>>, %arg2: memref<20x4xf32, #tpu.memory_space<vmem>>, %arg3: memref<4x20xf32, #tpu.memory_space<vmem>>, %arg4: memref<1x4xf32, #tpu.memory_space<vmem>>, %arg5: memref<1x4xf32, #tpu.memory_space<vmem>>, %arg6: memref<2x5x20xbf16, #tpu.memory_space<vmem>>) attributes {dimension_semantics = [], scalar_prefetch = 0 : i64, scratch_operands = 0 : i64, tpu.core_type = #tpu.core_type<tc>} {
    %cst = arith.constant 0.000000e+00 : f32
    %0 = vector.broadcast %cst : f32 to vector<2x5x20xf32>
    %c0 = arith.constant 0 : index
    %c0_0 = arith.constant 0 : index
    %c0_1 = arith.constant 0 : index
    %1 = vector.load %arg0[%c0, %c0_0, %c0_1] : memref<2x7x28xbf16, #tpu.memory_space<vmem>>, vector<2x5x28xbf16>
    %c0_2 = arith.constant 0 : index
    %c0_3 = arith.constant 0 : index
    %c0_4 = arith.constant 0 : index
    %2 = vector.load %arg1[%c0_2, %c0_3, %c0_4] : memref<3x28x20xbf16, #tpu.memory_space<vmem>>, vector<1x28x20xbf16>
    %3 = vector.shape_cast %2 : vector<1x28x20xbf16> to vector<28x20xbf16>
    %4 = vector.shape_cast %3 : vector<28x20xbf16> to vector<1x28x20xbf16>
    %5 = vector.broadcast %4 : vector<1x28x20xbf16> to vector<2x28x20xbf16>
    "tpu.trace_start"() <{level = 10 : i32, message = "bqk,bkd->bqd"}> : () -> ()
    %cst_5 = arith.constant dense<0.000000e+00> : vector<2x5x20xf32>
    %6 = tpu.matmul %1, %5, %cst_5 {dimension_numbers = #tpu.dot_dimension_numbers<[2], [1], [1], [2], [0, 0, 0, 1, 1, 2], [0], [0]>} : vector<2x5x28xbf16>, vector<2x28x20xbf16>, vector<2x5x20xf32> -> vector<2x5x20xf32>
    "tpu.trace_stop"() : () -> ()
    %7 = arith.addf %0, %6 : vector<2x5x20xf32>
    %c0_6 = arith.constant 0 : index
    %c1 = arith.constant 1 : index
    %c0_7 = arith.constant 0 : index
    %8 = vector.load %arg0[%c0_6, %c1, %c0_7] : memref<2x7x28xbf16, #tpu.memory_space<vmem>>, vector<2x5x28xbf16>
    %c1_8 = arith.constant 1 : index
    %c0_9 = arith.constant 0 : index
    %c0_10 = arith.constant 0 : index
    %9 = vector.load %arg1[%c1_8, %c0_9, %c0_10] : memref<3x28x20xbf16, #tpu.memory_space<vmem>>, vector<1x28x20xbf16>
    %10 = vector.shape_cast %9 : vector<1x28x20xbf16> to vector<28x20xbf16>
    %11 = vector.shape_cast %10 : vector<28x20xbf16> to vector<1x28x20xbf16>
    %12 = vector.broadcast %11 : vector<1x28x20xbf16> to vector<2x28x20xbf16>
    "tpu.trace_start"() <{level = 10 : i32, message = "bqk,bkd->bqd"}> : () -> ()
    %cst_11 = arith.constant dense<0.000000e+00> : vector<2x5x20xf32>
    %13 = tpu.matmul %8, %12, %cst_11 {dimension_numbers = #tpu.dot_dimension_numbers<[2], [1], [1], [2], [0, 0, 0, 1, 1, 2], [0], [0]>} : vector<2x5x28xbf16>, vector<2x28x20xbf16>, vector<2x5x20xf32> -> vector<2x5x20xf32>
    "tpu.trace_stop"() : () -> ()
    %14 = arith.addf %7, %13 : vector<2x5x20xf32>
    %c0_12 = arith.constant 0 : index
    %c2 = arith.constant 2 : index
    %c0_13 = arith.constant 0 : index
    %15 = vector.load %arg0[%c0_12, %c2, %c0_13] : memref<2x7x28xbf16, #tpu.memory_space<vmem>>, vector<2x5x28xbf16>
    %c2_14 = arith.constant 2 : index
    %c0_15 = arith.constant 0 : index
    %c0_16 = arith.constant 0 : index
    %16 = vector.load %arg1[%c2_14, %c0_15, %c0_16] : memref<3x28x20xbf16, #tpu.memory_space<vmem>>, vector<1x28x20xbf16>
    %17 = vector.shape_cast %16 : vector<1x28x20xbf16> to vector<28x20xbf16>
    %18 = vector.shape_cast %17 : vector<28x20xbf16> to vector<1x28x20xbf16>
    %19 = vector.broadcast %18 : vector<1x28x20xbf16> to vector<2x28x20xbf16>
    "tpu.trace_start"() <{level = 10 : i32, message = "bqk,bkd->bqd"}> : () -> ()
    %cst_17 = arith.constant dense<0.000000e+00> : vector<2x5x20xf32>
    %20 = tpu.matmul %15, %19, %cst_17 {dimension_numbers = #tpu.dot_dimension_numbers<[2], [1], [1], [2], [0, 0, 0, 1, 1, 2], [0], [0]>} : vector<2x5x28xbf16>, vector<2x28x20xbf16>, vector<2x5x20xf32> -> vector<2x5x20xf32>
    "tpu.trace_stop"() : () -> ()
    %21 = arith.addf %14, %20 : vector<2x5x20xf32>
    %cst_18 = arith.constant dense<0.000000e+00> : vector<5x20xf32>
    %22 = vector.multi_reduction <add>, %21, %cst_18 [0] : vector<2x5x20xf32> to vector<5x20xf32>
    %23 = vector.shape_cast %22 : vector<5x20xf32> to vector<1x5x20xf32>
    %cst_19 = arith.constant dense<0.000000e+00> : vector<1x20xf32>
    %24 = vector.multi_reduction <add>, %23, %cst_19 [1] : vector<1x5x20xf32> to vector<1x20xf32>
    %25 = vector.shape_cast %24 : vector<1x20xf32> to vector<1x1x20xf32>
    %26 = arith.mulf %21, %21 : vector<2x5x20xf32>
    %cst_20 = arith.constant dense<0.000000e+00> : vector<5x20xf32>
    %27 = vector.multi_reduction <add>, %26, %cst_20 [0] : vector<2x5x20xf32> to vector<5x20xf32>
    %28 = vector.shape_cast %27 : vector<5x20xf32> to vector<1x5x20xf32>
    %cst_21 = arith.constant dense<0.000000e+00> : vector<1x20xf32>
    %29 = vector.multi_reduction <add>, %28, %cst_21 [1] : vector<1x5x20xf32> to vector<1x20xf32>
    %30 = vector.shape_cast %29 : vector<1x20xf32> to vector<1x1x20xf32>
    %31 = vector.shape_cast %25 : vector<1x1x20xf32> to vector<1x20xf32>
    %c0_22 = arith.constant 0 : index
    %c0_23 = arith.constant 0 : index
    %32 = vector.load %arg2[%c0_22, %c0_23] : memref<20x4xf32, #tpu.memory_space<vmem>>, vector<20x4xf32>
    %cst_24 = arith.constant dense<0.000000e+00> : vector<1x4xf32>
    %33 = tpu.matmul %31, %32, %cst_24 {dimension_numbers = #tpu.dot_dimension_numbers<[1], [0], [0], [1], [0, 0, 1, 1], [], []>} : vector<1x20xf32>, vector<20x4xf32>, vector<1x4xf32> -> vector<1x4xf32>
    %34 = vector.shape_cast %30 : vector<1x1x20xf32> to vector<1x20xf32>
    %c0_25 = arith.constant 0 : index
    %c0_26 = arith.constant 0 : index
    %35 = vector.load %arg2[%c0_25, %c0_26] : memref<20x4xf32, #tpu.memory_space<vmem>>, vector<20x4xf32>
    %cst_27 = arith.constant dense<0.000000e+00> : vector<1x4xf32>
    %36 = tpu.matmul %34, %35, %cst_27 {dimension_numbers = #tpu.dot_dimension_numbers<[1], [0], [0], [1], [0, 0, 1, 1], [], []>} : vector<1x20xf32>, vector<20x4xf32>, vector<1x4xf32> -> vector<1x4xf32>
    %cst_28 = arith.constant 5.000000e+01 : f32
    %37 = vector.broadcast %cst_28 : f32 to vector<1x4xf32>
    %38 = arith.divf %33, %37 : vector<1x4xf32>
    %cst_29 = arith.constant 5.000000e+01 : f32
    %39 = vector.broadcast %cst_29 : f32 to vector<1x4xf32>
    %40 = arith.divf %36, %39 : vector<1x4xf32>
    %41 = arith.mulf %38, %38 : vector<1x4xf32>
    %42 = arith.subf %40, %41 : vector<1x4xf32>
    %c0_30 = arith.constant 0 : index
    %c0_31 = arith.constant 0 : index
    %43 = vector.load %arg4[%c0_30, %c0_31] : memref<1x4xf32, #tpu.memory_space<vmem>>, vector<1x4xf32>
    %cst_32 = arith.constant 9.99999974E-6 : f32
    %44 = vector.broadcast %cst_32 : f32 to vector<1x4xf32>
    %45 = arith.addf %42, %44 : vector<1x4xf32>
    %46 = math.rsqrt %45 : vector<1x4xf32>
    %47 = arith.mulf %43, %46 : vector<1x4xf32>
    %c0_33 = arith.constant 0 : index
    %c0_34 = arith.constant 0 : index
    %48 = vector.load %arg5[%c0_33, %c0_34] : memref<1x4xf32, #tpu.memory_space<vmem>>, vector<1x4xf32>
    %49 = arith.mulf %38, %47 : vector<1x4xf32>
    %50 = arith.subf %48, %49 : vector<1x4xf32>
    %c0_35 = arith.constant 0 : index
    %c0_36 = arith.constant 0 : index
    %51 = vector.load %arg3[%c0_35, %c0_36] : memref<4x20xf32, #tpu.memory_space<vmem>>, vector<4x20xf32>
    %cst_37 = arith.constant dense<0.000000e+00> : vector<1x20xf32>
    %52 = tpu.matmul %47, %51, %cst_37 {dimension_numbers = #tpu.dot_dimension_numbers<[1], [0], [0], [1], [0, 0, 1, 1], [], []>} : vector<1x4xf32>, vector<4x20xf32>, vector<1x20xf32> -> vector<1x20xf32>
    %c0_38 = arith.constant 0 : index
    %c0_39 = arith.constant 0 : index
    %53 = vector.load %arg3[%c0_38, %c0_39] : memref<4x20xf32, #tpu.memory_space<vmem>>, vector<4x20xf32>
    %cst_40 = arith.constant dense<0.000000e+00> : vector<1x20xf32>
    %54 = tpu.matmul %50, %53, %cst_40 {dimension_numbers = #tpu.dot_dimension_numbers<[1], [0], [0], [1], [0, 0, 1, 1], [], []>} : vector<1x4xf32>, vector<4x20xf32>, vector<1x20xf32> -> vector<1x20xf32>
    %55 = vector.shape_cast %52 : vector<1x20xf32> to vector<1x1x20xf32>
    %56 = vector.broadcast %55 : vector<1x1x20xf32> to vector<2x5x20xf32>
    %57 = arith.mulf %21, %56 : vector<2x5x20xf32>
    %58 = vector.shape_cast %54 : vector<1x20xf32> to vector<1x1x20xf32>
    %59 = vector.broadcast %58 : vector<1x1x20xf32> to vector<2x5x20xf32>
    %60 = arith.addf %57, %59 : vector<2x5x20xf32>
    %cst_41 = arith.constant 0.000000e+00 : f32
    %61 = vector.broadcast %cst_41 : f32 to vector<2x5x20xf32>
    %62 = arith.maximumf %60, %61 : vector<2x5x20xf32>
    %63 = arith.truncf %62 : vector<2x5x20xf32> to vector<2x5x20xbf16>
    %c0_42 = arith.constant 0 : index
    %c0_43 = arith.constant 0 : index
    %c0_44 = arith.constant 0 : index
    %64 = vector.load %arg6[%c0_42, %c0_43, %c0_44] : memref<2x5x20xbf16, #tpu.memory_space<vmem>>, vector<2x5x20xbf16>
    tpu.vector_store %arg6[%c0_42, %c0_43, %c0_44], %63 {strides = array<i32>} : memref<2x5x20xbf16, #tpu.memory_space<vmem>>, vector<2x5x20xbf16>,
    return
  }
}

module attributes {stable_mosaic.version = 11 : i64} {
  func.func @_matmul_bias_kernel(%arg0: memref<50x4xbf16, #tpu.memory_space<vmem>>, %arg1: memref<4x3xbf16, #tpu.memory_space<vmem>>, %arg2: memref<1x3xf32, #tpu.memory_space<vmem>>, %arg3: memref<50x3xbf16, #tpu.memory_space<vmem>>) attributes {dimension_semantics = [], scalar_prefetch = 0 : i64, scratch_operands = 0 : i64, tpu.core_type = #tpu.core_type<tc>} {
    %c0 = arith.constant 0 : index
    %c0_0 = arith.constant 0 : index
    %0 = vector.load %arg0[%c0, %c0_0] : memref<50x4xbf16, #tpu.memory_space<vmem>>, vector<50x4xbf16>
    %c0_1 = arith.constant 0 : index
    %c0_2 = arith.constant 0 : index
    %1 = vector.load %arg1[%c0_1, %c0_2] : memref<4x3xbf16, #tpu.memory_space<vmem>>, vector<4x3xbf16>
    %cst = arith.constant dense<0.000000e+00> : vector<50x3xf32>
    %2 = tpu.matmul %0, %1, %cst {dimension_numbers = #tpu.dot_dimension_numbers<[1], [0], [0], [1], [0, 0, 1, 1], [], []>} : vector<50x4xbf16>, vector<4x3xbf16>, vector<50x3xf32> -> vector<50x3xf32>
    %c0_3 = arith.constant 0 : index
    %c0_4 = arith.constant 0 : index
    %3 = vector.load %arg2[%c0_3, %c0_4] : memref<1x3xf32, #tpu.memory_space<vmem>>, vector<1x3xf32>
    %4 = vector.broadcast %3 : vector<1x3xf32> to vector<50x3xf32>
    %5 = arith.addf %2, %4 : vector<50x3xf32>
    %6 = arith.truncf %5 : vector<50x3xf32> to vector<50x3xbf16>
    %c0_5 = arith.constant 0 : index
    %c0_6 = arith.constant 0 : index
    %7 = vector.load %arg3[%c0_5, %c0_6] : memref<50x3xbf16, #tpu.memory_space<vmem>>, vector<50x3xbf16>
    tpu.vector_store %arg3[%c0_5, %c0_6], %6 {strides = array<i32>} : memref<50x3xbf16, #tpu.memory_space<vmem>>, vector<50x3xbf16>,
    return
  }
}

module attributes {stable_mosaic.version = 11 : i64} {
  func.func @_bmm_kernel(%arg0: memref<16x5xf32, #tpu.memory_space<vmem>>, %arg1: memref<2x5x15xbf16, #tpu.memory_space<vmem>>, %arg2: memref<2x16x15xf32, #tpu.memory_space<vmem>>) attributes {dimension_semantics = [], scalar_prefetch = 0 : i64, scratch_operands = 0 : i64, tpu.core_type = #tpu.core_type<tc>} {
    %c0 = arith.constant 0 : index
    %c0_0 = arith.constant 0 : index
    %0 = vector.load %arg0[%c0, %c0_0] : memref<16x5xf32, #tpu.memory_space<vmem>>, vector<16x5xf32>
    %1 = vector.shape_cast %0 : vector<16x5xf32> to vector<1x16x5xf32>
    %2 = vector.broadcast %1 : vector<1x16x5xf32> to vector<2x16x5xf32>
    %c0_1 = arith.constant 0 : index
    %c0_2 = arith.constant 0 : index
    %c0_3 = arith.constant 0 : index
    %3 = vector.load %arg1[%c0_1, %c0_2, %c0_3] : memref<2x5x15xbf16, #tpu.memory_space<vmem>>, vector<2x5x15xbf16>
    %4 = arith.extf %3 : vector<2x5x15xbf16> to vector<2x5x15xf32>
    "tpu.trace_start"() <{level = 10 : i32, message = "bjk,bkd->bjd"}> : () -> ()
    %cst = arith.constant dense<0.000000e+00> : vector<2x16x15xf32>
    %5 = tpu.matmul %2, %4, %cst {dimension_numbers = #tpu.dot_dimension_numbers<[2], [1], [1], [2], [0, 0, 0, 1, 1, 2], [0], [0]>} : vector<2x16x5xf32>, vector<2x5x15xf32>, vector<2x16x15xf32> -> vector<2x16x15xf32>
    "tpu.trace_stop"() : () -> ()
    %c0_4 = arith.constant 0 : index
    %c0_5 = arith.constant 0 : index
    %c0_6 = arith.constant 0 : index
    %6 = vector.load %arg2[%c0_4, %c0_5, %c0_6] : memref<2x16x15xf32, #tpu.memory_space<vmem>>, vector<2x16x15xf32>
    tpu.vector_store %arg2[%c0_4, %c0_5, %c0_6], %5 {strides = array<i32>} : memref<2x16x15xf32, #tpu.memory_space<vmem>>, vector<2x16x15xf32>,
    return
  }
}

module attributes {stable_mosaic.version = 11 : i64} {
  func.func @_bmm_kernel(%arg0: memref<16x5xf32, #tpu.memory_space<vmem>>, %arg1: memref<32x5x3xf32, #tpu.memory_space<vmem>>, %arg2: memref<32x16x3xf32, #tpu.memory_space<vmem>>) attributes {dimension_semantics = [], scalar_prefetch = 0 : i64, scratch_operands = 0 : i64, tpu.core_type = #tpu.core_type<tc>} {
    %c0 = arith.constant 0 : index
    %c0_0 = arith.constant 0 : index
    %0 = vector.load %arg0[%c0, %c0_0] : memref<16x5xf32, #tpu.memory_space<vmem>>, vector<16x5xf32>
    %1 = vector.shape_cast %0 : vector<16x5xf32> to vector<1x16x5xf32>
    %2 = vector.broadcast %1 : vector<1x16x5xf32> to vector<32x16x5xf32>
    %c0_1 = arith.constant 0 : index
    %c0_2 = arith.constant 0 : index
    %c0_3 = arith.constant 0 : index
    %3 = vector.load %arg1[%c0_1, %c0_2, %c0_3] : memref<32x5x3xf32, #tpu.memory_space<vmem>>, vector<32x5x3xf32>
    "tpu.trace_start"() <{level = 10 : i32, message = "bjk,bkd->bjd"}> : () -> ()
    %cst = arith.constant dense<0.000000e+00> : vector<32x16x3xf32>
    %4 = tpu.matmul %2, %3, %cst {dimension_numbers = #tpu.dot_dimension_numbers<[2], [1], [1], [2], [0, 0, 0, 1, 1, 2], [0], [0]>} : vector<32x16x5xf32>, vector<32x5x3xf32>, vector<32x16x3xf32> -> vector<32x16x3xf32>
    "tpu.trace_stop"() : () -> ()
    %c0_4 = arith.constant 0 : index
    %c0_5 = arith.constant 0 : index
    %c0_6 = arith.constant 0 : index
    %5 = vector.load %arg2[%c0_4, %c0_5, %c0_6] : memref<32x16x3xf32, #tpu.memory_space<vmem>>, vector<32x16x3xf32>
    tpu.vector_store %arg2[%c0_4, %c0_5, %c0_6], %4 {strides = array<i32>} : memref<32x16x3xf32, #tpu.memory_space<vmem>>, vector<32x16x3xf32>,
    return
  }
}

</mosaic_0001>

<bundles_post_ra>
// kernel: unet_forward.22
= control target key start
LH: loop header
LB: loop body
LE: loop exit
PB: predicated region body
PF: predicated region fallthrough
CT: control target
= control target key end

     0   :  { %vm95_vm0 = vcmask 1042432   ;;  %vm57_vm1 = vsmask.f32 7424  ;;  %vm91_vm2 = vcmask 441344   ;;  %vm240_vm3 = vcmask 1046528   ;;  %s818_s1 = inlined_call_operand.vmem [shape: bf16[3,54,64], index: 1, kind: input, shape index: {}]   ;;  %s819_s0 = inlined_call_operand.vmem [shape: bf16[2,18,54], index: 0, kind: input, shape index: {}]   ;;  %s820_s2 = inlined_call_operand.vmem [shape: f32[64,4], index: 2, kind: input, shape index: {}]   ;;  %s821_s3 = inlined_call_operand.vmem [shape: f32[4,64], index: 3, kind: input, shape index: {}]   ;;  %s822_s4 = inlined_call_operand.vmem [shape: f32[1,4], index: 4, kind: input, shape index: {}]   ;;  %s823_s5 = inlined_call_operand.vmem [shape: f32[1,4], index: 5, kind: input, shape index: {}]   ;;  %s824_s6 = inlined_call_operand.vmem [shape: bf16[2,16,64], index: 6, kind: output, shape index: {}]  }
   0x1   :  { %v518_v0 = vld [vmem:[%s818_s1 + $0x34] sm:$0x7]  ;;  %v34_v1 = vld [vmem:[%s818_s1 + $0x18] sm:$0x7]  ;;  %v603_v4 = vld [vmem:[%s819_s0] sm:$0xff]  ;;  %vm317_vm4 = vcmask 523264  }
   0x2   :  { %v83_v2 = vunpack.c.l.b16 %v518_v0  ;;  %v168_v3 = vunpack.c.l.b16 %v34_v1  ;;  %v37_v7 = vld [vmem:[%s819_s0 + $0x8] sm:$0x1]  ;;  %v604_v8 = vld [vmem:[%s819_s0 + $0xc] sm:$0xff]  ;;  %v40_v9 = vld [vmem:[%s819_s0 + $0x14] sm:$0x1]  ;;  %v61_v16 = vshll.u32 %v603_v4, 16 }
   0x3   :  { %v54_v10 = vunpack.c.l.b16 %v37_v7  ;;  %v118_v11 = vunpack.c.l.b16 %v40_v9  ;;  %v607_v14 = vld [vmem:[%s818_s1 + $0x2c] sm:$0xff]  ;;  %v124_v18 = vshll.u32 %v604_v8, 16  ;;  %v59_v21 = vshrl.u32 %v603_v4, 16  ;;  %v606_v24 = vld [vmem:[%s818_s1 + $0x24] sm:$0xff]  ;;  %v605_v31 = vld [vmem:[%s818_s1 + $0x1c] sm:$0xff] }
   0x4   :  { %v87_v5 = vpack.c.b16 %v83_v2, %v83_v2  ;;  %v172_v6 = vpack.c.b16 %v168_v3, %v168_v3  ;;  %v569_v19 = vld [vmem:[%s818_s1 + $0x50] sm:$0x7]  ;;  %v122_v22 = vshrl.u32 %v604_v8, 16  ;;  %v63_v25 = vrot.slane %v61_v16, 1  ;;  %v601_v29 = vld [vmem:[%s818_s1 + $0x8] sm:$0xff]  ;;  %v600_v36 = vld [vmem:[%s818_s1] sm:$0xff] }
   0x5   :  { %v56_v15 = vpack.c.b16 %v54_v10, %v54_v10  ;;  %v120_v17 = vpack.c.b16 %v118_v11, %v118_v11  ;;  %v602_v20 = vld [vmem:[%s818_s1 + $0x10] sm:$0xff]  ;;  %v257_v23 = vunpack.c.l.b16 %v569_v19  ;;  %v126_v27 = vrot.slane %v124_v18, 1  ;;  %v598_v40 = vld [vmem:[%s819_s0] sm:$0xff]  ;;  %v220_v42 = vld [vmem:[%s819_s0 + $0x8] sm:$0x1] }
   0x6   :  { %v97_v12 = vsel %vm95_vm0, %v87_v5, 0  ;;  %v180_v13 = vsel %vm95_vm0, %v172_v6, 0  ;;  %v64_v32 = vor.u32 %v63_v25, %v59_v21  ;;  %v599_v41 = vld [vmem:[%s819_s0 + $0xc] sm:$0xff]  ;;  %v223_v43 = vld [vmem:[%s819_s0 + $0x14] sm:$0x1]  ;;  %v237_v46 = vunpack.c.l.b16 %v220_v42  ;;  %v611_v51 = vld [vmem:[%s818_s1 + $0x40] sm:$0xff] }
   0x7   :  { %103 = vmatpush.bf16.msra.mxu0 %v97_v12  ;;  %140 = vmatpush.bf16.msra.mxu1 %v97_v12  ;;  %v66_v26 = vshll.u32 %v56_v15, 16  ;;  %v129_v28 = vshll.u32 %v120_v17, 16  ;;  %v261_v30 = vpack.c.b16 %v257_v23, %v257_v23  ;;  %v127_v34 = vor.u32 %v126_v27, %v122_v22  ;;  %v612_v44 = vld [vmem:[%s818_s1 + $0x48] sm:$0xff]  ;;  %v572_v45 = vld [vmem:[%s819_s0] sm:$0xe]  ;;  %v610_v56 = vld [vmem:[%s818_s1 + $0x38] sm:$0xff] }
   0x8   :  { %186 = vmatpush.bf16.msra.mxu2 %v180_v13  ;;  %208 = vmatpush.bf16.msra.mxu3 %v180_v13  ;;  %v290_v47 = vunpack.c.l.b16 %v223_v43  ;;  %v608_v48 = vld [vmem:[%s819_s0] sm:$0xf0]  ;;  %v589_v49 = vld [vmem:[%s819_s0 + $0xc] sm:$0xe]  ;;  %v609_v50 = vld [vmem:[%s819_s0 + $0xc] sm:$0xf0]  ;;  %v239_v53 = vpack.c.b16 %v237_v46, %v237_v46 }
   0x9   :  { %v68_v33 = vrot.slane %v66_v26, 1  ;;  %v131_v35 = vrot.slane %v129_v28, 1  ;;  %v269_v37 = vsel %vm95_vm0, %v261_v30, 0  ;;  %v573_v52 = vor.u32 %v608_v48, %v572_v45  ;;  %v359_v63 = vld [vmem:[%s820_s2 + $0x38] sm:$0xff]  ;;  %v358_v2 = vld [vmem:[%s820_s2 + $0x30] sm:$0xff]  ;;  %v357_v3 = vld [vmem:[%s820_s2 + $0x28] sm:$0xff] }
   0xa   :  { %v590_v54 = vor.u32 %v609_v50, %v589_v49  ;;  %v292_v55 = vpack.c.b16 %v290_v47, %v290_v47  ;;  %v242_v58 = vrot.slane %v239_v53, 1  ;;  %v356_v4 = vld [vmem:[%s820_s2 + $0x20] sm:$0xff]  ;;  %v355_v5 = vld [vmem:[%s820_s2 + $0x18] sm:$0xff]  ;;  %v354_v6 = vld [vmem:[%s820_s2 + $0x10] sm:$0xff]  ;;  %vm438_vm6 = vcmask 1043456  }
   0xb   :  { %104 = vmatpush.bf16.msra.mxu0 %v607_v14  ;;  %141 = vmatpush.bf16.msra.mxu1 %v607_v14  ;;  %v69_v38 = vsel %vm57_vm1, %v64_v32, %v68_v33  ;;  %v132_v39 = vsel %vm57_vm1, %v127_v34, %v131_v35  ;;  %v241_v57 = vrot.slane %v573_v52, 1  ;;  %v353_v9 = vld [vmem:[%s820_s2 + $0x8] sm:$0xff]  ;;  %v352_v12 = vld [vmem:[%s820_s2] sm:$0xff]  ;;  %vm434_vm10 = vcmask 31744  }
   0xc   :  { %187 = vmatpush.bf16.msra.mxu2 %v602_v20  ;;  %209 = vmatpush.bf16.msra.mxu3 %v602_v20  ;;  %v293_v59 = vrot.slane %v590_v54, 1  ;;  %v294_v60 = vrot.slane %v292_v55, 1  ;;  %vm503_vm11 = vcmask 519168  }
   0xd   :  { %v243_v61 = vsel %vm240_vm3, %v241_v57, %v242_v58 }
   0xe   :  { %v295_v62 = vsel %vm240_vm3, %v293_v59, %v294_v60 }
   0xf   :  { %105 = vmatpush.bf16.msra.mxu0 %v606_v24  ;;  %142 = vmatpush.bf16.msra.mxu1 %v606_v24 }
  0x10   :  { %188 = vmatpush.bf16.msra.mxu2 %v601_v29  ;;  %210 = vmatpush.bf16.msra.mxu3 %v601_v29 }
  0x13   :  { %106 = vmatpush.bf16.msra.mxu0 %v605_v31  ;;  %143 = vmatpush.bf16.msra.mxu1 %v605_v31 }
  0x14   :  { %189 = vmatpush.bf16.msra.mxu2 %v600_v36  ;;  %211 = vmatpush.bf16.msra.mxu3 %v600_v36 }
  0x16   :  { %535 = vmatmul.msk.bf16.vlgmr.msra.gmra.mxu0 %vm91_vm2, %v69_v38  ;;  %540 = vmatmul.msk.bf16.vlgmr.msra.gmra.mxu1 %vm91_vm2, %v132_v39 }
  0x17   :  { %275 = vmatpush.bf16.msrb.mxu0 %v269_v37  ;;  %303 = vmatpush.bf16.msrb.mxu1 %v269_v37 }
  0x18   :  { %557 = vmatmul.msk.bf16.vlgmr.msra.gmra.mxu2 %vm91_vm2, %v598_v40  ;;  %562 = vmatmul.msk.bf16.vlgmr.msra.gmra.mxu3 %vm91_vm2, %v599_v41 }
  0x19   :  { %371 = vmatpush.msrb.mxu2 %v359_v63  ;;  %394 = vmatpush.msrb.mxu3 %v359_v63 }
  0x1b   :  { %276 = vmatpush.bf16.msrb.mxu0 %v612_v44  ;;  %304 = vmatpush.bf16.msrb.mxu1 %v612_v44 }
  0x1c   :  { %372 = vmatpush.msrb.mxu2 %v358_v2  ;;  %395 = vmatpush.msrb.mxu3 %v358_v2 }
  0x1e   :  { %373 = vmatpush.msrb.mxu2 %v357_v3  ;;  %396 = vmatpush.msrb.mxu3 %v357_v3  ;;  %v433_v3 = vld [vmem:[%s821_s3] sm:$0xf] }
  0x1f   :  { %277 = vmatpush.bf16.msrb.mxu0 %v611_v51  ;;  %305 = vmatpush.bf16.msrb.mxu1 %v611_v51 }
  0x20   :  { %374 = vmatpush.msrb.mxu2 %v356_v4  ;;  %397 = vmatpush.msrb.mxu3 %v356_v4 }
  0x22   :  { %375 = vmatpush.msrb.mxu2 %v355_v5  ;;  %398 = vmatpush.msrb.mxu3 %v355_v5 }
  0x23   :  { %278 = vmatpush.bf16.msrb.mxu0 %v610_v56  ;;  %306 = vmatpush.bf16.msrb.mxu1 %v610_v56 }
  0x24   :  { %376 = vmatpush.msrb.mxu2 %v354_v6  ;;  %399 = vmatpush.msrb.mxu3 %v354_v6 }
  0x26   :  { %586 = vmatmul.msk.bf16.vlgmr.msrb.gmra.mxu0 %vm91_vm2, %v243_v61  ;;  %591 = vmatmul.msk.bf16.vlgmr.msrb.gmra.mxu1 %vm91_vm2, %v295_v62  ;;  %v618_v61 = vmov 512.0  }
  0x27   :  { %377 = vmatpush.msrb.mxu2 %v353_v9  ;;  %400 = vmatpush.msrb.mxu3 %v353_v9  ;;  %614 = vrcp.f32 %v618_v61 }
  0x29   :  { %378 = vmatpush.msrb.mxu2 %v352_v12  ;;  %401 = vmatpush.msrb.mxu3 %v352_v12 }
  0x2b   :  { %594 = vmatpush.msk.msra.mxu2 %vm438_vm6, %v433_v3  ;;  %596 = vmatpush.msk.msra.mxu3 %vm438_vm6, %v433_v3 }
  0x2d   :  { %v615_v62 = vpop.eup %614 }
  0x2e   :  { %v407_v63 = vmul.f32 512.0, %v615_v62  ;;  %vm411_vm5 = vweird.f32 %v615_v62 }
  0x93   :  { %v108_v0 = vpop.f32.mrf.mxu0  ;;  %v145_v1 = vpop.f32.mrf.mxu1 }
  0x9b   :  { %v110_v7 = vpop.f32.mrf.mxu0  ;;  %v147_v8 = vpop.f32.mrf.mxu1 }
  0x9c   :  { %v191_v10 = vpop.f32.mrf.mxu2  ;;  %v213_v11 = vpop.f32.mrf.mxu3 }
  0x9d   :  { %v192_v13 = vadd.f32 %v191_v10, %v108_v0  ;;  %v214_v14 = vadd.f32 %v213_v11, %v145_v1  ;;  %v408_v0 = vsub.f32 1.0, %v407_v63 }
  0x9f   :  { %v409_v1 = vmul.f32 %v615_v62, %v408_v0 }
  0xa1   :  { %v410_v2 = vadd.f32 %v615_v62, %v409_v1 }
  0xa3   :  { %v280_v15 = vpop.f32.mrf.mxu0  ;;  %v308_v16 = vpop.f32.mrf.mxu1  ;;  %v412_v4 = vsel %vm411_vm5, %v615_v62, %v410_v2 }
  0xa4   :  { %v759_v17 = vadd.f32 %v280_v15, %v192_v13  ;;  %v761_v18 = vadd.f32 %v308_v16, %v214_v14  ;;  %v193_v19 = vpop.f32.mrf.mxu2  ;;  %v215_v20 = vpop.f32.mrf.mxu3 }
  0xa5   :  { %v194_v23 = vadd.f32 %v193_v19, %v110_v7  ;;  %v216_v24 = vadd.f32 %v215_v20, %v147_v8  ;;  %v417_v19 = vld [vmem:[%s822_s4] sm:$0x1] }
  0xa6   :  { %v333_v21 = vmul.f32 %v759_v17, %v759_v17  ;;  %v335_v22 = vmul.f32 %v761_v18, %v761_v18  ;;  %v318_v25 = vsel %vm317_vm4, %v759_v17, 0.0  ;;  %v319_v26 = vsel %vm317_vm4, %v761_v18, 0.0 }
  0xa7   :  { %v320_v33 = vadd.f32 %v319_v26, %v318_v25 }
  0xa8   :  { %v337_v29 = vsel %vm317_vm4, %v333_v21, 0.0  ;;  %v338_v30 = vsel %vm317_vm4, %v335_v22, 0.0 }
  0xa9   :  { %v339_v38 = vadd.f32 %v338_v30, %v337_v29  ;;  %v324_v42 = vsel %vm317_vm4, %v320_v33, 0.0 }
  0xab   :  { %v282_v27 = vpop.f32.mrf.mxu0  ;;  %v310_v28 = vpop.f32.mrf.mxu1  ;;  %v343_v46 = vsel %vm317_vm4, %v339_v38, 0.0 }
  0xac   :  { %v773_v31 = vadd.f32 %v282_v27, %v194_v23  ;;  %v775_v32 = vadd.f32 %v310_v28, %v216_v24  ;;  %v430_v23 = vld [vmem:[%s823_s5] sm:$0x1] }
  0xae   :  { %v321_v34 = vsel %vm317_vm4, %v773_v31, 0.0  ;;  %v334_v35 = vmul.f32 %v773_v31, %v773_v31  ;;  %v322_v36 = vsel %vm317_vm4, %v775_v32, 0.0  ;;  %v336_v37 = vmul.f32 %v775_v32, %v775_v32 }
  0xaf   :  { %v323_v39 = vadd.f32 %v322_v36, %v321_v34 }
  0xb0   :  { %v340_v40 = vsel %vm317_vm4, %v334_v35, 0.0  ;;  %v341_v41 = vsel %vm317_vm4, %v336_v37, 0.0 }
  0xb1   :  { %v325_v43 = vsel %vm317_vm4, %v323_v39, 0.0  ;;  %v342_v44 = vadd.f32 %v341_v41, %v340_v40 }
  0xb2   :  { %v326_v45 = vadd.f32 %v325_v43, %v324_v42 }
  0xb3   :  { %v344_v47 = vsel %vm317_vm4, %v342_v44, 0.0 }
  0xb4   :  { %v327_v48 = vrot.slane %v326_v45, 4  ;;  %v345_v49 = vadd.f32 %v344_v47, %v343_v46 }
  0xb6   :  { %v328_v50 = vadd.f32 %v327_v48, %v326_v45  ;;  %v346_v51 = vrot.slane %v345_v49, 4 }
  0xb8   :  { %v329_v52 = vrot.slane %v328_v50, 2  ;;  %v347_v53 = vadd.f32 %v346_v51, %v345_v49 }
  0xba   :  { %v330_v54 = vadd.f32 %v329_v52, %v328_v50  ;;  %v348_v55 = vrot.slane %v347_v53, 2 }
  0xbc   :  { %v331_v56 = vrot.slane %v330_v54, 1  ;;  %v349_v57 = vadd.f32 %v348_v55, %v347_v53 }
  0xbe   :  { %v332_v58 = vadd.f32 %v331_v56, %v330_v54  ;;  %v350_v59 = vrot.slane %v349_v57, 1 }
  0xc0   :  { %592 = vmatmul.msk.f32.vlgmr.msrb.gmra.mxu2 %vm317_vm4, %v332_v58  ;;  %v351_v60 = vadd.f32 %v350_v59, %v349_v57 }
  0xc2   :  { %593 = vmatmul.msk.f32.vlgmr.msrb.gmra.mxu3 %vm317_vm4, %v351_v60 }
 0x143   :  { %v380_v5 = vpop.f32.mrf.mxu2 }
 0x144   :  { %v413_v6 = vmul.f32 %v412_v4, %v380_v5 }
 0x145   :  { %v403_v7 = vpop.f32.mrf.mxu3 }
 0x146   :  { %v415_v8 = vmul.f32 %v413_v6, %v413_v6  ;;  %v414_v9 = vmul.f32 %v412_v4, %v403_v7 }
 0x148   :  { %v416_v10 = vsub.f32 %v414_v9, %v415_v8 }
 0x14a   :  { %v418_v11 = vadd.f32 1e-05, %v416_v10 }
 0x14c   :  { %616 = vrsqrt.f32 %v418_v11  ;;  %vm425_vm8 = vweird.f32 %v418_v11 }
 0x152   :  { %v617_v12 = vpop.eup %616 }
 0x153   :  { %v420_v13 = vmul.f32 %v617_v12, %v418_v11  ;;  %vm426_vm7 = vweird.f32 %v617_v12 }
 0x154   :  { %vm427_vm9 = vmor %vm425_vm8, %vm426_vm7 }
 0x155   :  { %v421_v14 = vmul.f32 %v617_v12, %v420_v13 }
 0x157   :  { %v422_v15 = vmul.f32 0.5, %v421_v14 }
 0x159   :  { %v423_v16 = vsub.f32 1.5, %v422_v15 }
 0x15b   :  { %v424_v20 = vmul.f32 %v617_v12, %v423_v16 }
 0x15d   :  { %v428_v21 = vsel %vm427_vm9, %v617_v12, %v424_v20 }
 0x15e   :  { %v429_v22 = vmul.f32 %v428_v21, %v417_v19 }
 0x160   :  { %v431_v24 = vmul.f32 %v429_v22, %v413_v6  ;;  %595 = vmatmul.msk.f32.vlgmr.msra.gmra.mxu2 %vm434_vm10, %v429_v22 }
 0x162   :  { %v432_v25 = vsub.f32 %v430_v23, %v431_v24 }
 0x164   :  { %597 = vmatmul.msk.f32.vlgmr.msra.gmra.mxu3 %vm434_vm10, %v432_v25 }
 0x1e3   :  { %v459_v26 = vpop.f32.mrf.mxu2 }
 0x1e4   :  { %v485_v27 = vperm.slane %v459_v26, 0 }
 0x1e6   :  { %v486_v28 = vmul.f32 %v485_v27, %v759_v17  ;;  %v487_v30 = vmul.f32 %v485_v27, %v773_v31  ;;  %v488_v33 = vmul.f32 %v485_v27, %v761_v18  ;;  %v489_v34 = vmul.f32 %v485_v27, %v775_v32 }
 0x1e7   :  { %v482_v29 = vpop.f32.mrf.mxu3 }
 0x1e8   :  { %v490_v35 = vperm.slane %v482_v29, 0 }
 0x1ea   :  { %v491_v36 = vadd.f32 %v490_v35, %v486_v28  ;;  %v492_v37 = vadd.f32 %v490_v35, %v487_v30  ;;  %v493_v38 = vadd.f32 %v490_v35, %v488_v33  ;;  %v494_v39 = vadd.f32 %v490_v35, %v489_v34 }
 0x1ec   :  { %v495_v40 = vmax.f32 %v491_v36, 0.0  ;;  %v496_v41 = vmax.f32 %v492_v37, 0.0  ;;  %v497_v42 = vmax.f32 %v493_v38, 0.0  ;;  %v498_v43 = vmax.f32 %v494_v39, 0.0 }
 0x1ee   :  { %v499_v44 = vpack.c.bf16 %v495_v40, %v495_v40  ;;  %v500_v45 = vpack.c.bf16 %v496_v41, %v496_v41  ;;  %v501_v17 = vpack.c.bf16 %v497_v42, %v497_v42  ;;  %v502_v46 = vpack.c.bf16 %v498_v43, %v498_v43 }
 0x1f0   :  { %504 = vst.msk [vmem:[%s824_s6] sm:$0xf] %vm503_vm11, %v499_v44 }
 0x1f1   :  { %505 = vst.msk [vmem:[%s824_s6 + $0x4] sm:$0xf] %vm503_vm11, %v500_v45 }
 0x1f2   :  { %506 = vst.msk [vmem:[%s824_s6 + $0x8] sm:$0xf] %vm503_vm11, %v501_v17 }
 0x1f3   :  { %507 = vst.msk [vmem:[%s824_s6 + $0xc] sm:$0xf] %vm503_vm11, %v502_v46 }

// kernel: unet_forward.23
= control target key start
LH: loop header
LB: loop body
LE: loop exit
PB: predicated region body
PF: predicated region fallthrough
CT: control target
= control target key end

     0   :  { %vm105_vm0 = vcmask 1043456   ;;  %vm61_vm1 = vsmask.f32 7424  ;;  %vm101_vm2 = vcmask 588800   ;;  %vm258_vm3 = vcmask 1046528   ;;  %s871_s1 = inlined_call_operand.vmem [shape: bf16[3,72,64], index: 1, kind: input, shape index: {}]   ;;  %s872_s0 = inlined_call_operand.vmem [shape: bf16[2,18,72], index: 0, kind: input, shape index: {}]   ;;  %s873_s2 = inlined_call_operand.vmem [shape: f32[64,4], index: 2, kind: input, shape index: {}]   ;;  %s874_s3 = inlined_call_operand.vmem [shape: f32[4,64], index: 3, kind: input, shape index: {}]   ;;  %s875_s4 = inlined_call_operand.vmem [shape: f32[1,4], index: 4, kind: input, shape index: {}]   ;;  %s876_s5 = inlined_call_operand.vmem [shape: f32[1,4], index: 5, kind: input, shape index: {}]   ;;  %s877_s6 = inlined_call_operand.vmem [shape: bf16[2,16,64], index: 6, kind: output, shape index: {}]  }
   0x1   :  { %v543_v0 = vld [vmem:[%s871_s1 + $0x44] sm:$0xf]  ;;  %v36_v1 = vld [vmem:[%s871_s1 + $0x20] sm:$0xf]  ;;  %v39_v6 = vld [vmem:[%s872_s0 + $0x8] sm:$0x1] }
   0x2   :  { %v91_v2 = vunpack.c.l.b16 %v543_v0  ;;  %v182_v3 = vunpack.c.l.b16 %v36_v1  ;;  %v42_v7 = vld [vmem:[%s872_s0 + $0x14] sm:$0x1]  ;;  %v648_v10 = vld [vmem:[%s871_s1 + $0x3c] sm:$0xff]  ;;  %v58_v12 = vunpack.c.l.b16 %v39_v6  ;;  %v644_v13 = vld [vmem:[%s872_s0 + $0xc] sm:$0xff]  ;;  %vm341_vm4 = vcmask 523264  }
   0x3   :  { %v643_v11 = vld [vmem:[%s872_s0] sm:$0xff]  ;;  %v128_v14 = vunpack.c.l.b16 %v42_v7  ;;  %v642_v15 = vld [vmem:[%s871_s1 + $0x18] sm:$0xff]  ;;  %v604_v17 = vld [vmem:[%s871_s1 + $0x68] sm:$0xf]  ;;  %v134_v21 = vshll.u32 %v644_v13, 16  ;;  %v132_v25 = vshrl.u32 %v644_v13, 16 }
   0x4   :  { %v96_v4 = vpack.c.b16 %v91_v2, %v91_v2  ;;  %v187_v5 = vpack.c.b16 %v182_v3, %v182_v3  ;;  %v647_v16 = vld [vmem:[%s871_s1 + $0x34] sm:$0xff]  ;;  %v60_v18 = vpack.c.b16 %v58_v12, %v58_v12  ;;  %v65_v19 = vshll.u32 %v643_v11, 16  ;;  %v646_v26 = vld [vmem:[%s871_s1 + $0x2c] sm:$0xff]  ;;  %v645_v33 = vld [vmem:[%s871_s1 + $0x24] sm:$0xff] }
   0x5   :  { %v130_v20 = vpack.c.b16 %v128_v14, %v128_v14  ;;  %v641_v22 = vld [vmem:[%s871_s1 + $0x10] sm:$0xff]  ;;  %v279_v23 = vunpack.c.l.b16 %v604_v17  ;;  %v63_v24 = vshrl.u32 %v643_v11, 16  ;;  %v136_v29 = vrot.slane %v134_v21, 1  ;;  %v640_v31 = vld [vmem:[%s871_s1 + $0x8] sm:$0xff]  ;;  %v639_v38 = vld [vmem:[%s871_s1] sm:$0xff] }
   0x6   :  { %v107_v8 = vsel %vm105_vm0, %v96_v4, 0  ;;  %v196_v9 = vsel %vm105_vm0, %v187_v5, 0  ;;  %v67_v27 = vrot.slane %v65_v19, 1  ;;  %v70_v28 = vshll.u32 %v60_v18, 16  ;;  %v637_v42 = vld [vmem:[%s872_s0] sm:$0xff]  ;;  %v638_v43 = vld [vmem:[%s872_s0 + $0xc] sm:$0xff] }
   0x7   :  { %112 = vmatpush.bf16.msra.mxu0 %v107_v8  ;;  %149 = vmatpush.bf16.msra.mxu1 %v107_v8  ;;  %v139_v30 = vshll.u32 %v130_v20, 16  ;;  %v284_v32 = vpack.c.b16 %v279_v23, %v279_v23  ;;  %v137_v36 = vor.u32 %v136_v29, %v132_v25  ;;  %v654_v44 = vld [vmem:[%s871_s1 + $0x60] sm:$0xff]  ;;  %v236_v45 = vld [vmem:[%s872_s0 + $0x8] sm:$0x1]  ;;  %v239_v46 = vld [vmem:[%s872_s0 + $0x14] sm:$0x1] }
   0x8   :  { %201 = vmatpush.bf16.msra.mxu2 %v196_v9  ;;  %223 = vmatpush.bf16.msra.mxu3 %v196_v9  ;;  %v68_v34 = vor.u32 %v67_v27, %v63_v24  ;;  %v72_v35 = vrot.slane %v70_v28, 1  ;;  %v653_v47 = vld [vmem:[%s871_s1 + $0x58] sm:$0xff]  ;;  %v607_v48 = vld [vmem:[%s872_s0] sm:$0xe]  ;;  %v649_v49 = vld [vmem:[%s872_s0] sm:$0xf0]  ;;  %v255_v50 = vunpack.c.l.b16 %v236_v45  ;;  %v314_v51 = vunpack.c.l.b16 %v239_v46 }
   0x9   :  { %v141_v37 = vrot.slane %v139_v30, 1  ;;  %v293_v39 = vsel %vm105_vm0, %v284_v32, 0  ;;  %v628_v52 = vld [vmem:[%s872_s0 + $0xc] sm:$0xe]  ;;  %v650_v53 = vld [vmem:[%s872_s0 + $0xc] sm:$0xf0]  ;;  %v608_v54 = vor.u32 %v649_v49, %v607_v48 }
   0xa   :  { %v73_v40 = vsel %vm61_vm1, %v68_v34, %v72_v35  ;;  %v652_v55 = vld [vmem:[%s871_s1 + $0x50] sm:$0xff]  ;;  %v257_v56 = vpack.c.b16 %v255_v50, %v255_v50  ;;  %v629_v57 = vor.u32 %v650_v53, %v628_v52  ;;  %v316_v58 = vpack.c.b16 %v314_v51, %v314_v51  ;;  %v651_v59 = vld [vmem:[%s871_s1 + $0x48] sm:$0xff]  ;;  %v383_v2 = vld [vmem:[%s873_s2 + $0x38] sm:$0xff] }
   0xb   :  { %113 = vmatpush.bf16.msra.mxu0 %v648_v10  ;;  %150 = vmatpush.bf16.msra.mxu1 %v648_v10  ;;  %v142_v41 = vsel %vm61_vm1, %v137_v36, %v141_v37  ;;  %v259_v60 = vrot.slane %v608_v54, 1  ;;  %v382_v5 = vld [vmem:[%s873_s2 + $0x30] sm:$0xff]  ;;  %v381_v6 = vld [vmem:[%s873_s2 + $0x28] sm:$0xff]  ;;  %v380_v7 = vld [vmem:[%s873_s2 + $0x20] sm:$0xff]  ;;  %vm458_vm9 = vcmask 31744   ;;  %vm526_vm10 = vcmask 519168  }
   0xc   :  { %202 = vmatpush.bf16.msra.mxu2 %v642_v15  ;;  %224 = vmatpush.bf16.msra.mxu3 %v642_v15  ;;  %v260_v61 = vrot.slane %v257_v56, 1  ;;  %v317_v62 = vrot.slane %v629_v57, 1  ;;  %v318_v63 = vrot.slane %v316_v58, 1  ;;  %v379_v8 = vld [vmem:[%s873_s2 + $0x18] sm:$0xff]  ;;  %v378_v9 = vld [vmem:[%s873_s2 + $0x10] sm:$0xff]  ;;  %v377_v12 = vld [vmem:[%s873_s2 + $0x8] sm:$0xff] }
   0xd   :  { %v376_v13 = vld [vmem:[%s873_s2] sm:$0xff] }
   0xe   :  { %v261_v0 = vsel %vm258_vm3, %v259_v60, %v260_v61  ;;  %v319_v1 = vsel %vm258_vm3, %v317_v62, %v318_v63 }
   0xf   :  { %114 = vmatpush.bf16.msra.mxu0 %v647_v16  ;;  %151 = vmatpush.bf16.msra.mxu1 %v647_v16 }
  0x10   :  { %203 = vmatpush.bf16.msra.mxu2 %v641_v22  ;;  %225 = vmatpush.bf16.msra.mxu3 %v641_v22 }
  0x13   :  { %115 = vmatpush.bf16.msra.mxu0 %v646_v26  ;;  %152 = vmatpush.bf16.msra.mxu1 %v646_v26 }
  0x14   :  { %204 = vmatpush.bf16.msra.mxu2 %v640_v31  ;;  %226 = vmatpush.bf16.msra.mxu3 %v640_v31 }
  0x17   :  { %116 = vmatpush.bf16.msra.mxu0 %v645_v33  ;;  %153 = vmatpush.bf16.msra.mxu1 %v645_v33 }
  0x18   :  { %205 = vmatpush.bf16.msra.mxu2 %v639_v38  ;;  %227 = vmatpush.bf16.msra.mxu3 %v639_v38 }
  0x1a   :  { %564 = vmatmul.msk.bf16.vlgmr.msra.gmra.mxu0 %vm101_vm2, %v73_v40  ;;  %569 = vmatmul.msk.bf16.vlgmr.msra.gmra.mxu1 %vm101_vm2, %v142_v41 }
  0x1b   :  { %298 = vmatpush.bf16.msrb.mxu0 %v293_v39  ;;  %326 = vmatpush.bf16.msrb.mxu1 %v293_v39 }
  0x1c   :  { %590 = vmatmul.msk.bf16.vlgmr.msra.gmra.mxu2 %vm101_vm2, %v637_v42  ;;  %595 = vmatmul.msk.bf16.vlgmr.msra.gmra.mxu3 %vm101_vm2, %v638_v43 }
  0x1d   :  { %395 = vmatpush.msrb.mxu2 %v383_v2  ;;  %418 = vmatpush.msrb.mxu3 %v383_v2 }
  0x1f   :  { %299 = vmatpush.bf16.msrb.mxu0 %v654_v44  ;;  %327 = vmatpush.bf16.msrb.mxu1 %v654_v44 }
  0x20   :  { %396 = vmatpush.msrb.mxu2 %v382_v5  ;;  %419 = vmatpush.msrb.mxu3 %v382_v5 }
  0x22   :  { %397 = vmatpush.msrb.mxu2 %v381_v6  ;;  %420 = vmatpush.msrb.mxu3 %v381_v6  ;;  %v457_v6 = vld [vmem:[%s874_s3] sm:$0xf] }
  0x23   :  { %300 = vmatpush.bf16.msrb.mxu0 %v653_v47  ;;  %328 = vmatpush.bf16.msrb.mxu1 %v653_v47 }
  0x24   :  { %398 = vmatpush.msrb.mxu2 %v380_v7  ;;  %421 = vmatpush.msrb.mxu3 %v380_v7 }
  0x26   :  { %399 = vmatpush.msrb.mxu2 %v379_v8  ;;  %422 = vmatpush.msrb.mxu3 %v379_v8 }
  0x27   :  { %301 = vmatpush.bf16.msrb.mxu0 %v652_v55  ;;  %329 = vmatpush.bf16.msrb.mxu1 %v652_v55 }
  0x28   :  { %400 = vmatpush.msrb.mxu2 %v378_v9  ;;  %423 = vmatpush.msrb.mxu3 %v378_v9 }
  0x2a   :  { %401 = vmatpush.msrb.mxu2 %v377_v12  ;;  %424 = vmatpush.msrb.mxu3 %v377_v12 }
  0x2b   :  { %302 = vmatpush.bf16.msrb.mxu0 %v651_v59  ;;  %330 = vmatpush.bf16.msrb.mxu1 %v651_v59 }
  0x2c   :  { %402 = vmatpush.msrb.mxu2 %v376_v13  ;;  %425 = vmatpush.msrb.mxu3 %v376_v13 }
  0x2e   :  { %625 = vmatmul.msk.bf16.vlgmr.msrb.gmra.mxu0 %vm101_vm2, %v261_v0  ;;  %630 = vmatmul.msk.bf16.vlgmr.msrb.gmra.mxu1 %vm101_vm2, %v319_v1  ;;  %v660_v0 = vmov 512.0  }
  0x2f   :  { %656 = vrcp.f32 %v660_v0  ;;  %633 = vmatpush.msk.msra.mxu2 %vm105_vm0, %v457_v6  ;;  %635 = vmatpush.msk.msra.mxu3 %vm105_vm0, %v457_v6 }
  0x35   :  { %v657_v1 = vpop.eup %656 }
  0x36   :  { %v431_v2 = vmul.f32 512.0, %v657_v1  ;;  %vm435_vm5 = vweird.f32 %v657_v1 }
  0x97   :  { %v118_v3 = vpop.f32.mrf.mxu0  ;;  %v155_v4 = vpop.f32.mrf.mxu1 }
  0x9f   :  { %v120_v10 = vpop.f32.mrf.mxu0  ;;  %v157_v11 = vpop.f32.mrf.mxu1 }
  0xa0   :  { %v207_v14 = vpop.f32.mrf.mxu2  ;;  %v229_v15 = vpop.f32.mrf.mxu3 }
  0xa1   :  { %v208_v16 = vadd.f32 %v207_v14, %v118_v3  ;;  %v230_v17 = vadd.f32 %v229_v15, %v155_v4  ;;  %v432_v3 = vsub.f32 1.0, %v431_v2 }
  0xa3   :  { %v433_v4 = vmul.f32 %v657_v1, %v432_v3 }
  0xa5   :  { %v434_v5 = vadd.f32 %v657_v1, %v433_v4 }
  0xa7   :  { %v436_v7 = vsel %vm435_vm5, %v657_v1, %v434_v5 }
  0xa8   :  { %v209_v22 = vpop.f32.mrf.mxu2  ;;  %v231_v23 = vpop.f32.mrf.mxu3 }
  0xa9   :  { %v210_v26 = vadd.f32 %v209_v22, %v120_v10  ;;  %v232_v27 = vadd.f32 %v231_v23, %v157_v11  ;;  %v441_v22 = vld [vmem:[%s875_s4] sm:$0x1] }
  0xab   :  { %v304_v18 = vpop.f32.mrf.mxu0  ;;  %v332_v19 = vpop.f32.mrf.mxu1 }
  0xac   :  { %v810_v20 = vadd.f32 %v304_v18, %v208_v16  ;;  %v812_v21 = vadd.f32 %v332_v19, %v230_v17 }
  0xae   :  { %v357_v24 = vmul.f32 %v810_v20, %v810_v20  ;;  %v359_v25 = vmul.f32 %v812_v21, %v812_v21  ;;  %v342_v28 = vsel %vm341_vm4, %v810_v20, 0.0  ;;  %v343_v29 = vsel %vm341_vm4, %v812_v21, 0.0 }
  0xaf   :  { %v344_v36 = vadd.f32 %v343_v29, %v342_v28 }
  0xb0   :  { %v361_v32 = vsel %vm341_vm4, %v357_v24, 0.0  ;;  %v362_v33 = vsel %vm341_vm4, %v359_v25, 0.0 }
  0xb1   :  { %v363_v41 = vadd.f32 %v362_v33, %v361_v32  ;;  %v348_v45 = vsel %vm341_vm4, %v344_v36, 0.0 }
  0xb3   :  { %v306_v30 = vpop.f32.mrf.mxu0  ;;  %v334_v31 = vpop.f32.mrf.mxu1  ;;  %v367_v49 = vsel %vm341_vm4, %v363_v41, 0.0 }
  0xb4   :  { %v824_v34 = vadd.f32 %v306_v30, %v210_v26  ;;  %v826_v35 = vadd.f32 %v334_v31, %v232_v27  ;;  %v454_v26 = vld [vmem:[%s876_s5] sm:$0x1] }
  0xb6   :  { %v345_v37 = vsel %vm341_vm4, %v824_v34, 0.0  ;;  %v358_v38 = vmul.f32 %v824_v34, %v824_v34  ;;  %v346_v39 = vsel %vm341_vm4, %v826_v35, 0.0  ;;  %v360_v40 = vmul.f32 %v826_v35, %v826_v35 }
  0xb7   :  { %v347_v42 = vadd.f32 %v346_v39, %v345_v37 }
  0xb8   :  { %v364_v43 = vsel %vm341_vm4, %v358_v38, 0.0  ;;  %v365_v44 = vsel %vm341_vm4, %v360_v40, 0.0 }
  0xb9   :  { %v349_v46 = vsel %vm341_vm4, %v347_v42, 0.0  ;;  %v366_v47 = vadd.f32 %v365_v44, %v364_v43 }
  0xba   :  { %v350_v48 = vadd.f32 %v349_v46, %v348_v45 }
  0xbb   :  { %v368_v50 = vsel %vm341_vm4, %v366_v47, 0.0 }
  0xbc   :  { %v351_v51 = vrot.slane %v350_v48, 4  ;;  %v369_v52 = vadd.f32 %v368_v50, %v367_v49 }
  0xbe   :  { %v352_v53 = vadd.f32 %v351_v51, %v350_v48  ;;  %v370_v54 = vrot.slane %v369_v52, 4 }
  0xc0   :  { %v353_v55 = vrot.slane %v352_v53, 2  ;;  %v371_v56 = vadd.f32 %v370_v54, %v369_v52 }
  0xc2   :  { %v354_v57 = vadd.f32 %v353_v55, %v352_v53  ;;  %v372_v58 = vrot.slane %v371_v56, 2 }
  0xc4   :  { %v355_v59 = vrot.slane %v354_v57, 1  ;;  %v373_v60 = vadd.f32 %v372_v58, %v371_v56 }
  0xc6   :  { %v356_v61 = vadd.f32 %v355_v59, %v354_v57  ;;  %v374_v62 = vrot.slane %v373_v60, 1 }
  0xc8   :  { %631 = vmatmul.msk.f32.vlgmr.msrb.gmra.mxu2 %vm341_vm4, %v356_v61  ;;  %v375_v63 = vadd.f32 %v374_v62, %v373_v60 }
  0xca   :  { %632 = vmatmul.msk.f32.vlgmr.msrb.gmra.mxu3 %vm341_vm4, %v375_v63 }
 0x14b   :  { %v404_v8 = vpop.f32.mrf.mxu2 }
 0x14c   :  { %v437_v9 = vmul.f32 %v436_v7, %v404_v8 }
 0x14d   :  { %v427_v10 = vpop.f32.mrf.mxu3 }
 0x14e   :  { %v439_v11 = vmul.f32 %v437_v9, %v437_v9  ;;  %v438_v12 = vmul.f32 %v436_v7, %v427_v10 }
 0x150   :  { %v440_v13 = vsub.f32 %v438_v12, %v439_v11 }
 0x152   :  { %v442_v14 = vadd.f32 1e-05, %v440_v13 }
 0x154   :  { %658 = vrsqrt.f32 %v442_v14  ;;  %vm449_vm7 = vweird.f32 %v442_v14 }
 0x15a   :  { %v659_v15 = vpop.eup %658 }
 0x15b   :  { %v444_v16 = vmul.f32 %v659_v15, %v442_v14  ;;  %vm450_vm6 = vweird.f32 %v659_v15 }
 0x15c   :  { %vm451_vm8 = vmor %vm449_vm7, %vm450_vm6 }
 0x15d   :  { %v445_v17 = vmul.f32 %v659_v15, %v444_v16 }
 0x15f   :  { %v446_v18 = vmul.f32 0.5, %v445_v17 }
 0x161   :  { %v447_v19 = vsub.f32 1.5, %v446_v18 }
 0x163   :  { %v448_v23 = vmul.f32 %v659_v15, %v447_v19 }
 0x165   :  { %v452_v24 = vsel %vm451_vm8, %v659_v15, %v448_v23 }
 0x166   :  { %v453_v25 = vmul.f32 %v452_v24, %v441_v22 }
 0x168   :  { %v455_v27 = vmul.f32 %v453_v25, %v437_v9  ;;  %634 = vmatmul.msk.f32.vlgmr.msra.gmra.mxu2 %vm458_vm9, %v453_v25 }
 0x16a   :  { %v456_v28 = vsub.f32 %v454_v26, %v455_v27 }
 0x16c   :  { %636 = vmatmul.msk.f32.vlgmr.msra.gmra.mxu3 %vm458_vm9, %v456_v28 }
 0x1eb   :  { %v482_v29 = vpop.f32.mrf.mxu2 }
 0x1ec   :  { %v508_v30 = vperm.slane %v482_v29, 0 }
 0x1ee   :  { %v509_v31 = vmul.f32 %v508_v30, %v810_v20  ;;  %v510_v33 = vmul.f32 %v508_v30, %v824_v34  ;;  %v511_v36 = vmul.f32 %v508_v30, %v812_v21  ;;  %v512_v37 = vmul.f32 %v508_v30, %v826_v35 }
 0x1ef   :  { %v505_v32 = vpop.f32.mrf.mxu3 }
 0x1f0   :  { %v513_v38 = vperm.slane %v505_v32, 0 }
 0x1f2   :  { %v514_v39 = vadd.f32 %v513_v38, %v509_v31  ;;  %v515_v40 = vadd.f32 %v513_v38, %v510_v33  ;;  %v516_v41 = vadd.f32 %v513_v38, %v511_v36  ;;  %v517_v42 = vadd.f32 %v513_v38, %v512_v37 }
 0x1f4   :  { %v518_v43 = vmax.f32 %v514_v39, 0.0  ;;  %v519_v44 = vmax.f32 %v515_v40, 0.0  ;;  %v520_v45 = vmax.f32 %v516_v41, 0.0  ;;  %v521_v46 = vmax.f32 %v517_v42, 0.0 }
 0x1f6   :  { %v522_v47 = vpack.c.bf16 %v518_v43, %v518_v43  ;;  %v523_v48 = vpack.c.bf16 %v519_v44, %v519_v44  ;;  %v524_v20 = vpack.c.bf16 %v520_v45, %v520_v45  ;;  %v525_v49 = vpack.c.bf16 %v521_v46, %v521_v46 }
 0x1f8   :  { %527 = vst.msk [vmem:[%s877_s6] sm:$0xf] %vm526_vm10, %v522_v47 }
 0x1f9   :  { %528 = vst.msk [vmem:[%s877_s6 + $0x4] sm:$0xf] %vm526_vm10, %v523_v48 }
 0x1fa   :  { %529 = vst.msk [vmem:[%s877_s6 + $0x8] sm:$0xf] %vm526_vm10, %v524_v20 }
 0x1fb   :  { %530 = vst.msk [vmem:[%s877_s6 + $0xc] sm:$0xf] %vm526_vm10, %v525_v49 }

// kernel: unet_forward.24
= control target key start
LH: loop header
LB: loop body
LE: loop exit
PB: predicated region body
PF: predicated region fallthrough
CT: control target
= control target key end

     0   :  { %vm273_vm0 = vcmask 27648   ;;  %s635_s0 = inlined_call_operand.vmem [shape: bf16[128,4], index: 0, kind: input, shape index: {}]   ;;  %s636_s1 = inlined_call_operand.vmem [shape: bf16[128,4], index: 1, kind: input, shape index: {}]   ;;  %s637_s2 = inlined_call_operand.vmem [shape: bf16[128,4], index: 2, kind: input, shape index: {}]   ;;  %s638_s3 = inlined_call_operand.vmem [shape: bf16[128,4], index: 3, kind: input, shape index: {}]   ;;  %s639_s4 = inlined_call_operand.vmem [shape: bf16[128,4], index: 4, kind: output, shape index: {}]  }
   0x1   :  { %v295_v0 = vld [vmem:[%s635_s0] sm:$0xff]   ;;  %v422_v8 = vld [vmem:[%s635_s0 + $0x8] sm:$0xff]   ;;  %v423_v24 = vld [vmem:[%s635_s0 + $0x10] sm:$0xff]  }
   0x2   :  { %v327_v1 = vld [vmem:[%s636_s1] sm:$0xff]   ;;  %v296_v3 = vunpack.c.l.bf16 %v295_v0  ;;  %v297_v7 = vunpack.c.h.bf16 %v295_v0  ;;  %v429_v9 = vld [vmem:[%s636_s1 + $0x8] sm:$0xff]   ;;  %v300_v17 = vunpack.c.l.bf16 %v422_v8  ;;  %v430_v25 = vld [vmem:[%s636_s1 + $0x10] sm:$0xff]   ;;  %v301_v28 = vunpack.c.h.bf16 %v422_v8 }
   0x3   :  { %v359_v2 = vld [vmem:[%s637_s2] sm:$0xff]   ;;  %v328_v4 = vunpack.c.l.bf16 %v327_v1  ;;  %v329_v11 = vunpack.c.h.bf16 %v327_v1  ;;  %v436_v14 = vld [vmem:[%s637_s2 + $0x8] sm:$0xff]   ;;  %v332_v18 = vunpack.c.l.bf16 %v429_v9  ;;  %v437_v26 = vld [vmem:[%s637_s2 + $0x10] sm:$0xff]   ;;  %v333_v29 = vunpack.c.h.bf16 %v429_v9 }
   0x4   :  { %v360_v5 = vunpack.c.l.bf16 %v359_v2  ;;  %v391_v6 = vld [vmem:[%s638_s3] sm:$0xff]   ;;  %v361_v12 = vunpack.c.h.bf16 %v359_v2  ;;  %v443_v15 = vld [vmem:[%s638_s3 + $0x8] sm:$0xff]   ;;  %v364_v19 = vunpack.c.l.bf16 %v436_v14  ;;  %v365_v30 = vunpack.c.h.bf16 %v436_v14  ;;  %v444_v35 = vld [vmem:[%s638_s3 + $0x10] sm:$0xff]  }
   0x5   :  { %v392_v10 = vunpack.c.l.bf16 %v391_v6  ;;  %v393_v13 = vunpack.c.h.bf16 %v391_v6  ;;  %v81_v16 = vmax.f32 %v296_v3, %v328_v4  ;;  %v82_v21 = vmax.f32 %v297_v7, %v329_v11  ;;  %v424_v44 = vld [vmem:[%s635_s0 + $0x18] sm:$0xff]   ;;  %v425_v0 = vld [vmem:[%s635_s0 + $0x20] sm:$0xff]  }
   0x6   :  { %v396_v23 = vunpack.c.l.bf16 %v443_v15  ;;  %v83_v27 = vmax.f32 %v300_v17, %v332_v18  ;;  %v397_v34 = vunpack.c.h.bf16 %v443_v15  ;;  %v84_v36 = vmax.f32 %v301_v28, %v333_v29  ;;  %v431_v45 = vld [vmem:[%s636_s1 + $0x18] sm:$0xff]   ;;  %v432_v1 = vld [vmem:[%s636_s1 + $0x20] sm:$0xff]  }
   0x7   :  { %v177_v20 = vmax.f32 %v360_v5, %v392_v10  ;;  %v178_v22 = vmax.f32 %v361_v12, %v393_v13  ;;  %v304_v37 = vunpack.c.l.bf16 %v423_v24  ;;  %v336_v38 = vunpack.c.l.bf16 %v430_v25  ;;  %v438_v50 = vld [vmem:[%s637_s2 + $0x18] sm:$0xff]   ;;  %v439_v6 = vld [vmem:[%s637_s2 + $0x20] sm:$0xff]  }
   0x8   :  { %v179_v33 = vmax.f32 %v364_v19, %v396_v23  ;;  %v368_v39 = vunpack.c.l.bf16 %v437_v26  ;;  %v180_v43 = vmax.f32 %v365_v30, %v397_v34  ;;  %v400_v47 = vunpack.c.l.bf16 %v444_v35  ;;  %v445_v51 = vld [vmem:[%s638_s3 + $0x18] sm:$0xff]   ;;  %v446_v11 = vld [vmem:[%s638_s3 + $0x20] sm:$0xff]  }
   0x9   :  { %v241_v31 = vmax.f32 %v81_v16, %v177_v20  ;;  %v242_v32 = vmax.f32 %v82_v21, %v178_v22  ;;  %v85_v46 = vmax.f32 %v304_v37, %v336_v38  ;;  %v305_v48 = vunpack.c.h.bf16 %v423_v24  ;;  %v426_v20 = vld [vmem:[%s635_s0 + $0x28] sm:$0xff]  }
   0xa   :  { %v243_v42 = vmax.f32 %v83_v27, %v179_v33  ;;  %v337_v49 = vunpack.c.h.bf16 %v430_v25  ;;  %v244_v53 = vmax.f32 %v84_v36, %v180_v43  ;;  %v369_v54 = vunpack.c.h.bf16 %v437_v26  ;;  %v433_v21 = vld [vmem:[%s636_s1 + $0x28] sm:$0xff]  }
   0xb   :  { %v257_v40 = vpack.c.bf16 %v241_v31, %v241_v31  ;;  %v258_v41 = vpack.c.bf16 %v242_v32, %v242_v32  ;;  %v401_v55 = vunpack.c.h.bf16 %v444_v35  ;;  %v181_v56 = vmax.f32 %v368_v39, %v400_v47  ;;  %v440_v26 = vld [vmem:[%s637_s2 + $0x28] sm:$0xff]  }
   0xc   :  { %v259_v52 = vpack.c.bf16 %v243_v42, %v243_v42  ;;  %v86_v57 = vmax.f32 %v305_v48, %v337_v49  ;;  %v308_v58 = vunpack.c.l.bf16 %v424_v44  ;;  %v340_v59 = vunpack.c.l.bf16 %v431_v45  ;;  %v447_v27 = vld [vmem:[%s638_s3 + $0x28] sm:$0xff]  }
   0xd   :  { %274 = vst.msk [vmem:[%s639_s4] sm:$0xf] %vm273_vm0, %v257_v40  ;;  %v260_v60 = vpack.c.bf16 %v244_v53, %v244_v53  ;;  %v182_v61 = vmax.f32 %v369_v54, %v401_v55  ;;  %v372_v62 = vunpack.c.l.bf16 %v438_v50  ;;  %v404_v63 = vunpack.c.l.bf16 %v445_v51  ;;  %v427_v40 = vld [vmem:[%s635_s0 + $0x30] sm:$0xff]  }
   0xe   :  { %275 = vst.msk [vmem:[%s639_s4 + $0x4] sm:$0xf] %vm273_vm0, %v258_v41  ;;  %v245_v2 = vmax.f32 %v85_v46, %v181_v56  ;;  %v87_v3 = vmax.f32 %v308_v58, %v340_v59  ;;  %v309_v4 = vunpack.c.h.bf16 %v424_v44  ;;  %v341_v5 = vunpack.c.h.bf16 %v431_v45  ;;  %v434_v41 = vld [vmem:[%s636_s1 + $0x30] sm:$0xff]  }
   0xf   :  { %276 = vst.msk [vmem:[%s639_s4 + $0x8] sm:$0xf] %vm273_vm0, %v259_v52  ;;  %v246_v7 = vmax.f32 %v86_v57, %v182_v61  ;;  %v183_v8 = vmax.f32 %v372_v62, %v404_v63  ;;  %v373_v9 = vunpack.c.h.bf16 %v438_v50  ;;  %v405_v10 = vunpack.c.h.bf16 %v445_v51  ;;  %v441_v46 = vld [vmem:[%s637_s2 + $0x30] sm:$0xff]   ;;  %v435_v61 = vld [vmem:[%s636_s1 + $0x38] sm:$0xff]  }
  0x10   :  { %277 = vst.msk [vmem:[%s639_s4 + $0xc] sm:$0xf] %vm273_vm0, %v260_v60  ;;  %v261_v12 = vpack.c.bf16 %v245_v2, %v245_v2  ;;  %v88_v13 = vmax.f32 %v309_v4, %v341_v5  ;;  %v312_v14 = vunpack.c.l.bf16 %v425_v0  ;;  %v344_v15 = vunpack.c.l.bf16 %v432_v1  ;;  %v448_v51 = vld [vmem:[%s638_s3 + $0x30] sm:$0xff]   ;;  %v428_v60 = vld [vmem:[%s635_s0 + $0x38] sm:$0xff]  }
  0x11   :  { %v262_v16 = vpack.c.bf16 %v246_v7, %v246_v7  ;;  %v247_v17 = vmax.f32 %v87_v3, %v183_v8  ;;  %v184_v18 = vmax.f32 %v373_v9, %v405_v10  ;;  %v376_v19 = vunpack.c.l.bf16 %v439_v6  ;;  %v442_v2 = vld [vmem:[%s637_s2 + $0x38] sm:$0xff]  }
  0x12   :  { %278 = vst.msk [vmem:[%s639_s4 + $0x10] sm:$0xf] %vm273_vm0, %v261_v12  ;;  %v89_v22 = vmax.f32 %v312_v14, %v344_v15  ;;  %v408_v23 = vunpack.c.l.bf16 %v446_v11  ;;  %v313_v24 = vunpack.c.h.bf16 %v425_v0  ;;  %v345_v25 = vunpack.c.h.bf16 %v432_v1  ;;  %v449_v3 = vld [vmem:[%s638_s3 + $0x38] sm:$0xff]  }
  0x13   :  { %279 = vst.msk [vmem:[%s639_s4 + $0x14] sm:$0xf] %vm273_vm0, %v262_v16  ;;  %v263_v28 = vpack.c.bf16 %v247_v17, %v247_v17  ;;  %v248_v29 = vmax.f32 %v88_v13, %v184_v18  ;;  %v377_v30 = vunpack.c.h.bf16 %v439_v6  ;;  %v409_v31 = vunpack.c.h.bf16 %v446_v11 }
  0x14   :  { %v185_v32 = vmax.f32 %v376_v19, %v408_v23  ;;  %v90_v33 = vmax.f32 %v313_v24, %v345_v25  ;;  %v316_v34 = vunpack.c.l.bf16 %v426_v20  ;;  %v348_v35 = vunpack.c.l.bf16 %v433_v21 }
  0x15   :  { %280 = vst.msk [vmem:[%s639_s4 + $0x18] sm:$0xf] %vm273_vm0, %v263_v28  ;;  %v264_v36 = vpack.c.bf16 %v248_v29, %v248_v29  ;;  %v186_v37 = vmax.f32 %v377_v30, %v409_v31  ;;  %v380_v38 = vunpack.c.l.bf16 %v440_v26  ;;  %v412_v39 = vunpack.c.l.bf16 %v447_v27 }
  0x16   :  { %v249_v42 = vmax.f32 %v89_v22, %v185_v32  ;;  %v91_v43 = vmax.f32 %v316_v34, %v348_v35  ;;  %v317_v44 = vunpack.c.h.bf16 %v426_v20  ;;  %v349_v45 = vunpack.c.h.bf16 %v433_v21 }
  0x17   :  { %281 = vst.msk [vmem:[%s639_s4 + $0x1c] sm:$0xf] %vm273_vm0, %v264_v36  ;;  %v250_v47 = vmax.f32 %v90_v33, %v186_v37  ;;  %v187_v48 = vmax.f32 %v380_v38, %v412_v39  ;;  %v381_v49 = vunpack.c.h.bf16 %v440_v26  ;;  %v413_v50 = vunpack.c.h.bf16 %v447_v27 }
  0x18   :  { %v265_v52 = vpack.c.bf16 %v249_v42, %v249_v42  ;;  %v92_v53 = vmax.f32 %v317_v44, %v349_v45  ;;  %v320_v54 = vunpack.c.l.bf16 %v427_v40  ;;  %v352_v55 = vunpack.c.l.bf16 %v434_v41 }
  0x19   :  { %v266_v56 = vpack.c.bf16 %v250_v47, %v250_v47  ;;  %v251_v57 = vmax.f32 %v91_v43, %v187_v48  ;;  %v188_v58 = vmax.f32 %v381_v49, %v413_v50  ;;  %v384_v59 = vunpack.c.l.bf16 %v441_v46 }
  0x1a   :  { %282 = vst.msk [vmem:[%s639_s4 + $0x20] sm:$0xf] %vm273_vm0, %v265_v52  ;;  %v93_v62 = vmax.f32 %v320_v54, %v352_v55  ;;  %v416_v63 = vunpack.c.l.bf16 %v448_v51  ;;  %v321_v0 = vunpack.c.h.bf16 %v427_v40  ;;  %v353_v1 = vunpack.c.h.bf16 %v434_v41 }
  0x1b   :  { %283 = vst.msk [vmem:[%s639_s4 + $0x24] sm:$0xf] %vm273_vm0, %v266_v56  ;;  %v267_v4 = vpack.c.bf16 %v251_v57, %v251_v57  ;;  %v252_v5 = vmax.f32 %v92_v53, %v188_v58  ;;  %v385_v6 = vunpack.c.h.bf16 %v441_v46  ;;  %v417_v7 = vunpack.c.h.bf16 %v448_v51 }
  0x1c   :  { %v189_v8 = vmax.f32 %v384_v59, %v416_v63  ;;  %v94_v9 = vmax.f32 %v321_v0, %v353_v1  ;;  %v324_v10 = vunpack.c.l.bf16 %v428_v60  ;;  %v356_v11 = vunpack.c.l.bf16 %v435_v61 }
  0x1d   :  { %284 = vst.msk [vmem:[%s639_s4 + $0x28] sm:$0xf] %vm273_vm0, %v267_v4  ;;  %v268_v12 = vpack.c.bf16 %v252_v5, %v252_v5  ;;  %v190_v13 = vmax.f32 %v385_v6, %v417_v7  ;;  %v388_v14 = vunpack.c.l.bf16 %v442_v2  ;;  %v420_v15 = vunpack.c.l.bf16 %v449_v3 }
  0x1e   :  { %v253_v16 = vmax.f32 %v93_v62, %v189_v8  ;;  %v95_v17 = vmax.f32 %v324_v10, %v356_v11  ;;  %v325_v18 = vunpack.c.h.bf16 %v428_v60  ;;  %v357_v19 = vunpack.c.h.bf16 %v435_v61 }
  0x1f   :  { %285 = vst.msk [vmem:[%s639_s4 + $0x2c] sm:$0xf] %vm273_vm0, %v268_v12  ;;  %v254_v20 = vmax.f32 %v94_v9, %v190_v13  ;;  %v191_v21 = vmax.f32 %v388_v14, %v420_v15  ;;  %v389_v22 = vunpack.c.h.bf16 %v442_v2  ;;  %v421_v23 = vunpack.c.h.bf16 %v449_v3 }
  0x20   :  { %v269_v24 = vpack.c.bf16 %v253_v16, %v253_v16  ;;  %v96_v25 = vmax.f32 %v325_v18, %v357_v19 }
  0x21   :  { %v270_v26 = vpack.c.bf16 %v254_v20, %v254_v20  ;;  %v255_v27 = vmax.f32 %v95_v17, %v191_v21  ;;  %v192_v28 = vmax.f32 %v389_v22, %v421_v23 }
  0x22   :  { %286 = vst.msk [vmem:[%s639_s4 + $0x30] sm:$0xf] %vm273_vm0, %v269_v24 }
  0x23   :  { %287 = vst.msk [vmem:[%s639_s4 + $0x34] sm:$0xf] %vm273_vm0, %v270_v26  ;;  %v271_v29 = vpack.c.bf16 %v255_v27, %v255_v27  ;;  %v256_v30 = vmax.f32 %v96_v25, %v192_v28 }
  0x25   :  { %288 = vst.msk [vmem:[%s639_s4 + $0x38] sm:$0xf] %vm273_vm0, %v271_v29  ;;  %v272_v31 = vpack.c.bf16 %v256_v30, %v256_v30 }
  0x27   :  { %289 = vst.msk [vmem:[%s639_s4 + $0x3c] sm:$0xf] %vm273_vm0, %v272_v31 }

// kernel: unet_forward.25
= control target key start
LH: loop header
LB: loop body
LE: loop exit
PB: predicated region body
PF: predicated region fallthrough
CT: control target
= control target key end

     0   :  { %vm72_vm0 = vcmask 1043456   ;;  %vm68_vm1 = vcmask 326656   ;;  %vm241_vm2 = vcmask 523264   ;;  %vm346_vm7 = vcmask 64512   ;;  %s646_s1 = inlined_call_operand.vmem [shape: bf16[3,40,64], index: 1, kind: input, shape index: {}]   ;;  %s647_s0 = inlined_call_operand.vmem [shape: bf16[2,10,40], index: 0, kind: input, shape index: {}]   ;;  %s648_s2 = inlined_call_operand.vmem [shape: f32[64,8], index: 2, kind: input, shape index: {}]   ;;  %s649_s3 = inlined_call_operand.vmem [shape: f32[8,64], index: 3, kind: input, shape index: {}]   ;;  %s650_s4 = inlined_call_operand.vmem [shape: f32[1,8], index: 4, kind: input, shape index: {}]   ;;  %s651_s5 = inlined_call_operand.vmem [shape: f32[1,8], index: 5, kind: input, shape index: {}]   ;;  %s652_s6 = inlined_call_operand.vmem [shape: bf16[2,8,64], index: 6, kind: output, shape index: {}]  }
   0x1   :  { %v414_v0 = vld [vmem:[%s646_s1 + $0x24] sm:$0xf]  ;;  %v30_v1 = vld [vmem:[%s646_s1 + $0x10] sm:$0xf]  ;;  %v417_v4 = vld [vmem:[%s647_s0] sm:$0xf] }
   0x2   :  { %v62_v2 = vunpack.c.l.b16 %v414_v0  ;;  %v126_v3 = vunpack.c.l.b16 %v30_v1  ;;  %v472_v5 = vld [vmem:[%s647_s0] sm:$0x10]  ;;  %v430_v6 = vld [vmem:[%s647_s0 + $0x8] sm:$0xf]  ;;  %v473_v10 = vld [vmem:[%s647_s0 + $0x8] sm:$0x10] }
   0x3   :  { %v418_v9 = vor.u32 %v472_v5, %v417_v4  ;;  %v431_v11 = vor.u32 %v473_v10, %v430_v6  ;;  %v447_v12 = vld [vmem:[%s646_s1 + $0x38] sm:$0xf]  ;;  %v475_v16 = vld [vmem:[%s646_s1 + $0x1c] sm:$0xff]  ;;  %v471_v19 = vld [vmem:[%s646_s1 + $0x8] sm:$0xff]  ;;  %vm403_vm8 = vcmask 519168  }
   0x4   :  { %v65_v7 = vpack.c.b16 %v62_v2, %v62_v2  ;;  %v129_v8 = vpack.c.b16 %v126_v3, %v126_v3  ;;  %v192_v18 = vunpack.c.l.b16 %v447_v12  ;;  %v474_v25 = vld [vmem:[%s646_s1 + $0x14] sm:$0xff]  ;;  %v470_v26 = vld [vmem:[%s646_s1] sm:$0xff]  ;;  %v25_v31 = vld [vmem:[%s647_s0 + $0x8] sm:$0xf] }
   0x5   :  { %v49_v15 = vshll.u32 %v418_v9, 16  ;;  %v97_v17 = vshll.u32 %v431_v11, 16  ;;  %v47_v20 = vshrl.u32 %v418_v9, 16  ;;  %v95_v22 = vshrl.u32 %v431_v11, 16  ;;  %v24_v30 = vld [vmem:[%s647_s0] sm:$0xf] }
   0x6   :  { %v74_v13 = vsel %vm72_vm0, %v65_v7, 0  ;;  %v136_v14 = vsel %vm72_vm0, %v129_v8, 0  ;;  %v195_v24 = vpack.c.b16 %v192_v18, %v192_v18  ;;  %v479_v32 = vld [vmem:[%s646_s1 + $0x30] sm:$0xff]  ;;  %v478_v33 = vld [vmem:[%s646_s1 + $0x28] sm:$0xff]  ;;  %v450_v34 = vld [vmem:[%s647_s0] sm:$0xe] }
   0x7   :  { %81 = vmatpush.bf16.msra.mxu0 %v74_v13  ;;  %109 = vmatpush.bf16.msra.mxu1 %v74_v13  ;;  %v51_v21 = vrot.slane %v49_v15, 1  ;;  %v99_v23 = vrot.slane %v97_v17, 1  ;;  %v476_v35 = vld [vmem:[%s647_s0] sm:$0x10]  ;;  %v463_v36 = vld [vmem:[%s647_s0 + $0x8] sm:$0xe] }
   0x8   :  { %143 = vmatpush.bf16.msra.mxu2 %v136_v14  ;;  %159 = vmatpush.bf16.msra.mxu3 %v136_v14  ;;  %v202_v29 = vsel %vm72_vm0, %v195_v24, 0  ;;  %v477_v37 = vld [vmem:[%s647_s0 + $0x8] sm:$0x10]  ;;  %v451_v38 = vor.u32 %v476_v35, %v450_v34  ;;  %v271_v42 = vld [vmem:[%s648_s2 + $0x38] sm:$0xff]  ;;  %v270_v43 = vld [vmem:[%s648_s2 + $0x30] sm:$0xff]  ;;  %v485_v24 = vmov 128.0  }
   0x9   :  { %v52_v27 = vor.u32 %v51_v21, %v47_v20  ;;  %v100_v28 = vor.u32 %v99_v23, %v95_v22  ;;  %v464_v39 = vor.u32 %v477_v37, %v463_v36  ;;  %v269_v44 = vld [vmem:[%s648_s2 + $0x28] sm:$0xff]  ;;  %v268_v45 = vld [vmem:[%s648_s2 + $0x20] sm:$0xff]  ;;  %v267_v46 = vld [vmem:[%s648_s2 + $0x18] sm:$0xff]  ;;  %481 = vrcp.f32 %v485_v24 }
   0xa   :  { %v182_v40 = vrot.slane %v451_v38, 1  ;;  %v266_v47 = vld [vmem:[%s648_s2 + $0x10] sm:$0xff]  ;;  %v265_v48 = vld [vmem:[%s648_s2 + $0x8] sm:$0xff]  ;;  %v264_v51 = vld [vmem:[%s648_s2] sm:$0xff] }
   0xb   :  { %82 = vmatpush.bf16.msra.mxu0 %v475_v16  ;;  %110 = vmatpush.bf16.msra.mxu1 %v475_v16  ;;  %v222_v41 = vrot.slane %v464_v39, 1 }
   0xc   :  { %144 = vmatpush.bf16.msra.mxu2 %v471_v19  ;;  %160 = vmatpush.bf16.msra.mxu3 %v471_v19 }
   0xf   :  { %83 = vmatpush.bf16.msra.mxu0 %v474_v25  ;;  %111 = vmatpush.bf16.msra.mxu1 %v474_v25  ;;  %v482_v25 = vpop.eup %481 }
  0x10   :  { %145 = vmatpush.bf16.msra.mxu2 %v470_v26  ;;  %161 = vmatpush.bf16.msra.mxu3 %v470_v26  ;;  %v319_v26 = vmul.f32 128.0, %v482_v25  ;;  %vm323_vm3 = vweird.f32 %v482_v25 }
  0x12   :  { %427 = vmatmul.msk.bf16.vlgmr.msra.gmra.mxu0 %vm68_vm1, %v52_v27  ;;  %432 = vmatmul.msk.bf16.vlgmr.msra.gmra.mxu1 %vm68_vm1, %v100_v28  ;;  %v320_v27 = vsub.f32 1.0, %v319_v26 }
  0x13   :  { %209 = vmatpush.bf16.msrb.mxu0 %v202_v29  ;;  %231 = vmatpush.bf16.msrb.mxu1 %v202_v29 }
  0x14   :  { %441 = vmatmul.msk.bf16.vlgmr.msra.gmra.mxu2 %vm68_vm1, %v24_v30  ;;  %442 = vmatmul.msk.bf16.vlgmr.msra.gmra.mxu3 %vm68_vm1, %v25_v31  ;;  %v321_v28 = vmul.f32 %v482_v25, %v320_v27  ;;  %v345_v30 = vld [vmem:[%s649_s3] sm:$0xff] }
  0x15   :  { %283 = vmatpush.msrb.mxu2 %v271_v42  ;;  %306 = vmatpush.msrb.mxu3 %v271_v42 }
  0x16   :  { %v322_v29 = vadd.f32 %v482_v25, %v321_v28 }
  0x17   :  { %210 = vmatpush.bf16.msrb.mxu0 %v479_v32  ;;  %232 = vmatpush.bf16.msrb.mxu1 %v479_v32 }
  0x18   :  { %284 = vmatpush.msrb.mxu2 %v270_v43  ;;  %307 = vmatpush.msrb.mxu3 %v270_v43  ;;  %v324_v31 = vsel %vm323_vm3, %v482_v25, %v322_v29 }
  0x1a   :  { %285 = vmatpush.msrb.mxu2 %v269_v44  ;;  %308 = vmatpush.msrb.mxu3 %v269_v44  ;;  %v329_v44 = vld [vmem:[%s650_s4] sm:$0x1] }
  0x1b   :  { %211 = vmatpush.bf16.msrb.mxu0 %v478_v33  ;;  %233 = vmatpush.bf16.msrb.mxu1 %v478_v33 }
  0x1c   :  { %286 = vmatpush.msrb.mxu2 %v268_v45  ;;  %309 = vmatpush.msrb.mxu3 %v268_v45 }
  0x1e   :  { %287 = vmatpush.msrb.mxu2 %v267_v46  ;;  %310 = vmatpush.msrb.mxu3 %v267_v46 }
  0x20   :  { %288 = vmatpush.msrb.mxu2 %v266_v47  ;;  %311 = vmatpush.msrb.mxu3 %v266_v47 }
  0x22   :  { %460 = vmatmul.msk.bf16.vlgmr.msrb.gmra.mxu0 %vm68_vm1, %v182_v40  ;;  %465 = vmatmul.msk.bf16.vlgmr.msrb.gmra.mxu1 %vm68_vm1, %v222_v41 }
  0x23   :  { %289 = vmatpush.msrb.mxu2 %v265_v48  ;;  %312 = vmatpush.msrb.mxu3 %v265_v48  ;;  %v342_v48 = vld [vmem:[%s651_s5] sm:$0x1] }
  0x25   :  { %290 = vmatpush.msrb.mxu2 %v264_v51  ;;  %313 = vmatpush.msrb.mxu3 %v264_v51 }
  0x27   :  { %365 = vmatpush.msra.mxu2 %v345_v30  ;;  %388 = vmatpush.msra.mxu3 %v345_v30 }
  0x8f   :  { %v85_v49 = vpop.f32.mrf.mxu0  ;;  %v113_v50 = vpop.f32.mrf.mxu1 }
  0x97   :  { %v147_v52 = vpop.f32.mrf.mxu2  ;;  %v163_v53 = vpop.f32.mrf.mxu3 }
  0x98   :  { %v87_v54 = vpop.f32.mrf.mxu0  ;;  %v115_v55 = vpop.f32.mrf.mxu1  ;;  %v148_v56 = vadd.f32 %v147_v52, %v85_v49  ;;  %v164_v57 = vadd.f32 %v163_v53, %v113_v50 }
  0x9f   :  { %v149_v58 = vpop.f32.mrf.mxu2  ;;  %v165_v59 = vpop.f32.mrf.mxu3 }
  0xa0   :  { %v213_v60 = vpop.f32.mrf.mxu0  ;;  %v235_v61 = vpop.f32.mrf.mxu1 }
  0xa1   :  { %v611_v62 = vadd.f32 %v213_v60, %v148_v56  ;;  %v613_v63 = vadd.f32 %v235_v61, %v164_v57 }
  0xa3   :  { %v242_v0 = vsel %vm241_vm2, %v611_v62, 0.0  ;;  %v252_v1 = vmul.f32 %v611_v62, %v611_v62  ;;  %v243_v2 = vsel %vm241_vm2, %v613_v63, 0.0  ;;  %v253_v3 = vmul.f32 %v613_v63, %v613_v63 }
  0xa4   :  { %v244_v4 = vadd.f32 %v243_v2, %v242_v0 }
  0xa5   :  { %v254_v5 = vsel %vm241_vm2, %v252_v1, 0.0  ;;  %v255_v6 = vsel %vm241_vm2, %v253_v3, 0.0 }
  0xa6   :  { %v245_v7 = vsel %vm241_vm2, %v244_v4, 0.0  ;;  %v256_v8 = vadd.f32 %v255_v6, %v254_v5 }
  0xa7   :  { %v246_v9 = vrot.slane %v245_v7, 4 }
  0xa8   :  { %v257_v10 = vsel %vm241_vm2, %v256_v8, 0.0  ;;  %v215_v11 = vpop.f32.mrf.mxu0  ;;  %v237_v12 = vpop.f32.mrf.mxu1 }
  0xa9   :  { %v247_v13 = vadd.f32 %v246_v9, %v245_v7  ;;  %v258_v14 = vrot.slane %v257_v10, 4 }
  0xab   :  { %v248_v15 = vrot.slane %v247_v13, 2  ;;  %v259_v16 = vadd.f32 %v258_v14, %v257_v10 }
  0xad   :  { %v249_v17 = vadd.f32 %v248_v15, %v247_v13  ;;  %v260_v18 = vrot.slane %v259_v16, 2 }
  0xaf   :  { %v250_v19 = vrot.slane %v249_v17, 1  ;;  %v261_v20 = vadd.f32 %v260_v18, %v259_v16 }
  0xb1   :  { %v251_v21 = vadd.f32 %v250_v19, %v249_v17  ;;  %v262_v22 = vrot.slane %v261_v20, 1 }
  0xb3   :  { %466 = vmatmul.msk.f32.vlgmr.msrb.gmra.mxu2 %vm241_vm2, %v251_v21  ;;  %v263_v23 = vadd.f32 %v262_v22, %v261_v20 }
  0xb5   :  { %467 = vmatmul.msk.f32.vlgmr.msrb.gmra.mxu3 %vm241_vm2, %v263_v23 }
 0x136   :  { %v292_v32 = vpop.f32.mrf.mxu2 }
 0x137   :  { %v325_v33 = vmul.f32 %v324_v31, %v292_v32 }
 0x138   :  { %v315_v34 = vpop.f32.mrf.mxu3 }
 0x139   :  { %v327_v35 = vmul.f32 %v325_v33, %v325_v33  ;;  %v326_v36 = vmul.f32 %v324_v31, %v315_v34 }
 0x13b   :  { %v328_v37 = vsub.f32 %v326_v36, %v327_v35 }
 0x13d   :  { %v330_v38 = vadd.f32 1e-05, %v328_v37 }
 0x13f   :  { %483 = vrsqrt.f32 %v330_v38  ;;  %vm337_vm5 = vweird.f32 %v330_v38 }
 0x145   :  { %v484_v39 = vpop.eup %483 }
 0x146   :  { %v332_v40 = vmul.f32 %v484_v39, %v330_v38  ;;  %vm338_vm4 = vweird.f32 %v484_v39 }
 0x147   :  { %vm339_vm6 = vmor %vm337_vm5, %vm338_vm4 }
 0x148   :  { %v333_v41 = vmul.f32 %v484_v39, %v332_v40 }
 0x14a   :  { %v334_v42 = vmul.f32 0.5, %v333_v41 }
 0x14c   :  { %v335_v43 = vsub.f32 1.5, %v334_v42 }
 0x14e   :  { %v336_v45 = vmul.f32 %v484_v39, %v335_v43 }
 0x150   :  { %v340_v46 = vsel %vm339_vm6, %v484_v39, %v336_v45 }
 0x151   :  { %v341_v47 = vmul.f32 %v340_v46, %v329_v44 }
 0x153   :  { %v343_v49 = vmul.f32 %v341_v47, %v325_v33  ;;  %468 = vmatmul.msk.f32.vlgmr.msra.gmra.mxu2 %vm346_vm7, %v341_v47 }
 0x155   :  { %v344_v50 = vsub.f32 %v342_v48, %v343_v49 }
 0x157   :  { %469 = vmatmul.msk.f32.vlgmr.msra.gmra.mxu3 %vm346_vm7, %v344_v50 }
 0x1d6   :  { %v367_v51 = vpop.f32.mrf.mxu2 }
 0x1d7   :  { %v393_v52 = vperm.slane %v367_v51, 0 }
 0x1d9   :  { %v394_v54 = vmul.f32 %v393_v52, %v611_v62  ;;  %v395_v55 = vmul.f32 %v393_v52, %v613_v63 }
 0x1da   :  { %v390_v53 = vpop.f32.mrf.mxu3 }
 0x1db   :  { %v396_v56 = vperm.slane %v390_v53, 0 }
 0x1dd   :  { %v397_v57 = vadd.f32 %v396_v56, %v394_v54  ;;  %v398_v58 = vadd.f32 %v396_v56, %v395_v55 }
 0x1df   :  { %v399_v59 = vmax.f32 %v397_v57, 0.0  ;;  %v400_v60 = vmax.f32 %v398_v58, 0.0 }
 0x1e1   :  { %v401_v61 = vpack.c.bf16 %v399_v59, %v399_v59  ;;  %v402_v0 = vpack.c.bf16 %v400_v60, %v400_v60 }
 0x1e3   :  { %404 = vst.msk [vmem:[%s652_s6] sm:$0xf] %vm403_vm8, %v401_v61 }
 0x1e4   :  { %405 = vst.msk [vmem:[%s652_s6 + $0x4] sm:$0xf] %vm403_vm8, %v402_v0 }

// kernel: unet_forward.26
= control target key start
LH: loop header
LB: loop body
LE: loop exit
PB: predicated region body
PF: predicated region fallthrough
CT: control target
= control target key end

     0   :  { %vm93_vm0 = vcmask 654336   ;;  %vm291_vm1 = vcmask 523264   ;;  %vm396_vm6 = vcmask 64512   ;;  %vm453_vm7 = vcmask 519168   ;;  %s766_s1 = inlined_call_operand.vmem [shape: bf16[3,80,64], index: 1, kind: input, shape index: {}]   ;;  %s767_s0 = inlined_call_operand.vmem [shape: bf16[2,10,80], index: 0, kind: input, shape index: {}]   ;;  %s768_s2 = inlined_call_operand.vmem [shape: f32[64,8], index: 2, kind: input, shape index: {}]   ;;  %s769_s3 = inlined_call_operand.vmem [shape: f32[8,64], index: 3, kind: input, shape index: {}]   ;;  %s770_s4 = inlined_call_operand.vmem [shape: f32[1,8], index: 4, kind: input, shape index: {}]   ;;  %s771_s5 = inlined_call_operand.vmem [shape: f32[1,8], index: 5, kind: input, shape index: {}]   ;;  %s772_s6 = inlined_call_operand.vmem [shape: bf16[2,8,64], index: 6, kind: output, shape index: {}]  }
   0x1   :  { %v577_v0 = vld [vmem:[%s766_s1 + $0x48] sm:$0xff]  ;;  %v570_v1 = vld [vmem:[%s766_s1 + $0x20] sm:$0xff]  ;;  %v569_v3 = vld [vmem:[%s766_s1 + $0x18] sm:$0xff] }
   0x2   :  { %100 = vmatpush.bf16.msra.mxu0 %v577_v0  ;;  %128 = vmatpush.bf16.msra.mxu1 %v577_v0  ;;  %v576_v2 = vld [vmem:[%s766_s1 + $0x40] sm:$0xff]  ;;  %v497_v6 = vld [vmem:[%s767_s0 + $0x8] sm:$0xf]  ;;  %v572_v7 = vld [vmem:[%s767_s0 + $0x8] sm:$0x10] }
   0x3   :  { %174 = vmatpush.bf16.msra.mxu2 %v570_v1  ;;  %190 = vmatpush.bf16.msra.mxu3 %v570_v1  ;;  %v472_v4 = vld [vmem:[%s767_s0] sm:$0xf]  ;;  %v571_v5 = vld [vmem:[%s767_s0] sm:$0x10]  ;;  %v498_v9 = vor.u32 %v572_v7, %v497_v6  ;;  %v575_v10 = vld [vmem:[%s766_s1 + $0x38] sm:$0xff] }
   0x4   :  { %v473_v8 = vor.u32 %v571_v5, %v472_v4  ;;  %v568_v11 = vld [vmem:[%s766_s1 + $0x10] sm:$0xff]  ;;  %v567_v15 = vld [vmem:[%s766_s1 + $0x8] sm:$0xff]  ;;  %v566_v21 = vld [vmem:[%s766_s1] sm:$0xff] }
   0x5   :  { %v118_v13 = vshll.u32 %v498_v9, 16  ;;  %v574_v14 = vld [vmem:[%s766_s1 + $0x30] sm:$0xff]  ;;  %v116_v18 = vshrl.u32 %v498_v9, 16  ;;  %v573_v20 = vld [vmem:[%s766_s1 + $0x28] sm:$0xff]  ;;  %v24_v25 = vld [vmem:[%s767_s0] sm:$0xf] }
   0x6   :  { %101 = vmatpush.bf16.msra.mxu0 %v576_v2  ;;  %129 = vmatpush.bf16.msra.mxu1 %v576_v2  ;;  %v59_v12 = vshll.u32 %v473_v8, 16  ;;  %v57_v16 = vshrl.u32 %v473_v8, 16  ;;  %v584_v22 = vld [vmem:[%s766_s1 + $0x70] sm:$0xff]  ;;  %v25_v26 = vld [vmem:[%s767_s0 + $0x8] sm:$0xf]  ;;  %v582_v28 = vld [vmem:[%s766_s1 + $0x60] sm:$0xff] }
   0x7   :  { %175 = vmatpush.bf16.msra.mxu2 %v569_v3  ;;  %191 = vmatpush.bf16.msra.mxu3 %v569_v3  ;;  %v120_v19 = vrot.slane %v118_v13, 1  ;;  %v583_v27 = vld [vmem:[%s766_s1 + $0x68] sm:$0xff]  ;;  %v581_v29 = vld [vmem:[%s766_s1 + $0x58] sm:$0xff]  ;;  %v534_v30 = vld [vmem:[%s767_s0] sm:$0xe] }
   0x8   :  { %v61_v17 = vrot.slane %v59_v12, 1  ;;  %v578_v31 = vld [vmem:[%s767_s0] sm:$0x10]  ;;  %v559_v32 = vld [vmem:[%s767_s0 + $0x8] sm:$0xe]  ;;  %v580_v36 = vld [vmem:[%s766_s1 + $0x50] sm:$0xff] }
   0x9   :  { %v121_v24 = vor.u32 %v120_v19, %v116_v18  ;;  %v579_v33 = vld [vmem:[%s767_s0 + $0x8] sm:$0x10]  ;;  %v535_v34 = vor.u32 %v578_v31, %v534_v30  ;;  %v321_v39 = vld [vmem:[%s768_s2 + $0x38] sm:$0xff]  ;;  %v320_v40 = vld [vmem:[%s768_s2 + $0x30] sm:$0xff] }
   0xa   :  { %102 = vmatpush.bf16.msra.mxu0 %v575_v10  ;;  %130 = vmatpush.bf16.msra.mxu1 %v575_v10  ;;  %v62_v23 = vor.u32 %v61_v17, %v57_v16  ;;  %v560_v35 = vor.u32 %v579_v33, %v559_v32  ;;  %v319_v41 = vld [vmem:[%s768_s2 + $0x28] sm:$0xff]  ;;  %v318_v42 = vld [vmem:[%s768_s2 + $0x20] sm:$0xff]  ;;  %v317_v43 = vld [vmem:[%s768_s2 + $0x18] sm:$0xff] }
   0xb   :  { %176 = vmatpush.bf16.msra.mxu2 %v568_v11  ;;  %192 = vmatpush.bf16.msra.mxu3 %v568_v11  ;;  %v220_v37 = vrot.slane %v535_v34, 1  ;;  %v316_v44 = vld [vmem:[%s768_s2 + $0x10] sm:$0xff]  ;;  %v315_v45 = vld [vmem:[%s768_s2 + $0x8] sm:$0xff]  ;;  %v314_v48 = vld [vmem:[%s768_s2] sm:$0xff] }
   0xc   :  { %v272_v38 = vrot.slane %v560_v35, 1 }
   0xe   :  { %103 = vmatpush.bf16.msra.mxu0 %v574_v14  ;;  %131 = vmatpush.bf16.msra.mxu1 %v574_v14 }
   0xf   :  { %177 = vmatpush.bf16.msra.mxu2 %v567_v15  ;;  %193 = vmatpush.bf16.msra.mxu3 %v567_v15 }
  0x12   :  { %104 = vmatpush.bf16.msra.mxu0 %v573_v20  ;;  %132 = vmatpush.bf16.msra.mxu1 %v573_v20 }
  0x13   :  { %178 = vmatpush.bf16.msra.mxu2 %v566_v21  ;;  %194 = vmatpush.bf16.msra.mxu3 %v566_v21  ;;  %v590_v21 = vmov 128.0  }
  0x14   :  { %586 = vrcp.f32 %v590_v21 }
  0x15   :  { %494 = vmatmul.msk.bf16.vlgmr.msra.gmra.mxu0 %vm93_vm0, %v62_v23  ;;  %499 = vmatmul.msk.bf16.vlgmr.msra.gmra.mxu1 %vm93_vm0, %v121_v24 }
  0x16   :  { %257 = vmatpush.bf16.msrb.mxu0 %v584_v22  ;;  %279 = vmatpush.bf16.msrb.mxu1 %v584_v22 }
  0x17   :  { %520 = vmatmul.msk.bf16.vlgmr.msra.gmra.mxu2 %vm93_vm0, %v24_v25  ;;  %521 = vmatmul.msk.bf16.vlgmr.msra.gmra.mxu3 %vm93_vm0, %v25_v26 }
  0x18   :  { %333 = vmatpush.msrb.mxu2 %v321_v39  ;;  %356 = vmatpush.msrb.mxu3 %v321_v39 }
  0x1a   :  { %258 = vmatpush.bf16.msrb.mxu0 %v583_v27  ;;  %280 = vmatpush.bf16.msrb.mxu1 %v583_v27  ;;  %v587_v22 = vpop.eup %586  ;;  %v395_v27 = vld [vmem:[%s769_s3] sm:$0xff] }
  0x1b   :  { %334 = vmatpush.msrb.mxu2 %v320_v40  ;;  %357 = vmatpush.msrb.mxu3 %v320_v40  ;;  %v369_v23 = vmul.f32 128.0, %v587_v22  ;;  %vm373_vm2 = vweird.f32 %v587_v22 }
  0x1d   :  { %335 = vmatpush.msrb.mxu2 %v319_v41  ;;  %358 = vmatpush.msrb.mxu3 %v319_v41  ;;  %v370_v24 = vsub.f32 1.0, %v369_v23  ;;  %v379_v41 = vld [vmem:[%s770_s4] sm:$0x1] }
  0x1e   :  { %259 = vmatpush.bf16.msrb.mxu0 %v582_v28  ;;  %281 = vmatpush.bf16.msrb.mxu1 %v582_v28 }
  0x1f   :  { %336 = vmatpush.msrb.mxu2 %v318_v42  ;;  %359 = vmatpush.msrb.mxu3 %v318_v42  ;;  %v371_v25 = vmul.f32 %v587_v22, %v370_v24 }
  0x21   :  { %337 = vmatpush.msrb.mxu2 %v317_v43  ;;  %360 = vmatpush.msrb.mxu3 %v317_v43  ;;  %v372_v26 = vadd.f32 %v587_v22, %v371_v25 }
  0x22   :  { %260 = vmatpush.bf16.msrb.mxu0 %v581_v29  ;;  %282 = vmatpush.bf16.msrb.mxu1 %v581_v29 }
  0x23   :  { %338 = vmatpush.msrb.mxu2 %v316_v44  ;;  %361 = vmatpush.msrb.mxu3 %v316_v44  ;;  %v374_v28 = vsel %vm373_vm2, %v587_v22, %v372_v26 }
  0x25   :  { %339 = vmatpush.msrb.mxu2 %v315_v45  ;;  %362 = vmatpush.msrb.mxu3 %v315_v45  ;;  %v392_v45 = vld [vmem:[%s771_s5] sm:$0x1] }
  0x26   :  { %261 = vmatpush.bf16.msrb.mxu0 %v580_v36  ;;  %283 = vmatpush.bf16.msrb.mxu1 %v580_v36 }
  0x27   :  { %340 = vmatpush.msrb.mxu2 %v314_v48  ;;  %363 = vmatpush.msrb.mxu3 %v314_v48 }
  0x29   :  { %556 = vmatmul.msk.bf16.vlgmr.msrb.gmra.mxu0 %vm93_vm0, %v220_v37  ;;  %561 = vmatmul.msk.bf16.vlgmr.msrb.gmra.mxu1 %vm93_vm0, %v272_v38 }
  0x2a   :  { %415 = vmatpush.msra.mxu2 %v395_v27  ;;  %438 = vmatpush.msra.mxu3 %v395_v27 }
  0x92   :  { %v106_v46 = vpop.f32.mrf.mxu0  ;;  %v134_v47 = vpop.f32.mrf.mxu1 }
  0x9a   :  { %v180_v49 = vpop.f32.mrf.mxu2  ;;  %v196_v50 = vpop.f32.mrf.mxu3 }
  0x9b   :  { %v108_v51 = vpop.f32.mrf.mxu0  ;;  %v136_v52 = vpop.f32.mrf.mxu1  ;;  %v181_v55 = vadd.f32 %v180_v49, %v106_v46  ;;  %v197_v56 = vadd.f32 %v196_v50, %v134_v47 }
  0xa2   :  { %v182_v53 = vpop.f32.mrf.mxu2  ;;  %v198_v54 = vpop.f32.mrf.mxu3 }
  0xa6   :  { %v263_v57 = vpop.f32.mrf.mxu0  ;;  %v285_v58 = vpop.f32.mrf.mxu1 }
  0xa7   :  { %v731_v59 = vadd.f32 %v263_v57, %v181_v55  ;;  %v733_v60 = vadd.f32 %v285_v58, %v197_v56 }
  0xa9   :  { %v292_v61 = vsel %vm291_vm1, %v731_v59, 0.0  ;;  %v302_v62 = vmul.f32 %v731_v59, %v731_v59  ;;  %v293_v63 = vsel %vm291_vm1, %v733_v60, 0.0  ;;  %v303_v0 = vmul.f32 %v733_v60, %v733_v60 }
  0xaa   :  { %v294_v1 = vadd.f32 %v293_v63, %v292_v61 }
  0xab   :  { %v304_v2 = vsel %vm291_vm1, %v302_v62, 0.0  ;;  %v305_v3 = vsel %vm291_vm1, %v303_v0, 0.0 }
  0xac   :  { %v295_v4 = vsel %vm291_vm1, %v294_v1, 0.0  ;;  %v306_v5 = vadd.f32 %v305_v3, %v304_v2 }
  0xad   :  { %v296_v6 = vrot.slane %v295_v4, 4 }
  0xae   :  { %v307_v7 = vsel %vm291_vm1, %v306_v5, 0.0  ;;  %v265_v8 = vpop.f32.mrf.mxu0  ;;  %v287_v9 = vpop.f32.mrf.mxu1 }
  0xaf   :  { %v297_v10 = vadd.f32 %v296_v6, %v295_v4  ;;  %v308_v11 = vrot.slane %v307_v7, 4 }
  0xb1   :  { %v298_v12 = vrot.slane %v297_v10, 2  ;;  %v309_v13 = vadd.f32 %v308_v11, %v307_v7 }
  0xb3   :  { %v299_v14 = vadd.f32 %v298_v12, %v297_v10  ;;  %v310_v15 = vrot.slane %v309_v13, 2 }
  0xb5   :  { %v300_v16 = vrot.slane %v299_v14, 1  ;;  %v311_v17 = vadd.f32 %v310_v15, %v309_v13 }
  0xb7   :  { %v301_v18 = vadd.f32 %v300_v16, %v299_v14  ;;  %v312_v19 = vrot.slane %v311_v17, 1 }
  0xb9   :  { %562 = vmatmul.msk.f32.vlgmr.msrb.gmra.mxu2 %vm291_vm1, %v301_v18  ;;  %v313_v20 = vadd.f32 %v312_v19, %v311_v17 }
  0xbb   :  { %563 = vmatmul.msk.f32.vlgmr.msrb.gmra.mxu3 %vm291_vm1, %v313_v20 }
 0x13c   :  { %v342_v29 = vpop.f32.mrf.mxu2 }
 0x13d   :  { %v375_v30 = vmul.f32 %v374_v28, %v342_v29 }
 0x13e   :  { %v365_v31 = vpop.f32.mrf.mxu3 }
 0x13f   :  { %v377_v32 = vmul.f32 %v375_v30, %v375_v30  ;;  %v376_v33 = vmul.f32 %v374_v28, %v365_v31 }
 0x141   :  { %v378_v34 = vsub.f32 %v376_v33, %v377_v32 }
 0x143   :  { %v380_v35 = vadd.f32 1e-05, %v378_v34 }
 0x145   :  { %588 = vrsqrt.f32 %v380_v35  ;;  %vm387_vm4 = vweird.f32 %v380_v35 }
 0x14b   :  { %v589_v36 = vpop.eup %588 }
 0x14c   :  { %v382_v37 = vmul.f32 %v589_v36, %v380_v35  ;;  %vm388_vm3 = vweird.f32 %v589_v36 }
 0x14d   :  { %vm389_vm5 = vmor %vm387_vm4, %vm388_vm3 }
 0x14e   :  { %v383_v38 = vmul.f32 %v589_v36, %v382_v37 }
 0x150   :  { %v384_v39 = vmul.f32 0.5, %v383_v38 }
 0x152   :  { %v385_v40 = vsub.f32 1.5, %v384_v39 }
 0x154   :  { %v386_v42 = vmul.f32 %v589_v36, %v385_v40 }
 0x156   :  { %v390_v43 = vsel %vm389_vm5, %v589_v36, %v386_v42 }
 0x157   :  { %v391_v44 = vmul.f32 %v390_v43, %v379_v41 }
 0x159   :  { %v393_v46 = vmul.f32 %v391_v44, %v375_v30  ;;  %564 = vmatmul.msk.f32.vlgmr.msra.gmra.mxu2 %vm396_vm6, %v391_v44 }
 0x15b   :  { %v394_v47 = vsub.f32 %v392_v45, %v393_v46 }
 0x15d   :  { %565 = vmatmul.msk.f32.vlgmr.msra.gmra.mxu3 %vm396_vm6, %v394_v47 }
 0x1dc   :  { %v417_v48 = vpop.f32.mrf.mxu2 }
 0x1dd   :  { %v443_v49 = vperm.slane %v417_v48, 0 }
 0x1df   :  { %v444_v51 = vmul.f32 %v443_v49, %v731_v59  ;;  %v445_v52 = vmul.f32 %v443_v49, %v733_v60 }
 0x1e0   :  { %v440_v50 = vpop.f32.mrf.mxu3 }
 0x1e1   :  { %v446_v53 = vperm.slane %v440_v50, 0 }
 0x1e3   :  { %v447_v54 = vadd.f32 %v446_v53, %v444_v51  ;;  %v448_v55 = vadd.f32 %v446_v53, %v445_v52 }
 0x1e5   :  { %v449_v56 = vmax.f32 %v447_v54, 0.0  ;;  %v450_v57 = vmax.f32 %v448_v55, 0.0 }
 0x1e7   :  { %v451_v58 = vpack.c.bf16 %v449_v56, %v449_v56  ;;  %v452_v61 = vpack.c.bf16 %v450_v57, %v450_v57 }
 0x1e9   :  { %454 = vst.msk [vmem:[%s772_s6] sm:$0xf] %vm453_vm7, %v451_v58 }
 0x1ea   :  { %455 = vst.msk [vmem:[%s772_s6 + $0x4] sm:$0xf] %vm453_vm7, %v452_v61 }

// kernel: unet_forward.27
= control target key start
LH: loop header
LB: loop body
LE: loop exit
PB: predicated region body
PF: predicated region fallthrough
CT: control target
= control target key end

     0   :  { %vm81_vm0 = vcmask 60416   ;;  %s187_s0 = inlined_call_operand.vmem [shape: bf16[32,8], index: 0, kind: input, shape index: {}]   ;;  %s188_s1 = inlined_call_operand.vmem [shape: bf16[32,8], index: 1, kind: input, shape index: {}]   ;;  %s189_s2 = inlined_call_operand.vmem [shape: bf16[32,8], index: 2, kind: input, shape index: {}]   ;;  %s190_s3 = inlined_call_operand.vmem [shape: bf16[32,8], index: 3, kind: input, shape index: {}]   ;;  %s191_s4 = inlined_call_operand.vmem [shape: bf16[32,8], index: 4, kind: output, shape index: {}]  }
   0x1   :  { %v91_v0 = vld [vmem:[%s187_s0] sm:$0xff]   ;;  %v122_v8 = vld [vmem:[%s187_s0 + $0x8] sm:$0xff]  }
   0x2   :  { %v99_v1 = vld [vmem:[%s188_s1] sm:$0xff]   ;;  %v92_v3 = vunpack.c.l.bf16 %v91_v0  ;;  %v93_v7 = vunpack.c.h.bf16 %v91_v0  ;;  %v123_v9 = vld [vmem:[%s188_s1 + $0x8] sm:$0xff]   ;;  %v96_v17 = vunpack.c.l.bf16 %v122_v8  ;;  %v97_v25 = vunpack.c.h.bf16 %v122_v8 }
   0x3   :  { %v107_v2 = vld [vmem:[%s189_s2] sm:$0xff]   ;;  %v100_v4 = vunpack.c.l.bf16 %v99_v1  ;;  %v101_v11 = vunpack.c.h.bf16 %v99_v1  ;;  %v124_v14 = vld [vmem:[%s189_s2 + $0x8] sm:$0xff]   ;;  %v104_v18 = vunpack.c.l.bf16 %v123_v9  ;;  %v105_v26 = vunpack.c.h.bf16 %v123_v9 }
   0x4   :  { %v108_v5 = vunpack.c.l.bf16 %v107_v2  ;;  %v115_v6 = vld [vmem:[%s190_s3] sm:$0xff]   ;;  %v109_v12 = vunpack.c.h.bf16 %v107_v2  ;;  %v125_v15 = vld [vmem:[%s190_s3 + $0x8] sm:$0xff]   ;;  %v112_v19 = vunpack.c.l.bf16 %v124_v14  ;;  %v113_v27 = vunpack.c.h.bf16 %v124_v14 }
   0x5   :  { %v116_v10 = vunpack.c.l.bf16 %v115_v6  ;;  %v117_v13 = vunpack.c.h.bf16 %v115_v6  ;;  %v33_v16 = vmax.f32 %v92_v3, %v100_v4  ;;  %v34_v21 = vmax.f32 %v93_v7, %v101_v11 }
   0x6   :  { %v120_v23 = vunpack.c.l.bf16 %v125_v15  ;;  %v35_v24 = vmax.f32 %v96_v17, %v104_v18  ;;  %v121_v31 = vunpack.c.h.bf16 %v125_v15  ;;  %v36_v32 = vmax.f32 %v97_v25, %v105_v26 }
   0x7   :  { %v57_v20 = vmax.f32 %v108_v5, %v116_v10  ;;  %v58_v22 = vmax.f32 %v109_v12, %v117_v13 }
   0x8   :  { %v59_v30 = vmax.f32 %v112_v19, %v120_v23  ;;  %v60_v36 = vmax.f32 %v113_v27, %v121_v31 }
   0x9   :  { %v73_v28 = vmax.f32 %v33_v16, %v57_v20  ;;  %v74_v29 = vmax.f32 %v34_v21, %v58_v22 }
   0xa   :  { %v75_v35 = vmax.f32 %v35_v24, %v59_v30  ;;  %v76_v38 = vmax.f32 %v36_v32, %v60_v36 }
   0xb   :  { %v77_v33 = vpack.c.bf16 %v73_v28, %v73_v28  ;;  %v78_v34 = vpack.c.bf16 %v74_v29, %v74_v29 }
   0xc   :  { %v79_v37 = vpack.c.bf16 %v75_v35, %v75_v35  ;;  %v80_v39 = vpack.c.bf16 %v76_v38, %v76_v38 }
   0xd   :  { %82 = vst.msk [vmem:[%s191_s4] sm:$0xf] %vm81_vm0, %v77_v33 }
   0xe   :  { %83 = vst.msk [vmem:[%s191_s4 + $0x4] sm:$0xf] %vm81_vm0, %v78_v34 }
   0xf   :  { %84 = vst.msk [vmem:[%s191_s4 + $0x8] sm:$0xf] %vm81_vm0, %v79_v37 }
  0x10   :  { %85 = vst.msk [vmem:[%s191_s4 + $0xc] sm:$0xf] %vm81_vm0, %v80_v39 }

// kernel: unet_forward.28
= control target key start
LH: loop header
LB: loop body
LE: loop exit
PB: predicated region body
PF: predicated region fallthrough
CT: control target
= control target key end

     0   :  { %vm69_vm0 = vcmask 392192   ;;  %vm231_vm1 = vcmask 519168   ;;  %vm262_vm2 = vcmask 523264   ;;  %vm338_vm7 = vcmask 130048   ;;  %s615_s1 = inlined_call_operand.vmem [shape: bf16[3,48,64], index: 1, kind: input, shape index: {}]   ;;  %s616_s0 = inlined_call_operand.vmem [shape: bf16[2,6,48], index: 0, kind: input, shape index: {}]   ;;  %s617_s2 = inlined_call_operand.vmem [shape: f32[64,16], index: 2, kind: input, shape index: {}]   ;;  %s618_s3 = inlined_call_operand.vmem [shape: f32[16,64], index: 3, kind: input, shape index: {}]   ;;  %s619_s4 = inlined_call_operand.vmem [shape: f32[1,16], index: 4, kind: input, shape index: {}]   ;;  %s620_s5 = inlined_call_operand.vmem [shape: f32[1,16], index: 5, kind: input, shape index: {}]   ;;  %s621_s6 = inlined_call_operand.vmem [shape: bf16[2,4,64], index: 6, kind: output, shape index: {}]  }
   0x1   :  { %v465_v0 = vld [vmem:[%s615_s1 + $0x28] sm:$0xff]  ;;  %v462_v1 = vld [vmem:[%s615_s1 + $0x10] sm:$0xff]  ;;  %v464_v2 = vld [vmem:[%s615_s1 + $0x20] sm:$0xff]  ;;  %vm395_vm8 = vcmask 517120  }
   0x2   :  { %78 = vmatpush.bf16.msra.mxu0 %v465_v0  ;;  %104 = vmatpush.bf16.msra.mxu1 %v465_v0  ;;  %v32_v3 = vld [vmem:[%s616_s0] sm:$0x7]  ;;  %v33_v4 = vld [vmem:[%s616_s0 + $0x4] sm:$0x7]  ;;  %v461_v5 = vld [vmem:[%s615_s1 + $0x8] sm:$0xff] }
   0x3   :  { %138 = vmatpush.bf16.msra.mxu2 %v462_v1  ;;  %154 = vmatpush.bf16.msra.mxu3 %v462_v1  ;;  %v42_v6 = vunpack.c.l.b16 %v32_v3  ;;  %v87_v7 = vunpack.c.l.b16 %v33_v4  ;;  %v463_v10 = vld [vmem:[%s615_s1 + $0x18] sm:$0xff]  ;;  %v460_v11 = vld [vmem:[%s615_s1] sm:$0xff]  ;;  %v466_v26 = vld [vmem:[%s615_s1 + $0x30] sm:$0xff] }
   0x4   :  { %v468_v16 = vld [vmem:[%s615_s1 + $0x40] sm:$0xff]  ;;  %v467_v23 = vld [vmem:[%s615_s1 + $0x38] sm:$0xff]  ;;  %v260_v34 = vld [vmem:[%s617_s2 + $0x30] sm:$0xff] }
   0x5   :  { %v43_v8 = vpack.c.b16 %v42_v6, %v42_v6  ;;  %v88_v9 = vpack.c.b16 %v87_v7, %v87_v7  ;;  %v24_v21 = vld [vmem:[%s616_s0] sm:$0x3]  ;;  %v25_v22 = vld [vmem:[%s616_s0 + $0x4] sm:$0x3]  ;;  %v261_v33 = vld [vmem:[%s617_s2 + $0x38] sm:$0xff] }
   0x6   :  { %79 = vmatpush.bf16.msra.mxu0 %v464_v2  ;;  %105 = vmatpush.bf16.msra.mxu1 %v464_v2  ;;  %v162_v24 = vld [vmem:[%s616_s0] sm:$0x6]  ;;  %v163_v25 = vld [vmem:[%s616_s0 + $0x4] sm:$0x6]  ;;  %v259_v35 = vld [vmem:[%s617_s2 + $0x28] sm:$0xff] }
   0x7   :  { %139 = vmatpush.bf16.msra.mxu2 %v461_v5  ;;  %155 = vmatpush.bf16.msra.mxu3 %v461_v5  ;;  %v45_v12 = vshrl.u32 %v43_v8, 16  ;;  %v47_v13 = vshll.u32 %v43_v8, 16  ;;  %v90_v14 = vshrl.u32 %v88_v9, 16  ;;  %v92_v15 = vshll.u32 %v88_v9, 16  ;;  %v258_v36 = vld [vmem:[%s617_s2 + $0x20] sm:$0xff]  ;;  %v257_v37 = vld [vmem:[%s617_s2 + $0x18] sm:$0xff] }
   0x8   :  { %v172_v27 = vunpack.c.l.b16 %v162_v24  ;;  %v210_v28 = vunpack.c.l.b16 %v163_v25  ;;  %v256_v38 = vld [vmem:[%s617_s2 + $0x10] sm:$0xff]  ;;  %v255_v39 = vld [vmem:[%s617_s2 + $0x8] sm:$0xff]  ;;  %v254_v42 = vld [vmem:[%s617_s2] sm:$0xff] }
   0x9   :  { %v49_v17 = vrot.slane %v47_v13, 1  ;;  %v94_v18 = vrot.slane %v92_v15, 1  ;;  %v474_v15 = vmov 32.0  }
   0xa   :  { %80 = vmatpush.bf16.msra.mxu0 %v463_v10  ;;  %106 = vmatpush.bf16.msra.mxu1 %v463_v10  ;;  %v173_v29 = vpack.c.b16 %v172_v27, %v172_v27  ;;  %v211_v30 = vpack.c.b16 %v210_v28, %v210_v28  ;;  %470 = vrcp.f32 %v474_v15 }
   0xb   :  { %140 = vmatpush.bf16.msra.mxu2 %v460_v11  ;;  %156 = vmatpush.bf16.msra.mxu3 %v460_v11  ;;  %v50_v19 = vor.u32 %v49_v17, %v45_v12  ;;  %v95_v20 = vor.u32 %v94_v18, %v90_v14 }
   0xc   :  { %v174_v31 = vrot.slane %v173_v29, 1  ;;  %v212_v32 = vrot.slane %v211_v30, 1 }
   0xd   :  { %420 = vmatmul.msk.bf16.vlgmr.msra.gmra.mxu0 %vm69_vm0, %v50_v19  ;;  %421 = vmatmul.msk.bf16.vlgmr.msra.gmra.mxu1 %vm69_vm0, %v95_v20 }
   0xe   :  { %201 = vmatpush.bf16.msrb.mxu0 %v468_v16  ;;  %221 = vmatpush.bf16.msrb.mxu1 %v468_v16 }
   0xf   :  { %434 = vmatmul.msk.bf16.vlgmr.msra.gmra.mxu2 %vm69_vm0, %v24_v21  ;;  %435 = vmatmul.msk.bf16.vlgmr.msra.gmra.mxu3 %vm69_vm0, %v25_v22  ;;  %v337_v21 = vld [vmem:[%s618_s3 + $0x8] sm:$0xff]  ;;  %v336_v22 = vld [vmem:[%s618_s3] sm:$0xff] }
  0x10   :  { %274 = vmatpush.msrb.mxu2 %v261_v33  ;;  %297 = vmatpush.msrb.mxu3 %v261_v33  ;;  %v471_v16 = vpop.eup %470 }
  0x11   :  { %v310_v17 = vmul.f32 32.0, %v471_v16  ;;  %vm314_vm3 = vweird.f32 %v471_v16 }
  0x12   :  { %202 = vmatpush.bf16.msrb.mxu0 %v467_v23  ;;  %222 = vmatpush.bf16.msrb.mxu1 %v467_v23 }
  0x13   :  { %275 = vmatpush.msrb.mxu2 %v260_v34  ;;  %298 = vmatpush.msrb.mxu3 %v260_v34  ;;  %v311_v18 = vsub.f32 1.0, %v310_v17 }
  0x15   :  { %276 = vmatpush.msrb.mxu2 %v259_v35  ;;  %299 = vmatpush.msrb.mxu3 %v259_v35  ;;  %v312_v19 = vmul.f32 %v471_v16, %v311_v18 }
  0x16   :  { %203 = vmatpush.bf16.msrb.mxu0 %v466_v26  ;;  %223 = vmatpush.bf16.msrb.mxu1 %v466_v26 }
  0x17   :  { %277 = vmatpush.msrb.mxu2 %v258_v36  ;;  %300 = vmatpush.msrb.mxu3 %v258_v36  ;;  %v313_v20 = vadd.f32 %v471_v16, %v312_v19  ;;  %v320_v36 = vld [vmem:[%s619_s4] sm:$0x1] }
  0x19   :  { %278 = vmatpush.msrb.mxu2 %v257_v37  ;;  %301 = vmatpush.msrb.mxu3 %v257_v37  ;;  %v315_v23 = vsel %vm314_vm3, %v471_v16, %v313_v20 }
  0x1b   :  { %279 = vmatpush.msrb.mxu2 %v256_v38  ;;  %302 = vmatpush.msrb.mxu3 %v256_v38 }
  0x1d   :  { %454 = vmatmul.msk.bf16.vlgmr.msrb.gmra.mxu0 %vm69_vm0, %v174_v31  ;;  %455 = vmatmul.msk.bf16.vlgmr.msrb.gmra.mxu1 %vm69_vm0, %v212_v32 }
  0x1e   :  { %280 = vmatpush.msrb.mxu2 %v255_v39  ;;  %303 = vmatpush.msrb.mxu3 %v255_v39 }
  0x20   :  { %281 = vmatpush.msrb.mxu2 %v254_v42  ;;  %304 = vmatpush.msrb.mxu3 %v254_v42 }
  0x22   :  { %356 = vmatpush.msra.mxu2 %v337_v21  ;;  %379 = vmatpush.msra.mxu3 %v337_v21 }
  0x24   :  { %357 = vmatpush.msra.mxu2 %v336_v22  ;;  %380 = vmatpush.msra.mxu3 %v336_v22 }
  0x8a   :  { %v82_v40 = vpop.f32.mrf.mxu0  ;;  %v108_v41 = vpop.f32.mrf.mxu1 }
  0x92   :  { %v142_v43 = vpop.f32.mrf.mxu2  ;;  %v158_v44 = vpop.f32.mrf.mxu3 }
  0x93   :  { %v84_v45 = vpop.f32.mrf.mxu0  ;;  %v110_v46 = vpop.f32.mrf.mxu1  ;;  %v143_v47 = vadd.f32 %v142_v43, %v82_v40  ;;  %v159_v48 = vadd.f32 %v158_v44, %v108_v41  ;;  %v333_v40 = vld [vmem:[%s620_s5] sm:$0x1] }
  0x9a   :  { %v144_v49 = vpop.f32.mrf.mxu2  ;;  %v160_v50 = vpop.f32.mrf.mxu3 }
  0x9b   :  { %v205_v51 = vpop.f32.mrf.mxu0  ;;  %v225_v52 = vpop.f32.mrf.mxu1 }
  0x9c   :  { %v585_v53 = vadd.f32 %v205_v51, %v143_v47  ;;  %v587_v54 = vadd.f32 %v225_v52, %v159_v48 }
  0x9e   :  { %v232_v55 = vsel %vm231_vm1, %v585_v53, 0.0  ;;  %v242_v56 = vmul.f32 %v585_v53, %v585_v53  ;;  %v233_v57 = vsel %vm231_vm1, %v587_v54, 0.0  ;;  %v243_v58 = vmul.f32 %v587_v54, %v587_v54 }
  0x9f   :  { %v234_v59 = vadd.f32 %v233_v57, %v232_v55 }
  0xa0   :  { %v244_v60 = vsel %vm231_vm1, %v242_v56, 0.0  ;;  %v245_v61 = vsel %vm231_vm1, %v243_v58, 0.0 }
  0xa1   :  { %v235_v62 = vsel %vm231_vm1, %v234_v59, 0.0  ;;  %v246_v63 = vadd.f32 %v245_v61, %v244_v60 }
  0xa2   :  { %v236_v0 = vrot.slane %v235_v62, 4 }
  0xa3   :  { %v247_v1 = vsel %vm231_vm1, %v246_v63, 0.0  ;;  %v207_v2 = vpop.f32.mrf.mxu0  ;;  %v227_v3 = vpop.f32.mrf.mxu1 }
  0xa4   :  { %v237_v4 = vadd.f32 %v236_v0, %v235_v62  ;;  %v248_v5 = vrot.slane %v247_v1, 4 }
  0xa6   :  { %v238_v6 = vrot.slane %v237_v4, 2  ;;  %v249_v7 = vadd.f32 %v248_v5, %v247_v1 }
  0xa8   :  { %v239_v8 = vadd.f32 %v238_v6, %v237_v4  ;;  %v250_v9 = vrot.slane %v249_v7, 2 }
  0xaa   :  { %v240_v10 = vrot.slane %v239_v8, 1  ;;  %v251_v11 = vadd.f32 %v250_v9, %v249_v7 }
  0xac   :  { %v241_v12 = vadd.f32 %v240_v10, %v239_v8  ;;  %v252_v13 = vrot.slane %v251_v11, 1 }
  0xae   :  { %456 = vmatmul.msk.f32.vlgmr.msrb.gmra.mxu2 %vm262_vm2, %v241_v12  ;;  %v253_v14 = vadd.f32 %v252_v13, %v251_v11 }
  0xb0   :  { %457 = vmatmul.msk.f32.vlgmr.msrb.gmra.mxu3 %vm262_vm2, %v253_v14 }
 0x131   :  { %v283_v24 = vpop.f32.mrf.mxu2 }
 0x132   :  { %v316_v25 = vmul.f32 %v315_v23, %v283_v24 }
 0x133   :  { %v306_v26 = vpop.f32.mrf.mxu3 }
 0x134   :  { %v318_v27 = vmul.f32 %v316_v25, %v316_v25  ;;  %v317_v28 = vmul.f32 %v315_v23, %v306_v26 }
 0x136   :  { %v319_v29 = vsub.f32 %v317_v28, %v318_v27 }
 0x138   :  { %v321_v30 = vadd.f32 1e-05, %v319_v29 }
 0x13a   :  { %472 = vrsqrt.f32 %v321_v30  ;;  %vm328_vm5 = vweird.f32 %v321_v30 }
 0x140   :  { %v473_v31 = vpop.eup %472 }
 0x141   :  { %v323_v32 = vmul.f32 %v473_v31, %v321_v30  ;;  %vm329_vm4 = vweird.f32 %v473_v31 }
 0x142   :  { %vm330_vm6 = vmor %vm328_vm5, %vm329_vm4 }
 0x143   :  { %v324_v33 = vmul.f32 %v473_v31, %v323_v32 }
 0x145   :  { %v325_v34 = vmul.f32 0.5, %v324_v33 }
 0x147   :  { %v326_v35 = vsub.f32 1.5, %v325_v34 }
 0x149   :  { %v327_v37 = vmul.f32 %v473_v31, %v326_v35 }
 0x14b   :  { %v331_v38 = vsel %vm330_vm6, %v473_v31, %v327_v37 }
 0x14c   :  { %v332_v39 = vmul.f32 %v331_v38, %v320_v36 }
 0x14e   :  { %v334_v41 = vmul.f32 %v332_v39, %v316_v25  ;;  %458 = vmatmul.msk.f32.vlgmr.msra.gmra.mxu2 %vm338_vm7, %v332_v39 }
 0x150   :  { %v335_v42 = vsub.f32 %v333_v40, %v334_v41 }
 0x152   :  { %459 = vmatmul.msk.f32.vlgmr.msra.gmra.mxu3 %vm338_vm7, %v335_v42 }
 0x1d1   :  { %v359_v43 = vpop.f32.mrf.mxu2 }
 0x1d2   :  { %v385_v44 = vperm.slane %v359_v43, 0 }
 0x1d4   :  { %v386_v46 = vmul.f32 %v385_v44, %v585_v53  ;;  %v387_v47 = vmul.f32 %v385_v44, %v587_v54 }
 0x1d5   :  { %v382_v45 = vpop.f32.mrf.mxu3 }
 0x1d6   :  { %v388_v48 = vperm.slane %v382_v45, 0 }
 0x1d8   :  { %v389_v49 = vadd.f32 %v388_v48, %v386_v46  ;;  %v390_v50 = vadd.f32 %v388_v48, %v387_v47 }
 0x1da   :  { %v391_v51 = vmax.f32 %v389_v49, 0.0  ;;  %v392_v52 = vmax.f32 %v390_v50, 0.0 }
 0x1dc   :  { %v393_v55 = vpack.c.bf16 %v391_v51, %v391_v51  ;;  %v394_v56 = vpack.c.bf16 %v392_v52, %v392_v52 }
 0x1de   :  { %396 = vst.msk [vmem:[%s621_s6] sm:$0x3] %vm395_vm8, %v393_v55 }
 0x1df   :  { %397 = vst.msk [vmem:[%s621_s6 + $0x2] sm:$0x3] %vm395_vm8, %v394_v56 }

// kernel: unet_forward.29
= control target key start
LH: loop header
LB: loop body
LE: loop exit
PB: predicated region body
PF: predicated region fallthrough
CT: control target
= control target key end

     0   :  { %vm99_vm0 = vcmask 785408   ;;  %vm303_vm1 = vcmask 519168   ;;  %vm334_vm2 = vcmask 523264   ;;  %vm410_vm7 = vcmask 130048   ;;  %s771_s1 = inlined_call_operand.vmem [shape: bf16[3,96,64], index: 1, kind: input, shape index: {}]   ;;  %s772_s0 = inlined_call_operand.vmem [shape: bf16[2,6,96], index: 0, kind: input, shape index: {}]   ;;  %s773_s2 = inlined_call_operand.vmem [shape: f32[64,16], index: 2, kind: input, shape index: {}]   ;;  %s774_s3 = inlined_call_operand.vmem [shape: f32[16,64], index: 3, kind: input, shape index: {}]   ;;  %s775_s4 = inlined_call_operand.vmem [shape: f32[1,16], index: 4, kind: input, shape index: {}]   ;;  %s776_s5 = inlined_call_operand.vmem [shape: f32[1,16], index: 5, kind: input, shape index: {}]   ;;  %s777_s6 = inlined_call_operand.vmem [shape: bf16[2,4,64], index: 6, kind: output, shape index: {}]  }
   0x1   :  { %v591_v0 = vld [vmem:[%s771_s1 + $0x58] sm:$0xff]  ;;  %v585_v1 = vld [vmem:[%s771_s1 + $0x28] sm:$0xff]  ;;  %v590_v2 = vld [vmem:[%s771_s1 + $0x50] sm:$0xff]  ;;  %vm467_vm8 = vcmask 517120  }
   0x2   :  { %105 = vmatpush.bf16.msra.mxu0 %v591_v0  ;;  %131 = vmatpush.bf16.msra.mxu1 %v591_v0  ;;  %v584_v3 = vld [vmem:[%s771_s1 + $0x20] sm:$0xff]  ;;  %v589_v8 = vld [vmem:[%s771_s1 + $0x48] sm:$0xff]  ;;  %v583_v9 = vld [vmem:[%s771_s1 + $0x18] sm:$0xff] }
   0x3   :  { %183 = vmatpush.bf16.msra.mxu2 %v585_v1  ;;  %199 = vmatpush.bf16.msra.mxu3 %v585_v1  ;;  %v38_v4 = vld [vmem:[%s772_s0] sm:$0x7]  ;;  %v39_v5 = vld [vmem:[%s772_s0 + $0x4] sm:$0x7]  ;;  %v582_v13 = vld [vmem:[%s771_s1 + $0x10] sm:$0xff] }
   0x4   :  { %v54_v6 = vunpack.c.l.b16 %v38_v4  ;;  %v117_v7 = vunpack.c.l.b16 %v39_v5  ;;  %v588_v12 = vld [vmem:[%s771_s1 + $0x40] sm:$0xff]  ;;  %v587_v16 = vld [vmem:[%s771_s1 + $0x38] sm:$0xff]  ;;  %v581_v17 = vld [vmem:[%s771_s1 + $0x8] sm:$0xff] }
   0x5   :  { %v586_v22 = vld [vmem:[%s771_s1 + $0x30] sm:$0xff]  ;;  %v580_v23 = vld [vmem:[%s771_s1] sm:$0xff]  ;;  %v597_v24 = vld [vmem:[%s771_s1 + $0x88] sm:$0xff] }
   0x6   :  { %106 = vmatpush.bf16.msra.mxu0 %v590_v2  ;;  %132 = vmatpush.bf16.msra.mxu1 %v590_v2  ;;  %v55_v10 = vpack.c.b16 %v54_v6, %v54_v6  ;;  %v118_v11 = vpack.c.b16 %v117_v7, %v117_v7  ;;  %v24_v27 = vld [vmem:[%s772_s0] sm:$0x3]  ;;  %v25_v28 = vld [vmem:[%s772_s0 + $0x4] sm:$0x3]  ;;  %v595_v30 = vld [vmem:[%s771_s1 + $0x78] sm:$0xff] }
   0x7   :  { %184 = vmatpush.bf16.msra.mxu2 %v584_v3  ;;  %200 = vmatpush.bf16.msra.mxu3 %v584_v3  ;;  %v596_v29 = vld [vmem:[%s771_s1 + $0x80] sm:$0xff]  ;;  %v594_v31 = vld [vmem:[%s771_s1 + $0x70] sm:$0xff]  ;;  %v593_v36 = vld [vmem:[%s771_s1 + $0x68] sm:$0xff] }
   0x8   :  { %v59_v14 = vshll.u32 %v55_v10, 16  ;;  %v122_v15 = vshll.u32 %v118_v11, 16  ;;  %v57_v18 = vshrl.u32 %v55_v10, 16  ;;  %v120_v20 = vshrl.u32 %v118_v11, 16  ;;  %v210_v32 = vld [vmem:[%s772_s0] sm:$0x6] }
   0x9   :  { %v211_v33 = vld [vmem:[%s772_s0 + $0x4] sm:$0x6]  ;;  %v226_v34 = vunpack.c.l.b16 %v210_v32  ;;  %v333_v42 = vld [vmem:[%s773_s2 + $0x38] sm:$0xff]  ;;  %v332_v43 = vld [vmem:[%s773_s2 + $0x30] sm:$0xff] }
   0xa   :  { %107 = vmatpush.bf16.msra.mxu0 %v589_v8  ;;  %133 = vmatpush.bf16.msra.mxu1 %v589_v8  ;;  %v61_v19 = vrot.slane %v59_v14, 1  ;;  %v124_v21 = vrot.slane %v122_v15, 1  ;;  %v282_v35 = vunpack.c.l.b16 %v211_v33  ;;  %v592_v39 = vld [vmem:[%s771_s1 + $0x60] sm:$0xff]  ;;  %v331_v44 = vld [vmem:[%s773_s2 + $0x28] sm:$0xff]  ;;  %v329_v48 = vld [vmem:[%s773_s2 + $0x18] sm:$0xff] }
   0xb   :  { %185 = vmatpush.bf16.msra.mxu2 %v583_v9  ;;  %201 = vmatpush.bf16.msra.mxu3 %v583_v9  ;;  %v227_v37 = vpack.c.b16 %v226_v34, %v226_v34  ;;  %v330_v45 = vld [vmem:[%s773_s2 + $0x20] sm:$0xff]  ;;  %v328_v49 = vld [vmem:[%s773_s2 + $0x10] sm:$0xff]  ;;  %v327_v50 = vld [vmem:[%s773_s2 + $0x8] sm:$0xff] }
   0xc   :  { %v62_v25 = vor.u32 %v61_v19, %v57_v18  ;;  %v125_v26 = vor.u32 %v124_v21, %v120_v20  ;;  %v283_v38 = vpack.c.b16 %v282_v35, %v282_v35  ;;  %v326_v51 = vld [vmem:[%s773_s2] sm:$0xff] }
   0xd   :  { %v228_v40 = vrot.slane %v227_v37, 1 }
   0xe   :  { %108 = vmatpush.bf16.msra.mxu0 %v588_v12  ;;  %134 = vmatpush.bf16.msra.mxu1 %v588_v12  ;;  %v284_v41 = vrot.slane %v283_v38, 1 }
   0xf   :  { %186 = vmatpush.bf16.msra.mxu2 %v582_v13  ;;  %202 = vmatpush.bf16.msra.mxu3 %v582_v13 }
  0x12   :  { %109 = vmatpush.bf16.msra.mxu0 %v587_v16  ;;  %135 = vmatpush.bf16.msra.mxu1 %v587_v16 }
  0x13   :  { %187 = vmatpush.bf16.msra.mxu2 %v581_v17  ;;  %203 = vmatpush.bf16.msra.mxu3 %v581_v17 }
  0x16   :  { %110 = vmatpush.bf16.msra.mxu0 %v586_v22  ;;  %136 = vmatpush.bf16.msra.mxu1 %v586_v22 }
  0x17   :  { %188 = vmatpush.bf16.msra.mxu2 %v580_v23  ;;  %204 = vmatpush.bf16.msra.mxu3 %v580_v23 }
  0x19   :  { %510 = vmatmul.msk.bf16.vlgmr.msra.gmra.mxu0 %vm99_vm0, %v62_v25  ;;  %511 = vmatmul.msk.bf16.vlgmr.msra.gmra.mxu1 %vm99_vm0, %v125_v26 }
  0x1a   :  { %270 = vmatpush.bf16.msrb.mxu0 %v597_v24  ;;  %290 = vmatpush.bf16.msrb.mxu1 %v597_v24  ;;  %v603_v24 = vmov 32.0  }
  0x1b   :  { %536 = vmatmul.msk.bf16.vlgmr.msra.gmra.mxu2 %vm99_vm0, %v24_v27  ;;  %537 = vmatmul.msk.bf16.vlgmr.msra.gmra.mxu3 %vm99_vm0, %v25_v28  ;;  %599 = vrcp.f32 %v603_v24 }
  0x1c   :  { %346 = vmatpush.msrb.mxu2 %v333_v42  ;;  %369 = vmatpush.msrb.mxu3 %v333_v42 }
  0x1e   :  { %271 = vmatpush.bf16.msrb.mxu0 %v596_v29  ;;  %291 = vmatpush.bf16.msrb.mxu1 %v596_v29  ;;  %v409_v29 = vld [vmem:[%s774_s3 + $0x8] sm:$0xff] }
  0x1f   :  { %347 = vmatpush.msrb.mxu2 %v332_v43  ;;  %370 = vmatpush.msrb.mxu3 %v332_v43 }
  0x21   :  { %348 = vmatpush.msrb.mxu2 %v331_v44  ;;  %371 = vmatpush.msrb.mxu3 %v331_v44  ;;  %v600_v25 = vpop.eup %599 }
  0x22   :  { %272 = vmatpush.bf16.msrb.mxu0 %v595_v30  ;;  %292 = vmatpush.bf16.msrb.mxu1 %v595_v30  ;;  %v382_v26 = vmul.f32 32.0, %v600_v25  ;;  %vm386_vm3 = vweird.f32 %v600_v25 }
  0x23   :  { %349 = vmatpush.msrb.mxu2 %v330_v45  ;;  %372 = vmatpush.msrb.mxu3 %v330_v45  ;;  %v392_v45 = vld [vmem:[%s775_s4] sm:$0x1] }
  0x24   :  { %v383_v27 = vsub.f32 1.0, %v382_v26 }
  0x25   :  { %350 = vmatpush.msrb.mxu2 %v329_v48  ;;  %373 = vmatpush.msrb.mxu3 %v329_v48 }
  0x26   :  { %273 = vmatpush.bf16.msrb.mxu0 %v594_v31  ;;  %293 = vmatpush.bf16.msrb.mxu1 %v594_v31  ;;  %v384_v28 = vmul.f32 %v600_v25, %v383_v27  ;;  %v408_v31 = vld [vmem:[%s774_s3] sm:$0xff] }
  0x27   :  { %351 = vmatpush.msrb.mxu2 %v328_v49  ;;  %374 = vmatpush.msrb.mxu3 %v328_v49  ;;  %v405_v49 = vld [vmem:[%s776_s5] sm:$0x1] }
  0x28   :  { %v385_v30 = vadd.f32 %v600_v25, %v384_v28 }
  0x29   :  { %352 = vmatpush.msrb.mxu2 %v327_v50  ;;  %375 = vmatpush.msrb.mxu3 %v327_v50 }
  0x2a   :  { %274 = vmatpush.bf16.msrb.mxu0 %v593_v36  ;;  %294 = vmatpush.bf16.msrb.mxu1 %v593_v36  ;;  %v387_v32 = vsel %vm386_vm3, %v600_v25, %v385_v30 }
  0x2b   :  { %353 = vmatpush.msrb.mxu2 %v326_v51  ;;  %376 = vmatpush.msrb.mxu3 %v326_v51 }
  0x2d   :  { %428 = vmatpush.msra.mxu2 %v409_v29  ;;  %451 = vmatpush.msra.mxu3 %v409_v29 }
  0x2e   :  { %275 = vmatpush.bf16.msrb.mxu0 %v592_v39  ;;  %295 = vmatpush.bf16.msrb.mxu1 %v592_v39 }
  0x2f   :  { %429 = vmatpush.msra.mxu2 %v408_v31  ;;  %452 = vmatpush.msra.mxu3 %v408_v31 }
  0x31   :  { %574 = vmatmul.msk.bf16.vlgmr.msrb.gmra.mxu0 %vm99_vm0, %v228_v40  ;;  %575 = vmatmul.msk.bf16.vlgmr.msrb.gmra.mxu1 %vm99_vm0, %v284_v41 }
  0x96   :  { %v112_v46 = vpop.f32.mrf.mxu0  ;;  %v138_v47 = vpop.f32.mrf.mxu1 }
  0x9e   :  { %v190_v52 = vpop.f32.mrf.mxu2  ;;  %v206_v53 = vpop.f32.mrf.mxu3 }
  0x9f   :  { %v114_v54 = vpop.f32.mrf.mxu0  ;;  %v140_v55 = vpop.f32.mrf.mxu1  ;;  %v191_v58 = vadd.f32 %v190_v52, %v112_v46  ;;  %v207_v59 = vadd.f32 %v206_v53, %v138_v47 }
  0xa6   :  { %v192_v56 = vpop.f32.mrf.mxu2  ;;  %v208_v57 = vpop.f32.mrf.mxu3 }
  0xae   :  { %v277_v60 = vpop.f32.mrf.mxu0  ;;  %v297_v61 = vpop.f32.mrf.mxu1 }
  0xaf   :  { %v741_v62 = vadd.f32 %v277_v60, %v191_v58  ;;  %v743_v63 = vadd.f32 %v297_v61, %v207_v59 }
  0xb1   :  { %v304_v0 = vsel %vm303_vm1, %v741_v62, 0.0  ;;  %v314_v1 = vmul.f32 %v741_v62, %v741_v62  ;;  %v305_v2 = vsel %vm303_vm1, %v743_v63, 0.0  ;;  %v315_v3 = vmul.f32 %v743_v63, %v743_v63 }
  0xb2   :  { %v306_v4 = vadd.f32 %v305_v2, %v304_v0 }
  0xb3   :  { %v316_v5 = vsel %vm303_vm1, %v314_v1, 0.0  ;;  %v317_v6 = vsel %vm303_vm1, %v315_v3, 0.0 }
  0xb4   :  { %v307_v7 = vsel %vm303_vm1, %v306_v4, 0.0  ;;  %v318_v8 = vadd.f32 %v317_v6, %v316_v5 }
  0xb5   :  { %v308_v9 = vrot.slane %v307_v7, 4 }
  0xb6   :  { %v319_v10 = vsel %vm303_vm1, %v318_v8, 0.0  ;;  %v279_v11 = vpop.f32.mrf.mxu0  ;;  %v299_v12 = vpop.f32.mrf.mxu1 }
  0xb7   :  { %v309_v13 = vadd.f32 %v308_v9, %v307_v7  ;;  %v320_v14 = vrot.slane %v319_v10, 4 }
  0xb9   :  { %v310_v15 = vrot.slane %v309_v13, 2  ;;  %v321_v16 = vadd.f32 %v320_v14, %v319_v10 }
  0xbb   :  { %v311_v17 = vadd.f32 %v310_v15, %v309_v13  ;;  %v322_v18 = vrot.slane %v321_v16, 2 }
  0xbd   :  { %v312_v19 = vrot.slane %v311_v17, 1  ;;  %v323_v20 = vadd.f32 %v322_v18, %v321_v16 }
  0xbf   :  { %v313_v21 = vadd.f32 %v312_v19, %v311_v17  ;;  %v324_v22 = vrot.slane %v323_v20, 1 }
  0xc1   :  { %576 = vmatmul.msk.f32.vlgmr.msrb.gmra.mxu2 %vm334_vm2, %v313_v21  ;;  %v325_v23 = vadd.f32 %v324_v22, %v323_v20 }
  0xc3   :  { %577 = vmatmul.msk.f32.vlgmr.msrb.gmra.mxu3 %vm334_vm2, %v325_v23 }
 0x144   :  { %v355_v33 = vpop.f32.mrf.mxu2 }
 0x145   :  { %v388_v34 = vmul.f32 %v387_v32, %v355_v33 }
 0x146   :  { %v378_v35 = vpop.f32.mrf.mxu3 }
 0x147   :  { %v390_v36 = vmul.f32 %v388_v34, %v388_v34  ;;  %v389_v37 = vmul.f32 %v387_v32, %v378_v35 }
 0x149   :  { %v391_v38 = vsub.f32 %v389_v37, %v390_v36 }
 0x14b   :  { %v393_v39 = vadd.f32 1e-05, %v391_v38 }
 0x14d   :  { %601 = vrsqrt.f32 %v393_v39  ;;  %vm400_vm5 = vweird.f32 %v393_v39 }
 0x153   :  { %v602_v40 = vpop.eup %601 }
 0x154   :  { %v395_v41 = vmul.f32 %v602_v40, %v393_v39  ;;  %vm401_vm4 = vweird.f32 %v602_v40 }
 0x155   :  { %vm402_vm6 = vmor %vm400_vm5, %vm401_vm4 }
 0x156   :  { %v396_v42 = vmul.f32 %v602_v40, %v395_v41 }
 0x158   :  { %v397_v43 = vmul.f32 0.5, %v396_v42 }
 0x15a   :  { %v398_v44 = vsub.f32 1.5, %v397_v43 }
 0x15c   :  { %v399_v46 = vmul.f32 %v602_v40, %v398_v44 }
 0x15e   :  { %v403_v47 = vsel %vm402_vm6, %v602_v40, %v399_v46 }
 0x15f   :  { %v404_v48 = vmul.f32 %v403_v47, %v392_v45 }
 0x161   :  { %v406_v50 = vmul.f32 %v404_v48, %v388_v34  ;;  %578 = vmatmul.msk.f32.vlgmr.msra.gmra.mxu2 %vm410_vm7, %v404_v48 }
 0x163   :  { %v407_v51 = vsub.f32 %v405_v49, %v406_v50 }
 0x165   :  { %579 = vmatmul.msk.f32.vlgmr.msra.gmra.mxu3 %vm410_vm7, %v407_v51 }
 0x1e4   :  { %v431_v52 = vpop.f32.mrf.mxu2 }
 0x1e5   :  { %v457_v53 = vperm.slane %v431_v52, 0 }
 0x1e7   :  { %v458_v55 = vmul.f32 %v457_v53, %v741_v62  ;;  %v459_v56 = vmul.f32 %v457_v53, %v743_v63 }
 0x1e8   :  { %v454_v54 = vpop.f32.mrf.mxu3 }
 0x1e9   :  { %v460_v57 = vperm.slane %v454_v54, 0 }
 0x1eb   :  { %v461_v58 = vadd.f32 %v460_v57, %v458_v55  ;;  %v462_v59 = vadd.f32 %v460_v57, %v459_v56 }
 0x1ed   :  { %v463_v60 = vmax.f32 %v461_v58, 0.0  ;;  %v464_v61 = vmax.f32 %v462_v59, 0.0 }
 0x1ef   :  { %v465_v0 = vpack.c.bf16 %v463_v60, %v463_v60  ;;  %v466_v1 = vpack.c.bf16 %v464_v61, %v464_v61 }
 0x1f1   :  { %468 = vst.msk [vmem:[%s777_s6] sm:$0x3] %vm467_vm8, %v465_v0 }
 0x1f2   :  { %469 = vst.msk [vmem:[%s777_s6 + $0x2] sm:$0x3] %vm467_vm8, %v466_v1 }

// kernel: unet_forward.30
= control target key start
LH: loop header
LB: loop body
LE: loop exit
PB: predicated region body
PF: predicated region fallthrough
CT: control target
= control target key end

     0   :  { %vm33_vm0 = vcmask 125952   ;;  %s79_s0 = inlined_call_operand.vmem [shape: bf16[8,16], index: 0, kind: input, shape index: {}]   ;;  %s80_s1 = inlined_call_operand.vmem [shape: bf16[8,16], index: 1, kind: input, shape index: {}]   ;;  %s81_s2 = inlined_call_operand.vmem [shape: bf16[8,16], index: 2, kind: input, shape index: {}]   ;;  %s82_s3 = inlined_call_operand.vmem [shape: bf16[8,16], index: 3, kind: input, shape index: {}]   ;;  %s83_s4 = inlined_call_operand.vmem [shape: bf16[8,16], index: 4, kind: output, shape index: {}]  }
   0x1   :  { %v17_v0 = vld [vmem:[%s79_s0] sm:$0xf] }
   0x2   :  { %v18_v1 = vld [vmem:[%s80_s1] sm:$0xf]  ;;  %v19_v3 = vunpack.c.l.bf16 %v17_v0 }
   0x3   :  { %v23_v2 = vld [vmem:[%s81_s2] sm:$0xf]  ;;  %v20_v4 = vunpack.c.l.bf16 %v18_v1 }
   0x4   :  { %v24_v5 = vld [vmem:[%s82_s3] sm:$0xf]  ;;  %v25_v6 = vunpack.c.l.bf16 %v23_v2 }
   0x5   :  { %v26_v7 = vunpack.c.l.bf16 %v24_v5  ;;  %v21_v8 = vmax.f32 %v19_v3, %v20_v4 }
   0x7   :  { %v27_v9 = vmax.f32 %v25_v6, %v26_v7 }
   0x9   :  { %v31_v10 = vmax.f32 %v21_v8, %v27_v9 }
   0xb   :  { %v32_v11 = vpack.c.bf16 %v31_v10, %v31_v10 }
   0xd   :  { %34 = vst.msk [vmem:[%s83_s4] sm:$0xf] %vm33_vm0, %v32_v11 }

// kernel: unet_forward.31
= control target key start
LH: loop header
LB: loop body
LE: loop exit
PB: predicated region body
PF: predicated region fallthrough
CT: control target
= control target key end

     0   :  { %vm78_vm0 = vcmask 523264   ;;  %vm255_vm1 = vcmask 517120   ;;  %vm363_vm6 = vcmask 261120   ;;  %vm420_vm7 = vcmask 516096   ;;  %s676_s1 = inlined_call_operand.vmem [shape: bf16[3,64,64], index: 1, kind: input, shape index: {}]   ;;  %s677_s0 = inlined_call_operand.vmem [shape: bf16[2,4,64], index: 0, kind: input, shape index: {}]   ;;  %s678_s2 = inlined_call_operand.vmem [shape: f32[64,32], index: 2, kind: input, shape index: {}]   ;;  %s679_s3 = inlined_call_operand.vmem [shape: f32[32,64], index: 3, kind: input, shape index: {}]   ;;  %s680_s4 = inlined_call_operand.vmem [shape: f32[1,32], index: 4, kind: input, shape index: {}]   ;;  %s681_s5 = inlined_call_operand.vmem [shape: f32[1,32], index: 5, kind: input, shape index: {}]   ;;  %s682_s6 = inlined_call_operand.vmem [shape: bf16[2,2,64], index: 6, kind: output, shape index: {}]  }
   0x1   :  { %v508_v0 = vld [vmem:[%s676_s1 + $0x38] sm:$0xff]  ;;  %v507_v2 = vld [vmem:[%s676_s1 + $0x30] sm:$0xff]  ;;  %v34_v4 = vld [vmem:[%s677_s0] sm:$0x3] }
   0x2   :  { %v504_v1 = vld [vmem:[%s676_s1 + $0x18] sm:$0xff]  ;;  %86 = vmatpush.bf16.msra.mxu0 %v508_v0  ;;  %v503_v3 = vld [vmem:[%s676_s1 + $0x10] sm:$0xff]  ;;  %111 = vmatpush.bf16.msra.mxu1 %v508_v0  ;;  %46 = vst [vmem:[#allocation1] ss:$4 sm:$0xff] %v34_v4  ;;  %v506_v5 = vld [vmem:[%s676_s1 + $0x28] sm:$0xff] }
   0x3   :  { %151 = vmatpush.bf16.msra.mxu2 %v504_v1  ;;  %167 = vmatpush.bf16.msra.mxu3 %v504_v1  ;;  %v502_v6 = vld [vmem:[%s676_s1 + $0x8] sm:$0xff]  ;;  %v35_v7 = vld [vmem:[%s677_s0 + $0x2] sm:$0x3]  ;;  %v512_v13 = vld [vmem:[%s676_s1 + $0x58] sm:$0xff] }
   0x4   :  { %v505_v8 = vld [vmem:[%s676_s1 + $0x20] sm:$0xff]  ;;  %v511_v18 = vld [vmem:[%s676_s1 + $0x50] sm:$0xff]  ;;  %v510_v23 = vld [vmem:[%s676_s1 + $0x48] sm:$0xff] }
   0x5   :  { %v501_v9 = vld [vmem:[%s676_s1] sm:$0xff]  ;;  %v285_v32 = vld [vmem:[%s678_s2 + $0x38] sm:$0xff]  ;;  %v284_v33 = vld [vmem:[%s678_s2 + $0x30] sm:$0xff] }
   0x6   :  { %87 = vmatpush.bf16.msra.mxu0 %v507_v2  ;;  %112 = vmatpush.bf16.msra.mxu1 %v507_v2  ;;  %v24_v15 = vld [vmem:[%s677_s0] sm:$0x1]  ;;  %v25_v17 = vld [vmem:[%s677_s0 + $0x2] sm:$0x1]  ;;  %v176_v19 = vld [vmem:[%s677_s0] sm:$0x2] }
   0x7   :  { %152 = vmatpush.bf16.msra.mxu2 %v503_v3  ;;  %168 = vmatpush.bf16.msra.mxu3 %v503_v3  ;;  %v509_v26 = vld [vmem:[%s676_s1 + $0x40] sm:$0xff]  ;;  %v283_v34 = vld [vmem:[%s678_s2 + $0x28] sm:$0xff]  ;;  %v281_v37 = vld [vmem:[%s678_s2 + $0x18] sm:$0xff] }
   0x8   :  { %v177_v27 = vld [vmem:[%s677_s0 + $0x2] sm:$0x2]  ;;  %v280_v38 = vld [vmem:[%s678_s2 + $0x10] sm:$0xff]  ;;  %v279_v39 = vld [vmem:[%s678_s2 + $0x8] sm:$0xff] }
   0x9   :  { %v47_v10 = vld.sshfl [vmem:[#allocation1] sm:$0xff pattern:$0x73625140] }
   0xa   :  { %88 = vmatpush.bf16.msra.mxu0 %v506_v5  ;;  %113 = vmatpush.bf16.msra.mxu1 %v506_v5  ;;  %v48_v11 = vshrl.u32 %v47_v10, 16  ;;  %v50_v12 = vshll.u32 %v47_v10, 16  ;;  %96 = vst [vmem:[#allocation1] ss:$4 sm:$0xff] %v35_v7  ;;  %v282_v36 = vld [vmem:[%s678_s2 + $0x20] sm:$0xff] }
   0xb   :  { %153 = vmatpush.bf16.msra.mxu2 %v502_v6  ;;  %169 = vmatpush.bf16.msra.mxu3 %v502_v6  ;;  %v278_v42 = vld [vmem:[%s678_s2] sm:$0xff] }
   0xc   :  { %v52_v14 = vrot.slane %v50_v12, 1 }
   0xe   :  { %89 = vmatpush.bf16.msra.mxu0 %v505_v8  ;;  %v53_v16 = vor.u32 %v52_v14, %v48_v11  ;;  %114 = vmatpush.bf16.msra.mxu1 %v505_v8  ;;  %v518_v14 = vmov 8.0  }
   0xf   :  { %154 = vmatpush.bf16.msra.mxu2 %v501_v9  ;;  %170 = vmatpush.bf16.msra.mxu3 %v501_v9  ;;  %514 = vrcp.f32 %v518_v14 }
  0x11   :  { %451 = vmatmul.msk.bf16.vlgmr.msra.gmra.mxu0 %vm78_vm0, %v53_v16  ;;  %v97_v20 = vld.sshfl [vmem:[#allocation1] sm:$0xff pattern:$0x73625140] }
  0x12   :  { %223 = vmatpush.bf16.msrb.mxu0 %v512_v13  ;;  %469 = vmatmul.msk.bf16.vlgmr.msra.gmra.mxu2 %vm78_vm0, %v24_v15  ;;  %v98_v21 = vshrl.u32 %v97_v20, 16  ;;  %v100_v22 = vshll.u32 %v97_v20, 16  ;;  %188 = vst [vmem:[#allocation1] ss:$4 sm:$0xff] %v176_v19  ;;  %v361_v20 = vld [vmem:[%s679_s3 + $0x10] sm:$0xff] }
  0x13   :  { %470 = vmatmul.msk.bf16.vlgmr.msra.gmra.mxu3 %vm78_vm0, %v25_v17  ;;  %244 = vmatpush.bf16.msrb.mxu1 %v512_v13 }
  0x14   :  { %v102_v24 = vrot.slane %v100_v22, 1  ;;  %297 = vmatpush.msrb.mxu2 %v285_v32  ;;  %320 = vmatpush.msrb.mxu3 %v285_v32 }
  0x15   :  { %v515_v15 = vpop.eup %514 }
  0x16   :  { %224 = vmatpush.bf16.msrb.mxu0 %v511_v18  ;;  %v103_v25 = vor.u32 %v102_v24, %v98_v21  ;;  %298 = vmatpush.msrb.mxu2 %v284_v33  ;;  %v333_v16 = vmul.f32 8.0, %v515_v15  ;;  %v360_v21 = vld [vmem:[%s679_s3 + $0x8] sm:$0xff]  ;;  %vm337_vm2 = vweird.f32 %v515_v15 }
  0x17   :  { %245 = vmatpush.bf16.msrb.mxu1 %v511_v18  ;;  %321 = vmatpush.msrb.mxu3 %v284_v33  ;;  %v362_v18 = vld [vmem:[%s679_s3 + $0x18] sm:$0xff] }
  0x18   :  { %452 = vmatmul.msk.bf16.vlgmr.msra.gmra.mxu1 %vm78_vm0, %v103_v25  ;;  %299 = vmatpush.msrb.mxu2 %v283_v34  ;;  %v334_v17 = vsub.f32 1.0, %v333_v16 }
  0x19   :  { %v189_v28 = vld.sshfl [vmem:[#allocation1] sm:$0xff pattern:$0x73625140]  ;;  %322 = vmatpush.msrb.mxu3 %v283_v34 }
  0x1a   :  { %225 = vmatpush.bf16.msrb.mxu0 %v510_v23  ;;  %233 = vst [vmem:[#allocation1] ss:$4 sm:$0xff] %v177_v27  ;;  %v191_v29 = vrot.slane %v189_v28, 1  ;;  %300 = vmatpush.msrb.mxu2 %v282_v36  ;;  %v335_v19 = vmul.f32 %v515_v15, %v334_v17 }
  0x1b   :  { %246 = vmatpush.bf16.msrb.mxu1 %v510_v23  ;;  %323 = vmatpush.msrb.mxu3 %v282_v36  ;;  %v359_v23 = vld [vmem:[%s679_s3] sm:$0xff] }
  0x1c   :  { %301 = vmatpush.msrb.mxu2 %v281_v37  ;;  %v336_v22 = vadd.f32 %v515_v15, %v335_v19 }
  0x1d   :  { %324 = vmatpush.msrb.mxu3 %v281_v37  ;;  %v343_v37 = vld [vmem:[%s680_s4] sm:$0x1] }
  0x1e   :  { %226 = vmatpush.bf16.msrb.mxu0 %v509_v26  ;;  %302 = vmatpush.msrb.mxu2 %v280_v38  ;;  %v338_v24 = vsel %vm337_vm2, %v515_v15, %v336_v22 }
  0x1f   :  { %247 = vmatpush.bf16.msrb.mxu1 %v509_v26  ;;  %325 = vmatpush.msrb.mxu3 %v280_v38 }
  0x20   :  { %303 = vmatpush.msrb.mxu2 %v279_v39 }
  0x21   :  { %495 = vmatmul.msk.bf16.vlgmr.msrb.gmra.mxu0 %vm78_vm0, %v191_v29  ;;  %v234_v30 = vld.sshfl [vmem:[#allocation1] sm:$0xff pattern:$0x73625140]  ;;  %326 = vmatpush.msrb.mxu3 %v279_v39 }
  0x22   :  { %v236_v31 = vrot.slane %v234_v30, 1  ;;  %304 = vmatpush.msrb.mxu2 %v278_v42 }
  0x23   :  { %327 = vmatpush.msrb.mxu3 %v278_v42 }
  0x24   :  { %379 = vmatpush.msra.mxu2 %v362_v18 }
  0x25   :  { %402 = vmatpush.msra.mxu3 %v362_v18 }
  0x26   :  { %380 = vmatpush.msra.mxu2 %v361_v20 }
  0x27   :  { %403 = vmatpush.msra.mxu3 %v361_v20 }
  0x28   :  { %496 = vmatmul.msk.bf16.vlgmr.msrb.gmra.mxu1 %vm78_vm0, %v236_v31  ;;  %381 = vmatpush.msra.mxu2 %v360_v21 }
  0x29   :  { %404 = vmatpush.msra.mxu3 %v360_v21 }
  0x2a   :  { %382 = vmatpush.msra.mxu2 %v359_v23 }
  0x2b   :  { %405 = vmatpush.msra.mxu3 %v359_v23 }
  0x8e   :  { %v91_v35 = vpop.f32.mrf.mxu0 }
  0x95   :  { %v156_v40 = vpop.f32.mrf.mxu2  ;;  %v116_v43 = vpop.f32.mrf.mxu1 }
  0x96   :  { %v172_v41 = vpop.f32.mrf.mxu3  ;;  %v93_v44 = vpop.f32.mrf.mxu0  ;;  %v157_v49 = vadd.f32 %v156_v40, %v91_v35 }
  0x97   :  { %v173_v51 = vadd.f32 %v172_v41, %v116_v43  ;;  %v356_v41 = vld [vmem:[%s681_s5] sm:$0x1] }
  0x9d   :  { %v158_v45 = vpop.f32.mrf.mxu2  ;;  %v118_v47 = vpop.f32.mrf.mxu1 }
  0x9e   :  { %v174_v46 = vpop.f32.mrf.mxu3  ;;  %v228_v48 = vpop.f32.mrf.mxu0 }
  0x9f   :  { %v638_v50 = vadd.f32 %v228_v48, %v157_v49 }
  0xa1   :  { %v266_v54 = vmul.f32 %v638_v50, %v638_v50  ;;  %v256_v56 = vsel %vm255_vm1, %v638_v50, 0.0 }
  0xa3   :  { %v268_v60 = vsel %vm255_vm1, %v266_v54, 0.0 }
  0xa5   :  { %v249_v52 = vpop.f32.mrf.mxu1 }
  0xa6   :  { %v230_v53 = vpop.f32.mrf.mxu0  ;;  %v642_v55 = vadd.f32 %v249_v52, %v173_v51 }
  0xa8   :  { %v257_v57 = vsel %vm255_vm1, %v642_v55, 0.0  ;;  %v267_v58 = vmul.f32 %v642_v55, %v642_v55 }
  0xa9   :  { %v258_v59 = vadd.f32 %v257_v57, %v256_v56 }
  0xaa   :  { %v269_v61 = vsel %vm255_vm1, %v267_v58, 0.0 }
  0xab   :  { %v259_v62 = vsel %vm255_vm1, %v258_v59, 0.0  ;;  %v270_v63 = vadd.f32 %v269_v61, %v268_v60 }
  0xac   :  { %v260_v0 = vrot.slane %v259_v62, 4 }
  0xad   :  { %v271_v1 = vsel %vm255_vm1, %v270_v63, 0.0  ;;  %v251_v2 = vpop.f32.mrf.mxu1 }
  0xae   :  { %v261_v3 = vadd.f32 %v260_v0, %v259_v62  ;;  %v272_v4 = vrot.slane %v271_v1, 4 }
  0xb0   :  { %v262_v5 = vrot.slane %v261_v3, 2  ;;  %v273_v6 = vadd.f32 %v272_v4, %v271_v1 }
  0xb2   :  { %v263_v7 = vadd.f32 %v262_v5, %v261_v3  ;;  %v274_v8 = vrot.slane %v273_v6, 2 }
  0xb4   :  { %v264_v9 = vrot.slane %v263_v7, 1  ;;  %v275_v10 = vadd.f32 %v274_v8, %v273_v6 }
  0xb6   :  { %v265_v11 = vadd.f32 %v264_v9, %v263_v7  ;;  %v276_v12 = vrot.slane %v275_v10, 1 }
  0xb8   :  { %497 = vmatmul.msk.f32.vlgmr.msrb.gmra.mxu2 %vm78_vm0, %v265_v11  ;;  %v277_v13 = vadd.f32 %v276_v12, %v275_v10 }
  0xba   :  { %498 = vmatmul.msk.f32.vlgmr.msrb.gmra.mxu3 %vm78_vm0, %v277_v13 }
 0x13b   :  { %v306_v25 = vpop.f32.mrf.mxu2 }
 0x13c   :  { %v339_v26 = vmul.f32 %v338_v24, %v306_v25 }
 0x13d   :  { %v329_v27 = vpop.f32.mrf.mxu3 }
 0x13e   :  { %v341_v28 = vmul.f32 %v339_v26, %v339_v26  ;;  %v340_v29 = vmul.f32 %v338_v24, %v329_v27 }
 0x140   :  { %v342_v30 = vsub.f32 %v340_v29, %v341_v28 }
 0x142   :  { %v344_v31 = vadd.f32 1e-05, %v342_v30 }
 0x144   :  { %516 = vrsqrt.f32 %v344_v31  ;;  %vm351_vm4 = vweird.f32 %v344_v31 }
 0x14a   :  { %v517_v32 = vpop.eup %516 }
 0x14b   :  { %v346_v33 = vmul.f32 %v517_v32, %v344_v31  ;;  %vm352_vm3 = vweird.f32 %v517_v32 }
 0x14c   :  { %vm353_vm5 = vmor %vm351_vm4, %vm352_vm3 }
 0x14d   :  { %v347_v34 = vmul.f32 %v517_v32, %v346_v33 }
 0x14f   :  { %v348_v35 = vmul.f32 0.5, %v347_v34 }
 0x151   :  { %v349_v36 = vsub.f32 1.5, %v348_v35 }
 0x153   :  { %v350_v38 = vmul.f32 %v517_v32, %v349_v36 }
 0x155   :  { %v354_v39 = vsel %vm353_vm5, %v517_v32, %v350_v38 }
 0x156   :  { %v355_v40 = vmul.f32 %v354_v39, %v343_v37 }
 0x158   :  { %v357_v42 = vmul.f32 %v355_v40, %v339_v26  ;;  %499 = vmatmul.msk.f32.vlgmr.msra.gmra.mxu2 %vm363_vm6, %v355_v40 }
 0x15a   :  { %v358_v43 = vsub.f32 %v356_v41, %v357_v42 }
 0x15c   :  { %500 = vmatmul.msk.f32.vlgmr.msra.gmra.mxu3 %vm363_vm6, %v358_v43 }
 0x1db   :  { %v384_v44 = vpop.f32.mrf.mxu2 }
 0x1dc   :  { %v410_v45 = vperm.slane %v384_v44, 0 }
 0x1de   :  { %v411_v47 = vmul.f32 %v410_v45, %v638_v50  ;;  %v412_v48 = vmul.f32 %v410_v45, %v642_v55 }
 0x1df   :  { %v407_v46 = vpop.f32.mrf.mxu3 }
 0x1e0   :  { %v413_v49 = vperm.slane %v407_v46, 0 }
 0x1e2   :  { %v414_v51 = vadd.f32 %v413_v49, %v411_v47  ;;  %v415_v52 = vadd.f32 %v413_v49, %v412_v48 }
 0x1e4   :  { %v416_v53 = vmax.f32 %v414_v51, 0.0  ;;  %v417_v54 = vmax.f32 %v415_v52, 0.0 }
 0x1e6   :  { %v418_v56 = vpack.c.bf16 %v416_v53, %v416_v53  ;;  %v419_v57 = vpack.c.bf16 %v417_v54, %v417_v54 }
 0x1e8   :  { %421 = vst.msk [vmem:[%s682_s6] sm:$0x1] %vm420_vm7, %v418_v56 }
 0x1e9   :  { %422 = vst.msk [vmem:[%s682_s6 + $0x1] sm:$0x1] %vm420_vm7, %v419_v57 }

// kernel: unet_forward.32
= control target key start
LH: loop header
LB: loop body
LE: loop exit
PB: predicated region body
PF: predicated region fallthrough
CT: control target
= control target key end

     0   :  { %vm335_vm0 = vcmask 517120   ;;  %vm366_vm1 = vcmask 523264   ;;  %vm444_vm6 = vcmask 261120   ;;  %vm501_vm7 = vcmask 516096   ;;  %s855_s1 = inlined_call_operand.vmem [shape: bf16[3,128,64], index: 1, kind: input, shape index: {}]   ;;  %s856_s0 = inlined_call_operand.vmem [shape: bf16[2,4,128], index: 0, kind: input, shape index: {}]   ;;  %s857_s2 = inlined_call_operand.vmem [shape: f32[64,32], index: 2, kind: input, shape index: {}]   ;;  %s858_s3 = inlined_call_operand.vmem [shape: f32[32,64], index: 3, kind: input, shape index: {}]   ;;  %s859_s4 = inlined_call_operand.vmem [shape: f32[1,32], index: 4, kind: input, shape index: {}]   ;;  %s860_s5 = inlined_call_operand.vmem [shape: f32[1,32], index: 5, kind: input, shape index: {}]   ;;  %s861_s6 = inlined_call_operand.vmem [shape: bf16[2,2,64], index: 6, kind: output, shape index: {}]  }
   0x1   :  { %v655_v0 = vld [vmem:[%s855_s1 + $0x78] sm:$0xff]  ;;  %v654_v2 = vld [vmem:[%s855_s1 + $0x70] sm:$0xff]  ;;  %v653_v4 = vld [vmem:[%s855_s1 + $0x68] sm:$0xff] }
   0x2   :  { %v647_v1 = vld [vmem:[%s855_s1 + $0x38] sm:$0xff]  ;;  %118 = vmatpush.bf16.msra.mxu0 %v655_v0  ;;  %141 = vmatpush.bf16.msra.mxu1 %v655_v0  ;;  %v646_v3 = vld [vmem:[%s855_s1 + $0x30] sm:$0xff]  ;;  %v41_v5 = vld [vmem:[%s856_s0] sm:$0x3] }
   0x3   :  { %202 = vmatpush.bf16.msra.mxu2 %v647_v1  ;;  %215 = vmatpush.bf16.msra.mxu3 %v647_v1  ;;  %v645_v6 = vld [vmem:[%s855_s1 + $0x28] sm:$0xff]  ;;  %61 = vst [vmem:[#allocation1] ss:$4 sm:$0xff] %v41_v5  ;;  %v652_v7 = vld [vmem:[%s855_s1 + $0x60] sm:$0xff]  ;;  %v651_v10 = vld [vmem:[%s855_s1 + $0x58] sm:$0xff] }
   0x4   :  { %v644_v8 = vld [vmem:[%s855_s1 + $0x20] sm:$0xff]  ;;  %v643_v12 = vld [vmem:[%s855_s1 + $0x18] sm:$0xff]  ;;  %v650_v13 = vld [vmem:[%s855_s1 + $0x50] sm:$0xff] }
   0x5   :  { %v42_v9 = vld [vmem:[%s856_s0 + $0x2] sm:$0x3]  ;;  %v642_v14 = vld [vmem:[%s855_s1 + $0x10] sm:$0xff]  ;;  %v228_v15 = vld [vmem:[%s856_s0] sm:$0x2] }
   0x6   :  { %119 = vmatpush.bf16.msra.mxu0 %v654_v2  ;;  %142 = vmatpush.bf16.msra.mxu1 %v654_v2  ;;  %v649_v17 = vld [vmem:[%s855_s1 + $0x48] sm:$0xff]  ;;  %v648_v25 = vld [vmem:[%s855_s1 + $0x40] sm:$0xff]  ;;  %v663_v26 = vld [vmem:[%s855_s1 + $0xb8] sm:$0xff] }
   0x7   :  { %203 = vmatpush.bf16.msra.mxu2 %v646_v3  ;;  %216 = vmatpush.bf16.msra.mxu3 %v646_v3  ;;  %v641_v19 = vld [vmem:[%s855_s1 + $0x8] sm:$0xff]  ;;  %v640_v27 = vld [vmem:[%s855_s1] sm:$0xff]  ;;  %v662_v32 = vld [vmem:[%s855_s1 + $0xb0] sm:$0xff] }
   0x8   :  { %v229_v28 = vld [vmem:[%s856_s0 + $0x2] sm:$0x2]  ;;  %v23_v33 = vld [vmem:[%s856_s0] sm:$0x1]  ;;  %v24_v34 = vld [vmem:[%s856_s0 + $0x2] sm:$0x1] }
   0x9   :  { %v661_v35 = vld [vmem:[%s855_s1 + $0xa8] sm:$0xff]  ;;  %v660_v36 = vld [vmem:[%s855_s1 + $0xa0] sm:$0xff]  ;;  %v659_v37 = vld [vmem:[%s855_s1 + $0x98] sm:$0xff] }
   0xa   :  { %120 = vmatpush.bf16.msra.mxu0 %v653_v4  ;;  %143 = vmatpush.bf16.msra.mxu1 %v653_v4  ;;  %v62_v11 = vld.sshfl [vmem:[#allocation1] sm:$0xff pattern:$0x73625140]  ;;  %v658_v38 = vld [vmem:[%s855_s1 + $0x90] sm:$0xff]  ;;  %v657_v39 = vld [vmem:[%s855_s1 + $0x88] sm:$0xff] }
   0xb   :  { %204 = vmatpush.bf16.msra.mxu2 %v645_v6  ;;  %217 = vmatpush.bf16.msra.mxu3 %v645_v6  ;;  %132 = vst [vmem:[#allocation1] ss:$4 sm:$0xff] %v42_v9  ;;  %v65_v16 = vshll.u32 %v62_v11, 16  ;;  %v63_v21 = vshrl.u32 %v62_v11, 16  ;;  %v656_v40 = vld [vmem:[%s855_s1 + $0x80] sm:$0xff]  ;;  %v365_v46 = vld [vmem:[%s857_s2 + $0x38] sm:$0xff] }
   0xc   :  { %v364_v47 = vld [vmem:[%s857_s2 + $0x30] sm:$0xff]  ;;  %v363_v48 = vld [vmem:[%s857_s2 + $0x28] sm:$0xff]  ;;  %v362_v49 = vld [vmem:[%s857_s2 + $0x20] sm:$0xff] }
   0xd   :  { %v67_v22 = vrot.slane %v65_v16, 1  ;;  %v361_v52 = vld [vmem:[%s857_s2 + $0x18] sm:$0xff]  ;;  %v360_v53 = vld [vmem:[%s857_s2 + $0x10] sm:$0xff]  ;;  %v359_v56 = vld [vmem:[%s857_s2 + $0x8] sm:$0xff] }
   0xe   :  { %121 = vmatpush.bf16.msra.mxu0 %v652_v7  ;;  %144 = vmatpush.bf16.msra.mxu1 %v652_v7  ;;  %v358_v57 = vld [vmem:[%s857_s2] sm:$0xff] }
   0xf   :  { %205 = vmatpush.bf16.msra.mxu2 %v644_v8  ;;  %218 = vmatpush.bf16.msra.mxu3 %v644_v8  ;;  %v68_v29 = vor.u32 %v67_v22, %v63_v21 }
  0x12   :  { %122 = vmatpush.bf16.msra.mxu0 %v651_v10  ;;  %145 = vmatpush.bf16.msra.mxu1 %v651_v10  ;;  %v133_v18 = vld.sshfl [vmem:[#allocation1] sm:$0xff pattern:$0x73625140] }
  0x13   :  { %206 = vmatpush.bf16.msra.mxu2 %v643_v12  ;;  %219 = vmatpush.bf16.msra.mxu3 %v643_v12  ;;  %v136_v20 = vshll.u32 %v133_v18, 16  ;;  %248 = vst [vmem:[#allocation1] ss:$4 sm:$0xff] %v228_v15  ;;  %v134_v23 = vshrl.u32 %v133_v18, 16 }
  0x15   :  { %v138_v24 = vrot.slane %v136_v20, 1 }
  0x16   :  { %123 = vmatpush.bf16.msra.mxu0 %v650_v13  ;;  %146 = vmatpush.bf16.msra.mxu1 %v650_v13 }
  0x17   :  { %207 = vmatpush.bf16.msra.mxu2 %v642_v14  ;;  %220 = vmatpush.bf16.msra.mxu3 %v642_v14  ;;  %v139_v30 = vor.u32 %v138_v24, %v134_v23 }
  0x1a   :  { %124 = vmatpush.bf16.msra.mxu0 %v649_v17  ;;  %147 = vmatpush.bf16.msra.mxu1 %v649_v17  ;;  %v249_v31 = vld.sshfl [vmem:[#allocation1] sm:$0xff pattern:$0x73625140] }
  0x1b   :  { %208 = vmatpush.bf16.msra.mxu2 %v641_v19  ;;  %221 = vmatpush.bf16.msra.mxu3 %v641_v19  ;;  %315 = vst [vmem:[#allocation1] ss:$4 sm:$0xff] %v229_v28  ;;  %v251_v42 = vrot.slane %v249_v31, 1 }
  0x1e   :  { %125 = vmatpush.bf16.msra.mxu0 %v648_v25  ;;  %148 = vmatpush.bf16.msra.mxu1 %v648_v25 }
  0x1f   :  { %209 = vmatpush.bf16.msra.mxu2 %v640_v27  ;;  %222 = vmatpush.bf16.msra.mxu3 %v640_v27 }
  0x21   :  { %126 = vmatmul.bf16.vlgmr.msra.gmra.mxu0 %v68_v29  ;;  %149 = vmatmul.bf16.vlgmr.msra.gmra.mxu1 %v139_v30  ;;  %v443_v30 = vld [vmem:[%s858_s3 + $0x18] sm:$0xff] }
  0x22   :  { %301 = vmatpush.bf16.msrb.mxu0 %v663_v26  ;;  %320 = vmatpush.bf16.msrb.mxu1 %v663_v26  ;;  %v316_v41 = vld.sshfl [vmem:[#allocation1] sm:$0xff pattern:$0x73625140]  ;;  %v669_v26 = vmov 8.0  }
  0x23   :  { %210 = vmatmul.bf16.vlgmr.msra.gmra.mxu2 %v23_v33  ;;  %223 = vmatmul.bf16.vlgmr.msra.gmra.mxu3 %v24_v34  ;;  %v318_v43 = vrot.slane %v316_v41, 1  ;;  %665 = vrcp.f32 %v669_v26  ;;  %v441_v33 = vld [vmem:[%s858_s3 + $0x8] sm:$0xff] }
  0x24   :  { %378 = vmatpush.msrb.mxu2 %v365_v46  ;;  %401 = vmatpush.msrb.mxu3 %v365_v46 }
  0x26   :  { %302 = vmatpush.bf16.msrb.mxu0 %v662_v32  ;;  %321 = vmatpush.bf16.msrb.mxu1 %v662_v32  ;;  %v442_v32 = vld [vmem:[%s858_s3 + $0x10] sm:$0xff] }
  0x27   :  { %379 = vmatpush.msrb.mxu2 %v364_v47  ;;  %402 = vmatpush.msrb.mxu3 %v364_v47 }
  0x29   :  { %380 = vmatpush.msrb.mxu2 %v363_v48  ;;  %403 = vmatpush.msrb.mxu3 %v363_v48  ;;  %v666_v27 = vpop.eup %665 }
  0x2a   :  { %303 = vmatpush.bf16.msrb.mxu0 %v661_v35  ;;  %322 = vmatpush.bf16.msrb.mxu1 %v661_v35  ;;  %v414_v28 = vmul.f32 8.0, %v666_v27  ;;  %vm418_vm2 = vweird.f32 %v666_v27  ;;  %v440_v35 = vld [vmem:[%s858_s3] sm:$0xff] }
  0x2b   :  { %381 = vmatpush.msrb.mxu2 %v362_v49  ;;  %404 = vmatpush.msrb.mxu3 %v362_v49  ;;  %v424_v49 = vld [vmem:[%s859_s4] sm:$0x1] }
  0x2c   :  { %v415_v29 = vsub.f32 1.0, %v414_v28 }
  0x2d   :  { %382 = vmatpush.msrb.mxu2 %v361_v52  ;;  %405 = vmatpush.msrb.mxu3 %v361_v52 }
  0x2e   :  { %304 = vmatpush.bf16.msrb.mxu0 %v660_v36  ;;  %323 = vmatpush.bf16.msrb.mxu1 %v660_v36  ;;  %v416_v31 = vmul.f32 %v666_v27, %v415_v29 }
  0x2f   :  { %383 = vmatpush.msrb.mxu2 %v360_v53  ;;  %406 = vmatpush.msrb.mxu3 %v360_v53  ;;  %v437_v53 = vld [vmem:[%s860_s5] sm:$0x1] }
  0x30   :  { %v417_v34 = vadd.f32 %v666_v27, %v416_v31 }
  0x31   :  { %384 = vmatpush.msrb.mxu2 %v359_v56  ;;  %407 = vmatpush.msrb.mxu3 %v359_v56 }
  0x32   :  { %305 = vmatpush.bf16.msrb.mxu0 %v659_v37  ;;  %324 = vmatpush.bf16.msrb.mxu1 %v659_v37  ;;  %v419_v36 = vsel %vm418_vm2, %v666_v27, %v417_v34 }
  0x33   :  { %385 = vmatpush.msrb.mxu2 %v358_v57  ;;  %408 = vmatpush.msrb.mxu3 %v358_v57 }
  0x35   :  { %460 = vmatpush.msra.mxu2 %v443_v30  ;;  %483 = vmatpush.msra.mxu3 %v443_v30 }
  0x36   :  { %306 = vmatpush.bf16.msrb.mxu0 %v658_v38  ;;  %325 = vmatpush.bf16.msrb.mxu1 %v658_v38 }
  0x37   :  { %461 = vmatpush.msra.mxu2 %v442_v32  ;;  %484 = vmatpush.msra.mxu3 %v442_v32 }
  0x39   :  { %462 = vmatpush.msra.mxu2 %v441_v33  ;;  %485 = vmatpush.msra.mxu3 %v441_v33 }
  0x3a   :  { %307 = vmatpush.bf16.msrb.mxu0 %v657_v39  ;;  %326 = vmatpush.bf16.msrb.mxu1 %v657_v39 }
  0x3b   :  { %463 = vmatpush.msra.mxu2 %v440_v35  ;;  %486 = vmatpush.msra.mxu3 %v440_v35 }
  0x3e   :  { %308 = vmatpush.bf16.msrb.mxu0 %v656_v40  ;;  %327 = vmatpush.bf16.msrb.mxu1 %v656_v40 }
  0x41   :  { %309 = vmatmul.bf16.vlgmr.msrb.gmra.mxu0 %v251_v42  ;;  %328 = vmatmul.bf16.vlgmr.msrb.gmra.mxu1 %v318_v43 }
  0x9e   :  { %v127_v44 = vpop.f32.mrf.mxu0  ;;  %v150_v45 = vpop.f32.mrf.mxu1 }
  0xa6   :  { %v129_v50 = vpop.f32.mrf.mxu0  ;;  %v152_v51 = vpop.f32.mrf.mxu1 }
  0xa7   :  { %v211_v54 = vpop.f32.mrf.mxu2  ;;  %v224_v55 = vpop.f32.mrf.mxu3 }
  0xa8   :  { %v212_v60 = vadd.f32 %v211_v54, %v127_v44  ;;  %v225_v61 = vadd.f32 %v224_v55, %v150_v45 }
  0xaf   :  { %v213_v58 = vpop.f32.mrf.mxu2  ;;  %v226_v59 = vpop.f32.mrf.mxu3 }
  0xbe   :  { %v310_v62 = vpop.f32.mrf.mxu0  ;;  %v329_v63 = vpop.f32.mrf.mxu1 }
  0xbf   :  { %v819_v0 = vadd.f32 %v310_v62, %v212_v60  ;;  %v821_v1 = vadd.f32 %v329_v63, %v225_v61 }
  0xc1   :  { %v336_v2 = vsel %vm335_vm0, %v819_v0, 0.0  ;;  %v346_v3 = vmul.f32 %v819_v0, %v819_v0  ;;  %v337_v4 = vsel %vm335_vm0, %v821_v1, 0.0  ;;  %v347_v5 = vmul.f32 %v821_v1, %v821_v1 }
  0xc2   :  { %v338_v6 = vadd.f32 %v337_v4, %v336_v2 }
  0xc3   :  { %v348_v7 = vsel %vm335_vm0, %v346_v3, 0.0  ;;  %v349_v8 = vsel %vm335_vm0, %v347_v5, 0.0 }
  0xc4   :  { %v339_v9 = vsel %vm335_vm0, %v338_v6, 0.0  ;;  %v350_v10 = vadd.f32 %v349_v8, %v348_v7 }
  0xc5   :  { %v340_v11 = vrot.slane %v339_v9, 4 }
  0xc6   :  { %v351_v12 = vsel %vm335_vm0, %v350_v10, 0.0  ;;  %v312_v13 = vpop.f32.mrf.mxu0  ;;  %v331_v14 = vpop.f32.mrf.mxu1 }
  0xc7   :  { %v341_v15 = vadd.f32 %v340_v11, %v339_v9  ;;  %v352_v16 = vrot.slane %v351_v12, 4 }
  0xc9   :  { %v342_v17 = vrot.slane %v341_v15, 2  ;;  %v353_v18 = vadd.f32 %v352_v16, %v351_v12 }
  0xcb   :  { %v343_v19 = vadd.f32 %v342_v17, %v341_v15  ;;  %v354_v20 = vrot.slane %v353_v18, 2 }
  0xcd   :  { %v344_v21 = vrot.slane %v343_v19, 1  ;;  %v355_v22 = vadd.f32 %v354_v20, %v353_v18 }
  0xcf   :  { %v345_v23 = vadd.f32 %v344_v21, %v343_v19  ;;  %v356_v24 = vrot.slane %v355_v22, 1 }
  0xd1   :  { %636 = vmatmul.msk.f32.vlgmr.msrb.gmra.mxu2 %vm366_vm1, %v345_v23  ;;  %v357_v25 = vadd.f32 %v356_v24, %v355_v22 }
  0xd3   :  { %637 = vmatmul.msk.f32.vlgmr.msrb.gmra.mxu3 %vm366_vm1, %v357_v25 }
 0x154   :  { %v387_v37 = vpop.f32.mrf.mxu2 }
 0x155   :  { %v420_v38 = vmul.f32 %v419_v36, %v387_v37 }
 0x156   :  { %v410_v39 = vpop.f32.mrf.mxu3 }
 0x157   :  { %v422_v40 = vmul.f32 %v420_v38, %v420_v38  ;;  %v421_v41 = vmul.f32 %v419_v36, %v410_v39 }
 0x159   :  { %v423_v42 = vsub.f32 %v421_v41, %v422_v40 }
 0x15b   :  { %v425_v43 = vadd.f32 1e-05, %v423_v42 }
 0x15d   :  { %667 = vrsqrt.f32 %v425_v43  ;;  %vm432_vm4 = vweird.f32 %v425_v43 }
 0x163   :  { %v668_v44 = vpop.eup %667 }
 0x164   :  { %v427_v45 = vmul.f32 %v668_v44, %v425_v43  ;;  %vm433_vm3 = vweird.f32 %v668_v44 }
 0x165   :  { %vm434_vm5 = vmor %vm432_vm4, %vm433_vm3 }
 0x166   :  { %v428_v46 = vmul.f32 %v668_v44, %v427_v45 }
 0x168   :  { %v429_v47 = vmul.f32 0.5, %v428_v46 }
 0x16a   :  { %v430_v48 = vsub.f32 1.5, %v429_v47 }
 0x16c   :  { %v431_v50 = vmul.f32 %v668_v44, %v430_v48 }
 0x16e   :  { %v435_v51 = vsel %vm434_vm5, %v668_v44, %v431_v50 }
 0x16f   :  { %v436_v52 = vmul.f32 %v435_v51, %v424_v49 }
 0x171   :  { %v438_v54 = vmul.f32 %v436_v52, %v420_v38  ;;  %638 = vmatmul.msk.f32.vlgmr.msra.gmra.mxu2 %vm444_vm6, %v436_v52 }
 0x173   :  { %v439_v55 = vsub.f32 %v437_v53, %v438_v54 }
 0x175   :  { %639 = vmatmul.msk.f32.vlgmr.msra.gmra.mxu3 %vm444_vm6, %v439_v55 }
 0x1f4   :  { %v465_v56 = vpop.f32.mrf.mxu2 }
 0x1f5   :  { %v491_v57 = vperm.slane %v465_v56, 0 }
 0x1f7   :  { %v492_v59 = vmul.f32 %v491_v57, %v819_v0  ;;  %v493_v60 = vmul.f32 %v491_v57, %v821_v1 }
 0x1f8   :  { %v488_v58 = vpop.f32.mrf.mxu3 }
 0x1f9   :  { %v494_v61 = vperm.slane %v488_v58, 0 }
 0x1fb   :  { %v495_v62 = vadd.f32 %v494_v61, %v492_v59  ;;  %v496_v63 = vadd.f32 %v494_v61, %v493_v60 }
 0x1fd   :  { %v497_v2 = vmax.f32 %v495_v62, 0.0  ;;  %v498_v3 = vmax.f32 %v496_v63, 0.0 }
 0x1ff   :  { %v499_v4 = vpack.c.bf16 %v497_v2, %v497_v2  ;;  %v500_v5 = vpack.c.bf16 %v498_v3, %v498_v3 }
 0x201   :  { %502 = vst.msk [vmem:[%s861_s6] sm:$0x1] %vm501_vm7, %v499_v4 }
 0x202   :  { %503 = vst.msk [vmem:[%s861_s6 + $0x1] sm:$0x1] %vm501_vm7, %v500_v5 }

// kernel: unet_forward.33
= control target key start
LH: loop header
LB: loop body
LE: loop exit
PB: predicated region body
PF: predicated region fallthrough
CT: control target
= control target key end

     0   :  { %vm140_vm0 = vcmask 261120   ;;  %vm516_vm1 = vcmask 189440   ;;  %vm517_vm2 = vsmask.f32 1280  ;;  %s883_s1 = inlined_call_operand.vmem [shape: bf16[3,160,24], index: 1, kind: input, shape index: {}]   ;;  %s884_s0 = inlined_call_operand.vmem [shape: bf16[2,5,160], index: 0, kind: input, shape index: {}]   ;;  %s885_s2 = inlined_call_operand.vmem [shape: f32[1,24], index: 2, kind: input, shape index: {}]   ;;  %s886_s3 = inlined_call_operand.vmem [shape: bf16[2,3,24], index: 3, kind: output, shape index: {}]  }
   0x1   :  { %v712_v0 = vld [vmem:[%s883_s1 + $0x88] sm:$0xff]  ;;  %v714_v1 = vld [vmem:[%s883_s1 + $0x98] sm:$0xff]  ;;  %v711_v2 = vld [vmem:[%s883_s1 + $0x80] sm:$0xff] }
   0x2   :  { %144 = vmatpush.bf16.msra.mxu0 %v712_v0  ;;  %163 = vmatpush.bf16.msra.mxu1 %v714_v1  ;;  %v713_v3 = vld [vmem:[%s883_s1 + $0x90] sm:$0xff]  ;;  %v38_v4 = vld [vmem:[%s884_s0 + $0x8] sm:$0x33]  ;;  %v37_v6 = vld [vmem:[%s884_s0] sm:$0x33] }
   0x3   :  { %193 = vmatpush.bf16.msra.mxu2 %v712_v0  ;;  %212 = vmatpush.bf16.msra.mxu3 %v714_v1  ;;  %v172_v5 = vunpack.c.h.b16 %v38_v4  ;;  %v702_v7 = vld [vmem:[%s883_s1 + $0x38] sm:$0xff]  ;;  %v770_v8 = vld [vmem:[%s883_s1 + $0x48] sm:$0xff]  ;;  %v62_v9 = vunpack.c.h.b16 %v37_v6  ;;  %v701_v15 = vld [vmem:[%s883_s1 + $0x30] sm:$0xff]  ;;  %v61_v25 = vunpack.c.l.b16 %v37_v6  ;;  %v171_v27 = vunpack.c.l.b16 %v38_v4 }
   0x4   :  { %v710_v11 = vld [vmem:[%s883_s1 + $0x78] sm:$0xff]  ;;  %v782_v16 = vld [vmem:[%s883_s1 + $0x40] sm:$0xff]  ;;  %v709_v20 = vld [vmem:[%s883_s1 + $0x70] sm:$0xff] }
   0x5   :  { %v174_v10 = vpack.c.b16 %v172_v5, %v172_v5  ;;  %v64_v12 = vpack.c.b16 %v62_v9, %v62_v9  ;;  %v700_v24 = vld [vmem:[%s883_s1 + $0x28] sm:$0xff]  ;;  %v699_v28 = vld [vmem:[%s883_s1 + $0x20] sm:$0xff]  ;;  %v63_v29 = vpack.c.b16 %v61_v25, %v61_v25  ;;  %v173_v32 = vpack.c.b16 %v171_v27, %v171_v27  ;;  %v698_v33 = vld [vmem:[%s883_s1 + $0x18] sm:$0xff] }
   0x6   :  { %145 = vmatpush.bf16.msra.mxu0 %v711_v2  ;;  %164 = vmatpush.bf16.msra.mxu1 %v713_v3  ;;  %v708_v26 = vld [vmem:[%s883_s1 + $0x68] sm:$0xff]  ;;  %v707_v30 = vld [vmem:[%s883_s1 + $0x60] sm:$0xff]  ;;  %v706_v36 = vld [vmem:[%s883_s1 + $0x58] sm:$0xff] }
   0x7   :  { %194 = vmatpush.bf16.msra.mxu2 %v711_v2  ;;  %213 = vmatpush.bf16.msra.mxu3 %v713_v3  ;;  %v183_v13 = vshrl.u32 %v174_v10, 16  ;;  %v185_v14 = vshll.u32 %v174_v10, 16  ;;  %v73_v17 = vshrl.u32 %v64_v12, 16  ;;  %v75_v18 = vshll.u32 %v64_v12, 16  ;;  %v15_v31 = vld [vmem:[%s884_s0] sm:$0x33]  ;;  %vm518_vm3 = vmand %vm516_vm1, %vm517_vm2 }
   0x8   :  { %v221_v34 = vunpack.c.h.b16 %v15_v31  ;;  %v68_v35 = vshll.u32 %v63_v29, 16  ;;  %v178_v37 = vshll.u32 %v173_v32, 16  ;;  %v697_v38 = vld [vmem:[%s883_s1 + $0x10] sm:$0xff]  ;;  %v66_v40 = vshrl.u32 %v63_v29, 16  ;;  %v722_v45 = vld [vmem:[%s883_s1 + $0xd8] sm:$0xff]  ;;  %v696_v46 = vld [vmem:[%s883_s1 + $0x8] sm:$0xff] }
   0x9   :  { %v187_v19 = vrot.slane %v185_v14, 1  ;;  %v77_v21 = vrot.slane %v75_v18, 1  ;;  %v705_v42 = vld [vmem:[%s883_s1 + $0x50] sm:$0xff]  ;;  %v176_v43 = vshrl.u32 %v173_v32, 16  ;;  %v220_v50 = vunpack.c.l.b16 %v15_v31  ;;  %v695_v51 = vld [vmem:[%s883_s1] sm:$0xff]  ;;  %v724_v52 = vld [vmem:[%s883_s1 + $0xe8] sm:$0xff] }
   0xa   :  { %288 = vmatpush.bf16.msrb.mxu1 %v702_v7  ;;  %146 = vmatpush.bf16.msra.mxu0 %v710_v11  ;;  %v223_v39 = vpack.c.b16 %v221_v34, %v221_v34  ;;  %v70_v41 = vrot.slane %v68_v35, 1  ;;  %v180_v44 = vrot.slane %v178_v37, 1  ;;  %v721_v49 = vld [vmem:[%s883_s1 + $0xd0] sm:$0xff]  ;;  %v16_v53 = vld [vmem:[%s884_s0 + $0x8] sm:$0x33]  ;;  %v723_v57 = vld [vmem:[%s883_s1 + $0xe0] sm:$0xff] }
   0xb   :  { %307 = vmatpush.bf16.msrb.mxu3 %v770_v8  ;;  %195 = vmatpush.bf16.msra.mxu2 %v710_v11  ;;  %v188_v22 = vor.u32 %v187_v19, %v183_v13  ;;  %v78_v23 = vor.u32 %v77_v21, %v73_v17  ;;  %v222_v54 = vpack.c.b16 %v220_v50, %v220_v50  ;;  %v720_v55 = vld [vmem:[%s883_s1 + $0xc8] sm:$0xff]  ;;  %v315_v56 = vunpack.c.l.b16 %v16_v53  ;;  %v719_v58 = vld [vmem:[%s883_s1 + $0xc0] sm:$0xff]  ;;  %v718_v61 = vld [vmem:[%s883_s1 + $0xb8] sm:$0xff] }
   0xc   :  { %v71_v47 = vor.u32 %v70_v41, %v66_v40  ;;  %v181_v48 = vor.u32 %v180_v44, %v176_v43  ;;  %v349_v59 = vld [vmem:[%s884_s0] sm:$0x66]  ;;  %v717_v63 = vld [vmem:[%s883_s1 + $0xb0] sm:$0xff]  ;;  %v350_v1 = vld [vmem:[%s884_s0 + $0x8] sm:$0x66]  ;;  %v316_v6 = vunpack.c.h.b16 %v16_v53 }
   0xd   :  { %590 = vmatmul.msk.bf16.vlgmr.msra.gmra.mxu3 %vm140_vm0, %v188_v22  ;;  %589 = vmatmul.msk.bf16.vlgmr.msra.gmra.mxu1 %vm140_vm0, %v78_v23  ;;  %v317_v60 = vpack.c.b16 %v315_v56, %v315_v56  ;;  %v374_v62 = vunpack.c.h.b16 %v349_v59  ;;  %v470_v2 = vunpack.c.l.b16 %v350_v1  ;;  %v716_v4 = vld [vmem:[%s883_s1 + $0xa8] sm:$0xff]  ;;  %v373_v5 = vunpack.c.l.b16 %v349_v59  ;;  %v725_v41 = vld [vmem:[%s885_s2] ss:$0 sm:$0xff]  ;;  %v522_v53 = vld [vmem:[%s886_s3 + $0x2] sm:$0x3] }
   0xe   :  { %289 = vmatpush.bf16.msrb.mxu1 %v701_v15  ;;  %147 = vmatpush.bf16.msra.mxu0 %v709_v20  ;;  %v318_v10 = vpack.c.b16 %v316_v6, %v316_v6  ;;  %v471_v13 = vunpack.c.h.b16 %v350_v1 }
   0xf   :  { %308 = vmatpush.bf16.msrb.mxu3 %v782_v16  ;;  %196 = vmatpush.bf16.msra.mxu2 %v709_v20  ;;  %v376_v0 = vpack.c.b16 %v374_v62, %v374_v62  ;;  %v375_v9 = vpack.c.b16 %v373_v5, %v373_v5 }
  0x10   :  { %v473_v14 = vpack.c.b16 %v471_v13, %v471_v13 }
  0x11   :  { %v378_v3 = vrot.slane %v376_v0, 1  ;;  %v377_v12 = vrot.slane %v375_v9, 1 }
  0x12   :  { %290 = vmatpush.bf16.msrb.mxu1 %v700_v24  ;;  %148 = vmatpush.bf16.msra.mxu0 %v708_v26 }
  0x13   :  { %323 = vmatpush.bf16.msra.mxu3 %v702_v7  ;;  %197 = vmatpush.bf16.msra.mxu2 %v708_v26  ;;  %v472_v7 = vpack.c.b16 %v470_v2, %v470_v2 }
  0x15   :  { %v474_v11 = vrot.slane %v472_v7, 1 }
  0x16   :  { %291 = vmatpush.bf16.msrb.mxu1 %v699_v28  ;;  %149 = vmatpush.bf16.msra.mxu0 %v707_v30 }
  0x17   :  { %324 = vmatpush.bf16.msra.mxu3 %v701_v15  ;;  %198 = vmatpush.bf16.msra.mxu2 %v707_v30  ;;  %v475_v15 = vrot.slane %v473_v14, 1 }
  0x1a   :  { %292 = vmatpush.bf16.msrb.mxu1 %v698_v33  ;;  %150 = vmatpush.bf16.msra.mxu0 %v706_v36 }
  0x1b   :  { %325 = vmatpush.bf16.msra.mxu3 %v700_v24  ;;  %199 = vmatpush.bf16.msra.mxu2 %v706_v36 }
  0x1d   :  { %631 = vmatmul.msk.bf16.vlgmr.msrb.gmra.mxu3 %vm140_vm0, %v223_v39 }
  0x1e   :  { %293 = vmatpush.bf16.msrb.mxu1 %v697_v38  ;;  %151 = vmatpush.bf16.msra.mxu0 %v705_v42 }
  0x1f   :  { %326 = vmatpush.bf16.msra.mxu3 %v699_v28  ;;  %200 = vmatpush.bf16.msra.mxu2 %v705_v42 }
  0x21   :  { %152 = vmatmul.bf16.vlgmr.msra.gmra.mxu0 %v71_v47 }
  0x22   :  { %480 = vmatpush.bf16.msrb.mxu0 %v722_v45  ;;  %294 = vmatpush.bf16.msrb.mxu1 %v696_v46 }
  0x23   :  { %327 = vmatpush.bf16.msra.mxu3 %v698_v33  ;;  %443 = vmatpush.bf16.msrb.mxu2 %v722_v45 }
  0x24   :  { %201 = vmatmul.bf16.vlgmr.msra.gmra.mxu2 %v181_v48 }
  0x26   :  { %481 = vmatpush.bf16.msrb.mxu0 %v721_v49  ;;  %295 = vmatpush.bf16.msrb.mxu1 %v695_v51 }
  0x27   :  { %328 = vmatpush.bf16.msra.mxu3 %v697_v38  ;;  %444 = vmatpush.bf16.msrb.mxu2 %v721_v49  ;;  %v519_v49 = vld [vmem:[%s886_s3] sm:$0x3] }
  0x29   :  { %296 = vmatmul.bf16.vlgmr.msrb.gmra.mxu1 %v222_v54 }
  0x2a   :  { %462 = vmatpush.bf16.msra.mxu1 %v724_v52  ;;  %482 = vmatpush.bf16.msrb.mxu0 %v720_v55 }
  0x2b   :  { %329 = vmatpush.bf16.msra.mxu3 %v696_v46  ;;  %445 = vmatpush.bf16.msrb.mxu2 %v720_v55 }
  0x2e   :  { %463 = vmatpush.bf16.msra.mxu1 %v723_v57  ;;  %483 = vmatpush.bf16.msrb.mxu0 %v719_v58 }
  0x2f   :  { %330 = vmatpush.bf16.msra.mxu3 %v695_v51  ;;  %446 = vmatpush.bf16.msrb.mxu2 %v719_v58 }
  0x32   :  { %499 = vmatpush.bf16.msrb.mxu1 %v724_v52  ;;  %331 = vmatmul.bf16.vlgmr.msra.gmra.mxu3 %v317_v60 }
  0x33   :  { %342 = vmatpush.bf16.msrb.mxu3 %v770_v8  ;;  %484 = vmatpush.bf16.msrb.mxu0 %v718_v61  ;;  %v715_v8 = vld [vmem:[%s883_s1 + $0xa0] sm:$0xff] }
  0x34   :  { %447 = vmatpush.bf16.msrb.mxu2 %v718_v61 }
  0x36   :  { %500 = vmatpush.bf16.msrb.mxu1 %v723_v57 }
  0x37   :  { %343 = vmatpush.bf16.msrb.mxu3 %v782_v16  ;;  %485 = vmatpush.bf16.msrb.mxu0 %v717_v63 }
  0x38   :  { %448 = vmatpush.bf16.msrb.mxu2 %v717_v63 }
  0x39   :  { %693 = vmatmul.msk.bf16.vlgmr.msra.gmra.mxu1 %vm140_vm0, %v378_v3 }
  0x3b   :  { %486 = vmatpush.bf16.msrb.mxu0 %v716_v4 }
  0x3c   :  { %449 = vmatpush.bf16.msrb.mxu2 %v716_v4 }
  0x3f   :  { %487 = vmatpush.bf16.msrb.mxu0 %v715_v8 }
  0x40   :  { %450 = vmatpush.bf16.msrb.mxu2 %v715_v8 }
  0x42   :  { %632 = vmatmul.msk.bf16.vlgmr.msrb.gmra.mxu3 %vm140_vm0, %v318_v10  ;;  %488 = vmatmul.bf16.vlgmr.msrb.gmra.mxu0 %v474_v11 }
  0x43   :  { %451 = vmatmul.bf16.vlgmr.msrb.gmra.mxu2 %v377_v12 }
  0x49   :  { %694 = vmatmul.msk.bf16.vlgmr.msrb.gmra.mxu1 %vm140_vm0, %v475_v15 }
  0x8a   :  { %v166_v16 = vpop.f32.mrf.mxu1 }
  0x90   :  { %v215_v17 = vpop.f32.mrf.mxu3 }
  0x92   :  { %v168_v18 = vpop.f32.mrf.mxu1 }
  0x98   :  { %v217_v19 = vpop.f32.mrf.mxu3 }
  0x9e   :  { %v153_v20 = vpop.f32.mrf.mxu0 }
  0x9f   :  { %v167_v33 = vadd.f32 %v166_v16, %v153_v20 }
  0xa0   :  { %v310_v21 = vpop.f32.mrf.mxu3 }
  0xa6   :  { %v297_v22 = vpop.f32.mrf.mxu1  ;;  %v155_v24 = vpop.f32.mrf.mxu0 }
  0xa7   :  { %v202_v23 = vpop.f32.mrf.mxu2  ;;  %v298_v34 = vadd.f32 %v297_v22, %v167_v33 }
  0xa8   :  { %v312_v25 = vpop.f32.mrf.mxu3  ;;  %v216_v36 = vadd.f32 %v215_v17, %v202_v23 }
  0xa9   :  { %v311_v38 = vadd.f32 %v310_v21, %v298_v34 }
  0xae   :  { %v299_v26 = vpop.f32.mrf.mxu1 }
  0xaf   :  { %v204_v27 = vpop.f32.mrf.mxu2 }
  0xb5   :  { %v332_v28 = vpop.f32.mrf.mxu3 }
  0xb6   :  { %v465_v29 = vpop.f32.mrf.mxu1  ;;  %v333_v39 = vadd.f32 %v332_v28, %v216_v36 }
  0xbd   :  { %v334_v30 = vpop.f32.mrf.mxu3 }
  0xbe   :  { %v467_v32 = vpop.f32.mrf.mxu1 }
  0xbf   :  { %v489_v31 = vpop.f32.mrf.mxu0 }
  0xc5   :  { %v345_v35 = vpop.f32.mrf.mxu3 }
  0xc6   :  { %v452_v37 = vpop.f32.mrf.mxu2  ;;  %v502_v43 = vpop.f32.mrf.mxu1  ;;  %v346_v44 = vadd.f32 %v345_v35, %v333_v39 }
  0xc7   :  { %v466_v40 = vadd.f32 %v465_v29, %v452_v37  ;;  %v491_v42 = vpop.f32.mrf.mxu0  ;;  %v503_v46 = vadd.f32 %v502_v43, %v489_v31 }
  0xc9   :  { %v506_v45 = vadd.f32 %v466_v40, %v311_v38  ;;  %v507_v48 = vadd.f32 %v503_v46, %v346_v44 }
  0xcb   :  { %v512_v47 = vadd.f32 %v725_v41, %v506_v45  ;;  %v513_v52 = vadd.f32 %v725_v41, %v507_v48 }
  0xcd   :  { %v347_v50 = vpop.f32.mrf.mxu3  ;;  %v514_v51 = vpack.c.bf16 %v512_v47, %v512_v47  ;;  %v515_v56 = vpack.c.bf16 %v513_v52, %v513_v52 }
  0xce   :  { %v454_v54 = vpop.f32.mrf.mxu2  ;;  %v504_v57 = vpop.f32.mrf.mxu1 }
  0xcf   :  { %v520_v55 = vsel %vm518_vm3, %v514_v51, %v519_v49  ;;  %v523_v58 = vsel %vm518_vm3, %v515_v56, %v522_v53 }
  0xd0   :  { %521 = vst [vmem:[%s886_s3] sm:$0x3] %v520_v55 }
  0xd1   :  { %524 = vst [vmem:[%s886_s3 + $0x2] sm:$0x3] %v523_v58 }

// kernel: unet_forward.34
= control target key start
LH: loop header
LB: loop body
LE: loop exit
PB: predicated region body
PF: predicated region fallthrough
CT: control target
= control target key end

     0   :  { %vm68_vm0 = vcmask 1043456   ;;  %vm64_vm1 = vcmask 326656   ;;  %vm229_vm2 = vcmask 190464   ;;  %vm255_vm3 = vcmask 195584   ;;  %s587_s1 = inlined_call_operand.vmem [shape: bf16[3,40,24], index: 1, kind: input, shape index: {}]   ;;  %s588_s0 = inlined_call_operand.vmem [shape: bf16[2,5,40], index: 0, kind: input, shape index: {}]   ;;  %s589_s2 = inlined_call_operand.vmem [shape: f32[24,8], index: 2, kind: input, shape index: {}]   ;;  %s590_s3 = inlined_call_operand.vmem [shape: f32[8,24], index: 3, kind: input, shape index: {}]   ;;  %s591_s4 = inlined_call_operand.vmem [shape: f32[1,8], index: 4, kind: input, shape index: {}]   ;;  %s592_s5 = inlined_call_operand.vmem [shape: f32[1,8], index: 5, kind: input, shape index: {}]   ;;  %s593_s6 = inlined_call_operand.vmem [shape: bf16[2,3,24], index: 6, kind: output, shape index: {}]  }
   0x1   :  { %v404_v0 = vld [vmem:[%s587_s1 + $0x24] sm:$0xf]  ;;  %v30_v1 = vld [vmem:[%s587_s1 + $0x10] sm:$0xf]  ;;  %v31_v4 = vld [vmem:[%s588_s0] sm:$0x3] }
   0x2   :  { %v58_v2 = vunpack.c.l.b16 %v404_v0  ;;  %v120_v3 = vunpack.c.l.b16 %v30_v1  ;;  %v32_v5 = vld [vmem:[%s588_s0 + $0x4] sm:$0x3]  ;;  %v40_v8 = vunpack.c.l.b16 %v31_v4  ;;  %v429_v10 = vld [vmem:[%s587_s1 + $0x38] sm:$0xf]  ;;  %v447_v16 = vld [vmem:[%s587_s1 + $0x1c] sm:$0xff]  ;;  %vm330_vm8 = vcmask 64512  }
   0x3   :  { %v86_v9 = vunpack.c.l.b16 %v32_v5  ;;  %v182_v11 = vunpack.c.l.b16 %v429_v10  ;;  %v445_v17 = vld [vmem:[%s587_s1 + $0x8] sm:$0xff]  ;;  %v446_v25 = vld [vmem:[%s587_s1 + $0x14] sm:$0xff]  ;;  %v444_v26 = vld [vmem:[%s587_s1] sm:$0xff]  ;;  %vm387_vm9 = vcmask 189440   ;;  %vm388_vm10 = vsmask.f32 1280 }
   0x4   :  { %v61_v6 = vpack.c.b16 %v58_v2, %v58_v2  ;;  %v123_v7 = vpack.c.b16 %v120_v3, %v120_v3  ;;  %v41_v14 = vpack.c.b16 %v40_v8, %v40_v8  ;;  %v24_v30 = vld [vmem:[%s588_s0] sm:$0x3]  ;;  %v25_v31 = vld [vmem:[%s588_s0 + $0x4] sm:$0x3]  ;;  %v449_v32 = vld [vmem:[%s587_s1 + $0x30] sm:$0xff] }
   0x5   :  { %v87_v15 = vpack.c.b16 %v86_v9, %v86_v9  ;;  %v185_v20 = vpack.c.b16 %v182_v11, %v182_v11  ;;  %v161_v33 = vld [vmem:[%s588_s0] sm:$0x6]  ;;  %v162_v34 = vld [vmem:[%s588_s0 + $0x4] sm:$0x6]  ;;  %v448_v35 = vld [vmem:[%s587_s1 + $0x28] sm:$0xff] }
   0x6   :  { %v70_v12 = vsel %vm68_vm0, %v61_v6, 0  ;;  %v130_v13 = vsel %vm68_vm0, %v123_v7, 0  ;;  %v45_v18 = vshll.u32 %v41_v14, 16  ;;  %v43_v21 = vshrl.u32 %v41_v14, 16  ;;  %v254_v42 = vld [vmem:[%s589_s2 + $0x10] sm:$0xff]  ;;  %v253_v43 = vld [vmem:[%s589_s2 + $0x8] sm:$0xff]  ;;  %vm389_vm11 = vmand %vm387_vm9, %vm388_vm10 }
   0x7   :  { %77 = vmatpush.bf16.msra.mxu0 %v70_v12  ;;  %103 = vmatpush.bf16.msra.mxu1 %v70_v12  ;;  %v91_v19 = vshll.u32 %v87_v15, 16  ;;  %v89_v23 = vshrl.u32 %v87_v15, 16  ;;  %v192_v29 = vsel %vm68_vm0, %v185_v20, 0  ;;  %v170_v36 = vunpack.c.l.b16 %v161_v33  ;;  %v252_v44 = vld [vmem:[%s589_s2] sm:$0xff] }
   0x8   :  { %137 = vmatpush.bf16.msra.mxu2 %v130_v13  ;;  %153 = vmatpush.bf16.msra.mxu3 %v130_v13  ;;  %v47_v22 = vrot.slane %v45_v18, 1  ;;  %v208_v37 = vunpack.c.l.b16 %v162_v34 }
   0x9   :  { %v93_v24 = vrot.slane %v91_v19, 1  ;;  %v171_v38 = vpack.c.b16 %v170_v36, %v170_v36  ;;  %v455_v19 = vmov 18.0  }
   0xa   :  { %v48_v27 = vor.u32 %v47_v22, %v43_v21  ;;  %v209_v39 = vpack.c.b16 %v208_v37, %v208_v37  ;;  %451 = vrcp.f32 %v455_v19 }
   0xb   :  { %78 = vmatpush.bf16.msra.mxu0 %v447_v16  ;;  %104 = vmatpush.bf16.msra.mxu1 %v447_v16  ;;  %v94_v28 = vor.u32 %v93_v24, %v89_v23  ;;  %v172_v40 = vrot.slane %v171_v38, 1 }
   0xc   :  { %138 = vmatpush.bf16.msra.mxu2 %v445_v17  ;;  %154 = vmatpush.bf16.msra.mxu3 %v445_v17  ;;  %v210_v41 = vrot.slane %v209_v39, 1  ;;  %v313_v39 = vld [vmem:[%s591_s4] sm:$0x1] }
   0xf   :  { %79 = vmatpush.bf16.msra.mxu0 %v446_v25  ;;  %105 = vmatpush.bf16.msra.mxu1 %v446_v25  ;;  %v329_v25 = vld [vmem:[%s590_s3] sm:$0xff] }
  0x10   :  { %139 = vmatpush.bf16.msra.mxu2 %v444_v26  ;;  %155 = vmatpush.bf16.msra.mxu3 %v444_v26  ;;  %v452_v20 = vpop.eup %451 }
  0x11   :  { %v303_v21 = vmul.f32 18.0, %v452_v20  ;;  %vm307_vm4 = vweird.f32 %v452_v20 }
  0x12   :  { %413 = vmatmul.msk.bf16.vlgmr.msra.gmra.mxu0 %vm64_vm1, %v48_v27  ;;  %414 = vmatmul.msk.bf16.vlgmr.msra.gmra.mxu1 %vm64_vm1, %v94_v28 }
  0x13   :  { %199 = vmatpush.bf16.msrb.mxu0 %v192_v29  ;;  %219 = vmatpush.bf16.msrb.mxu1 %v192_v29  ;;  %v304_v22 = vsub.f32 1.0, %v303_v21 }
  0x14   :  { %423 = vmatmul.msk.bf16.vlgmr.msra.gmra.mxu2 %vm64_vm1, %v24_v30  ;;  %424 = vmatmul.msk.bf16.vlgmr.msra.gmra.mxu3 %vm64_vm1, %v25_v31 }
  0x15   :  { %272 = vmatpush.msrb.mxu2 %v254_v42  ;;  %295 = vmatpush.msrb.mxu3 %v254_v42  ;;  %v305_v23 = vmul.f32 %v452_v20, %v304_v22 }
  0x17   :  { %200 = vmatpush.bf16.msrb.mxu0 %v449_v32  ;;  %220 = vmatpush.bf16.msrb.mxu1 %v449_v32  ;;  %v306_v24 = vadd.f32 %v452_v20, %v305_v23 }
  0x18   :  { %273 = vmatpush.msrb.mxu2 %v253_v43  ;;  %296 = vmatpush.msrb.mxu3 %v253_v43  ;;  %v326_v43 = vld [vmem:[%s592_s5] sm:$0x1] }
  0x19   :  { %v308_v26 = vsel %vm307_vm4, %v452_v20, %v306_v24 }
  0x1a   :  { %274 = vmatpush.msrb.mxu2 %v252_v44  ;;  %297 = vmatpush.msrb.mxu3 %v252_v44 }
  0x1b   :  { %201 = vmatpush.bf16.msrb.mxu0 %v448_v35  ;;  %221 = vmatpush.bf16.msrb.mxu1 %v448_v35 }
  0x1c   :  { %349 = vmatpush.msra.mxu2 %v329_v25  ;;  %372 = vmatpush.msra.mxu3 %v329_v25 }
  0x22   :  { %438 = vmatmul.msk.bf16.vlgmr.msrb.gmra.mxu0 %vm64_vm1, %v172_v40  ;;  %439 = vmatmul.msk.bf16.vlgmr.msrb.gmra.mxu1 %vm64_vm1, %v210_v41 }
  0x8f   :  { %v81_v45 = vpop.f32.mrf.mxu0  ;;  %v107_v46 = vpop.f32.mrf.mxu1 }
  0x97   :  { %v141_v47 = vpop.f32.mrf.mxu2  ;;  %v157_v48 = vpop.f32.mrf.mxu3 }
  0x98   :  { %v83_v49 = vpop.f32.mrf.mxu0  ;;  %v109_v50 = vpop.f32.mrf.mxu1  ;;  %v142_v51 = vadd.f32 %v141_v47, %v81_v45  ;;  %v158_v52 = vadd.f32 %v157_v48, %v107_v46 }
  0x9f   :  { %v143_v53 = vpop.f32.mrf.mxu2  ;;  %v159_v54 = vpop.f32.mrf.mxu3 }
  0xa0   :  { %v203_v55 = vpop.f32.mrf.mxu0  ;;  %v223_v56 = vpop.f32.mrf.mxu1 }
  0xa1   :  { %v554_v57 = vadd.f32 %v203_v55, %v142_v51  ;;  %v556_v58 = vadd.f32 %v223_v56, %v158_v52  ;;  %v390_v56 = vld [vmem:[%s593_s6] sm:$0x3] }
  0xa3   :  { %v230_v59 = vsel %vm229_vm2, %v554_v57, 0.0  ;;  %v240_v60 = vmul.f32 %v554_v57, %v554_v57  ;;  %v231_v61 = vsel %vm229_vm2, %v556_v58, 0.0  ;;  %v241_v62 = vmul.f32 %v556_v58, %v556_v58 }
  0xa4   :  { %v232_v63 = vadd.f32 %v231_v61, %v230_v59  ;;  %v393_v59 = vld [vmem:[%s593_s6 + $0x2] sm:$0x3] }
  0xa5   :  { %v242_v0 = vsel %vm229_vm2, %v240_v60, 0.0  ;;  %v243_v1 = vsel %vm229_vm2, %v241_v62, 0.0 }
  0xa6   :  { %v233_v2 = vsel %vm229_vm2, %v232_v63, 0.0  ;;  %v244_v3 = vadd.f32 %v243_v1, %v242_v0 }
  0xa7   :  { %v234_v4 = vrot.slane %v233_v2, 4 }
  0xa8   :  { %v245_v5 = vsel %vm229_vm2, %v244_v3, 0.0  ;;  %v205_v6 = vpop.f32.mrf.mxu0  ;;  %v225_v7 = vpop.f32.mrf.mxu1 }
  0xa9   :  { %v235_v8 = vadd.f32 %v234_v4, %v233_v2  ;;  %v246_v9 = vrot.slane %v245_v5, 4 }
  0xab   :  { %v236_v10 = vrot.slane %v235_v8, 2  ;;  %v247_v11 = vadd.f32 %v246_v9, %v245_v5 }
  0xad   :  { %v237_v12 = vadd.f32 %v236_v10, %v235_v8  ;;  %v248_v13 = vrot.slane %v247_v11, 2 }
  0xaf   :  { %v238_v14 = vrot.slane %v237_v12, 1  ;;  %v249_v15 = vadd.f32 %v248_v13, %v247_v11 }
  0xb1   :  { %v239_v16 = vadd.f32 %v238_v14, %v237_v12  ;;  %v250_v17 = vrot.slane %v249_v15, 1 }
  0xb3   :  { %440 = vmatmul.msk.f32.vlgmr.msrb.gmra.mxu2 %vm255_vm3, %v239_v16  ;;  %v251_v18 = vadd.f32 %v250_v17, %v249_v15 }
  0xb5   :  { %441 = vmatmul.msk.f32.vlgmr.msrb.gmra.mxu3 %vm255_vm3, %v251_v18 }
 0x136   :  { %v276_v27 = vpop.f32.mrf.mxu2 }
 0x137   :  { %v309_v28 = vmul.f32 %v308_v26, %v276_v27 }
 0x138   :  { %v299_v29 = vpop.f32.mrf.mxu3 }
 0x139   :  { %v311_v30 = vmul.f32 %v309_v28, %v309_v28  ;;  %v310_v31 = vmul.f32 %v308_v26, %v299_v29 }
 0x13b   :  { %v312_v32 = vsub.f32 %v310_v31, %v311_v30 }
 0x13d   :  { %v314_v33 = vadd.f32 1e-05, %v312_v32 }
 0x13f   :  { %453 = vrsqrt.f32 %v314_v33  ;;  %vm321_vm6 = vweird.f32 %v314_v33 }
 0x145   :  { %v454_v34 = vpop.eup %453 }
 0x146   :  { %v316_v35 = vmul.f32 %v454_v34, %v314_v33  ;;  %vm322_vm5 = vweird.f32 %v454_v34 }
 0x147   :  { %vm323_vm7 = vmor %vm321_vm6, %vm322_vm5 }
 0x148   :  { %v317_v36 = vmul.f32 %v454_v34, %v316_v35 }
 0x14a   :  { %v318_v37 = vmul.f32 0.5, %v317_v36 }
 0x14c   :  { %v319_v38 = vsub.f32 1.5, %v318_v37 }
 0x14e   :  { %v320_v40 = vmul.f32 %v454_v34, %v319_v38 }
 0x150   :  { %v324_v41 = vsel %vm323_vm7, %v454_v34, %v320_v40 }
 0x151   :  { %v325_v42 = vmul.f32 %v324_v41, %v313_v39 }
 0x153   :  { %v327_v44 = vmul.f32 %v325_v42, %v309_v28  ;;  %442 = vmatmul.msk.f32.vlgmr.msra.gmra.mxu2 %vm330_vm8, %v325_v42 }
 0x155   :  { %v328_v45 = vsub.f32 %v326_v43, %v327_v44 }
 0x157   :  { %443 = vmatmul.msk.f32.vlgmr.msra.gmra.mxu3 %vm330_vm8, %v328_v45 }
 0x1d6   :  { %v351_v46 = vpop.f32.mrf.mxu2 }
 0x1d7   :  { %v377_v47 = vperm.slane %v351_v46, 0 }
 0x1d9   :  { %v378_v49 = vmul.f32 %v377_v47, %v554_v57  ;;  %v379_v50 = vmul.f32 %v377_v47, %v556_v58 }
 0x1da   :  { %v374_v48 = vpop.f32.mrf.mxu3 }
 0x1db   :  { %v380_v51 = vperm.slane %v374_v48, 0 }
 0x1dd   :  { %v381_v52 = vadd.f32 %v380_v51, %v378_v49  ;;  %v382_v53 = vadd.f32 %v380_v51, %v379_v50 }
 0x1df   :  { %v383_v54 = vmax.f32 %v381_v52, 0.0  ;;  %v384_v55 = vmax.f32 %v382_v53, 0.0 }
 0x1e1   :  { %v385_v60 = vpack.c.bf16 %v383_v54, %v383_v54  ;;  %v386_v57 = vpack.c.bf16 %v384_v55, %v384_v55 }
 0x1e3   :  { %v391_v61 = vsel %vm389_vm11, %v385_v60, %v390_v56  ;;  %v394_v58 = vsel %vm389_vm11, %v386_v57, %v393_v59 }
 0x1e4   :  { %392 = vst [vmem:[%s593_s6] sm:$0x3] %v391_v61 }
 0x1e5   :  { %395 = vst [vmem:[%s593_s6 + $0x2] sm:$0x3] %v394_v58 }

// kernel: unet_forward.36
= control target key start
LH: loop header
LB: loop body
LE: loop exit
PB: predicated region body
PF: predicated region fallthrough
CT: control target
= control target key end

     0   :  { %vm16_vm0 = vcmask 64512   ;;  %vm60_vm1 = vcmask 518144   ;;  %s100_s1 = inlined_call_operand.vmem [shape: bf16[2,8,64], index: 1, kind: input, shape index: {}]   ;;  %s101_s0 = inlined_call_operand.vmem [shape: f32[3,8], index: 0, kind: input, shape index: {}]   ;;  %s102_s2 = inlined_call_operand.vmem [shape: f32[2,3,64], index: 2, kind: output, shape index: {}]  }
   0x1   :  { %v70_v0 = vld [vmem:[%s100_s1] sm:$0xff]  }
   0x2   :  { %v71_v1 = vunpack.c.l.bf16 %v70_v0  ;;  %v72_v2 = vunpack.c.h.bf16 %v70_v0  ;;  %v11_v3 = vld [vmem:[%s101_s0] sm:$0x7] }
   0x4   :  { %35 = vmatpush.msra.mxu0 %v71_v1  ;;  %55 = vmatpush.msra.mxu1 %v72_v2 }
   0x5   :  { %67 = vmatmul.msk.f32.vlgmr.msra.gmra.mxu0 %vm16_vm0, %v11_v3  ;;  %68 = vmatmul.msk.f32.vlgmr.msra.gmra.mxu1 %vm16_vm0, %v11_v3 }
  0x82   :  { %v37_v4 = vpop.f32.mrf.mxu0  ;;  %v57_v5 = vpop.f32.mrf.mxu1 }
  0x83   :  { %61 = vst.msk [vmem:[%s102_s2] sm:$0x7] %vm60_vm1, %v37_v4 }
  0x84   :  { %62 = vst.msk [vmem:[%s102_s2 + $0x4] sm:$0x7] %vm60_vm1, %v57_v5 }

// kernel: unet_forward.37
= control target key start
LH: loop header
LB: loop body
LE: loop exit
PB: predicated region body
PF: predicated region fallthrough
CT: control target
= control target key end

     0   :  { %vm18_vm0 = vcmask 64512   ;;  %vm148_vm1 = vcmask 58368   ;;  %vm149_vm2 = vsmask.f32 1280  ;;  %s273_s1 = inlined_call_operand.vmem [shape: f32[6,8,8], index: 1, kind: input, shape index: {}]   ;;  %s274_s0 = inlined_call_operand.vmem [shape: f32[3,8], index: 0, kind: input, shape index: {}]   ;;  %s275_s2 = inlined_call_operand.vmem [shape: bf16[6,3,8], index: 2, kind: output, shape index: {}]  }
   0x1   :  { %v12_v0 = vld [vmem:[%s273_s1] sm:$0xff]  ;;  %v13_v1 = vld [vmem:[%s273_s1 + $0x8] sm:$0xff]  ;;  %v14_v5 = vld [vmem:[%s273_s1 + $0x10] sm:$0xff] }
   0x2   :  { %v11_v2 = vld [vmem:[%s274_s0] sm:$0x7]  ;;  %37 = vmatpush.msra.mxu0 %v12_v0  ;;  %57 = vmatpush.msra.mxu1 %v13_v1  ;;  %v17_v4 = vld [vmem:[%s273_s1 + $0x28] sm:$0xff]  ;;  %v15_v6 = vld [vmem:[%s273_s1 + $0x18] sm:$0xff] }
   0x3   :  { %v16_v3 = vld [vmem:[%s273_s1 + $0x20] sm:$0xff]  ;;  %173 = vmatmul.msk.f32.vlgmr.msra.gmra.mxu0 %vm18_vm0, %v11_v2  ;;  %174 = vmatmul.msk.f32.vlgmr.msra.gmra.mxu1 %vm18_vm0, %v11_v2  ;;  %vm221_vm3 = vmand %vm148_vm1, %vm149_vm2  ;;  %v163_v17 = vld [vmem:[%s275_s2 + $0x8] sm:$0x3] }
   0x4   :  { %117 = vmatpush.msrb.mxu0 %v16_v3  ;;  %137 = vmatpush.msrb.mxu1 %v17_v4  ;;  %v151_v9 = vld [vmem:[%s275_s2] sm:$0x3]  ;;  %v154_v11 = vld [vmem:[%s275_s2 + $0x2] sm:$0x3]  ;;  %v157_v20 = vld [vmem:[%s275_s2 + $0x4] sm:$0x3] }
   0x5   :  { %77 = vmatpush.msra.mxu2 %v14_v5  ;;  %97 = vmatpush.msra.mxu3 %v15_v6  ;;  %v160_v22 = vld [vmem:[%s275_s2 + $0x6] sm:$0x3]  ;;  %v166_v25 = vld [vmem:[%s275_s2 + $0xa] sm:$0x3] }
   0x6   :  { %175 = vmatmul.msk.f32.vlgmr.msra.gmra.mxu2 %vm18_vm0, %v11_v2  ;;  %176 = vmatmul.msk.f32.vlgmr.msra.gmra.mxu3 %vm18_vm0, %v11_v2 }
   0xb   :  { %177 = vmatmul.msk.f32.vlgmr.msrb.gmra.mxu0 %vm18_vm0, %v11_v2  ;;  %178 = vmatmul.msk.f32.vlgmr.msrb.gmra.mxu1 %vm18_vm0, %v11_v2 }
  0x80   :  { %v39_v7 = vpop.f32.mrf.mxu0  ;;  %v59_v10 = vpop.f32.mrf.mxu1 }
  0x81   :  { %v142_v12 = vpack.c.bf16 %v39_v7, %v39_v7  ;;  %v143_v13 = vpack.c.bf16 %v59_v10, %v59_v10 }
  0x83   :  { %v152_v14 = vsel %vm221_vm3, %v142_v12, %v151_v9  ;;  %v155_v15 = vsel %vm221_vm3, %v143_v13, %v154_v11 }
  0x84   :  { %153 = vst [vmem:[%s275_s2] sm:$0x3] %v152_v14 }
  0x85   :  { %156 = vst [vmem:[%s275_s2 + $0x2] sm:$0x3] %v155_v15 }
  0x88   :  { %v119_v16 = vpop.f32.mrf.mxu0  ;;  %v139_v18 = vpop.f32.mrf.mxu1 }
  0x89   :  { %v79_v19 = vpop.f32.mrf.mxu2  ;;  %v99_v21 = vpop.f32.mrf.mxu3  ;;  %v146_v23 = vpack.c.bf16 %v119_v16, %v119_v16  ;;  %v147_v24 = vpack.c.bf16 %v139_v18, %v139_v18 }
  0x8a   :  { %v144_v26 = vpack.c.bf16 %v79_v19, %v79_v19  ;;  %v145_v27 = vpack.c.bf16 %v99_v21, %v99_v21 }
  0x8b   :  { %v164_v28 = vsel %vm221_vm3, %v146_v23, %v163_v17  ;;  %v167_v31 = vsel %vm221_vm3, %v147_v24, %v166_v25 }
  0x8c   :  { %v158_v29 = vsel %vm221_vm3, %v144_v26, %v157_v20  ;;  %v161_v30 = vsel %vm221_vm3, %v145_v27, %v160_v22  ;;  %165 = vst [vmem:[%s275_s2 + $0x8] sm:$0x3] %v164_v28 }
  0x8d   :  { %159 = vst [vmem:[%s275_s2 + $0x4] sm:$0x3] %v158_v29 }
  0x8e   :  { %162 = vst [vmem:[%s275_s2 + $0x6] sm:$0x3] %v161_v30 }
  0x8f   :  { %168 = vst [vmem:[%s275_s2 + $0xa] sm:$0x3] %v167_v31 }

// kernel: unet_forward.38
= control target key start
LH: loop header
LB: loop body
LE: loop exit
PB: predicated region body
PF: predicated region fallthrough
CT: control target
= control target key end

     0   :  { %vm100_vm0 = vcmask 916480   ;;  %vm326_vm1 = vcmask 157696   ;;  %vm327_vm2 = vsmask.f32 2304  ;;  %s601_s1 = inlined_call_operand.vmem [shape: bf16[3,112,20], index: 1, kind: input, shape index: {}]   ;;  %s602_s0 = inlined_call_operand.vmem [shape: bf16[2,7,112], index: 0, kind: input, shape index: {}]   ;;  %s603_s2 = inlined_call_operand.vmem [shape: f32[1,20], index: 2, kind: input, shape index: {}]   ;;  %s604_s3 = inlined_call_operand.vmem [shape: bf16[2,5,20], index: 3, kind: output, shape index: {}]  }
   0x1   :  { %v470_v0 = vld [vmem:[%s601_s1 + $0x68] sm:$0xff]  ;;  %v463_v1 = vld [vmem:[%s601_s1 + $0x30] sm:$0xff]  ;;  %v469_v2 = vld [vmem:[%s601_s1 + $0x60] sm:$0xff] }
   0x2   :  { %105 = vmatpush.bf16.msra.mxu0 %v470_v0  ;;  %131 = vmatpush.bf16.msra.mxu1 %v470_v0  ;;  %v462_v3 = vld [vmem:[%s601_s1 + $0x28] sm:$0xff]  ;;  %v468_v4 = vld [vmem:[%s601_s1 + $0x58] sm:$0xff]  ;;  %v31_v5 = vld [vmem:[%s602_s0] sm:$0x7] }
   0x3   :  { %189 = vmatpush.bf16.msra.mxu2 %v463_v1  ;;  %205 = vmatpush.bf16.msra.mxu3 %v463_v1  ;;  %v32_v6 = vld [vmem:[%s602_s0 + $0x4] sm:$0x7]  ;;  %v49_v8 = vunpack.c.l.b16 %v31_v5  ;;  %v467_v10 = vld [vmem:[%s601_s1 + $0x50] sm:$0xff]  ;;  %v460_v11 = vld [vmem:[%s601_s1 + $0x18] sm:$0xff] }
   0x4   :  { %v461_v7 = vld [vmem:[%s601_s1 + $0x20] sm:$0xff]  ;;  %v118_v9 = vunpack.c.l.b16 %v32_v6  ;;  %v466_v14 = vld [vmem:[%s601_s1 + $0x48] sm:$0xff]  ;;  %v459_v15 = vld [vmem:[%s601_s1 + $0x10] sm:$0xff] }
   0x5   :  { %v50_v12 = vpack.c.b16 %v49_v8, %v49_v8  ;;  %v465_v18 = vld [vmem:[%s601_s1 + $0x40] sm:$0xff]  ;;  %v458_v19 = vld [vmem:[%s601_s1 + $0x8] sm:$0xff]  ;;  %v464_v24 = vld [vmem:[%s601_s1 + $0x38] sm:$0xff] }
   0x6   :  { %106 = vmatpush.bf16.msra.mxu0 %v469_v2  ;;  %132 = vmatpush.bf16.msra.mxu1 %v469_v2  ;;  %v119_v13 = vpack.c.b16 %v118_v9, %v118_v9  ;;  %v477_v25 = vld [vmem:[%s601_s1 + $0xa0] sm:$0xff]  ;;  %v476_v29 = vld [vmem:[%s601_s1 + $0x98] sm:$0xff]  ;;  %v475_v32 = vld [vmem:[%s601_s1 + $0x90] sm:$0xff] }
   0x7   :  { %190 = vmatpush.bf16.msra.mxu2 %v462_v3  ;;  %206 = vmatpush.bf16.msra.mxu3 %v462_v3  ;;  %v54_v16 = vshll.u32 %v50_v12, 16  ;;  %v52_v20 = vshrl.u32 %v50_v12, 16  ;;  %v457_v26 = vld [vmem:[%s601_s1] sm:$0xff]  ;;  %v474_v33 = vld [vmem:[%s601_s1 + $0x88] sm:$0xff]  ;;  %v472_v39 = vld [vmem:[%s601_s1 + $0x78] sm:$0xff] }
   0x8   :  { %v123_v17 = vshll.u32 %v119_v13, 16  ;;  %v121_v22 = vshrl.u32 %v119_v13, 16  ;;  %v15_v30 = vld [vmem:[%s602_s0] sm:$0x7]  ;;  %v16_v31 = vld [vmem:[%s602_s0 + $0x4] sm:$0x7]  ;;  %vm328_vm3 = vmand %vm326_vm1, %vm327_vm2 }
   0x9   :  { %v56_v21 = vrot.slane %v54_v16, 1  ;;  %v473_v34 = vld [vmem:[%s601_s1 + $0x80] sm:$0xff]  ;;  %v471_v42 = vld [vmem:[%s601_s1 + $0x70] sm:$0xff] }
   0xa   :  { %107 = vmatpush.bf16.msra.mxu0 %v468_v4  ;;  %133 = vmatpush.bf16.msra.mxu1 %v468_v4  ;;  %v125_v23 = vrot.slane %v123_v17, 1  ;;  %v217_v35 = vld [vmem:[%s602_s0] sm:$0xe]  ;;  %v218_v36 = vld [vmem:[%s602_s0 + $0x4] sm:$0xe] }
   0xb   :  { %191 = vmatpush.bf16.msra.mxu2 %v461_v7  ;;  %207 = vmatpush.bf16.msra.mxu3 %v461_v7  ;;  %v57_v27 = vor.u32 %v56_v21, %v52_v20  ;;  %v235_v37 = vunpack.c.l.b16 %v217_v35  ;;  %v297_v38 = vunpack.c.l.b16 %v218_v36  ;;  %v478_v55 = vld [vmem:[%s603_s2] ss:$0 sm:$0xff]  ;;  %v332_v63 = vld [vmem:[%s604_s3 + $0x4] sm:$0x7] }
   0xc   :  { %v126_v28 = vor.u32 %v125_v23, %v121_v22  ;;  %v329_v62 = vld [vmem:[%s604_s3] sm:$0x7] }
   0xd   :  { %v236_v40 = vpack.c.b16 %v235_v37, %v235_v37  ;;  %v298_v41 = vpack.c.b16 %v297_v38, %v297_v38 }
   0xe   :  { %108 = vmatpush.bf16.msra.mxu0 %v467_v10  ;;  %134 = vmatpush.bf16.msra.mxu1 %v467_v10 }
   0xf   :  { %192 = vmatpush.bf16.msra.mxu2 %v460_v11  ;;  %208 = vmatpush.bf16.msra.mxu3 %v460_v11  ;;  %v237_v43 = vrot.slane %v236_v40, 1  ;;  %v299_v44 = vrot.slane %v298_v41, 1 }
  0x12   :  { %109 = vmatpush.bf16.msra.mxu0 %v466_v14  ;;  %135 = vmatpush.bf16.msra.mxu1 %v466_v14 }
  0x13   :  { %193 = vmatpush.bf16.msra.mxu2 %v459_v15  ;;  %209 = vmatpush.bf16.msra.mxu3 %v459_v15 }
  0x16   :  { %110 = vmatpush.bf16.msra.mxu0 %v465_v18  ;;  %136 = vmatpush.bf16.msra.mxu1 %v465_v18 }
  0x17   :  { %194 = vmatpush.bf16.msra.mxu2 %v458_v19  ;;  %210 = vmatpush.bf16.msra.mxu3 %v458_v19 }
  0x1a   :  { %111 = vmatpush.bf16.msra.mxu0 %v464_v24  ;;  %137 = vmatpush.bf16.msra.mxu1 %v464_v24 }
  0x1b   :  { %195 = vmatpush.bf16.msra.mxu2 %v457_v26  ;;  %211 = vmatpush.bf16.msra.mxu3 %v457_v26 }
  0x1d   :  { %381 = vmatmul.msk.bf16.vlgmr.msra.gmra.mxu0 %vm100_vm0, %v57_v27  ;;  %382 = vmatmul.msk.bf16.vlgmr.msra.gmra.mxu1 %vm100_vm0, %v126_v28 }
  0x1e   :  { %284 = vmatpush.bf16.msrb.mxu0 %v477_v25  ;;  %304 = vmatpush.bf16.msrb.mxu1 %v477_v25 }
  0x1f   :  { %411 = vmatmul.msk.bf16.vlgmr.msra.gmra.mxu2 %vm100_vm0, %v15_v30  ;;  %412 = vmatmul.msk.bf16.vlgmr.msra.gmra.mxu3 %vm100_vm0, %v16_v31 }
  0x22   :  { %285 = vmatpush.bf16.msrb.mxu0 %v476_v29  ;;  %305 = vmatpush.bf16.msrb.mxu1 %v476_v29 }
  0x26   :  { %286 = vmatpush.bf16.msrb.mxu0 %v475_v32  ;;  %306 = vmatpush.bf16.msrb.mxu1 %v475_v32 }
  0x2a   :  { %287 = vmatpush.bf16.msrb.mxu0 %v474_v33  ;;  %307 = vmatpush.bf16.msrb.mxu1 %v474_v33 }
  0x2e   :  { %288 = vmatpush.bf16.msrb.mxu0 %v473_v34  ;;  %308 = vmatpush.bf16.msrb.mxu1 %v473_v34 }
  0x32   :  { %289 = vmatpush.bf16.msrb.mxu0 %v472_v39  ;;  %309 = vmatpush.bf16.msrb.mxu1 %v472_v39 }
  0x36   :  { %290 = vmatpush.bf16.msrb.mxu0 %v471_v42  ;;  %310 = vmatpush.bf16.msrb.mxu1 %v471_v42 }
  0x39   :  { %455 = vmatmul.msk.bf16.vlgmr.msrb.gmra.mxu0 %vm100_vm0, %v237_v43  ;;  %456 = vmatmul.msk.bf16.vlgmr.msrb.gmra.mxu1 %vm100_vm0, %v299_v44 }
  0x9a   :  { %v113_v45 = vpop.f32.mrf.mxu0  ;;  %v139_v46 = vpop.f32.mrf.mxu1 }
  0xa2   :  { %v115_v47 = vpop.f32.mrf.mxu0  ;;  %v141_v48 = vpop.f32.mrf.mxu1 }
  0xa3   :  { %v197_v49 = vpop.f32.mrf.mxu2  ;;  %v213_v50 = vpop.f32.mrf.mxu3 }
  0xa4   :  { %v198_v53 = vadd.f32 %v197_v49, %v113_v45  ;;  %v214_v54 = vadd.f32 %v213_v50, %v139_v46 }
  0xab   :  { %v199_v51 = vpop.f32.mrf.mxu2  ;;  %v215_v52 = vpop.f32.mrf.mxu3 }
  0xb6   :  { %v292_v56 = vpop.f32.mrf.mxu0  ;;  %v312_v57 = vpop.f32.mrf.mxu1 }
  0xb7   :  { %v316_v58 = vadd.f32 %v292_v56, %v198_v53  ;;  %v317_v59 = vadd.f32 %v312_v57, %v214_v54 }
  0xb9   :  { %v322_v60 = vadd.f32 %v478_v55, %v316_v58  ;;  %v323_v61 = vadd.f32 %v478_v55, %v317_v59 }
  0xbb   :  { %v324_v0 = vpack.c.bf16 %v322_v60, %v322_v60  ;;  %v325_v1 = vpack.c.bf16 %v323_v61, %v323_v61 }
  0xbd   :  { %v330_v2 = vsel %vm328_vm3, %v324_v0, %v329_v62  ;;  %v333_v3 = vsel %vm328_vm3, %v325_v1, %v332_v63 }
  0xbe   :  { %331 = vst [vmem:[%s604_s3] sm:$0x7] %v330_v2  ;;  %v294_v4 = vpop.f32.mrf.mxu0  ;;  %v314_v5 = vpop.f32.mrf.mxu1 }
  0xbf   :  { %334 = vst [vmem:[%s604_s3 + $0x4] sm:$0x7] %v333_v3 }

// kernel: unet_forward.39
= control target key start
LH: loop header
LB: loop body
LE: loop exit
PB: predicated region body
PF: predicated region fallthrough
CT: control target
= control target key end

     0   :  { %vm62_vm0 = vcmask 1045504   ;;  %vm58_vm1 = vcmask 228352   ;;  %vm244_vm2 = vcmask 1043456   ;;  %vm214_vm3 = vcmask 159744   ;;  %s585_s1 = inlined_call_operand.vmem [shape: bf16[3,28,20], index: 1, kind: input, shape index: {}]   ;;  %s586_s0 = inlined_call_operand.vmem [shape: bf16[2,7,28], index: 0, kind: input, shape index: {}]   ;;  %s587_s2 = inlined_call_operand.vmem [shape: f32[20,4], index: 2, kind: input, shape index: {}]   ;;  %s588_s3 = inlined_call_operand.vmem [shape: f32[4,20], index: 3, kind: input, shape index: {}]   ;;  %s589_s4 = inlined_call_operand.vmem [shape: f32[1,4], index: 4, kind: input, shape index: {}]   ;;  %s590_s5 = inlined_call_operand.vmem [shape: f32[1,4], index: 5, kind: input, shape index: {}]   ;;  %s591_s6 = inlined_call_operand.vmem [shape: bf16[2,5,20], index: 6, kind: output, shape index: {}]  }
   0x1   :  { %v402_v0 = vld [vmem:[%s585_s1 + $0x18] sm:$0xf]  ;;  %v441_v1 = vld [vmem:[%s585_s1 + $0x18] sm:$0x30]  ;;  %v412_v2 = vld [vmem:[%s585_s1 + $0x8] sm:$0xf] }
   0x2   :  { %v403_v3 = vor.u32 %v441_v1, %v402_v0  ;;  %v439_v4 = vld [vmem:[%s585_s1 + $0x8] sm:$0x30]  ;;  %v30_v6 = vld [vmem:[%s586_s0] sm:$0x7]  ;;  %v31_v7 = vld [vmem:[%s586_s0 + $0x4] sm:$0x7] }
   0x3   :  { %v413_v5 = vor.u32 %v439_v4, %v412_v2  ;;  %v38_v9 = vunpack.c.l.b16 %v30_v6  ;;  %v80_v10 = vunpack.c.l.b16 %v31_v7  ;;  %v426_v11 = vld [vmem:[%s585_s1 + $0x28] sm:$0xf]  ;;  %v440_v13 = vld [vmem:[%s585_s1 + $0x10] sm:$0xff]  ;;  %v443_v14 = vld [vmem:[%s585_s1 + $0x28] sm:$0x30]  ;;  %vm240_vm4 = vcmask 162816  }
   0x4   :  { %v64_v8 = vsel %vm62_vm0, %v403_v3, 0  ;;  %v438_v15 = vld [vmem:[%s585_s1] sm:$0xff]  ;;  %v427_v18 = vor.u32 %v443_v14, %v426_v11  ;;  %v239_v39 = vld [vmem:[%s587_s2 + $0x10] sm:$0xf]  ;;  %v238_v40 = vld [vmem:[%s587_s2 + $0x8] sm:$0xff]  ;;  %vm319_vm9 = vcmask 31744  }
   0x5   :  { %72 = vmatpush.bf16.msra.mxu0 %v64_v8  ;;  %98 = vmatpush.bf16.msra.mxu1 %v64_v8  ;;  %v120_v12 = vsel %vm62_vm0, %v413_v5, 0  ;;  %v39_v16 = vpack.c.b16 %v38_v9, %v38_v9  ;;  %v81_v17 = vpack.c.b16 %v80_v10, %v80_v10  ;;  %v24_v26 = vld [vmem:[%s586_s0] sm:$0x7]  ;;  %v25_v27 = vld [vmem:[%s586_s0 + $0x4] sm:$0x7]  ;;  %vm379_vm10 = vcmask 157696  }
   0x6   :  { %128 = vmatpush.bf16.msra.mxu2 %v120_v12  ;;  %144 = vmatpush.bf16.msra.mxu3 %v120_v12  ;;  %v177_v23 = vsel %vm62_vm0, %v427_v18, 0  ;;  %v442_v28 = vld [vmem:[%s585_s1 + $0x20] sm:$0xff]  ;;  %vm380_vm11 = vsmask.f32 2304 }
   0x7   :  { %v41_v19 = vshrl.u32 %v39_v16, 16  ;;  %v43_v20 = vshll.u32 %v39_v16, 16  ;;  %v83_v21 = vshrl.u32 %v81_v17, 16  ;;  %v85_v22 = vshll.u32 %v81_v17, 16  ;;  %v151_v31 = vld [vmem:[%s586_s0] sm:$0xe]  ;;  %vm381_vm12 = vmand %vm379_vm10, %vm380_vm11 }
   0x8   :  { %v152_v32 = vld [vmem:[%s586_s0 + $0x4] sm:$0xe]  ;;  %v159_v33 = vunpack.c.l.b16 %v151_v31  ;;  %v449_v16 = vmov 50.0  }
   0x9   :  { %73 = vmatpush.bf16.msra.mxu0 %v440_v13  ;;  %99 = vmatpush.bf16.msra.mxu1 %v440_v13  ;;  %v45_v24 = vrot.slane %v43_v20, 1  ;;  %v87_v25 = vrot.slane %v85_v22, 1  ;;  %v193_v34 = vunpack.c.l.b16 %v152_v32  ;;  %v237_v41 = vld [vmem:[%s587_s2] sm:$0xff]  ;;  %445 = vrcp.f32 %v449_v16 }
   0xa   :  { %129 = vmatpush.bf16.msra.mxu2 %v438_v15  ;;  %145 = vmatpush.bf16.msra.mxu3 %v438_v15  ;;  %v160_v35 = vpack.c.b16 %v159_v33, %v159_v33  ;;  %v318_v22 = vld [vmem:[%s588_s3] sm:$0xf] }
   0xb   :  { %v46_v29 = vor.u32 %v45_v24, %v41_v19  ;;  %v88_v30 = vor.u32 %v87_v25, %v83_v21  ;;  %v194_v36 = vpack.c.b16 %v193_v34, %v193_v34 }
   0xc   :  { %v161_v37 = vrot.slane %v160_v35, 1 }
   0xd   :  { %185 = vmatpush.bf16.msrb.mxu0 %v177_v23  ;;  %205 = vmatpush.bf16.msrb.mxu1 %v177_v23  ;;  %v195_v38 = vrot.slane %v194_v36, 1  ;;  %v302_v36 = vld [vmem:[%s589_s4] sm:$0x1] }
   0xe   :  { %414 = vmatmul.msk.bf16.vlgmr.msra.gmra.mxu2 %vm58_vm1, %v24_v26  ;;  %415 = vmatmul.msk.bf16.vlgmr.msra.gmra.mxu3 %vm58_vm1, %v25_v27 }
   0xf   :  { %404 = vmatmul.msk.bf16.vlgmr.msra.gmra.mxu0 %vm58_vm1, %v46_v29  ;;  %405 = vmatmul.msk.bf16.vlgmr.msra.gmra.mxu1 %vm58_vm1, %v88_v30  ;;  %v446_v17 = vpop.eup %445 }
  0x10   :  { %430 = vmatpush.msk.msrb.mxu2 %vm244_vm2, %v239_v39  ;;  %432 = vmatpush.msk.msrb.mxu3 %vm244_vm2, %v239_v39  ;;  %v292_v18 = vmul.f32 50.0, %v446_v17  ;;  %vm296_vm5 = vweird.f32 %v446_v17 }
  0x11   :  { %186 = vmatpush.bf16.msrb.mxu0 %v442_v28  ;;  %206 = vmatpush.bf16.msrb.mxu1 %v442_v28 }
  0x12   :  { %262 = vmatpush.msrb.mxu2 %v238_v40  ;;  %285 = vmatpush.msrb.mxu3 %v238_v40  ;;  %v293_v19 = vsub.f32 1.0, %v292_v18  ;;  %v315_v40 = vld [vmem:[%s590_s5] sm:$0x1] }
  0x14   :  { %263 = vmatpush.msrb.mxu2 %v237_v41  ;;  %286 = vmatpush.msrb.mxu3 %v237_v41  ;;  %v294_v20 = vmul.f32 %v446_v17, %v293_v19 }
  0x16   :  { %v295_v21 = vadd.f32 %v446_v17, %v294_v20  ;;  %434 = vmatpush.msk.msra.mxu2 %vm244_vm2, %v318_v22  ;;  %436 = vmatpush.msk.msra.mxu3 %vm244_vm2, %v318_v22 }
  0x18   :  { %v297_v23 = vsel %vm296_vm5, %v446_v17, %v295_v21 }
  0x1f   :  { %428 = vmatmul.msk.bf16.vlgmr.msrb.gmra.mxu0 %vm58_vm1, %v161_v37  ;;  %429 = vmatmul.msk.bf16.vlgmr.msrb.gmra.mxu1 %vm58_vm1, %v195_v38 }
  0x8c   :  { %v75_v42 = vpop.f32.mrf.mxu0  ;;  %v101_v43 = vpop.f32.mrf.mxu1 }
  0x91   :  { %v131_v44 = vpop.f32.mrf.mxu2  ;;  %v147_v45 = vpop.f32.mrf.mxu3 }
  0x92   :  { %v132_v50 = vadd.f32 %v131_v44, %v75_v42  ;;  %v148_v51 = vadd.f32 %v147_v45, %v101_v43 }
  0x94   :  { %v77_v46 = vpop.f32.mrf.mxu0  ;;  %v103_v47 = vpop.f32.mrf.mxu1 }
  0x99   :  { %v133_v48 = vpop.f32.mrf.mxu2  ;;  %v149_v49 = vpop.f32.mrf.mxu3 }
  0x9c   :  { %v188_v52 = vpop.f32.mrf.mxu0  ;;  %v208_v53 = vpop.f32.mrf.mxu1 }
  0x9d   :  { %v550_v54 = vadd.f32 %v188_v52, %v132_v50  ;;  %v552_v55 = vadd.f32 %v208_v53, %v148_v51  ;;  %v382_v53 = vld [vmem:[%s591_s6] sm:$0x7] }
  0x9f   :  { %v215_v56 = vsel %vm214_vm3, %v550_v54, 0.0  ;;  %v225_v57 = vmul.f32 %v550_v54, %v550_v54  ;;  %v216_v58 = vsel %vm214_vm3, %v552_v55, 0.0  ;;  %v226_v59 = vmul.f32 %v552_v55, %v552_v55 }
  0xa0   :  { %v217_v60 = vadd.f32 %v216_v58, %v215_v56  ;;  %v385_v56 = vld [vmem:[%s591_s6 + $0x4] sm:$0x7] }
  0xa1   :  { %v227_v61 = vsel %vm214_vm3, %v225_v57, 0.0  ;;  %v228_v62 = vsel %vm214_vm3, %v226_v59, 0.0 }
  0xa2   :  { %v218_v63 = vsel %vm214_vm3, %v217_v60, 0.0  ;;  %v229_v0 = vadd.f32 %v228_v62, %v227_v61 }
  0xa3   :  { %v219_v1 = vrot.slane %v218_v63, 4 }
  0xa4   :  { %v230_v2 = vsel %vm214_vm3, %v229_v0, 0.0  ;;  %v190_v3 = vpop.f32.mrf.mxu0  ;;  %v210_v4 = vpop.f32.mrf.mxu1 }
  0xa5   :  { %v220_v5 = vadd.f32 %v219_v1, %v218_v63  ;;  %v231_v6 = vrot.slane %v230_v2, 4 }
  0xa7   :  { %v221_v7 = vrot.slane %v220_v5, 2  ;;  %v232_v8 = vadd.f32 %v231_v6, %v230_v2 }
  0xa9   :  { %v222_v9 = vadd.f32 %v221_v7, %v220_v5  ;;  %v233_v10 = vrot.slane %v232_v8, 2 }
  0xab   :  { %v223_v11 = vrot.slane %v222_v9, 1  ;;  %v234_v12 = vadd.f32 %v233_v10, %v232_v8 }
  0xad   :  { %v224_v13 = vadd.f32 %v223_v11, %v222_v9  ;;  %v235_v14 = vrot.slane %v234_v12, 1 }
  0xaf   :  { %431 = vmatmul.msk.f32.vlgmr.msrb.gmra.mxu2 %vm240_vm4, %v224_v13  ;;  %v236_v15 = vadd.f32 %v235_v14, %v234_v12 }
  0xb1   :  { %433 = vmatmul.msk.f32.vlgmr.msrb.gmra.mxu3 %vm240_vm4, %v236_v15 }
 0x132   :  { %v265_v24 = vpop.f32.mrf.mxu2 }
 0x133   :  { %v298_v25 = vmul.f32 %v297_v23, %v265_v24 }
 0x134   :  { %v288_v26 = vpop.f32.mrf.mxu3 }
 0x135   :  { %v300_v27 = vmul.f32 %v298_v25, %v298_v25  ;;  %v299_v28 = vmul.f32 %v297_v23, %v288_v26 }
 0x137   :  { %v301_v29 = vsub.f32 %v299_v28, %v300_v27 }
 0x139   :  { %v303_v30 = vadd.f32 1e-05, %v301_v29 }
 0x13b   :  { %447 = vrsqrt.f32 %v303_v30  ;;  %vm310_vm7 = vweird.f32 %v303_v30 }
 0x141   :  { %v448_v31 = vpop.eup %447 }
 0x142   :  { %v305_v32 = vmul.f32 %v448_v31, %v303_v30  ;;  %vm311_vm6 = vweird.f32 %v448_v31 }
 0x143   :  { %vm312_vm8 = vmor %vm310_vm7, %vm311_vm6 }
 0x144   :  { %v306_v33 = vmul.f32 %v448_v31, %v305_v32 }
 0x146   :  { %v307_v34 = vmul.f32 0.5, %v306_v33 }
 0x148   :  { %v308_v35 = vsub.f32 1.5, %v307_v34 }
 0x14a   :  { %v309_v37 = vmul.f32 %v448_v31, %v308_v35 }
 0x14c   :  { %v313_v38 = vsel %vm312_vm8, %v448_v31, %v309_v37 }
 0x14d   :  { %v314_v39 = vmul.f32 %v313_v38, %v302_v36 }
 0x14f   :  { %v316_v41 = vmul.f32 %v314_v39, %v298_v25  ;;  %435 = vmatmul.msk.f32.vlgmr.msra.gmra.mxu2 %vm319_vm9, %v314_v39 }
 0x151   :  { %v317_v42 = vsub.f32 %v315_v40, %v316_v41 }
 0x153   :  { %437 = vmatmul.msk.f32.vlgmr.msra.gmra.mxu3 %vm319_vm9, %v317_v42 }
 0x1d2   :  { %v343_v43 = vpop.f32.mrf.mxu2 }
 0x1d3   :  { %v369_v44 = vperm.slane %v343_v43, 0 }
 0x1d5   :  { %v370_v46 = vmul.f32 %v369_v44, %v550_v54  ;;  %v371_v47 = vmul.f32 %v369_v44, %v552_v55 }
 0x1d6   :  { %v366_v45 = vpop.f32.mrf.mxu3 }
 0x1d7   :  { %v372_v48 = vperm.slane %v366_v45, 0 }
 0x1d9   :  { %v373_v49 = vadd.f32 %v372_v48, %v370_v46  ;;  %v374_v50 = vadd.f32 %v372_v48, %v371_v47 }
 0x1db   :  { %v375_v51 = vmax.f32 %v373_v49, 0.0  ;;  %v376_v52 = vmax.f32 %v374_v50, 0.0 }
 0x1dd   :  { %v377_v57 = vpack.c.bf16 %v375_v51, %v375_v51  ;;  %v378_v54 = vpack.c.bf16 %v376_v52, %v376_v52 }
 0x1df   :  { %v383_v58 = vsel %vm381_vm12, %v377_v57, %v382_v53  ;;  %v386_v55 = vsel %vm381_vm12, %v378_v54, %v385_v56 }
 0x1e0   :  { %384 = vst [vmem:[%s591_s6] sm:$0x7] %v383_v58 }
 0x1e1   :  { %387 = vst [vmem:[%s591_s6 + $0x4] sm:$0x7] %v386_v55 }

// kernel: unet_forward.41
= control target key start
LH: loop header
LB: loop body
LE: loop exit
PB: predicated region body
PF: predicated region fallthrough
CT: control target
= control target key end

     0   :  { %vm58_vm0 = vcmask 1041408   ;;  %vm45_vm1 = vcmask 31744   ;;  %vm97_vm2 = vcmask 19456   ;;  %vm104_vm3 = vcmask 16384   ;;  %s198_s1 = inlined_call_operand.vmem [shape: bf16[4,3], index: 1, kind: input, shape index: {}]   ;;  %s199_s0 = inlined_call_operand.vmem [shape: bf16[50,4], index: 0, kind: input, shape index: {}]   ;;  %s200_s2 = inlined_call_operand.vmem [shape: f32[1,3], index: 2, kind: input, shape index: {}]   ;;  %s201_s3 = inlined_call_operand.vmem [shape: bf16[50,3], index: 3, kind: output, shape index: {}]  }
   0x1   :  { %v22_v0 = vld [vmem:[%s198_s1] sm:$0x3]  ;;  %v127_v3 = vld [vmem:[%s199_s0 + $0x8] sm:$0xff]  ;;  %v21_v4 = vld [vmem:[%s199_s0 + $0x18] sm:$0x1] }
   0x2   :  { %v126_v1 = vld [vmem:[%s199_s0] sm:$0xff]  ;;  %v60_v2 = vsel %vm58_vm0, %v22_v0, 0  ;;  %v128_v5 = vld [vmem:[%s199_s0 + $0x10] sm:$0xff]  ;;  %v40_v6 = vunpack.c.l.b16 %v21_v4 }
   0x3   :  { %69 = vmatpush.bf16.msra.mxu0 %v60_v2  ;;  %129 = vmatpush.bf16.msra.mxu1 %v60_v2  ;;  %v132_v8 = vld [vmem:[%s200_s2] ss:$0 sm:$0xff] }
   0x4   :  { %130 = vmatpush.bf16.msra.mxu2 %v60_v2  ;;  %131 = vmatpush.bf16.msra.mxu3 %v60_v2  ;;  %v44_v7 = vpack.c.b16 %v40_v6, %v40_v6 }
   0x6   :  { %122 = vmatmul.msk.bf16.vlgmr.msra.gmra.mxu0 %vm45_vm1, %v126_v1  ;;  %123 = vmatmul.msk.bf16.vlgmr.msra.gmra.mxu1 %vm45_vm1, %v127_v3 }
   0x7   :  { %124 = vmatmul.msk.bf16.vlgmr.msra.gmra.mxu2 %vm45_vm1, %v128_v5  ;;  %125 = vmatmul.msk.bf16.vlgmr.msra.gmra.mxu3 %vm45_vm1, %v44_v7 }
  0x83   :  { %v71_v9 = vpop.f32.mrf.mxu0  ;;  %v76_v10 = vpop.f32.mrf.mxu1 }
  0x84   :  { %v72_v11 = vadd.f32 %v132_v8, %v71_v9  ;;  %v77_v12 = vadd.f32 %v132_v8, %v76_v10 }
  0x86   :  { %v90_v13 = vpack.c.bf16 %v72_v11, %v72_v11  ;;  %v92_v14 = vpack.c.bf16 %v77_v12, %v77_v12 }
  0x88   :  { %98 = vst.msk [vmem:[%s201_s3] sm:$0xf] %vm97_vm2, %v90_v13 }
  0x89   :  { %100 = vst.msk [vmem:[%s201_s3 + $0x8] sm:$0xf] %vm97_vm2, %v92_v14 }
  0x8a   :  { %v81_v15 = vpop.f32.mrf.mxu2  ;;  %v86_v16 = vpop.f32.mrf.mxu3 }
  0x8b   :  { %v82_v17 = vadd.f32 %v132_v8, %v81_v15  ;;  %v87_v18 = vadd.f32 %v132_v8, %v86_v16  ;;  %v73_v19 = vpop.f32.mrf.mxu0  ;;  %v78_v20 = vpop.f32.mrf.mxu1 }
  0x8c   :  { %v74_v21 = vadd.f32 %v132_v8, %v73_v19  ;;  %v79_v22 = vadd.f32 %v132_v8, %v78_v20 }
  0x8d   :  { %v94_v23 = vpack.c.bf16 %v82_v17, %v82_v17  ;;  %v96_v24 = vpack.c.bf16 %v87_v18, %v87_v18 }
  0x8e   :  { %v91_v25 = vpack.c.bf16 %v74_v21, %v74_v21  ;;  %v93_v26 = vpack.c.bf16 %v79_v22, %v79_v22 }
  0x8f   :  { %102 = vst.msk [vmem:[%s201_s3 + $0x10] sm:$0xf] %vm97_vm2, %v94_v23 }
  0x90   :  { %105 = vst.msk [vmem:[%s201_s3 + $0x18] sm:$0x1] %vm104_vm3, %v96_v24 }
  0x91   :  { %99 = vst.msk [vmem:[%s201_s3 + $0x4] sm:$0xf] %vm97_vm2, %v91_v25 }
  0x92   :  { %101 = vst.msk [vmem:[%s201_s3 + $0xc] sm:$0xf] %vm97_vm2, %v93_v26  ;;  %v83_v27 = vpop.f32.mrf.mxu2  ;;  %v88_v28 = vpop.f32.mrf.mxu3 }
  0x93   :  { %v84_v29 = vadd.f32 %v132_v8, %v83_v27 }
  0x95   :  { %v95_v30 = vpack.c.bf16 %v84_v29, %v84_v29 }
  0x97   :  { %103 = vst.msk [vmem:[%s201_s3 + $0x14] sm:$0xf] %vm97_vm2, %v95_v30 }

// kernel: unet_forward.42
= control target key start
LH: loop header
LB: loop body
LE: loop exit
PB: predicated region body
PF: predicated region fallthrough
CT: control target
= control target key end

     0   :  { %vm24_vm0 = vcmask 1044480   ;;  %vm17_vm1 = vcmask 39936   ;;  %vm77_vm2 = vcmask 121856   ;;  %s133_s1 = inlined_call_operand.vmem [shape: bf16[2,5,15], index: 1, kind: input, shape index: {}]   ;;  %s134_s0 = inlined_call_operand.vmem [shape: f32[16,5], index: 0, kind: input, shape index: {}]   ;;  %s135_s2 = inlined_call_operand.vmem [shape: f32[2,16,15], index: 2, kind: output, shape index: {}]  }
   0x1   :  { %v13_v0 = vld [vmem:[%s133_s1] sm:$0x7]  ;;  %v14_v1 = vld [vmem:[%s133_s1 + $0x4] sm:$0x7]  ;;  %v12_v4 = vld [vmem:[%s134_s0 + $0x8] sm:$0xff] }
   0x2   :  { %v15_v2 = vunpack.c.l.bf16 %v13_v0  ;;  %v16_v3 = vunpack.c.l.bf16 %v14_v1  ;;  %v11_v5 = vld [vmem:[%s134_s0] sm:$0xff] }
   0x4   :  { %92 = vmatpush.msk.msra.mxu2 %vm24_vm0, %v15_v2  ;;  %93 = vmatpush.msk.msra.mxu3 %vm24_vm0, %v16_v3 }
   0x5   :  { %88 = vmatmul.msk.f32.vlgmr.msra.gmra.mxu2 %vm17_vm1, %v12_v4  ;;  %91 = vmatmul.msk.f32.vlgmr.msra.gmra.mxu3 %vm17_vm1, %v12_v4 }
   0x6   :  { %86 = vmatpush.msk.msra.mxu0 %vm24_vm0, %v15_v2  ;;  %89 = vmatpush.msk.msra.mxu1 %vm24_vm0, %v16_v3 }
   0x7   :  { %87 = vmatmul.msk.f32.vlgmr.msra.gmra.mxu0 %vm17_vm1, %v11_v5  ;;  %90 = vmatmul.msk.f32.vlgmr.msra.gmra.mxu1 %vm17_vm1, %v11_v5 }
  0x84   :  { %v45_v6 = vpop.f32.mrf.mxu0  ;;  %v71_v7 = vpop.f32.mrf.mxu1 }
  0x85   :  { %78 = vst.msk [vmem:[%s135_s2] sm:$0xff] %vm77_vm2, %v45_v6 }
  0x86   :  { %80 = vst.msk [vmem:[%s135_s2 + $0x10] sm:$0xff] %vm77_vm2, %v71_v7 }
  0x88   :  { %v48_v8 = vpop.f32.mrf.mxu2  ;;  %v74_v9 = vpop.f32.mrf.mxu3 }
  0x89   :  { %79 = vst.msk [vmem:[%s135_s2 + $0x8] sm:$0xff] %vm77_vm2, %v48_v8 }
  0x8a   :  { %81 = vst.msk [vmem:[%s135_s2 + $0x18] sm:$0xff] %vm77_vm2, %v74_v9 }

// kernel: unet_forward.43
= control target key start
LH: loop header
LB: loop body
LE: loop exit
PB: predicated region body
PF: predicated region fallthrough
CT: control target
= control target key end

     0   :  { %vm52_vm0 = vcmask 1044480   ;;  %vm45_vm1 = vcmask 39936   ;;  %vm885_vm2 = vcmask 23552   ;;  %s1587_s1 = inlined_call_operand.vmem [shape: f32[32,5,3], index: 1, kind: input, shape index: {}]   ;;  %s1588_s0 = inlined_call_operand.vmem [shape: f32[16,5], index: 0, kind: input, shape index: {}]   ;;  %s1589_s2 = inlined_call_operand.vmem [shape: f32[32,16,3], index: 2, kind: output, shape index: {}]  }
   0x1   :  { %v15_v0 = vld [vmem:[%s1587_s1 + $0x10] sm:$0x1f]  ;;  %v16_v1 = vld [vmem:[%s1587_s1 + $0x18] sm:$0x1f]  ;;  %v1074_v2 = vld [vmem:[%s1588_s0] sm:$0xff] }
   0x2   :  { %960 = vmatpush.msk.msra.mxu2 %vm52_vm0, %v15_v0  ;;  %963 = vmatpush.msk.msra.mxu3 %vm52_vm0, %v16_v1  ;;  %v19_v3 = vld [vmem:[%s1587_s1 + $0x30] sm:$0x1f]  ;;  %v20_v4 = vld [vmem:[%s1587_s1 + $0x38] sm:$0x1f]  ;;  %v13_v5 = vld [vmem:[%s1587_s1] sm:$0x1f] }
   0x3   :  { %961 = vmatmul.msk.f32.vlgmr.msra.gmra.mxu2 %vm45_vm1, %v1074_v2  ;;  %964 = vmatmul.msk.f32.vlgmr.msra.gmra.mxu3 %vm45_vm1, %v1074_v2  ;;  %v14_v6 = vld [vmem:[%s1587_s1 + $0x8] sm:$0x1f]  ;;  %v17_v7 = vld [vmem:[%s1587_s1 + $0x20] sm:$0x1f]  ;;  %v23_v9 = vld [vmem:[%s1587_s1 + $0x50] sm:$0x1f] }
   0x4   :  { %972 = vmatpush.msk.msrb.mxu2 %vm52_vm0, %v19_v3  ;;  %975 = vmatpush.msk.msrb.mxu3 %vm52_vm0, %v20_v4  ;;  %v18_v8 = vld [vmem:[%s1587_s1 + $0x28] sm:$0x1f]  ;;  %v24_v10 = vld [vmem:[%s1587_s1 + $0x58] sm:$0x1f]  ;;  %v21_v11 = vld [vmem:[%s1587_s1 + $0x40] sm:$0x1f] }
   0x5   :  { %954 = vmatpush.msk.msra.mxu0 %vm52_vm0, %v13_v5  ;;  %957 = vmatpush.msk.msra.mxu1 %vm52_vm0, %v14_v6  ;;  %v22_v12 = vld [vmem:[%s1587_s1 + $0x48] sm:$0x1f]  ;;  %v27_v14 = vld [vmem:[%s1587_s1 + $0x70] sm:$0x1f]  ;;  %v28_v15 = vld [vmem:[%s1587_s1 + $0x78] sm:$0x1f] }
   0x6   :  { %955 = vmatmul.msk.f32.vlgmr.msra.gmra.mxu0 %vm45_vm1, %v1074_v2  ;;  %958 = vmatmul.msk.f32.vlgmr.msra.gmra.mxu1 %vm45_vm1, %v1074_v2  ;;  %v1125_v13 = vld [vmem:[%s1588_s0 + $0x8] sm:$0xff]  ;;  %v25_v16 = vld [vmem:[%s1587_s1 + $0x60] sm:$0x1f]  ;;  %v31_v18 = vld [vmem:[%s1587_s1 + $0x90] sm:$0x1f] }
   0x7   :  { %966 = vmatpush.msk.msrb.mxu0 %vm52_vm0, %v17_v7  ;;  %969 = vmatpush.msk.msrb.mxu1 %vm52_vm0, %v18_v8  ;;  %v26_v17 = vld [vmem:[%s1587_s1 + $0x68] sm:$0x1f]  ;;  %v32_v19 = vld [vmem:[%s1587_s1 + $0x98] sm:$0x1f]  ;;  %v29_v20 = vld [vmem:[%s1587_s1 + $0x80] sm:$0x1f] }
   0x8   :  { %984 = vmatpush.msk.msra.mxu2 %vm52_vm0, %v23_v9  ;;  %987 = vmatpush.msk.msra.mxu3 %vm52_vm0, %v24_v10  ;;  %v30_v21 = vld [vmem:[%s1587_s1 + $0x88] sm:$0x1f]  ;;  %v35_v22 = vld [vmem:[%s1587_s1 + $0xb0] sm:$0x1f]  ;;  %v36_v23 = vld [vmem:[%s1587_s1 + $0xb8] sm:$0x1f] }
   0x9   :  { %978 = vmatpush.msk.msra.mxu0 %vm52_vm0, %v21_v11  ;;  %981 = vmatpush.msk.msra.mxu1 %vm52_vm0, %v22_v12  ;;  %v33_v24 = vld [vmem:[%s1587_s1 + $0xa0] sm:$0x1f]  ;;  %v34_v25 = vld [vmem:[%s1587_s1 + $0xa8] sm:$0x1f]  ;;  %v39_v26 = vld [vmem:[%s1587_s1 + $0xd0] sm:$0x1f] }
   0xa   :  { %v40_v27 = vld [vmem:[%s1587_s1 + $0xd8] sm:$0x1f]  ;;  %v37_v28 = vld [vmem:[%s1587_s1 + $0xc0] sm:$0x1f]  ;;  %v38_v29 = vld [vmem:[%s1587_s1 + $0xc8] sm:$0x1f] }
   0xb   :  { %962 = vmatmul.msk.f32.gmra.mxu2 %vm45_vm1, %v1125_v13  ;;  %965 = vmatmul.msk.f32.gmra.mxu3 %vm45_vm1, %v1125_v13  ;;  %v43_v30 = vld [vmem:[%s1587_s1 + $0xf0] sm:$0x1f]  ;;  %v44_v31 = vld [vmem:[%s1587_s1 + $0xf8] sm:$0x1f]  ;;  %v41_v32 = vld [vmem:[%s1587_s1 + $0xe0] sm:$0x1f] }
   0xc   :  { %v42_v33 = vld [vmem:[%s1587_s1 + $0xe8] sm:$0x1f] }
   0xe   :  { %956 = vmatmul.msk.f32.gmra.mxu0 %vm45_vm1, %v1125_v13  ;;  %959 = vmatmul.msk.f32.gmra.mxu1 %vm45_vm1, %v1125_v13 }
  0x13   :  { %973 = vmatmul.msk.f32.vlgmr.msrb.gmra.mxu2 %vm45_vm1, %v1074_v2  ;;  %976 = vmatmul.msk.f32.vlgmr.msrb.gmra.mxu3 %vm45_vm1, %v1074_v2 }
  0x14   :  { %996 = vmatpush.msk.msrb.mxu2 %vm52_vm0, %v27_v14  ;;  %999 = vmatpush.msk.msrb.mxu3 %vm52_vm0, %v28_v15 }
  0x16   :  { %967 = vmatmul.msk.f32.vlgmr.msrb.gmra.mxu0 %vm45_vm1, %v1074_v2  ;;  %970 = vmatmul.msk.f32.vlgmr.msrb.gmra.mxu1 %vm45_vm1, %v1074_v2 }
  0x17   :  { %990 = vmatpush.msk.msrb.mxu0 %vm52_vm0, %v25_v16  ;;  %993 = vmatpush.msk.msrb.mxu1 %vm52_vm0, %v26_v17 }
  0x1b   :  { %974 = vmatmul.msk.f32.gmra.mxu2 %vm45_vm1, %v1125_v13  ;;  %977 = vmatmul.msk.f32.gmra.mxu3 %vm45_vm1, %v1125_v13 }
  0x1e   :  { %968 = vmatmul.msk.f32.gmra.mxu0 %vm45_vm1, %v1125_v13  ;;  %971 = vmatmul.msk.f32.gmra.mxu1 %vm45_vm1, %v1125_v13 }
  0x23   :  { %985 = vmatmul.msk.f32.vlgmr.msra.gmra.mxu2 %vm45_vm1, %v1074_v2  ;;  %988 = vmatmul.msk.f32.vlgmr.msra.gmra.mxu3 %vm45_vm1, %v1074_v2 }
  0x24   :  { %1008 = vmatpush.msk.msra.mxu2 %vm52_vm0, %v31_v18  ;;  %1011 = vmatpush.msk.msra.mxu3 %vm52_vm0, %v32_v19 }
  0x26   :  { %979 = vmatmul.msk.f32.vlgmr.msra.gmra.mxu0 %vm45_vm1, %v1074_v2  ;;  %982 = vmatmul.msk.f32.vlgmr.msra.gmra.mxu1 %vm45_vm1, %v1074_v2 }
  0x27   :  { %1002 = vmatpush.msk.msra.mxu0 %vm52_vm0, %v29_v20  ;;  %1005 = vmatpush.msk.msra.mxu1 %vm52_vm0, %v30_v21 }
  0x2b   :  { %986 = vmatmul.msk.f32.gmra.mxu2 %vm45_vm1, %v1125_v13  ;;  %989 = vmatmul.msk.f32.gmra.mxu3 %vm45_vm1, %v1125_v13 }
  0x2e   :  { %980 = vmatmul.msk.f32.gmra.mxu0 %vm45_vm1, %v1125_v13  ;;  %983 = vmatmul.msk.f32.gmra.mxu1 %vm45_vm1, %v1125_v13 }
  0x33   :  { %997 = vmatmul.msk.f32.vlgmr.msrb.gmra.mxu2 %vm45_vm1, %v1074_v2  ;;  %1000 = vmatmul.msk.f32.vlgmr.msrb.gmra.mxu3 %vm45_vm1, %v1074_v2 }
  0x34   :  { %1020 = vmatpush.msk.msrb.mxu2 %vm52_vm0, %v35_v22  ;;  %1023 = vmatpush.msk.msrb.mxu3 %vm52_vm0, %v36_v23 }
  0x36   :  { %991 = vmatmul.msk.f32.vlgmr.msrb.gmra.mxu0 %vm45_vm1, %v1074_v2  ;;  %994 = vmatmul.msk.f32.vlgmr.msrb.gmra.mxu1 %vm45_vm1, %v1074_v2 }
  0x37   :  { %1014 = vmatpush.msk.msrb.mxu0 %vm52_vm0, %v33_v24  ;;  %1017 = vmatpush.msk.msrb.mxu1 %vm52_vm0, %v34_v25 }
  0x3b   :  { %998 = vmatmul.msk.f32.gmra.mxu2 %vm45_vm1, %v1125_v13  ;;  %1001 = vmatmul.msk.f32.gmra.mxu3 %vm45_vm1, %v1125_v13 }
  0x3e   :  { %992 = vmatmul.msk.f32.gmra.mxu0 %vm45_vm1, %v1125_v13  ;;  %995 = vmatmul.msk.f32.gmra.mxu1 %vm45_vm1, %v1125_v13 }
  0x43   :  { %1009 = vmatmul.msk.f32.vlgmr.msra.gmra.mxu2 %vm45_vm1, %v1074_v2  ;;  %1012 = vmatmul.msk.f32.vlgmr.msra.gmra.mxu3 %vm45_vm1, %v1074_v2 }
  0x44   :  { %1032 = vmatpush.msk.msra.mxu2 %vm52_vm0, %v39_v26  ;;  %1035 = vmatpush.msk.msra.mxu3 %vm52_vm0, %v40_v27 }
  0x46   :  { %1003 = vmatmul.msk.f32.vlgmr.msra.gmra.mxu0 %vm45_vm1, %v1074_v2  ;;  %1006 = vmatmul.msk.f32.vlgmr.msra.gmra.mxu1 %vm45_vm1, %v1074_v2 }
  0x47   :  { %1026 = vmatpush.msk.msra.mxu0 %vm52_vm0, %v37_v28  ;;  %1029 = vmatpush.msk.msra.mxu1 %vm52_vm0, %v38_v29 }
  0x4b   :  { %1010 = vmatmul.msk.f32.gmra.mxu2 %vm45_vm1, %v1125_v13  ;;  %1013 = vmatmul.msk.f32.gmra.mxu3 %vm45_vm1, %v1125_v13 }
  0x4e   :  { %1004 = vmatmul.msk.f32.gmra.mxu0 %vm45_vm1, %v1125_v13  ;;  %1007 = vmatmul.msk.f32.gmra.mxu1 %vm45_vm1, %v1125_v13 }
  0x53   :  { %1021 = vmatmul.msk.f32.vlgmr.msrb.gmra.mxu2 %vm45_vm1, %v1074_v2  ;;  %1024 = vmatmul.msk.f32.vlgmr.msrb.gmra.mxu3 %vm45_vm1, %v1074_v2 }
  0x54   :  { %1044 = vmatpush.msk.msrb.mxu2 %vm52_vm0, %v43_v30  ;;  %1047 = vmatpush.msk.msrb.mxu3 %vm52_vm0, %v44_v31 }
  0x56   :  { %1015 = vmatmul.msk.f32.vlgmr.msrb.gmra.mxu0 %vm45_vm1, %v1074_v2  ;;  %1018 = vmatmul.msk.f32.vlgmr.msrb.gmra.mxu1 %vm45_vm1, %v1074_v2 }
  0x57   :  { %1038 = vmatpush.msk.msrb.mxu0 %vm52_vm0, %v41_v32  ;;  %1041 = vmatpush.msk.msrb.mxu1 %vm52_vm0, %v42_v33 }
  0x5b   :  { %1022 = vmatmul.msk.f32.gmra.mxu2 %vm45_vm1, %v1125_v13  ;;  %1025 = vmatmul.msk.f32.gmra.mxu3 %vm45_vm1, %v1125_v13 }
  0x5e   :  { %1016 = vmatmul.msk.f32.gmra.mxu0 %vm45_vm1, %v1125_v13  ;;  %1019 = vmatmul.msk.f32.gmra.mxu1 %vm45_vm1, %v1125_v13 }
  0x63   :  { %1033 = vmatmul.msk.f32.vlgmr.msra.gmra.mxu2 %vm45_vm1, %v1074_v2  ;;  %1036 = vmatmul.msk.f32.vlgmr.msra.gmra.mxu3 %vm45_vm1, %v1074_v2 }
  0x66   :  { %1027 = vmatmul.msk.f32.vlgmr.msra.gmra.mxu0 %vm45_vm1, %v1074_v2  ;;  %1030 = vmatmul.msk.f32.vlgmr.msra.gmra.mxu1 %vm45_vm1, %v1074_v2 }
  0x6b   :  { %1034 = vmatmul.msk.f32.gmra.mxu2 %vm45_vm1, %v1125_v13  ;;  %1037 = vmatmul.msk.f32.gmra.mxu3 %vm45_vm1, %v1125_v13 }
  0x6e   :  { %1028 = vmatmul.msk.f32.gmra.mxu0 %vm45_vm1, %v1125_v13  ;;  %1031 = vmatmul.msk.f32.gmra.mxu1 %vm45_vm1, %v1125_v13 }
  0x73   :  { %1045 = vmatmul.msk.f32.vlgmr.msrb.gmra.mxu2 %vm45_vm1, %v1074_v2  ;;  %1048 = vmatmul.msk.f32.vlgmr.msrb.gmra.mxu3 %vm45_vm1, %v1074_v2 }
  0x76   :  { %1039 = vmatmul.msk.f32.vlgmr.msrb.gmra.mxu0 %vm45_vm1, %v1074_v2  ;;  %1042 = vmatmul.msk.f32.vlgmr.msrb.gmra.mxu1 %vm45_vm1, %v1074_v2 }
  0x7b   :  { %1046 = vmatmul.msk.f32.gmra.mxu2 %vm45_vm1, %v1125_v13  ;;  %1049 = vmatmul.msk.f32.gmra.mxu3 %vm45_vm1, %v1125_v13 }
  0x7e   :  { %1040 = vmatmul.msk.f32.gmra.mxu0 %vm45_vm1, %v1125_v13  ;;  %1043 = vmatmul.msk.f32.gmra.mxu1 %vm45_vm1, %v1125_v13 }
  0x83   :  { %v73_v34 = vpop.f32.mrf.mxu0  ;;  %v99_v35 = vpop.f32.mrf.mxu1 }
  0x84   :  { %886 = vst.msk [vmem:[%s1589_s2] sm:$0xff] %vm885_vm2, %v73_v34 }
  0x85   :  { %888 = vst.msk [vmem:[%s1589_s2 + $0x10] sm:$0xff] %vm885_vm2, %v99_v35 }
  0x86   :  { %v125_v36 = vpop.f32.mrf.mxu2  ;;  %v151_v37 = vpop.f32.mrf.mxu3 }
  0x87   :  { %890 = vst.msk [vmem:[%s1589_s2 + $0x20] sm:$0xff] %vm885_vm2, %v125_v36 }
  0x88   :  { %892 = vst.msk [vmem:[%s1589_s2 + $0x30] sm:$0xff] %vm885_vm2, %v151_v37 }
  0x8b   :  { %v76_v38 = vpop.f32.mrf.mxu0  ;;  %v102_v39 = vpop.f32.mrf.mxu1 }
  0x8c   :  { %887 = vst.msk [vmem:[%s1589_s2 + $0x8] sm:$0xff] %vm885_vm2, %v76_v38 }
  0x8d   :  { %889 = vst.msk [vmem:[%s1589_s2 + $0x18] sm:$0xff] %vm885_vm2, %v102_v39 }
  0x8e   :  { %v128_v40 = vpop.f32.mrf.mxu2  ;;  %v154_v41 = vpop.f32.mrf.mxu3 }
  0x8f   :  { %891 = vst.msk [vmem:[%s1589_s2 + $0x28] sm:$0xff] %vm885_vm2, %v128_v40 }
  0x90   :  { %893 = vst.msk [vmem:[%s1589_s2 + $0x38] sm:$0xff] %vm885_vm2, %v154_v41 }
  0x93   :  { %v177_v42 = vpop.f32.mrf.mxu0  ;;  %v203_v43 = vpop.f32.mrf.mxu1 }
  0x94   :  { %894 = vst.msk [vmem:[%s1589_s2 + $0x40] sm:$0xff] %vm885_vm2, %v177_v42 }
  0x95   :  { %896 = vst.msk [vmem:[%s1589_s2 + $0x50] sm:$0xff] %vm885_vm2, %v203_v43 }
  0x96   :  { %v229_v44 = vpop.f32.mrf.mxu2  ;;  %v255_v45 = vpop.f32.mrf.mxu3 }
  0x97   :  { %898 = vst.msk [vmem:[%s1589_s2 + $0x60] sm:$0xff] %vm885_vm2, %v229_v44 }
  0x98   :  { %900 = vst.msk [vmem:[%s1589_s2 + $0x70] sm:$0xff] %vm885_vm2, %v255_v45 }
  0x9b   :  { %v180_v46 = vpop.f32.mrf.mxu0  ;;  %v206_v47 = vpop.f32.mrf.mxu1 }
  0x9c   :  { %895 = vst.msk [vmem:[%s1589_s2 + $0x48] sm:$0xff] %vm885_vm2, %v180_v46 }
  0x9d   :  { %897 = vst.msk [vmem:[%s1589_s2 + $0x58] sm:$0xff] %vm885_vm2, %v206_v47 }
  0x9e   :  { %v232_v48 = vpop.f32.mrf.mxu2  ;;  %v258_v49 = vpop.f32.mrf.mxu3 }
  0x9f   :  { %899 = vst.msk [vmem:[%s1589_s2 + $0x68] sm:$0xff] %vm885_vm2, %v232_v48 }
  0xa0   :  { %901 = vst.msk [vmem:[%s1589_s2 + $0x78] sm:$0xff] %vm885_vm2, %v258_v49 }
  0xa3   :  { %v281_v50 = vpop.f32.mrf.mxu0  ;;  %v307_v51 = vpop.f32.mrf.mxu1 }
  0xa4   :  { %902 = vst.msk [vmem:[%s1589_s2 + $0x80] sm:$0xff] %vm885_vm2, %v281_v50 }
  0xa5   :  { %904 = vst.msk [vmem:[%s1589_s2 + $0x90] sm:$0xff] %vm885_vm2, %v307_v51 }
  0xa6   :  { %v333_v52 = vpop.f32.mrf.mxu2  ;;  %v359_v53 = vpop.f32.mrf.mxu3 }
  0xa7   :  { %906 = vst.msk [vmem:[%s1589_s2 + $0xa0] sm:$0xff] %vm885_vm2, %v333_v52 }
  0xa8   :  { %908 = vst.msk [vmem:[%s1589_s2 + $0xb0] sm:$0xff] %vm885_vm2, %v359_v53 }
  0xab   :  { %v284_v54 = vpop.f32.mrf.mxu0  ;;  %v310_v55 = vpop.f32.mrf.mxu1 }
  0xac   :  { %903 = vst.msk [vmem:[%s1589_s2 + $0x88] sm:$0xff] %vm885_vm2, %v284_v54 }
  0xad   :  { %905 = vst.msk [vmem:[%s1589_s2 + $0x98] sm:$0xff] %vm885_vm2, %v310_v55 }
  0xae   :  { %v336_v56 = vpop.f32.mrf.mxu2  ;;  %v362_v57 = vpop.f32.mrf.mxu3 }
  0xaf   :  { %907 = vst.msk [vmem:[%s1589_s2 + $0xa8] sm:$0xff] %vm885_vm2, %v336_v56 }
  0xb0   :  { %909 = vst.msk [vmem:[%s1589_s2 + $0xb8] sm:$0xff] %vm885_vm2, %v362_v57 }
  0xb3   :  { %v385_v58 = vpop.f32.mrf.mxu0  ;;  %v411_v59 = vpop.f32.mrf.mxu1 }
  0xb4   :  { %910 = vst.msk [vmem:[%s1589_s2 + $0xc0] sm:$0xff] %vm885_vm2, %v385_v58 }
  0xb5   :  { %912 = vst.msk [vmem:[%s1589_s2 + $0xd0] sm:$0xff] %vm885_vm2, %v411_v59 }
  0xb6   :  { %v437_v60 = vpop.f32.mrf.mxu2  ;;  %v463_v61 = vpop.f32.mrf.mxu3 }
  0xb7   :  { %914 = vst.msk [vmem:[%s1589_s2 + $0xe0] sm:$0xff] %vm885_vm2, %v437_v60 }
  0xb8   :  { %916 = vst.msk [vmem:[%s1589_s2 + $0xf0] sm:$0xff] %vm885_vm2, %v463_v61 }
  0xbb   :  { %v388_v62 = vpop.f32.mrf.mxu0  ;;  %v414_v63 = vpop.f32.mrf.mxu1 }
  0xbc   :  { %911 = vst.msk [vmem:[%s1589_s2 + $0xc8] sm:$0xff] %vm885_vm2, %v388_v62 }
  0xbd   :  { %913 = vst.msk [vmem:[%s1589_s2 + $0xd8] sm:$0xff] %vm885_vm2, %v414_v63 }
  0xbe   :  { %v440_v0 = vpop.f32.mrf.mxu2  ;;  %v466_v1 = vpop.f32.mrf.mxu3 }
  0xbf   :  { %915 = vst.msk [vmem:[%s1589_s2 + $0xe8] sm:$0xff] %vm885_vm2, %v440_v0 }
  0xc0   :  { %917 = vst.msk [vmem:[%s1589_s2 + $0xf8] sm:$0xff] %vm885_vm2, %v466_v1 }
  0xc3   :  { %v489_v2 = vpop.f32.mrf.mxu0  ;;  %v515_v3 = vpop.f32.mrf.mxu1 }
  0xc4   :  { %918 = vst.msk [vmem:[%s1589_s2 + $0x100] sm:$0xff] %vm885_vm2, %v489_v2 }
  0xc5   :  { %920 = vst.msk [vmem:[%s1589_s2 + $0x110] sm:$0xff] %vm885_vm2, %v515_v3 }
  0xc6   :  { %v541_v4 = vpop.f32.mrf.mxu2  ;;  %v567_v5 = vpop.f32.mrf.mxu3 }
  0xc7   :  { %922 = vst.msk [vmem:[%s1589_s2 + $0x120] sm:$0xff] %vm885_vm2, %v541_v4 }
  0xc8   :  { %924 = vst.msk [vmem:[%s1589_s2 + $0x130] sm:$0xff] %vm885_vm2, %v567_v5 }
  0xcb   :  { %v492_v6 = vpop.f32.mrf.mxu0  ;;  %v518_v7 = vpop.f32.mrf.mxu1 }
  0xcc   :  { %919 = vst.msk [vmem:[%s1589_s2 + $0x108] sm:$0xff] %vm885_vm2, %v492_v6 }
  0xcd   :  { %921 = vst.msk [vmem:[%s1589_s2 + $0x118] sm:$0xff] %vm885_vm2, %v518_v7 }
  0xce   :  { %v544_v8 = vpop.f32.mrf.mxu2  ;;  %v570_v9 = vpop.f32.mrf.mxu3 }
  0xcf   :  { %923 = vst.msk [vmem:[%s1589_s2 + $0x128] sm:$0xff] %vm885_vm2, %v544_v8 }
  0xd0   :  { %925 = vst.msk [vmem:[%s1589_s2 + $0x138] sm:$0xff] %vm885_vm2, %v570_v9 }
  0xd3   :  { %v593_v10 = vpop.f32.mrf.mxu0  ;;  %v619_v11 = vpop.f32.mrf.mxu1 }
  0xd4   :  { %926 = vst.msk [vmem:[%s1589_s2 + $0x140] sm:$0xff] %vm885_vm2, %v593_v10 }
  0xd5   :  { %928 = vst.msk [vmem:[%s1589_s2 + $0x150] sm:$0xff] %vm885_vm2, %v619_v11 }
  0xd6   :  { %v645_v12 = vpop.f32.mrf.mxu2  ;;  %v671_v13 = vpop.f32.mrf.mxu3 }
  0xd7   :  { %930 = vst.msk [vmem:[%s1589_s2 + $0x160] sm:$0xff] %vm885_vm2, %v645_v12 }
  0xd8   :  { %932 = vst.msk [vmem:[%s1589_s2 + $0x170] sm:$0xff] %vm885_vm2, %v671_v13 }
  0xdb   :  { %v596_v14 = vpop.f32.mrf.mxu0  ;;  %v622_v15 = vpop.f32.mrf.mxu1 }
  0xdc   :  { %927 = vst.msk [vmem:[%s1589_s2 + $0x148] sm:$0xff] %vm885_vm2, %v596_v14 }
  0xdd   :  { %929 = vst.msk [vmem:[%s1589_s2 + $0x158] sm:$0xff] %vm885_vm2, %v622_v15 }
  0xde   :  { %v648_v16 = vpop.f32.mrf.mxu2  ;;  %v674_v17 = vpop.f32.mrf.mxu3 }
  0xdf   :  { %931 = vst.msk [vmem:[%s1589_s2 + $0x168] sm:$0xff] %vm885_vm2, %v648_v16 }
  0xe0   :  { %933 = vst.msk [vmem:[%s1589_s2 + $0x178] sm:$0xff] %vm885_vm2, %v674_v17 }
  0xe3   :  { %v697_v18 = vpop.f32.mrf.mxu0  ;;  %v723_v19 = vpop.f32.mrf.mxu1 }
  0xe4   :  { %934 = vst.msk [vmem:[%s1589_s2 + $0x180] sm:$0xff] %vm885_vm2, %v697_v18 }
  0xe5   :  { %936 = vst.msk [vmem:[%s1589_s2 + $0x190] sm:$0xff] %vm885_vm2, %v723_v19 }
  0xe6   :  { %v749_v20 = vpop.f32.mrf.mxu2  ;;  %v775_v21 = vpop.f32.mrf.mxu3 }
  0xe7   :  { %938 = vst.msk [vmem:[%s1589_s2 + $0x1a0] sm:$0xff] %vm885_vm2, %v749_v20 }
  0xe8   :  { %940 = vst.msk [vmem:[%s1589_s2 + $0x1b0] sm:$0xff] %vm885_vm2, %v775_v21 }
  0xeb   :  { %v700_v22 = vpop.f32.mrf.mxu0  ;;  %v726_v23 = vpop.f32.mrf.mxu1 }
  0xec   :  { %935 = vst.msk [vmem:[%s1589_s2 + $0x188] sm:$0xff] %vm885_vm2, %v700_v22 }
  0xed   :  { %937 = vst.msk [vmem:[%s1589_s2 + $0x198] sm:$0xff] %vm885_vm2, %v726_v23 }
  0xee   :  { %v752_v24 = vpop.f32.mrf.mxu2  ;;  %v778_v25 = vpop.f32.mrf.mxu3 }
  0xef   :  { %939 = vst.msk [vmem:[%s1589_s2 + $0x1a8] sm:$0xff] %vm885_vm2, %v752_v24 }
  0xf0   :  { %941 = vst.msk [vmem:[%s1589_s2 + $0x1b8] sm:$0xff] %vm885_vm2, %v778_v25 }
  0xf3   :  { %v801_v26 = vpop.f32.mrf.mxu0  ;;  %v827_v27 = vpop.f32.mrf.mxu1 }
  0xf4   :  { %942 = vst.msk [vmem:[%s1589_s2 + $0x1c0] sm:$0xff] %vm885_vm2, %v801_v26 }
  0xf5   :  { %944 = vst.msk [vmem:[%s1589_s2 + $0x1d0] sm:$0xff] %vm885_vm2, %v827_v27 }
  0xf6   :  { %v853_v28 = vpop.f32.mrf.mxu2  ;;  %v879_v29 = vpop.f32.mrf.mxu3 }
  0xf7   :  { %946 = vst.msk [vmem:[%s1589_s2 + $0x1e0] sm:$0xff] %vm885_vm2, %v853_v28 }
  0xf8   :  { %948 = vst.msk [vmem:[%s1589_s2 + $0x1f0] sm:$0xff] %vm885_vm2, %v879_v29 }
  0xfb   :  { %v804_v30 = vpop.f32.mrf.mxu0  ;;  %v830_v31 = vpop.f32.mrf.mxu1 }
  0xfc   :  { %943 = vst.msk [vmem:[%s1589_s2 + $0x1c8] sm:$0xff] %vm885_vm2, %v804_v30 }
  0xfd   :  { %945 = vst.msk [vmem:[%s1589_s2 + $0x1d8] sm:$0xff] %vm885_vm2, %v830_v31 }
  0xfe   :  { %v856_v32 = vpop.f32.mrf.mxu2  ;;  %v882_v33 = vpop.f32.mrf.mxu3 }
  0xff   :  { %947 = vst.msk [vmem:[%s1589_s2 + $0x1e8] sm:$0xff] %vm885_vm2, %v856_v32 }
 0x100   :  { %949 = vst.msk [vmem:[%s1589_s2 + $0x1f8] sm:$0xff] %vm885_vm2, %v882_v33 }

</bundles_post_ra>
